<compile_context>
chip_gen: v6e
topology: v6e:2x2x1
jax: 0.10.0
libtpu: 0.0.40
codegen_flags: <defaults>
</compile_context>

<pallas_src>
import jax
import jax.numpy as jnp
from jax.experimental import pallas as pl
from jax.experimental.pallas import tpu as pltpu


def _round_up(x, m):
    return ((x + m - 1) // m) * m


def fold_bn_into_conv(w_hwio, gamma, beta, mean, var, eps=1e-5):
    """Fold inference-mode BN into the conv weight + a per-channel bias."""
    scale = gamma / jnp.sqrt(var + eps)
    return w_hwio * scale[None, None, None, :], beta - mean * scale


def _prep_weight(w_hwio, Cp):
    """(3,3,Cin,Cout) -> channel-padded, tap-major (9*Cp, Cp) bf16.
    Rows [t*Cp:(t+1)*Cp] hold w[kh, kw, :, :] for tap t = kh*3 + kw."""
    kh, kw, cin, cout = w_hwio.shape
    wp = jnp.zeros((kh, kw, Cp, Cp), jnp.float32).at[:, :, :cin, :cout].set(w_hwio)
    return wp.reshape(kh * kw * Cp, Cp).astype(jnp.bfloat16)


def _prep_bias(b, Cp):
    return jnp.zeros((1, Cp), jnp.float32).at[0, :b.shape[0]].set(b)


def _make_fused_block_kernel(H, W, Cp, F, P_alloc):
    """Fused conv1+bn1+relu -> conv2+bn2 -> +residual -> relu for one image.

    Flattened layout: row F + r*(W+2) + c of the (P_alloc, Cp) buffer holds
    padded position (r, c); rows outside the padded image are zero.
    Computed rows q = i*(W+2) + j, q in [0, Q): valid for j < W.
    """
    Wp = W + 2
    Q = H * Wp                    # computed output rows (incl. 2 junk cols per image row)
    INT = F + Wp + 1              # flattened offset of padded (1,1); multiple of 8 by choice of F
    TAIL = P_alloc - INT - Q      # trailing halo rows never touched by the interior write

    def conv3x3(src_ref, w_ref, b_ref):
        # 9 accumulating MXU matmuls; LHS operands are contiguous shifted
        # slices of the flattened padded activation (no staging buffer).
        acc = None
        for kh in range(3):
            for kw in range(3):
                t = kh * 3 + kw
                a = src_ref[pl.ds(F + kh * Wp + kw, Q), :]            # (Q, Cp) bf16
                c = jnp.dot(a, w_ref[pl.ds(t * Cp, Cp), :],
                            preferred_element_type=jnp.float32)       # f32 accumulate
                acc = c if acc is None else acc + c
        return acc + b_ref[...]                                       # folded BN bias

    def kernel(x_ref, w1_ref, b1_ref, w2_ref, b2_ref, mask_ref, out_ref, h_ref):
        # Zero only the halo-scratch rows the interior write below never
        # covers (~2 image rows); everything else is rewritten every step.
        h_ref[pl.ds(0, INT), :] = jnp.zeros((INT, Cp), jnp.bfloat16)
        h_ref[pl.ds(INT + Q, TAIL), :] = jnp.zeros((TAIL, Cp), jnp.bfloat16)

        mask = mask_ref[...]                                          # (Q,1): 1. where col < W

        # conv1 + bn1 + relu.  Junk (wrap-around) columns are zeroed so the
        # write-back also restores conv2's zero border.
        y1 = jnp.maximum(conv3x3(x_ref, w1_ref, b1_ref), 0.0) * mask
        h_ref[pl.ds(INT, Q), :] = y1.astype(jnp.bfloat16)             # one aligned contiguous store

        # conv2 + bn2 + residual + relu.  Residual is the resident input tile.
        y2 = conv3x3(h_ref, w2_ref, b2_ref)
        res = x_ref[pl.ds(INT, Q), :].astype(jnp.float32)
        out_ref[...] = jnp.maximum(y2 + res, 0.0).astype(out_ref.dtype)

    return kernel


def basic_block_forward(x_nchw, params):
    """Pallas implementation of BasicBlock.forward (stride=1, no downsample)."""
    N, C, H, W = x_nchw.shape
    Cout = params["w1"].shape[-1]
    assert Cout == C, "downsample=None requires inplanes == planes"
    Cp = _round_up(C, 128)                         # lane-dense channel dimension

    Hp, Wp = H + 2, W + 2
    P = Hp * Wp
    F = (-(Wp + 1)) % 8                            # front pad -> interior starts 8-aligned
    P_alloc = _round_up(F + P + 2, 8)              # +2: tap slices read 2 rows past the image
    Q = H * Wp

    # NCHW -> NHWC, channel pad to Cp, 1-pixel spatial zero border, flatten
    # spatial, bf16 (one wrapper-side relayout; keep this layout between
    # blocks when chaining).
    x_nhwc = jnp.transpose(x_nchw, (0, 2, 3, 1))
    xp = jnp.pad(x_nhwc, ((0, 0), (1, 1), (1, 1), (0, Cp - C))).astype(jnp.bfloat16)
    xflat = jnp.pad(xp.reshape(N, P, Cp), ((0, 0), (F, P_alloc - F - P), (0, 0)))

    # Fold inference BN into the conv weights + per-channel bias.
    w1f, b1 = fold_bn_into_conv(params["w1"], params["bn1_gamma"], params["bn1_beta"],
                                params["bn1_mean"], params["bn1_var"])
    w2f, b2 = fold_bn_into_conv(params["w2"], params["bn2_gamma"], params["bn2_beta"],
                                params["bn2_mean"], params["bn2_var"])
    w1p, w2p = _prep_weight(w1f, Cp), _prep_weight(w2f, Cp)
    b1p, b2p = _prep_bias(b1, Cp), _prep_bias(b2, Cp)

    # Column-validity mask over the Q computed rows (1 where col < W).
    mask = ((jnp.arange(Q, dtype=jnp.int32) % Wp) < W).astype(jnp.bfloat16).reshape(Q, 1)

    kernel = _make_fused_block_kernel(H, W, Cp, F, P_alloc)

    # Rough VMEM budget: double-buffered in/out blocks + resident weights + halo scratch.
    est = (2 * P_alloc * Cp * 2 + 2 * Q * Cp * 2 + 2 * 2 * 9 * Cp * Cp * 2
           + 2 * Q * 128 * 2 + P_alloc * Cp * 2 + 4 * Cp * 4)
    vmem_limit = int(min(max(2 * est, 32 * 2 ** 20), 64 * 2 ** 20))

    out_p = pl.pallas_call(
        kernel,
        out_shape=jax.ShapeDtypeStruct((N, Q, Cp), jnp.bfloat16),
        grid_spec=pltpu.PrefetchScalarGridSpec(
            num_scalar_prefetch=0,
            grid=(N,),
            in_specs=[
                pl.BlockSpec((None, P_alloc, Cp), lambda n: (n, 0, 0)),   # x (flattened, padded)
                pl.BlockSpec((9 * Cp, Cp), lambda n: (0, 0)),             # w1 (resident)
                pl.BlockSpec((1, Cp), lambda n: (0, 0)),                  # b1
                pl.BlockSpec((9 * Cp, Cp), lambda n: (0, 0)),             # w2 (resident)
                pl.BlockSpec((1, Cp), lambda n: (0, 0)),                  # b2
                pl.BlockSpec((Q, 1), lambda n: (0, 0)),                   # column mask
            ],
            out_specs=pl.BlockSpec((None, Q, Cp), lambda n: (n, 0, 0)),
            scratch_shapes=[pltpu.VMEM((P_alloc, Cp), jnp.bfloat16)],     # halo buffer for y1
        ),
        compiler_params=pltpu.CompilerParams(
            dimension_semantics=("parallel",),
            vmem_limit_bytes=vmem_limit),
    )(xflat, w1p, b1p, w2p, b2p, mask)

    # Drop junk columns / channel padding, back to NCHW f32 for the module API.
    out = out_p.reshape(N, H, Wp, Cp)[:, :, :W, :C]
    return jnp.transpose(out, (0, 3, 1, 2)).astype(jnp.float32)


def basic_block_reference(x_nchw, params, match_bf16=False):
    """Pure-JAX reference (lax conv).  match_bf16=True mimics the kernel's
    bf16 operands / bf16 intermediate / bf16 output, for a tight comparison."""
    x = jnp.transpose(x_nchw, (0, 2, 3, 1)).astype(jnp.float32)
    w1, b1 = fold_bn_into_conv(params["w1"], params["bn1_gamma"], params["bn1_beta"],
                               params["bn1_mean"], params["bn1_var"])
    w2, b2 = fold_bn_into_conv(params["w2"], params["bn2_gamma"], params["bn2_beta"],
                               params["bn2_mean"], params["bn2_var"])
    rd = (lambda a: a.astype(jnp.bfloat16).astype(jnp.float32)) if match_bf16 else (lambda a: a)
    xq, w1q, w2q = rd(x), rd(w1), rd(w2)

    def conv(inp, w):
        return jax.lax.conv_general_dilated(
            inp, w, window_strides=(1, 1), padding="SAME",
            dimension_numbers=("NHWC", "HWIO", "NHWC"))

    h = rd(jnp.maximum(conv(xq, w1q) + b1, 0.0))
    out = rd(jnp.maximum(conv(h, w2q) + b2 + xq, 0.0))
    return jnp.transpose(out, (0, 3, 1, 2))


def init_params(key, inplanes, planes):
    ks = jax.random.split(key, 8)
    return {
        # HWIO conv weights (PyTorch OIHW (planes, inplanes, 3, 3) transposed)
        "w1": 0.1 * jax.random.normal(ks[0], (3, 3, inplanes, planes), jnp.float32),
        "w2": 0.1 * jax.random.normal(ks[1], (3, 3, planes, planes), jnp.float32),
        "bn1_gamma": 1.0 + 0.1 * jax.random.normal(ks[2], (planes,), jnp.float32),
        "bn1_beta": 0.1 * jax.random.normal(ks[3], (planes,), jnp.float32),
        "bn1_mean": 0.1 * jax.random.normal(ks[4], (planes,), jnp.float32),
        "bn1_var": jnp.abs(1.0 + 0.1 * jax.random.normal(ks[5], (planes,), jnp.float32)),
        "bn2_gamma": 1.0 + 0.1 * jax.random.normal(ks[6], (planes,), jnp.float32),
        "bn2_beta": 0.1 * jax.random.normal(ks[7], (planes,), jnp.float32),
        "bn2_mean": jnp.zeros((planes,), jnp.float32),
        "bn2_var": jnp.ones((planes,), jnp.float32),
    }


if __name__ == "__main__":
    key = jax.random.PRNGKey(0)
    k_x, k_p = jax.random.split(key)

    N, C, H, W = 2, 4, 16, 16          # inplanes = planes = 4, stride = 1
    x = jax.random.normal(k_x, (N, C, H, W), jnp.float32)
    params = init_params(k_p, C, C)

    out = jax.block_until_ready(basic_block_forward(x, params))
    assert out.shape == (N, C, H, W), out.shape

    # Tight check vs a bf16-matched reference (same rounding points, f32 accumulate).
    ref_bf16 = basic_block_reference(x, params, match_bf16=True)
    assert jnp.allclose(out, ref_bf16, rtol=3e-2, atol=3e-2), \
        float(jnp.max(jnp.abs(out - ref_bf16)))

    # Loose sanity check vs the pure-f32 reference (bf16 operands/output => ~1e-2 dev).
    ref_f32 = basic_block_reference(x, params, match_bf16=False)
    assert jnp.allclose(out, ref_f32, rtol=1e-1, atol=1e-1), \
        float(jnp.max(jnp.abs(out - ref_f32)))

    print("KERNEL_OK")
</pallas_src>

<mosaic_0001>
module attributes {stable_mosaic.version = 11 : i64} {
  func.func @kernel(%arg0: i32, %arg1: memref<1x336x128xbf16, #tpu.memory_space<vmem>>, %arg2: memref<1152x128xbf16, #tpu.memory_space<vmem>>, %arg3: memref<1x128xf32, #tpu.memory_space<vmem>>, %arg4: memref<1152x128xbf16, #tpu.memory_space<vmem>>, %arg5: memref<1x128xf32, #tpu.memory_space<vmem>>, %arg6: memref<288x1xbf16, #tpu.memory_space<vmem>>, %arg7: memref<1x288x128xbf16, #tpu.memory_space<vmem>>, %arg8: memref<336x128xbf16, #tpu.memory_space<vmem>>) attributes {dimension_semantics = [#tpu.dimension_semantics<parallel>], iteration_bounds = array<i64: 2>, scalar_prefetch = 0 : i64, scratch_operands = 1 : i64, tpu.core_type = #tpu.core_type<tc>, window_params = [{transform_indices = @transform_0, window_bounds = array<i64: 1, 336, 128>}, {pipeline_mode = #tpu.pipeline_mode<synchronous>, transform_indices = @transform_1, window_bounds = array<i64: 1152, 128>}, {pipeline_mode = #tpu.pipeline_mode<synchronous>, transform_indices = @transform_2, window_bounds = array<i64: 1, 128>}, {pipeline_mode = #tpu.pipeline_mode<synchronous>, transform_indices = @transform_3, window_bounds = array<i64: 1152, 128>}, {pipeline_mode = #tpu.pipeline_mode<synchronous>, transform_indices = @transform_4, window_bounds = array<i64: 1, 128>}, {pipeline_mode = #tpu.pipeline_mode<synchronous>, transform_indices = @transform_5, window_bounds = array<i64: 288, 1>}, {transform_indices = @transform_6, window_bounds = array<i64: 1, 288, 128>}]} {
    %cst = arith.constant 0.000000e+00 : bf16
    %0 = vector.broadcast %cst : bf16 to vector<24x128xbf16>
    %c0 = arith.constant 0 : index
    %c0_0 = arith.constant 0 : index
    %1 = vector.load %arg8[%c0, %c0_0] : memref<336x128xbf16, #tpu.memory_space<vmem>>, vector<24x128xbf16>
    tpu.vector_store %arg8[%c0, %c0_0], %0 {strides = array<i32>} : memref<336x128xbf16, #tpu.memory_space<vmem>>, vector<24x128xbf16>,
    %cst_1 = arith.constant 0.000000e+00 : bf16
    %2 = vector.broadcast %cst_1 : bf16 to vector<24x128xbf16>
    %c312 = arith.constant 312 : index
    %c0_2 = arith.constant 0 : index
    %3 = vector.load %arg8[%c312, %c0_2] : memref<336x128xbf16, #tpu.memory_space<vmem>>, vector<24x128xbf16>
    tpu.vector_store %arg8[%c312, %c0_2], %2 {strides = array<i32>} : memref<336x128xbf16, #tpu.memory_space<vmem>>, vector<24x128xbf16>,
    %c0_3 = arith.constant 0 : index
    %c0_4 = arith.constant 0 : index
    %4 = vector.load %arg6[%c0_3, %c0_4] : memref<288x1xbf16, #tpu.memory_space<vmem>>, vector<288x1xbf16>
    %c0_5 = arith.constant 0 : index
    %c5 = arith.constant 5 : index
    %c0_6 = arith.constant 0 : index
    %5 = vector.load %arg1[%c0_5, %c5, %c0_6] : memref<1x336x128xbf16, #tpu.memory_space<vmem>>, vector<1x288x128xbf16>
    %6 = vector.shape_cast %5 : vector<1x288x128xbf16> to vector<288x128xbf16>
    %c0_7 = arith.constant 0 : index
    %c0_8 = arith.constant 0 : index
    %7 = vector.load %arg2[%c0_7, %c0_8] : memref<1152x128xbf16, #tpu.memory_space<vmem>>, vector<128x128xbf16>
    %cst_9 = arith.constant dense<0.000000e+00> : vector<288x128xf32>
    %8 = tpu.matmul %6, %7, %cst_9 {dimension_numbers = #tpu.dot_dimension_numbers<[1], [0], [0], [1], [0, 0, 1, 1], [], []>} : vector<288x128xbf16>, vector<128x128xbf16>, vector<288x128xf32> -> vector<288x128xf32>
    %c0_10 = arith.constant 0 : index
    %c6 = arith.constant 6 : index
    %c0_11 = arith.constant 0 : index
    %9 = vector.load %arg1[%c0_10, %c6, %c0_11] : memref<1x336x128xbf16, #tpu.memory_space<vmem>>, vector<1x288x128xbf16>
    %10 = vector.shape_cast %9 : vector<1x288x128xbf16> to vector<288x128xbf16>
    %c128 = arith.constant 128 : index
    %c0_12 = arith.constant 0 : index
    %11 = vector.load %arg2[%c128, %c0_12] : memref<1152x128xbf16, #tpu.memory_space<vmem>>, vector<128x128xbf16>
    %cst_13 = arith.constant dense<0.000000e+00> : vector<288x128xf32>
    %12 = tpu.matmul %10, %11, %cst_13 {dimension_numbers = #tpu.dot_dimension_numbers<[1], [0], [0], [1], [0, 0, 1, 1], [], []>} : vector<288x128xbf16>, vector<128x128xbf16>, vector<288x128xf32> -> vector<288x128xf32>
    %13 = arith.addf %8, %12 : vector<288x128xf32>
    %c0_14 = arith.constant 0 : index
    %c7 = arith.constant 7 : index
    %c0_15 = arith.constant 0 : index
    %14 = vector.load %arg1[%c0_14, %c7, %c0_15] : memref<1x336x128xbf16, #tpu.memory_space<vmem>>, vector<1x288x128xbf16>
    %15 = vector.shape_cast %14 : vector<1x288x128xbf16> to vector<288x128xbf16>
    %c256 = arith.constant 256 : index
    %c0_16 = arith.constant 0 : index
    %16 = vector.load %arg2[%c256, %c0_16] : memref<1152x128xbf16, #tpu.memory_space<vmem>>, vector<128x128xbf16>
    %cst_17 = arith.constant dense<0.000000e+00> : vector<288x128xf32>
    %17 = tpu.matmul %15, %16, %cst_17 {dimension_numbers = #tpu.dot_dimension_numbers<[1], [0], [0], [1], [0, 0, 1, 1], [], []>} : vector<288x128xbf16>, vector<128x128xbf16>, vector<288x128xf32> -> vector<288x128xf32>
    %18 = arith.addf %13, %17 : vector<288x128xf32>
    %c0_18 = arith.constant 0 : index
    %c23 = arith.constant 23 : index
    %c0_19 = arith.constant 0 : index
    %19 = vector.load %arg1[%c0_18, %c23, %c0_19] : memref<1x336x128xbf16, #tpu.memory_space<vmem>>, vector<1x288x128xbf16>
    %20 = vector.shape_cast %19 : vector<1x288x128xbf16> to vector<288x128xbf16>
    %c384 = arith.constant 384 : index
    %c0_20 = arith.constant 0 : index
    %21 = vector.load %arg2[%c384, %c0_20] : memref<1152x128xbf16, #tpu.memory_space<vmem>>, vector<128x128xbf16>
    %cst_21 = arith.constant dense<0.000000e+00> : vector<288x128xf32>
    %22 = tpu.matmul %20, %21, %cst_21 {dimension_numbers = #tpu.dot_dimension_numbers<[1], [0], [0], [1], [0, 0, 1, 1], [], []>} : vector<288x128xbf16>, vector<128x128xbf16>, vector<288x128xf32> -> vector<288x128xf32>
    %23 = arith.addf %18, %22 : vector<288x128xf32>
    %c0_22 = arith.constant 0 : index
    %c24 = arith.constant 24 : index
    %c0_23 = arith.constant 0 : index
    %24 = vector.load %arg1[%c0_22, %c24, %c0_23] : memref<1x336x128xbf16, #tpu.memory_space<vmem>>, vector<1x288x128xbf16>
    %25 = vector.shape_cast %24 : vector<1x288x128xbf16> to vector<288x128xbf16>
    %c512 = arith.constant 512 : index
    %c0_24 = arith.constant 0 : index
    %26 = vector.load %arg2[%c512, %c0_24] : memref<1152x128xbf16, #tpu.memory_space<vmem>>, vector<128x128xbf16>
    %cst_25 = arith.constant dense<0.000000e+00> : vector<288x128xf32>
    %27 = tpu.matmul %25, %26, %cst_25 {dimension_numbers = #tpu.dot_dimension_numbers<[1], [0], [0], [1], [0, 0, 1, 1], [], []>} : vector<288x128xbf16>, vector<128x128xbf16>, vector<288x128xf32> -> vector<288x128xf32>
    %28 = arith.addf %23, %27 : vector<288x128xf32>
    %c0_26 = arith.constant 0 : index
    %c25 = arith.constant 25 : index
    %c0_27 = arith.constant 0 : index
    %29 = vector.load %arg1[%c0_26, %c25, %c0_27] : memref<1x336x128xbf16, #tpu.memory_space<vmem>>, vector<1x288x128xbf16>
    %30 = vector.shape_cast %29 : vector<1x288x128xbf16> to vector<288x128xbf16>
    %c640 = arith.constant 640 : index
    %c0_28 = arith.constant 0 : index
    %31 = vector.load %arg2[%c640, %c0_28] : memref<1152x128xbf16, #tpu.memory_space<vmem>>, vector<128x128xbf16>
    %cst_29 = arith.constant dense<0.000000e+00> : vector<288x128xf32>
    %32 = tpu.matmul %30, %31, %cst_29 {dimension_numbers = #tpu.dot_dimension_numbers<[1], [0], [0], [1], [0, 0, 1, 1], [], []>} : vector<288x128xbf16>, vector<128x128xbf16>, vector<288x128xf32> -> vector<288x128xf32>
    %33 = arith.addf %28, %32 : vector<288x128xf32>
    %c0_30 = arith.constant 0 : index
    %c41 = arith.constant 41 : index
    %c0_31 = arith.constant 0 : index
    %34 = vector.load %arg1[%c0_30, %c41, %c0_31] : memref<1x336x128xbf16, #tpu.memory_space<vmem>>, vector<1x288x128xbf16>
    %35 = vector.shape_cast %34 : vector<1x288x128xbf16> to vector<288x128xbf16>
    %c768 = arith.constant 768 : index
    %c0_32 = arith.constant 0 : index
    %36 = vector.load %arg2[%c768, %c0_32] : memref<1152x128xbf16, #tpu.memory_space<vmem>>, vector<128x128xbf16>
    %cst_33 = arith.constant dense<0.000000e+00> : vector<288x128xf32>
    %37 = tpu.matmul %35, %36, %cst_33 {dimension_numbers = #tpu.dot_dimension_numbers<[1], [0], [0], [1], [0, 0, 1, 1], [], []>} : vector<288x128xbf16>, vector<128x128xbf16>, vector<288x128xf32> -> vector<288x128xf32>
    %38 = arith.addf %33, %37 : vector<288x128xf32>
    %c0_34 = arith.constant 0 : index
    %c42 = arith.constant 42 : index
    %c0_35 = arith.constant 0 : index
    %39 = vector.load %arg1[%c0_34, %c42, %c0_35] : memref<1x336x128xbf16, #tpu.memory_space<vmem>>, vector<1x288x128xbf16>
    %40 = vector.shape_cast %39 : vector<1x288x128xbf16> to vector<288x128xbf16>
    %c896 = arith.constant 896 : index
    %c0_36 = arith.constant 0 : index
    %41 = vector.load %arg2[%c896, %c0_36] : memref<1152x128xbf16, #tpu.memory_space<vmem>>, vector<128x128xbf16>
    %cst_37 = arith.constant dense<0.000000e+00> : vector<288x128xf32>
    %42 = tpu.matmul %40, %41, %cst_37 {dimension_numbers = #tpu.dot_dimension_numbers<[1], [0], [0], [1], [0, 0, 1, 1], [], []>} : vector<288x128xbf16>, vector<128x128xbf16>, vector<288x128xf32> -> vector<288x128xf32>
    %43 = arith.addf %38, %42 : vector<288x128xf32>
    %c0_38 = arith.constant 0 : index
    %c43 = arith.constant 43 : index
    %c0_39 = arith.constant 0 : index
    %44 = vector.load %arg1[%c0_38, %c43, %c0_39] : memref<1x336x128xbf16, #tpu.memory_space<vmem>>, vector<1x288x128xbf16>
    %45 = vector.shape_cast %44 : vector<1x288x128xbf16> to vector<288x128xbf16>
    %c1024 = arith.constant 1024 : index
    %c0_40 = arith.constant 0 : index
    %46 = vector.load %arg2[%c1024, %c0_40] : memref<1152x128xbf16, #tpu.memory_space<vmem>>, vector<128x128xbf16>
    %cst_41 = arith.constant dense<0.000000e+00> : vector<288x128xf32>
    %47 = tpu.matmul %45, %46, %cst_41 {dimension_numbers = #tpu.dot_dimension_numbers<[1], [0], [0], [1], [0, 0, 1, 1], [], []>} : vector<288x128xbf16>, vector<128x128xbf16>, vector<288x128xf32> -> vector<288x128xf32>
    %48 = arith.addf %43, %47 : vector<288x128xf32>
    %c0_42 = arith.constant 0 : index
    %c0_43 = arith.constant 0 : index
    %49 = vector.load %arg3[%c0_42, %c0_43] : memref<1x128xf32, #tpu.memory_space<vmem>>, vector<1x128xf32>
    %50 = vector.broadcast %49 : vector<1x128xf32> to vector<288x128xf32>
    %51 = arith.addf %48, %50 : vector<288x128xf32>
    %cst_44 = arith.constant 0.000000e+00 : f32
    %52 = vector.broadcast %cst_44 : f32 to vector<288x128xf32>
    %53 = arith.maximumf %51, %52 : vector<288x128xf32>
    %54 = arith.extf %4 : vector<288x1xbf16> to vector<288x1xf32>
    %55 = vector.broadcast %54 : vector<288x1xf32> to vector<288x128xf32>
    %56 = arith.mulf %53, %55 : vector<288x128xf32>
    %57 = arith.truncf %56 : vector<288x128xf32> to vector<288x128xbf16>
    %c24_45 = arith.constant 24 : index
    %c0_46 = arith.constant 0 : index
    %58 = vector.load %arg8[%c24_45, %c0_46] : memref<336x128xbf16, #tpu.memory_space<vmem>>, vector<288x128xbf16>
    tpu.vector_store %arg8[%c24_45, %c0_46], %57 {strides = array<i32>} : memref<336x128xbf16, #tpu.memory_space<vmem>>, vector<288x128xbf16>,
    %c5_47 = arith.constant 5 : index
    %c0_48 = arith.constant 0 : index
    %59 = vector.load %arg8[%c5_47, %c0_48] : memref<336x128xbf16, #tpu.memory_space<vmem>>, vector<288x128xbf16>
    %c0_49 = arith.constant 0 : index
    %c0_50 = arith.constant 0 : index
    %60 = vector.load %arg4[%c0_49, %c0_50] : memref<1152x128xbf16, #tpu.memory_space<vmem>>, vector<128x128xbf16>
    %cst_51 = arith.constant dense<0.000000e+00> : vector<288x128xf32>
    %61 = tpu.matmul %59, %60, %cst_51 {dimension_numbers = #tpu.dot_dimension_numbers<[1], [0], [0], [1], [0, 0, 1, 1], [], []>} : vector<288x128xbf16>, vector<128x128xbf16>, vector<288x128xf32> -> vector<288x128xf32>
    %c6_52 = arith.constant 6 : index
    %c0_53 = arith.constant 0 : index
    %62 = vector.load %arg8[%c6_52, %c0_53] : memref<336x128xbf16, #tpu.memory_space<vmem>>, vector<288x128xbf16>
    %c128_54 = arith.constant 128 : index
    %c0_55 = arith.constant 0 : index
    %63 = vector.load %arg4[%c128_54, %c0_55] : memref<1152x128xbf16, #tpu.memory_space<vmem>>, vector<128x128xbf16>
    %cst_56 = arith.constant dense<0.000000e+00> : vector<288x128xf32>
    %64 = tpu.matmul %62, %63, %cst_56 {dimension_numbers = #tpu.dot_dimension_numbers<[1], [0], [0], [1], [0, 0, 1, 1], [], []>} : vector<288x128xbf16>, vector<128x128xbf16>, vector<288x128xf32> -> vector<288x128xf32>
    %65 = arith.addf %61, %64 : vector<288x128xf32>
    %c7_57 = arith.constant 7 : index
    %c0_58 = arith.constant 0 : index
    %66 = vector.load %arg8[%c7_57, %c0_58] : memref<336x128xbf16, #tpu.memory_space<vmem>>, vector<288x128xbf16>
    %c256_59 = arith.constant 256 : index
    %c0_60 = arith.constant 0 : index
    %67 = vector.load %arg4[%c256_59, %c0_60] : memref<1152x128xbf16, #tpu.memory_space<vmem>>, vector<128x128xbf16>
    %cst_61 = arith.constant dense<0.000000e+00> : vector<288x128xf32>
    %68 = tpu.matmul %66, %67, %cst_61 {dimension_numbers = #tpu.dot_dimension_numbers<[1], [0], [0], [1], [0, 0, 1, 1], [], []>} : vector<288x128xbf16>, vector<128x128xbf16>, vector<288x128xf32> -> vector<288x128xf32>
    %69 = arith.addf %65, %68 : vector<288x128xf32>
    %c23_62 = arith.constant 23 : index
    %c0_63 = arith.constant 0 : index
    %70 = vector.load %arg8[%c23_62, %c0_63] : memref<336x128xbf16, #tpu.memory_space<vmem>>, vector<288x128xbf16>
    %c384_64 = arith.constant 384 : index
    %c0_65 = arith.constant 0 : index
    %71 = vector.load %arg4[%c384_64, %c0_65] : memref<1152x128xbf16, #tpu.memory_space<vmem>>, vector<128x128xbf16>
    %cst_66 = arith.constant dense<0.000000e+00> : vector<288x128xf32>
    %72 = tpu.matmul %70, %71, %cst_66 {dimension_numbers = #tpu.dot_dimension_numbers<[1], [0], [0], [1], [0, 0, 1, 1], [], []>} : vector<288x128xbf16>, vector<128x128xbf16>, vector<288x128xf32> -> vector<288x128xf32>
    %73 = arith.addf %69, %72 : vector<288x128xf32>
    %c24_67 = arith.constant 24 : index
    %c0_68 = arith.constant 0 : index
    %74 = vector.load %arg8[%c24_67, %c0_68] : memref<336x128xbf16, #tpu.memory_space<vmem>>, vector<288x128xbf16>
    %c512_69 = arith.constant 512 : index
    %c0_70 = arith.constant 0 : index
    %75 = vector.load %arg4[%c512_69, %c0_70] : memref<1152x128xbf16, #tpu.memory_space<vmem>>, vector<128x128xbf16>
    %cst_71 = arith.constant dense<0.000000e+00> : vector<288x128xf32>
    %76 = tpu.matmul %74, %75, %cst_71 {dimension_numbers = #tpu.dot_dimension_numbers<[1], [0], [0], [1], [0, 0, 1, 1], [], []>} : vector<288x128xbf16>, vector<128x128xbf16>, vector<288x128xf32> -> vector<288x128xf32>
    %77 = arith.addf %73, %76 : vector<288x128xf32>
    %c25_72 = arith.constant 25 : index
    %c0_73 = arith.constant 0 : index
    %78 = vector.load %arg8[%c25_72, %c0_73] : memref<336x128xbf16, #tpu.memory_space<vmem>>, vector<288x128xbf16>
    %c640_74 = arith.constant 640 : index
    %c0_75 = arith.constant 0 : index
    %79 = vector.load %arg4[%c640_74, %c0_75] : memref<1152x128xbf16, #tpu.memory_space<vmem>>, vector<128x128xbf16>
    %cst_76 = arith.constant dense<0.000000e+00> : vector<288x128xf32>
    %80 = tpu.matmul %78, %79, %cst_76 {dimension_numbers = #tpu.dot_dimension_numbers<[1], [0], [0], [1], [0, 0, 1, 1], [], []>} : vector<288x128xbf16>, vector<128x128xbf16>, vector<288x128xf32> -> vector<288x128xf32>
    %81 = arith.addf %77, %80 : vector<288x128xf32>
    %c41_77 = arith.constant 41 : index
    %c0_78 = arith.constant 0 : index
    %82 = vector.load %arg8[%c41_77, %c0_78] : memref<336x128xbf16, #tpu.memory_space<vmem>>, vector<288x128xbf16>
    %c768_79 = arith.constant 768 : index
    %c0_80 = arith.constant 0 : index
    %83 = vector.load %arg4[%c768_79, %c0_80] : memref<1152x128xbf16, #tpu.memory_space<vmem>>, vector<128x128xbf16>
    %cst_81 = arith.constant dense<0.000000e+00> : vector<288x128xf32>
    %84 = tpu.matmul %82, %83, %cst_81 {dimension_numbers = #tpu.dot_dimension_numbers<[1], [0], [0], [1], [0, 0, 1, 1], [], []>} : vector<288x128xbf16>, vector<128x128xbf16>, vector<288x128xf32> -> vector<288x128xf32>
    %85 = arith.addf %81, %84 : vector<288x128xf32>
    %c42_82 = arith.constant 42 : index
    %c0_83 = arith.constant 0 : index
    %86 = vector.load %arg8[%c42_82, %c0_83] : memref<336x128xbf16, #tpu.memory_space<vmem>>, vector<288x128xbf16>
    %c896_84 = arith.constant 896 : index
    %c0_85 = arith.constant 0 : index
    %87 = vector.load %arg4[%c896_84, %c0_85] : memref<1152x128xbf16, #tpu.memory_space<vmem>>, vector<128x128xbf16>
    %cst_86 = arith.constant dense<0.000000e+00> : vector<288x128xf32>
    %88 = tpu.matmul %86, %87, %cst_86 {dimension_numbers = #tpu.dot_dimension_numbers<[1], [0], [0], [1], [0, 0, 1, 1], [], []>} : vector<288x128xbf16>, vector<128x128xbf16>, vector<288x128xf32> -> vector<288x128xf32>
    %89 = arith.addf %85, %88 : vector<288x128xf32>
    %c43_87 = arith.constant 43 : index
    %c0_88 = arith.constant 0 : index
    %90 = vector.load %arg8[%c43_87, %c0_88] : memref<336x128xbf16, #tpu.memory_space<vmem>>, vector<288x128xbf16>
    %c1024_89 = arith.constant 1024 : index
    %c0_90 = arith.constant 0 : index
    %91 = vector.load %arg4[%c1024_89, %c0_90] : memref<1152x128xbf16, #tpu.memory_space<vmem>>, vector<128x128xbf16>
    %cst_91 = arith.constant dense<0.000000e+00> : vector<288x128xf32>
    %92 = tpu.matmul %90, %91, %cst_91 {dimension_numbers = #tpu.dot_dimension_numbers<[1], [0], [0], [1], [0, 0, 1, 1], [], []>} : vector<288x128xbf16>, vector<128x128xbf16>, vector<288x128xf32> -> vector<288x128xf32>
    %93 = arith.addf %89, %92 : vector<288x128xf32>
    %c0_92 = arith.constant 0 : index
    %c0_93 = arith.constant 0 : index
    %94 = vector.load %arg5[%c0_92, %c0_93] : memref<1x128xf32, #tpu.memory_space<vmem>>, vector<1x128xf32>
    %95 = vector.broadcast %94 : vector<1x128xf32> to vector<288x128xf32>
    %96 = arith.addf %93, %95 : vector<288x128xf32>
    %c0_94 = arith.constant 0 : index
    %c24_95 = arith.constant 24 : index
    %c0_96 = arith.constant 0 : index
    %97 = vector.load %arg1[%c0_94, %c24_95, %c0_96] : memref<1x336x128xbf16, #tpu.memory_space<vmem>>, vector<1x288x128xbf16>
    %98 = vector.shape_cast %97 : vector<1x288x128xbf16> to vector<288x128xbf16>
    %99 = arith.extf %98 : vector<288x128xbf16> to vector<288x128xf32>
    %100 = arith.addf %96, %99 : vector<288x128xf32>
    %cst_97 = arith.constant 0.000000e+00 : f32
    %101 = vector.broadcast %cst_97 : f32 to vector<288x128xf32>
    %102 = arith.maximumf %100, %101 : vector<288x128xf32>
    %103 = arith.truncf %102 : vector<288x128xf32> to vector<288x128xbf16>
    %c0_98 = arith.constant 0 : index
    %c0_99 = arith.constant 0 : index
    %c0_100 = arith.constant 0 : index
    %104 = vector.load %arg7[%c0_98, %c0_99, %c0_100] : memref<1x288x128xbf16, #tpu.memory_space<vmem>>, vector<1x288x128xbf16>
    %105 = vector.shape_cast %104 : vector<1x288x128xbf16> to vector<288x128xbf16>
    %106 = vector.shape_cast %103 : vector<288x128xbf16> to vector<1x288x128xbf16>
    tpu.vector_store %arg7[%c0_98, %c0_99, %c0_100], %106 {strides = array<i32>} : memref<1x288x128xbf16, #tpu.memory_space<vmem>>, vector<1x288x128xbf16>,
    return
  }
  func.func @transform_0(%arg0: i32) -> (i32, i32, i32) {
    %c0_i32 = arith.constant 0 : i32
    %c0_i32_0 = arith.constant 0 : i32
    %c0_i32_1 = arith.constant 0 : i32
    return %arg0, %c0_i32, %c0_i32_0 : i32, i32, i32
  }
  func.func @transform_1(%arg0: i32) -> (i32, i32) {
    %c0_i32 = arith.constant 0 : i32
    %c0_i32_0 = arith.constant 0 : i32
    %c0_i32_1 = arith.constant 0 : i32
    return %c0_i32, %c0_i32_0 : i32, i32
  }
  func.func @transform_2(%arg0: i32) -> (i32, i32) {
    %c0_i32 = arith.constant 0 : i32
    %c0_i32_0 = arith.constant 0 : i32
    %c0_i32_1 = arith.constant 0 : i32
    return %c0_i32, %c0_i32_0 : i32, i32
  }
  func.func @transform_3(%arg0: i32) -> (i32, i32) {
    %c0_i32 = arith.constant 0 : i32
    %c0_i32_0 = arith.constant 0 : i32
    %c0_i32_1 = arith.constant 0 : i32
    return %c0_i32, %c0_i32_0 : i32, i32
  }
  func.func @transform_4(%arg0: i32) -> (i32, i32) {
    %c0_i32 = arith.constant 0 : i32
    %c0_i32_0 = arith.constant 0 : i32
    %c0_i32_1 = arith.constant 0 : i32
    return %c0_i32, %c0_i32_0 : i32, i32
  }
  func.func @transform_5(%arg0: i32) -> (i32, i32) {
    %c0_i32 = arith.constant 0 : i32
    %c0_i32_0 = arith.constant 0 : i32
    %c0_i32_1 = arith.constant 0 : i32
    return %c0_i32, %c0_i32_0 : i32, i32
  }
  func.func @transform_6(%arg0: i32) -> (i32, i32, i32) {
    %c0_i32 = arith.constant 0 : i32
    %c0_i32_0 = arith.constant 0 : i32
    %c0_i32_1 = arith.constant 0 : i32
    return %arg0, %c0_i32, %c0_i32_0 : i32, i32, i32
  }
}

</mosaic_0001>

<bundles_post_ra>
// kernel: tpu_custom_call.1
= control target key start
LH: loop header
LB: loop body
LE: loop exit
PB: predicated region body
PF: predicated region fallthrough
CT: control target
= control target key end

     0   :  { %11 = vsyncpa [#allocation4], 0  ;;  %s16478_s0 = inlined_call_operand.hbm [shape: bf16[2,336,128], index: 0, kind: input, shape index: {}]   ;;  %s16479_s1 = inlined_call_operand.hbm [shape: bf16[1152,128], index: 1, kind: input, shape index: {}]   ;;  %s16480_s2 = inlined_call_operand.vmem [shape: f32[1,128], index: 2, kind: input, shape index: {}]   ;;  %s16481_s3 = inlined_call_operand.hbm [shape: bf16[1152,128], index: 3, kind: input, shape index: {}]   ;;  %s16482_s4 = inlined_call_operand.vmem [shape: f32[1,128], index: 4, kind: input, shape index: {}]   ;;  %s16483_s5 = inlined_call_operand.vmem [shape: bf16[288,1], index: 5, kind: input, shape index: {}]   ;;  %s16484_s6 = inlined_call_operand.hbm [shape: bf16[2,288,128], index: 6, kind: output, shape index: {}]  }
   0x1   :  { %13 = vsyncpa [#allocation4 + $0x1], 0 }
   0x2   :  { %14 = vsyncpa [#allocation7], 0 }
   0x3   :  { %15 = vsyncpa [#allocation5], 0 }
   0x4   :  { %17 = vsyncpa [#allocation5 + $0x1], 0  ;;  %s12357_s21 = smov 0   ;;  %s12359_s22 = smov 0  }
   0x5   :  { %s12361_s23 = smov 0   ;;  %s12363_s24 = smov 0  }
   0x6 LB: > { %s12378_s25 = sadd.s32 4294967295, %s12311_s24   ;;  %s9366_s26 = sadd.s32 4294967294, %s12311_s24   ;;  %s12311_s24 = sphi %s12363_s24, %s17150_s24   ;;  %s12307_s23 = sphi %s12361_s23, %s17149_s23   ;;  %s12303_s22 = sphi %s12359_s22, %s17148_s22   ;;  %s12299_s21 = sphi %s12357_s21, %s17147_s21  }
   0x7   : > { %p43_p0 = scmp.ne.s32.totalorder %s12303_s22, %s12299_s21  ;;  %p16487_p1 = scmp.eq.s32.totalorder %s12378_s25, 0 }
   0x8   : > { %p172_p2 = scmp.eq.s32.totalorder %s12378_s25, 1  ;;  %p178_p3 = scmp.eq.s32.totalorder %s9366_s26, 1 }
   0x9   : > { %p12387_p4 = por %p16487_p1, %p43_p0  ;;  %p9367_p5 = scmp.ge.s32.totalorder %s12311_s24, 1 }
   0xa   : > { %p12392_p6 = por %p178_p3, %p43_p0  ;;  %p185_p7 = scmp.lt.s32.totalorder %s12311_s24, 3 }
   0xb   : > { %s16598_s27 = scalar_select %p12387_p4, 1, 0 }
   0xc   : > { %s16599_s28 = scalar_select %p12392_p6, 1, 0 }
   0xd   : > { %p12397_p8 = pnand %p9367_p5, %p185_p7  ;;  %s12313_s30 = smov [#allocation6]  }
   0xe   : > { %s197_s7 = sshll.u32 %s12313_s30, 4  ;;  %s12314_s9 = smov [#allocation8]   ;;  %s198_s7 = int_to_ptr.vmem [resolvable:$true] %s197_s7 }
   0xf   : > { %s16600_s29 = scalar_select %p12397_p8, 1, 0 }
  0x10   : > { %p11668_p9 = pneg %p12397_p8  ;;  %s213_s10 = sshll.u32 %s12314_s9, 4  ;;  %s214_s10 = int_to_ptr.vmem [resolvable:$true] %s213_s10 }
  0x11   : > { %s12174_s11 = scalar_lea.vmem %s198_s7, 9216  ;;  %p12182_p5 = scmp.lt.s32.totalorder %s198_s7, %s198_s7 }
  0x12   : > { %p12406_p11 = pnand %p11668_p9, %p16487_p1  ;;  %p12175_p13 = scmp.ne.s32.totalorder %s198_s7, %s12174_s11 }
  0x13   : > { %p12183_p7 = scmp.lt.s32.totalorder %s12174_s11, %s12174_s11 }
  0x14   : > { %p12165_p12 = pneg %p12406_p11 }
  0x15   : > { %p12184_p10 = por %p12183_p7, %p12182_p5 }
  0x16   : > { %p12177_p0 = pnand %p12175_p13, %p12165_p12 }
  0x18   : > { %p12178_p3 = pneg %p12177_p0 }
  0x1a   : > { %p12185_p9 = pnand %p12184_p10, %p12178_p3 }
  0x1c   : > { %12188 = shalt.err (!%p12185_p9)
}
  0x1d   : > { %s16485_s12 = smov 64   ;;  %s16486_s13 = smov 4  }
  0x1e   : > { %11671 = dma.hbm_to_vmem [thread:$0]  (!%p12406_p11), %s16479_s1, 9216, %s198_s7, [#allocation7], %s16485_s12, %s16485_s12, %s16486_s13  }
  0x1f   : > { %s12200_s16 = scalar_lea.vmem %s214_s10, 9216  ;;  %p12208_p10 = scmp.lt.s32.totalorder %s214_s10, %s214_s10 }
  0x20   : > { %p12201_p13 = scmp.ne.s32.totalorder %s214_s10, %s12200_s16  ;;  %p12209_p3 = scmp.lt.s32.totalorder %s12200_s16, %s12200_s16 }
  0x22   : > { %p12203_p0 = pnand %p12201_p13, %p12165_p12  ;;  %p12210_p7 = por %p12209_p3, %p12208_p10 }
  0x24   : > { %p12204_p5 = pneg %p12203_p0 }
  0x26   : > { %p12211_p9 = pnand %p12210_p7, %p12204_p5 }
  0x28   : > { %12214 = shalt.err (!%p12211_p9)
}
  0x29   : > { %11674 = dma.hbm_to_vmem [thread:$0]  (!%p12406_p11), %s16481_s3, 9216, %s214_s10, [#allocation7], %s16485_s12, %s16485_s12, %s16486_s13  }
  0x2a   : > { %s12435_s19 = sadd.s32 1, %s12311_s24   ;;  %s30_s20 = sadd.s32 1, %s12307_s23 }
  0x2b   : > { %s27_s26 = ssub.s32 %s12311_s24, %s12435_s19  ;;  %p37_p12 = scmp.ne.s32.totalorder %s12307_s23, %s12303_s22 }
  0x2c   : > { %p28_p13 = scmp.eq.s32.totalorder %s27_s26, 0  ;;  %p38_p0 = scmp.eq.s32.totalorder %s12311_s24, 0 }
  0x2d   : > { %p12445_p5 = por %p172_p2, %p37_p12  ;;  %p11685_p10 = scmp.lt.s32.totalorder %s12311_s24, 2 }
  0x2e   : > { %s12451_s7 = scalar_select %p28_p13, %s12307_s23, %s30_s20  }
  0x2f   : > { %s16602_s30 = scalar_select %p12445_p5, 1, 0 }
  0x30   : > { %p39_p3 = por %p38_p0, %p37_p12  ;;  %s233_s8 = sand.u32 1, %s12307_s23  }
  0x31   : > { %s11651_s9 = smul.u32 168, %s233_s8  ;;  %s12466_s20 = scalar_lea.sflag [#allocation4], %s233_s8 }
  0x32   : > { %s11652_s10 = smul.u32 2688, %s12311_s24  ;;  %p12455_p11 = pnand %p11685_p10, %p39_p3 }
  0x33   : > { %s237_s17 = scalar_lea.vmem [#allocation3], %s11651_s9 }
  0x34   : > { %s12462_s16 = scalar_lea.hbm %s16478_s0, %s11652_s10  ;;  %s244_s18 = sshll.u32 %s237_s17, 4  ;;  %s12464_s18 = int_to_ptr.vmem [resolvable:$true] %s244_s18 }
  0x35   : > { %s12215_s26 = scalar_lea.hbm %s12462_s16, 2688  ;;  %p12217_p7 = pneg %p12455_p11 }
  0x36   : > { %p12216_p2 = scmp.ne.s32.totalorder %s12462_s16, %s12215_s26  ;;  %s12220_s10 = scalar_lea.hbm %s16478_s0, 5376 }
  0x37   : > { %p12221_p13 = scmp.lt.s32.totalorder %s12462_s16, %s16478_s0  ;;  %p12222_p0 = scmp.lt.s32.totalorder %s12220_s10, %s12215_s26 }
  0x38   : > { %p12218_p9 = pnand %p12217_p7, %p12216_p2 }
  0x39   : > { %p12223_p10 = por %p12222_p0, %p12221_p13 }
  0x3a   : > { %p12219_p12 = pneg %p12218_p9 }
  0x3c   : > { %p12224_p3 = pnand %p12223_p10, %p12219_p12 }
  0x3e   : > { %12227 = shalt.err (!%p12224_p3)
}
  0x3f   : > { %s12228_s8 = scalar_lea.vmem %s12464_s18, 2688  ;;  %s12317_s9 = smov [#allocation3]  }
  0x40   : > { %p12229_p1 = scmp.ne.s32.totalorder %s12464_s18, %s12228_s8  ;;  %s12233_s17 = sshll.u32 %s12317_s9, 4  ;;  %s12234_s17 = int_to_ptr.vmem [resolvable:$false] %s12233_s17 }
  0x41   : > { %s12235_s12 = scalar_lea.vmem %s12234_s17, 5376  ;;  %p12236_p9 = scmp.lt.s32.totalorder %s12464_s18, %s12234_s17 }
  0x42   : > { %p12231_p6 = pnand %p12229_p1, %p12217_p7  ;;  %p12237_p5 = scmp.lt.s32.totalorder %s12235_s12, %s12228_s8 }
  0x44   : > { %p12232_p2 = pneg %p12231_p6  ;;  %p12238_p4 = por %p12237_p5, %p12236_p9 }
  0x46   : > { %p12239_p8 = pnand %p12238_p4, %p12232_p2 }
  0x48   : > { %12242 = shalt.err (!%p12239_p8)
}
  0x49   : > { %s16604_s13 = smov 4   ;;  %s16605_s26 = smov 64  }
  0x4a   : > { %11678 = dma.hbm_to_vmem [thread:$0]  (!%p12455_p11), %s12462_s16, 2688, %s12464_s18, %s12466_s20, %s16605_s26, %s16605_s26, %s16604_s13  }
  0x4b   : > { %p16606_p1 = scmp.ne.s32.totalorder %s16600_s29, 0 }
  0x4d   : > { %256 = sbr.rel (%p16606_p1) target bundleno = 1226 (0x4ca), region = 44 }
  0x52   : > { %s12493_s14 = sand.u32 1, %s12303_s22   ;;  %p16607_p4 = scmp.ne.s32.totalorder %s16598_s27, 0 }
  0x53   : > { %s11653_s10 = smul.u32 168, %s12493_s14  ;;  %s259_s15 = scalar_lea.sflag [#allocation4], %s12493_s14 }
  0x55   : > { %s12497_s8 = scalar_lea.vmem [#allocation3], %s11653_s10 }
  0x56   : > { %12286 = dma.done.wait (%p16607_p4), %s259_s15, 2688  }
  0x57   : > { %12288 = vsyncadd (%p16607_p4), %s259_s15, 4294964608  ;;  %p16608_p6 = scmp.eq.s32.totalorder %s12378_s25, 0 }
  0x59   : > { %12290 = dma.done.wait (%p16608_p6), [#allocation7], 18432   ;;  %p16609_p8 = pmov %p16608_p6 }
  0x5a   : > { %v11815_v0 = vld [vmem:[#allocation6 + $0x78] sm:$0xff]   ;;  %v11817_v2 = vld [vmem:[#allocation6 + $0x70] sm:$0xff]   ;;  %v11819_v4 = vld [vmem:[#allocation6 + $0x68] sm:$0xff]   ;;  %vm789_vm0 = vsmask.f32 5376  ;;  %vm505_vm1 = vcmask 1044480  }
  0x5b   : > { %12292 = vsyncadd (%p16609_p8), [#allocation7], 4294948864  ;;  %v11816_v1 = vld [vmem:[#allocation6 + $0x38] sm:$0xff]   ;;  %10715 = vmatprep.subr.bf16.mxu0 %v11815_v0  ;;  %v11818_v3 = vld [vmem:[#allocation6 + $0x30] sm:$0xff]   ;;  %vm1223_vm2 = vsmask.f32 4352 }
  0x5c   : > { %10767 = vmatprep.subr.bf16.mxu1 %v11816_v1  ;;  %10716 = vmatpush3.bf16.msra.mxu0 %v11815_v0  ;;  %v11820_v5 = vld [vmem:[#allocation6 + $0x28] sm:$0xff]   ;;  %v11821_v6 = vld [vmem:[#allocation6 + $0x60] sm:$0xff]   ;;  %v11823_v8 = vld [vmem:[#allocation6 + $0x58] sm:$0xff]   ;;  %vm2642_vm3 = vsmask.f32 7424  ;;  %vm3663_vm5 = vcmask 1046528  }
  0x5d   : > { %10768 = vmatpush3.bf16.msra.mxu1 %v11816_v1  ;;  %10717 = vmatprep.subr.bf16.mxu0 %v11817_v2  ;;  %v11822_v7 = vld [vmem:[#allocation6 + $0x20] sm:$0xff]   ;;  %v11824_v9 = vld [vmem:[#allocation6 + $0x18] sm:$0xff]   ;;  %v11825_v10 = vld [vmem:[#allocation6 + $0x50] sm:$0xff]   ;;  %vm4000_vm4 = vsmask.f32 6400  ;;  %s11654_s29 = smul.u32 144, %s12493_s14 }
  0x5e   : > { %10769 = vmatprep.subr.bf16.mxu1 %v11818_v3  ;;  %v11826_v11 = vld [vmem:[#allocation6 + $0x10] sm:$0xff]   ;;  %v12510_v14 = vld [vmem:[%s12497_s8 + $0x8] sm:$0xff]   ;;  %v12516_v18 = vld [vmem:[%s12497_s8 + $0x10] sm:$0xff]   ;;  %s9261_s17 = scalar_lea.sflag [#allocation5], %s12493_s14  ;;  %p17144_p11 = scmp.ne.s32.totalorder %s16602_s30, 0 }
  0x5f   : > { %v343_v12 = vld [vmem:[%s12497_s8 + $0x4] sm:$0xf]  ;;  %v395_v13 = vld [vmem:[%s12497_s8] sm:$0x8]  ;;  %v11827_v19 = vld [vmem:[#allocation6 + $0x48] sm:$0xff]   ;;  %v507_v20 = vrot.slane %v12510_v14, 3 }
  0x60   : > { %10718 = vmatpush3.bf16.msra.mxu0 %v11817_v2  ;;  %v342_v15 = vld [vmem:[%s12497_s8] sm:$0xc]  ;;  %v12513_v16 = vcombine.low %v395_v13, %v343_v12  ;;  %v799_v21 = vshrl.u32 %v12510_v14, 16  ;;  %v802_v22 = vshll.u32 %v12510_v14, 16  ;;  %v11828_v23 = vld [vmem:[#allocation6 + $0x8] sm:$0xff]   ;;  %v808_v29 = vshrl.u32 %v12516_v18, 16 }
  0x61   : > { %10770 = vmatpush3.bf16.msra.mxu1 %v11818_v3  ;;  %10719 = vmatprep.subr.bf16.mxu0 %v11819_v4  ;;  %v9402_v17 = vcombine.low %v342_v15, %v343_v12  ;;  %v811_v30 = vshll.u32 %v12516_v18, 16  ;;  %v12530_v34 = vld [vmem:[%s12497_s8 + $0x18] sm:$0xff]   ;;  %v11829_v35 = vld [vmem:[#allocation6 + $0x40] sm:$0xff]   ;;  %v12539_v42 = vld [vmem:[%s12497_s8 + $0x20] sm:$0xff]   ;;  %v509_v48 = vrot.slane %v12516_v18, 3  ;;  %s16284_s11 = scalar_lea.vmem [#allocation9], %s11654_s29 }
  0x62   : > { %10771 = vmatprep.subr.bf16.mxu1 %v11820_v5  ;;  %v506_v24 = vrot.slane %v12513_v16, 3  ;;  %v801_v27 = vrot.slane %v799_v21, 2  ;;  %v804_v28 = vrot.slane %v802_v22, 3  ;;  %v810_v37 = vrot.slane %v808_v29, 2  ;;  %v11830_v43 = vld [vmem:[#allocation6] sm:$0xff]   ;;  %v11835_v50 = vld [vmem:[#allocation6 + $0xb8] sm:$0xff]  }
  0x63   : > { %v791_v25 = vshrl.u32 %v9402_v17, 16  ;;  %v794_v26 = vshll.u32 %v9402_v17, 16  ;;  %v813_v39 = vrot.slane %v811_v30, 3  ;;  %v817_v40 = vshrl.u32 %v12530_v34, 16  ;;  %v12542_v44 = vld [vmem:[%s12497_s8 + $0x28] sm:$0xff]   ;;  %v12562_v61 = vld [vmem:[%s12497_s8 + $0x30] sm:$0xff]  }
  0x64   : > { %10720 = vmatpush3.bf16.msra.mxu0 %v11819_v4  ;;  %v508_v31 = vsel %vm505_vm1, %v506_v24, %v507_v20  ;;  %v805_v36 = vor.u32 %v804_v28, %v801_v27  ;;  %v820_v41 = vshll.u32 %v12530_v34, 16  ;;  %v511_v51 = vrot.slane %v12530_v34, 3  ;;  %v11838_v0 = vld [vmem:[#allocation6 + $0xb0] sm:$0xff]   ;;  %s9274_s16 = sshll.u32 %s16284_s11, 4  ;;  %s12319_s12 = smov [#allocation9]   ;;  %s16434_s16 = int_to_ptr.vmem [resolvable:$true] %s9274_s16 }
  0x65   : > { %10772 = vmatpush3.bf16.msra.mxu1 %v11820_v5  ;;  %10721 = vmatprep.subr.bf16.mxu0 %v11821_v6  ;;  %v793_v32 = vrot.slane %v791_v25, 2  ;;  %v796_v33 = vrot.slane %v794_v26, 3  ;;  %v819_v46 = vrot.slane %v817_v40, 2  ;;  %v814_v49 = vor.u32 %v813_v39, %v810_v37  ;;  %v12571_v3 = vld [vmem:[%s12497_s8 + $0x38] sm:$0xff]   ;;  %v12580_v13 = vld [vmem:[%s12497_s8 + $0x40] sm:$0xff]   ;;  %v11844_v26 = vld [vmem:[#allocation6 + $0xa0] sm:$0xff]  }
  0x66   : > { %10773 = vmatprep.subr.bf16.mxu1 %v11822_v7  ;;  %10731 = vmatprep.mubr.bf16.mxu0 %v508_v31  ;;  %v822_v47 = vrot.slane %v820_v41, 3  ;;  %v826_v52 = vshrl.u32 %v12539_v42, 16  ;;  %v829_v53 = vshll.u32 %v12539_v42, 16  ;;  %v835_v55 = vshrl.u32 %v12542_v44, 16  ;;  %s12247_s13 = sshll.u32 %s12319_s12, 4  ;;  %s12248_s13 = int_to_ptr.vmem [resolvable:$false] %s12247_s13 }
  0x67   : > { %v797_v38 = vor.u32 %v796_v33, %v793_v32  ;;  %v838_v56 = vshll.u32 %v12542_v44, 16  ;;  %v510_v57 = vsel %vm505_vm1, %v507_v20, %v509_v48  ;;  %v815_v58 = vsel %vm789_vm0, %v805_v36, %v814_v49  ;;  %s12249_s26 = scalar_lea.vmem %s12248_s13, 4608  ;;  %p12250_p13 = scmp.lt.s32.totalorder %s16434_s16, %s12248_s13 }
  0x68   : > { %10722 = vmatpush3.bf16.msra.mxu0 %v11821_v6  ;;  %v823_v54 = vor.u32 %v822_v47, %v819_v46  ;;  %v828_v59 = vrot.slane %v826_v52, 2  ;;  %v831_v60 = vrot.slane %v829_v53, 3  ;;  %v512_v62 = vsel %vm505_vm1, %v509_v48, %v511_v51  ;;  %v11847_v47 = vld [vmem:[#allocation6 + $0x98] sm:$0xff]   ;;  %v12607_v48 = vld [vmem:[%s12497_s8 + $0x58] sm:$0xff]  }
  0x69   : > { %10774 = vmatpush3.bf16.msra.mxu1 %v11822_v7  ;;  %10723 = vmatprep.subr.bf16.mxu0 %v11823_v8  ;;  %v806_v45 = vsel %vm789_vm0, %v797_v38, %v805_v36  ;;  %v837_v1 = vrot.slane %v835_v55, 2  ;;  %v840_v2 = vrot.slane %v838_v56, 3  ;;  %v513_v4 = vrot.slane %v12539_v42, 3  ;;  %v11850_v36 = vld [vmem:[#allocation6 + $0xf8] sm:$0xff]  }
  0x6a   : > { %10775 = vmatprep.subr.bf16.mxu1 %v11824_v9  ;;  %10783 = vmatprep.mubr.bf16.mxu1 %v806_v45  ;;  %v824_v63 = vsel %vm789_vm0, %v814_v49, %v823_v54  ;;  %v515_v5 = vrot.slane %v12542_v44, 3  ;;  %v832_v6 = vor.u32 %v831_v60, %v828_v59  ;;  %v844_v7 = vshrl.u32 %v12562_v61, 16  ;;  %v1588_v44 = vld [vmem:[%s12497_s8 + $0x8] sm:$0x8] }
  0x6b   : > { %v856_v12 = vshll.u32 %v12571_v3, 16  ;;  %v514_v15 = vsel %vm505_vm1, %v511_v51, %v513_v4  ;;  %v519_v32 = vrot.slane %v12571_v3, 3  ;;  %v862_v33 = vshrl.u32 %v12580_v13, 16 }
  0x6c   : > { %10724 = vmatpush3.bf16.msra.mxu0 %v11823_v8  ;;  %v847_v8 = vshll.u32 %v12562_v61, 16  ;;  %v516_v17 = vsel %vm505_vm1, %v513_v4, %v515_v5  ;;  %v833_v20 = vsel %vm789_vm0, %v823_v54, %v832_v6  ;;  %v846_v24 = vrot.slane %v844_v7, 2 }
  0x6d   : > { %10776 = vmatpush3.bf16.msra.mxu1 %v11824_v9  ;;  %10725 = vmatprep.subr.bf16.mxu0 %v11825_v10  ;;  %v11841_v9 = vld [vmem:[#allocation6 + $0xa8] sm:$0xff]   ;;  %v858_v31 = vrot.slane %v856_v12, 3  ;;  %v865_v37 = vshll.u32 %v12580_v13, 16  ;;  %v521_v51 = vrot.slane %v12580_v13, 3  ;;  %v864_v54 = vrot.slane %v862_v33, 2 }
  0x6e   : > { %10777 = vmatprep.subr.bf16.mxu1 %v11826_v11  ;;  %v849_v25 = vrot.slane %v847_v8, 3  ;;  %v889_v4 = vshrl.u32 %v12607_v48, 16  ;;  %v1237_v14 = vrot.slane %v811_v30, 4 }
  0x70   : > { %10726 = vmatpush3.bf16.msra.mxu0 %v11825_v10  ;;  %v841_v10 = vor.u32 %v840_v2, %v837_v1  ;;  %v850_v45 = vor.u32 %v849_v25, %v846_v24  ;;  %v11855_v2 = vld [vmem:[#allocation6 + $0xe8] sm:$0xff]  }
  0x71   : > { %10778 = vmatpush3.bf16.msra.mxu1 %v11826_v11  ;;  %10727 = vmatprep.subr.bf16.mxu0 %v11827_v19  ;;  %v853_v11 = vshrl.u32 %v12571_v3, 16 }
  0x72   : > { %10779 = vmatprep.subr.bf16.mxu1 %v11828_v23  ;;  %v842_v27 = vsel %vm789_vm0, %v832_v6, %v841_v10  ;;  %v12627_v6 = vld [vmem:[%s12497_s8 + $0x60] sm:$0xff]  }
  0x73   : > { %v855_v28 = vrot.slane %v853_v11, 2 }
  0x74   : > { %10728 = vmatpush3.bf16.msra.mxu0 %v11827_v19  ;;  %v12585_v19 = vld [vmem:[%s12497_s8 + $0x48] sm:$0xff]  }
  0x75   : > { %10780 = vmatpush3.bf16.msra.mxu1 %v11828_v23  ;;  %10729 = vmatprep.subr.bf16.mxu0 %v11829_v35  ;;  %v517_v23 = vrot.slane %v12562_v61, 3  ;;  %v871_v38 = vshrl.u32 %v12585_v19, 16  ;;  %v874_v39 = vshll.u32 %v12585_v19, 16  ;;  %v859_v46 = vor.u32 %v858_v31, %v855_v28 }
  0x76   : > { %10781 = vmatprep.subr.bf16.mxu1 %v11830_v43  ;;  %v898_v31 = vshrl.u32 %v12627_v6, 16  ;;  %v1256_v61 = vrot.slane %v853_v11, 3 }
  0x77   : > { %v518_v49 = vsel %vm505_vm1, %v515_v5, %v517_v23  ;;  %v873_v59 = vrot.slane %v871_v38, 2  ;;  %v876_v60 = vrot.slane %v874_v39, 3  ;;  %v892_v5 = vshll.u32 %v12607_v48, 16 }
  0x78   : > { %10730 = vmatpush3.bf16.msra.mxu0 %v11829_v35  ;;  %v12601_v35 = vld [vmem:[%s12497_s8 + $0x50] sm:$0xff]   ;;  %v1265_v13 = vrot.slane %v874_v39, 4 }
  0x79   : > { %10782 = vmatpush3.bf16.msra.mxu1 %v11830_v43  ;;  %10819 = vmatprep.subr.bf16.mxu0 %v11835_v50  ;;  %v11852_v43 = vld [vmem:[#allocation6 + $0xf0] sm:$0xff]   ;;  %v883_v1 = vshll.u32 %v12601_v35, 16  ;;  %v894_v28 = vrot.slane %v892_v5, 3 }
  0x7a   : > { %10871 = vmatprep.subr.bf16.mxu1 %v11850_v36 }
  0x7b   : > { %10732 = vmatmul.mubr.bf16.vlgmr.msra.gmra.mxu0 %v510_v57  ;;  %v867_v57 = vrot.slane %v865_v37, 3  ;;  %v885_v25 = vrot.slane %v883_v1, 3 }
  0x7c   : > { %10784 = vmatmul.mubr.bf16.vlgmr.msra.gmra.mxu1 %v815_v58  ;;  %10820 = vmatpush3.bf16.msra.mxu0 %v11835_v50  ;;  %v520_v50 = vsel %vm505_vm1, %v517_v23, %v519_v32  ;;  %v851_v58 = vsel %vm789_vm0, %v841_v10, %v850_v45  ;;  %v1225_v23 = vshrl.u32 %v12513_v16, 16 }
  0x7d   : > { %10735 = vmatprep.mubr.bf16.mxu0 %v512_v62  ;;  %10787 = vmatprep.mubr.bf16.mxu1 %v824_v63  ;;  %v880_v62 = vshrl.u32 %v12601_v35, 16  ;;  %v11851_v63 = vld [vmem:[#allocation6 + $0x90] sm:$0xff]   ;;  %v868_v10 = vor.u32 %v867_v57, %v864_v54  ;;  %v11860_v54 = vld [vmem:[#allocation6 + $0xd8] sm:$0xff]   ;;  %v11863_v57 = vld [vmem:[#allocation6 + $0x80] sm:$0xff]  }
  0x7e   : > { %10821 = vmatprep.subr.bf16.mxu0 %v11838_v0  ;;  %10872 = vmatpush3.bf16.msra.mxu1 %v11850_v36 }
  0x7f   : > { %10873 = vmatprep.subr.bf16.mxu1 %v11852_v43  ;;  %v882_v24 = vrot.slane %v880_v62, 2  ;;  %v869_v36 = vsel %vm789_vm0, %v859_v46, %v868_v10 }
  0x80   : > { %10822 = vmatpush3.bf16.msra.mxu0 %v11838_v0  ;;  %v860_v0 = vsel %vm789_vm0, %v850_v45, %v859_v46  ;;  %v12644_v45 = vld [vmem:[%s12497_s8 + $0x68] sm:$0xff]   ;;  %v1227_v46 = vrot.slane %v1225_v23, 3 }
  0x81   : > { %10823 = vmatprep.subr.bf16.mxu0 %v11841_v9  ;;  %v16491_v23 = vshll.u32 %v12644_v45, 16 }
  0x82   : > { %10874 = vmatpush3.bf16.msra.mxu1 %v11852_v43 }
  0x83   : > { %10736 = vmatmul.mubr.bf16.gmra.mxu0 %v514_v15  ;;  %v523_v15 = vrot.slane %v12585_v19, 3  ;;  %10875 = vmatprep.subr.bf16.mxu1 %v11855_v2 }
  0x84   : > { %10788 = vmatmul.mubr.bf16.gmra.mxu1 %v833_v20  ;;  %10739 = vmatprep.mubr.bf16.mxu0 %v516_v17  ;;  %v877_v17 = vor.u32 %v876_v60, %v873_v59  ;;  %v11856_v20 = vld [vmem:[#allocation6 + $0x88] sm:$0xff]   ;;  %v11861_v59 = vld [vmem:[#allocation6 + $0xd0] sm:$0xff]  }
  0x85   : > { %10791 = vmatprep.mubr.bf16.mxu1 %v842_v27  ;;  %10824 = vmatpush3.bf16.msra.mxu0 %v11841_v9  ;;  %v11857_v9 = vld [vmem:[#allocation6 + $0xe0] sm:$0xff]   ;;  %v891_v27 = vrot.slane %v889_v4, 2  ;;  %v524_v43 = vsel %vm505_vm1, %v521_v51, %v523_v15 }
  0x86   : > { %10825 = vmatprep.subr.bf16.mxu0 %v11844_v26  ;;  %10876 = vmatpush3.bf16.msra.mxu1 %v11855_v2 }
  0x87   : > { %10877 = vmatprep.subr.bf16.mxu1 %v11857_v9 }
  0x89   : > { %10826 = vmatpush3.bf16.msra.mxu0 %v11844_v26  ;;  %v522_v26 = vsel %vm505_vm1, %v519_v32, %v521_v51  ;;  %v878_v32 = vsel %vm789_vm0, %v868_v10, %v877_v17  ;;  %v901_v51 = vshll.u32 %v12627_v6, 16  ;;  %v16492_v10 = vshrl.u32 %v12644_v45, 16 }
  0x8a   : > { %10827 = vmatprep.subr.bf16.mxu0 %v11847_v47  ;;  %10878 = vmatpush3.bf16.msra.mxu1 %v11857_v9 }
  0x8b   : > { %10740 = vmatmul.mubr.bf16.gmra.mxu0 %v518_v49  ;;  %v525_v49 = vrot.slane %v12601_v35, 3  ;;  %10879 = vmatprep.subr.bf16.mxu1 %v11860_v54  ;;  %v1273_v35 = vrot.slane %v892_v5, 4 }
  0x8c   : > { %10792 = vmatmul.mubr.bf16.gmra.mxu1 %v851_v58  ;;  %10743 = vmatprep.mubr.bf16.mxu0 %v520_v50  ;;  %v527_v50 = vrot.slane %v12607_v48, 3  ;;  %v886_v58 = vor.u32 %v885_v25, %v882_v24  ;;  %v12665_v24 = vld [vmem:[%s12497_s8 + $0x78] sm:$0xff]   ;;  %v12667_v25 = vld [vmem:[#allocation6 + $0x138] sm:$0xff]  }
  0x8d   : > { %10795 = vmatprep.mubr.bf16.mxu1 %v860_v0  ;;  %10828 = vmatpush3.bf16.msra.mxu0 %v11847_v47  ;;  %v1228_v47 = vshll.u32 %v12513_v16, 16  ;;  %v12652_v16 = vld [vmem:[%s12497_s8 + $0x70] sm:$0xff]   ;;  %v900_v0 = vrot.slane %v898_v31, 2  ;;  %v526_v2 = vsel %vm505_vm1, %v523_v15, %v525_v49  ;;  %v16493_v30 = vshll.u32 %v12665_v24, 16 }
  0x8e   : > { %10829 = vmatprep.subr.bf16.mxu0 %v11851_v63  ;;  %v528_v9 = vsel %vm505_vm1, %v525_v49, %v527_v50  ;;  %10880 = vmatpush3.bf16.msra.mxu1 %v11860_v54  ;;  %v12688_v49 = vld [vmem:[%s12497_s8 + $0x10] sm:$0xf]  ;;  %v1240_v54 = vrot.slane %v817_v40, 3 }
  0x8f   : > { %v1230_v60 = vrot.slane %v1228_v47, 4  ;;  %10881 = vmatprep.subr.bf16.mxu1 %v11861_v59  ;;  %v11865_v47 = vld [vmem:[#allocation6 + $0xc8] sm:$0xff]  }
  0x91   : > { %10830 = vmatpush3.bf16.msra.mxu0 %v11851_v63  ;;  %v12654_v63 = vor.u32 %v894_v28, %v891_v27  ;;  %v1231_v15 = vor.u32 %v1230_v60, %v1227_v46  ;;  %v1233_v27 = vrot.slane %v802_v22, 4  ;;  %v903_v28 = vrot.slane %v901_v51, 3  ;;  %v12685_v22 = vld [vmem:[%s12497_s8 + $0xc] sm:$0xf] }
  0x92   : > { %10831 = vmatprep.subr.bf16.mxu0 %v11856_v20  ;;  %v909_v46 = vrot.slane %v16492_v10, 2  ;;  %10882 = vmatpush3.bf16.msra.mxu1 %v11861_v59 }
  0x93   : > { %10744 = vmatmul.mubr.bf16.gmra.mxu0 %v522_v26  ;;  %v887_v26 = vsel %vm789_vm0, %v877_v17, %v886_v58  ;;  %v1236_v17 = vrot.slane %v808_v29, 3  ;;  %v912_v29 = vrot.slane %v16491_v23, 3  ;;  %v11866_v23 = vld [vmem:[#allocation6 + $0xc0] sm:$0xff]   ;;  %v904_v18 = vor.u32 %v903_v28, %v900_v0  ;;  %10883 = vmatprep.subr.bf16.mxu1 %v11865_v47 }
  0x94   : > { %10796 = vmatmul.mubr.bf16.gmra.mxu1 %v869_v36  ;;  %10747 = vmatprep.mubr.bf16.mxu0 %v524_v43  ;;  %v916_v36 = vshrl.u32 %v12652_v16, 16  ;;  %v919_v43 = vshll.u32 %v12652_v16, 16  ;;  %v930_v0 = vrot.slane %v16493_v30, 3  ;;  %v1244_v28 = vrot.slane %v826_v52, 3  ;;  %v12739_v52 = vld [vmem:[%s12497_s8 + $0x88] sm:$0xff]  }
  0x95   : > { %10799 = vmatprep.mubr.bf16.mxu1 %v878_v32  ;;  %10832 = vmatpush3.bf16.msra.mxu0 %v11856_v20  ;;  %v1232_v20 = vrot.slane %v799_v21, 3  ;;  %v896_v32 = vsel %vm789_vm0, %v886_v58, %v12654_v63  ;;  %v925_v58 = vshrl.u32 %v12665_v24, 16  ;;  %v1238_v60 = vor.u32 %v1237_v14, %v1236_v17 }
  0x96   : > { %10833 = vmatprep.subr.bf16.mxu0 %v11863_v57  ;;  %v918_v34 = vrot.slane %v916_v36, 2  ;;  %10884 = vmatpush3.bf16.msra.mxu1 %v11865_v47  ;;  %v1245_v14 = vrot.slane %v829_v53, 4  ;;  %v905_v47 = vsel %vm789_vm0, %v12654_v63, %v904_v18  ;;  %v1249_v53 = vrot.slane %v838_v56, 4 }
  0x97   : > { %v1234_v21 = vor.u32 %v1233_v27, %v1232_v20  ;;  %v1241_v20 = vrot.slane %v820_v41, 4  ;;  %v529_v27 = vrot.slane %v12627_v6, 3  ;;  %v921_v41 = vrot.slane %v919_v43, 3  ;;  %10885 = vmatprep.subr.bf16.mxu1 %v11866_v23 }
  0x98   : > { %v1246_v42 = vor.u32 %v1245_v14, %v1244_v28  ;;  %v535_v63 = vrot.slane %v12665_v24, 3  ;;  %v1252_v30 = vrot.slane %v844_v7, 3  ;;  %v1253_v7 = vrot.slane %v847_v8, 4 }
  0x99   : > { %10834 = vmatpush3.bf16.msra.mxu0 %v11863_v57  ;;  %v12702_v57 = vld [vmem:[%s12497_s8 + $0x80] sm:$0xff]   ;;  %v12705_v40 = vsel %vm1223_vm2, %v1231_v15, %v1234_v21  ;;  %v12712_v10 = vsel %vm1223_vm2, %v1234_v21, %v1238_v60  ;;  %v1242_v59 = vor.u32 %v1241_v20, %v1240_v54  ;;  %v913_v15 = vor.u32 %v912_v29, %v909_v46 }
  0x9a   : > { %10923 = vmatprep.subr.bf16.mxu0 %v12667_v25  ;;  %v530_v17 = vsel %vm505_vm1, %v527_v50, %v529_v27  ;;  %v937_v21 = vshll.u32 %v12702_v57, 16  ;;  %v533_v46 = vrot.slane %v12652_v16, 3  ;;  %v1248_v50 = vrot.slane %v835_v55, 3  ;;  %v12743_v29 = vld [vmem:[#allocation6 + $0x178] sm:$0xff]   ;;  %10886 = vmatpush3.bf16.msra.mxu1 %v11866_v23 }
  0x9b   : > { %10748 = vmatmul.mubr.bf16.gmra.mxu0 %v526_v2  ;;  %v531_v2 = vrot.slane %v12644_v45, 3  ;;  %v922_v20 = vor.u32 %v921_v41, %v918_v34  ;;  %v12757_v56 = vsel %vm1223_vm2, %v1242_v59, %v1246_v42  ;;  %v16495_v23 = vshrl.u32 %v12739_v52, 16  ;;  %v12761_v41 = vld [vmem:[%s12497_s8 + $0x14] sm:$0xf]  ;;  %10975 = vmatprep.subr.bf16.mxu1 %v12743_v29 }
  0x9c   : > { %10800 = vmatmul.mubr.bf16.gmra.mxu1 %v887_v26  ;;  %10751 = vmatprep.mubr.bf16.mxu0 %v528_v9  ;;  %v927_v9 = vrot.slane %v925_v58, 2  ;;  %v12723_v26 = vsel %vm1223_vm2, %v1238_v60, %v1242_v59  ;;  %v914_v60 = vsel %vm789_vm0, %v904_v18, %v913_v15  ;;  %v939_v18 = vrot.slane %v937_v21, 3 }
  0x9d   : > { %10803 = vmatprep.mubr.bf16.mxu1 %v896_v32  ;;  %v934_v32 = vshrl.u32 %v12702_v57, 16  ;;  %v532_v54 = vsel %vm505_vm1, %v529_v27, %v531_v2  ;;  %v1250_v34 = vor.u32 %v1249_v53, %v1248_v50  ;;  %v16494_v28 = vshll.u32 %v12739_v52, 16 }
  0x9e   : > { %v931_v27 = vor.u32 %v930_v0, %v927_v9  ;;  %v534_v9 = vsel %vm505_vm1, %v531_v2, %v533_v46  ;;  %v923_v0 = vsel %vm789_vm0, %v913_v15, %v922_v20  ;;  %v537_v14 = vrot.slane %v12702_v57, 3 }
  0x9f   : > { %v936_v55 = vrot.slane %v934_v32, 2  ;;  %v12773_v59 = vsel %vm1223_vm2, %v1246_v42, %v1250_v34  ;;  %v1257_v8 = vrot.slane %v856_v12, 4  ;;  %v536_v2 = vsel %vm505_vm1, %v533_v46, %v535_v63 }
  0xa0   : > { %v932_v15 = vsel %vm789_vm0, %v922_v20, %v931_v27  ;;  %v9421_v50 = vcombine.low %v12688_v49, %v12761_v41  ;;  %v945_v3 = vrot.slane %v16495_v23, 2  ;;  %v948_v12 = vrot.slane %v16494_v28, 3 }
  0xa1   : > { %v1258_v11 = vor.u32 %v1257_v8, %v1256_v61  ;;  %v538_v53 = vsel %vm505_vm1, %v535_v63, %v537_v14  ;;  %v12810_v63 = vld [vmem:[%s12497_s8 + $0x20] sm:$0xf]  ;;  %v1264_v28 = vrot.slane %v871_v38, 3  ;;  %v1268_v38 = vrot.slane %v880_v62, 3 }
  0xa2   : > { %v1743_v8 = vshrl.u32 %v9421_v50, 16  ;;  %v16611_v6 = vshll.u32 %v12644_v45, 16  ;;  %v16617_v57 = vshll.u32 %v12739_v52, 16 }
  0xa3   : > { %10752 = vmatmul.mubr.bf16.gmra.mxu0 %v530_v17  ;;  %v12770_v17 = vld [vmem:[%s12497_s8 + $0x90] ss:$0 sps:$4 sm:$0x77]   ;;  %v1266_v19 = vor.u32 %v1265_v13, %v1264_v28 }
  0xa4   : > { %10804 = vmatmul.mubr.bf16.gmra.mxu1 %v905_v47  ;;  %10755 = vmatprep.mubr.bf16.mxu0 %v532_v54  ;;  %v1254_v47 = vor.u32 %v1253_v7, %v1252_v30  ;;  %v9420_v54 = vcombine.low %v1588_v44, %v12685_v22  ;;  %v539_v30 = vrot.slane %v12739_v52, 3  ;;  %v952_v46 = vshrl.u32 %v12770_v17, 16 }
  0xa5   : > { %10807 = vmatprep.mubr.bf16.mxu1 %v914_v60  ;;  %v940_v60 = vor.u32 %v939_v18, %v936_v55  ;;  %v955_v20 = vshll.u32 %v12770_v17, 16  ;;  %v12797_v55 = vld [vmem:[%s12497_s8 + $0x18] sm:$0xf]  ;;  %v12800_v18 = vld [vmem:[%s12497_s8 + $0x1c] sm:$0xf]  ;;  %v1261_v7 = vrot.slane %v865_v37, 4 }
  0xa6   : > { %v12787_v42 = vsel %vm1223_vm2, %v1250_v34, %v1254_v47  ;;  %v12803_v44 = vsel %vm1223_vm2, %v1254_v47, %v1258_v11  ;;  %v1260_v34 = vrot.slane %v862_v33, 3  ;;  %v1735_v61 = vshrl.u32 %v9420_v54, 16 }
  0xa7   : > { %v540_v47 = vsel %vm505_vm1, %v537_v14, %v539_v30  ;;  %v1746_v33 = vshll.u32 %v9421_v50, 16  ;;  %v941_v37 = vsel %vm789_vm0, %v931_v27, %v940_v60  ;;  %v9422_v14 = vcombine.low %v12797_v55, %v12800_v18 }
  0xa8   : > { %v1262_v23 = vor.u32 %v1261_v7, %v1260_v34  ;;  %v957_v39 = vrot.slane %v955_v20, 3  ;;  %v1737_v27 = vrot.slane %v1735_v61, 3  ;;  %v12840_v7 = vld [vmem:[%s12497_s8 + $0x28] sm:$0xf]  ;;  %v1272_v20 = vrot.slane %v889_v4, 3 }
  0xa9   : > { %v1748_v34 = vrot.slane %v1746_v33, 4  ;;  %v1755_v61 = vshll.u32 %v9422_v14, 16 }
  0xaa   : > { %v12829_v50 = vsel %vm1223_vm2, %v1258_v11, %v1262_v23 }
  0xab   : > { %10756 = vmatmul.mubr.bf16.gmra.mxu0 %v534_v9  ;;  %v1738_v9 = vshll.u32 %v9420_v54, 16  ;;  %v12822_v54 = vld [vmem:[%s12497_s8 + $0x24] sm:$0xf] }
  0xac   : > { %10808 = vmatmul.mubr.bf16.gmra.mxu1 %v923_v0  ;;  %10759 = vmatprep.mubr.bf16.mxu0 %v536_v2  ;;  %v949_v0 = vor.u32 %v948_v12, %v945_v3  ;;  %v541_v2 = vrot.slane %v12770_v17, 3  ;;  %v1269_v17 = vrot.slane %v883_v1, 4  ;;  %v1745_v12 = vrot.slane %v1743_v8, 3 }
  0xad   : > { %10811 = vmatprep.mubr.bf16.mxu1 %v932_v15  ;;  %v954_v15 = vrot.slane %v952_v46, 2  ;;  %v1740_v3 = vrot.slane %v1738_v9, 4  ;;  %v9423_v62 = vcombine.low %v12810_v63, %v12822_v54  ;;  %v12836_v46 = vsel %vm1223_vm2, %v1262_v23, %v1266_v19  ;;  %v12847_v9 = vld [vmem:[%s12497_s8 + $0x2c] sm:$0xf]  ;;  %v12850_v23 = vld [vmem:[%s12497_s8 + $0x30] sm:$0xf] }
  0xae   : > { %v950_v11 = vsel %vm789_vm0, %v940_v60, %v949_v0  ;;  %v1270_v28 = vor.u32 %v1269_v17, %v1268_v38  ;;  %v1752_v1 = vshrl.u32 %v9422_v14, 16  ;;  %v1274_v8 = vor.u32 %v1273_v35, %v1272_v20  ;;  %v12856_v38 = vld [vmem:[%s12497_s8 + $0x34] sm:$0xf]  ;;  %v12884_v35 = vld [vmem:[%s12497_s8 + $0x38] sm:$0xf] }
  0xaf   : > { %v958_v33 = vor.u32 %v957_v39, %v954_v15  ;;  %v1741_v4 = vor.u32 %v1740_v3, %v1737_v27  ;;  %v1749_v13 = vor.u32 %v1748_v34, %v1745_v12  ;;  %v1761_v48 = vshrl.u32 %v9423_v62, 16 }
  0xb0   : > { %v12853_v60 = vsel %vm1223_vm2, %v1266_v19, %v1270_v28  ;;  %v1764_v5 = vshll.u32 %v9423_v62, 16  ;;  %v542_v14 = vsel %vm505_vm1, %v539_v30, %v541_v2  ;;  %v1754_v15 = vrot.slane %v1752_v1, 3 }
  0xb1   : > { %v9424_v19 = vcombine.low %v12840_v7, %v12847_v9  ;;  %v16610_v39 = vshrl.u32 %v12644_v45, 16  ;;  %v1757_v3 = vrot.slane %v1755_v61, 4  ;;  %v959_v12 = vsel %vm789_vm0, %v949_v0, %v958_v33  ;;  %v12887_v45 = vld [vmem:[%s12497_s8 + $0x3c] sm:$0xf] }
  0xb2   : > { %v1750_v30 = vsel %vm1223_vm2, %v1741_v4, %v1749_v13  ;;  %v1284_v2 = vrot.slane %v916_v36, 3  ;;  %v1763_v34 = vrot.slane %v1761_v48, 3  ;;  %v1766_v62 = vrot.slane %v1764_v5, 4 }
  0xb3   : > { %10760 = vmatmul.mubr.bf16.gmra.mxu0 %v538_v53  ;;  %v12859_v53 = vsel %vm1223_vm2, %v1270_v28, %v1274_v8  ;;  %v1280_v27 = vrot.slane %v16610_v39, 3  ;;  %v1770_v20 = vshrl.u32 %v9424_v19, 16  ;;  %v1285_v0 = vrot.slane %v919_v43, 4  ;;  %v12900_v43 = vld [vmem:[%s12497_s8 + $0x40] sm:$0xf] }
  0xb4   : > { %10812 = vmatmul.mubr.bf16.gmra.mxu1 %v941_v37  ;;  %10763 = vmatprep.mubr.bf16.mxu0 %v540_v47  ;;  %v1276_v47 = vrot.slane %v898_v31, 3  ;;  %v1277_v37 = vrot.slane %v901_v51, 4  ;;  %v9425_v31 = vcombine.low %v12850_v23, %v12856_v38  ;;  %v1281_v51 = vrot.slane %v16611_v6, 4  ;;  %16613 = vst [vmem:[#allocation13_spill] sm:$0xff] %v12900_v43 }
  0xb5   : > { %10815 = vmatprep.mubr.bf16.mxu1 %v950_v11  ;;  %v1758_v36 = vor.u32 %v1757_v3, %v1754_v15  ;;  %v1773_v1 = vshll.u32 %v9424_v19, 16  ;;  %v1286_v33 = vor.u32 %v1285_v0, %v1284_v2  ;;  %v1288_v4 = vrot.slane %v925_v58, 3  ;;  %v11876_v2 = vld [vmem:[#allocation6 + $0x128] sm:$0xff]   ;;  %v12931_v0 = vld [vmem:[%s12497_s8 + $0x4c] sm:$0xf] }
  0xb6   : > { %v1278_v17 = vor.u32 %v1277_v37, %v1276_v47  ;;  %v1282_v28 = vor.u32 %v1281_v51, %v1280_v27  ;;  %v1779_v61 = vshrl.u32 %v9425_v31, 16  ;;  %v16612_v48 = vshll.u32 %v12665_v24, 16  ;;  %v12903_v37 = vld [vmem:[%s12497_s8 + $0x44] sm:$0xf]  ;;  %16618 = vst [vmem:[#allocation16_spill] sm:$0xff] %v12931_v0 }
  0xb7   : > { %v1767_v47 = vor.u32 %v1766_v62, %v1763_v34  ;;  %v1782_v16 = vshll.u32 %v9425_v31, 16  ;;  %16614 = vst [vmem:[#allocation14_spill] sm:$0xff] %v12903_v37  ;;  %v1759_v15 = vsel %vm1223_vm2, %v1749_v13, %v1758_v36  ;;  %v1772_v19 = vrot.slane %v1770_v20, 3  ;;  %v11872_v24 = vld [vmem:[#allocation6 + $0x130] sm:$0xff]   ;;  %v12925_v34 = vld [vmem:[%s12497_s8 + $0x48] sm:$0xf] }
  0xb8   : > { %v12881_v11 = vsel %vm1223_vm2, %v1274_v8, %v1278_v17  ;;  %v12893_v8 = vsel %vm1223_vm2, %v1278_v17, %v1282_v28  ;;  %v1289_v5 = vrot.slane %v16612_v48, 4  ;;  %v1775_v39 = vrot.slane %v1773_v1, 4  ;;  %16616 = vst [vmem:[#allocation15_spill] sm:$0xff] %v12925_v34  ;;  %v12944_v48 = vld [vmem:[%s12497_s8 + $0x54] sm:$0xf] }
  0xb9   : > { %v9426_v58 = vcombine.low %v12884_v35, %v12887_v45  ;;  %v1781_v27 = vrot.slane %v1779_v61, 3  ;;  %v1292_v31 = vrot.slane %v934_v32, 3  ;;  %v1293_v17 = vrot.slane %v937_v21, 4  ;;  %v11887_v32 = vld [vmem:[#allocation6 + $0x170] sm:$0xff]   ;;  %16620 = vst [vmem:[#allocation18_spill] sm:$0xff] %v12944_v48 }
  0xba   : > { %v1768_v6 = vsel %vm1223_vm2, %v1758_v36, %v1767_v47  ;;  %v1784_v13 = vrot.slane %v1782_v16, 4  ;;  %v9427_v51 = vcombine.low %v12900_v43, %v12903_v37  ;;  %v1297_v21 = vrot.slane %v16617_v57, 4  ;;  %v12935_v36 = vld [vmem:[%s12497_s8 + $0x50] sm:$0xf]  ;;  %v13185_v43 = vld [vmem:[%s12497_s8 + $0x7c] sm:$0xff]  }
  0xbb   : > { %10764 = vmatmul.mubr.bf16.gmra.mxu0 %v542_v14  ;;  %v1290_v14 = vor.u32 %v1289_v5, %v1288_v4  ;;  %v1294_v62 = vor.u32 %v1293_v17, %v1292_v31  ;;  %v1791_v20 = vshll.u32 %v9426_v58, 16  ;;  %16619 = vst [vmem:[#allocation17_spill] sm:$0xff] %v12935_v36  ;;  %v11890_v4 = vld [vmem:[#allocation6 + $0x168] sm:$0xff]   ;;  %v9429_v31 = vcombine.low %v12935_v36, %v12944_v48  ;;  %v11902_v37 = vld [vmem:[#allocation6 + $0x140] sm:$0xff]  }
  0xbc   : > { %10816 = vmatmul.mubr.bf16.gmra.mxu1 %v959_v12  ;;  %10835 = vmatprep.mubr.bf16.mxu0 %v12705_v40  ;;  %v12906_v40 = vsel %vm1223_vm2, %v1282_v28, %v1286_v33  ;;  %v16615_v12 = vshrl.u32 %v12739_v52, 16  ;;  %v1788_v28 = vshrl.u32 %v9426_v58, 16  ;;  %v1785_v52 = vor.u32 %v1784_v13, %v1781_v27  ;;  %v12962_v17 = vld [vmem:[%s12497_s8 + $0x5c] sm:$0xf]  ;;  %v13182_v48 = vld [vmem:[%s12497_s8 + $0x74] sm:$0xff]  }
  0xbd   : > { %10887 = vmatprep.mubr.bf16.mxu1 %v1750_v30  ;;  %v12912_v3 = vsel %vm1223_vm2, %v1286_v33, %v1290_v14  ;;  %v12938_v1 = vsel %vm1223_vm2, %v1290_v14, %v1294_v62  ;;  %v1800_v33 = vshll.u32 %v9427_v51, 16  ;;  %v1793_v16 = vrot.slane %v1791_v20, 4  ;;  %16622 = vst [vmem:[#allocation20_spill] sm:$0xff] %v12962_v17  ;;  %v11896_v20 = vld [vmem:[#allocation6 + $0x150] sm:$0xff]  }
  0xbe   : > { %v1296_v30 = vrot.slane %v16615_v12, 3  ;;  %v1790_v5 = vrot.slane %v1788_v28, 3  ;;  %v9428_v14 = vcombine.low %v12925_v34, %v12931_v0  ;;  %v12967_v12 = vld [vmem:[%s12497_s8 + $0x60] sm:$0xf]  ;;  %v12975_v28 = vld [vmem:[%s12497_s8 + $0x68] sm:$0xf] }
  0xbf   : > { %16623 = vst [vmem:[#allocation21_spill] sm:$0xff] %v12967_v12  ;;  %16625 = vst [vmem:[#allocation23_spill] sm:$0xff] %v12975_v28  ;;  %v13031_v34 = vld [vmem:[%s12497_s8 + $0x8c] sm:$0xf] }
  0xc0   : > { %v12940_v61 = vor.u32 %v1297_v21, %v1296_v30  ;;  %v1806_v13 = vshrl.u32 %v9428_v14, 16  ;;  %v12970_v30 = vld [vmem:[%s12497_s8 + $0x64] sm:$0xf]  ;;  %v1815_v21 = vshrl.u32 %v9429_v31, 16  ;;  %16634 = vst [vmem:[#allocation32_spill] sm:$0xff] %v13031_v34 }
  0xc1   : > { %16624 = vst [vmem:[#allocation22_spill] sm:$0xff] %v12970_v30 }
  0xc3   : > { %10836 = vmatmul.mubr.bf16.vlgmr.msra.gmra.mxu0 %v12712_v10  ;;  %v1776_v10 = vor.u32 %v1775_v39, %v1772_v19  ;;  %v11879_v19 = vld [vmem:[#allocation6 + $0x120] sm:$0xff]   ;;  %v12956_v39 = vld [vmem:[%s12497_s8 + $0x58] sm:$0xf] }
  0xc4   : > { %10924 = vmatpush3.bf16.msra.mxu0 %v12667_v25  ;;  %10888 = vmatmul.mubr.bf16.vlgmr.msra.gmra.mxu1 %v1759_v15  ;;  %v1797_v25 = vshrl.u32 %v9427_v51, 16  ;;  %16621 = vst [vmem:[#allocation19_spill] sm:$0xff] %v12956_v39  ;;  %v11882_v51 = vld [vmem:[#allocation6 + $0x118] sm:$0xff]  }
  0xc5   : > { %10839 = vmatprep.mubr.bf16.mxu0 %v12723_v26  ;;  %10891 = vmatprep.mubr.bf16.mxu1 %v1768_v6  ;;  %v12948_v26 = vsel %vm1223_vm2, %v1294_v62, %v12940_v61  ;;  %v1786_v58 = vsel %vm1223_vm2, %v1776_v10, %v1785_v52  ;;  %v1794_v6 = vor.u32 %v1793_v16, %v1790_v5  ;;  %v1809_v62 = vshll.u32 %v9428_v14, 16  ;;  %v11886_v5 = vld [vmem:[#allocation6 + $0x110] sm:$0xff]   ;;  %v13028_v15 = vld [vmem:[%s12497_s8 + $0x88] sm:$0xf] }
  0xc6   : > { %10925 = vmatprep.subr.bf16.mxu0 %v11872_v24  ;;  %10976 = vmatpush3.bf16.msra.mxu1 %v12743_v29  ;;  %v1777_v29 = vsel %vm1223_vm2, %v1767_v47, %v1776_v10  ;;  %v1799_v27 = vrot.slane %v1797_v25, 3  ;;  %v11892_v47 = vld [vmem:[#allocation6 + $0x160] sm:$0xff]   ;;  %16633 = vst [vmem:[#allocation31_spill] sm:$0xff] %v13028_v15 }
  0xc7   : > { %10977 = vmatprep.subr.bf16.mxu1 %v11887_v32  ;;  %v12980_v10 = vld [vmem:[%s12497_s8 + $0x6c] sm:$0xf]  ;;  %v1795_v25 = vsel %vm1223_vm2, %v1785_v52, %v1794_v6  ;;  %v1811_v16 = vrot.slane %v1809_v62, 4  ;;  %v1817_v52 = vrot.slane %v1815_v21, 3 }
  0xc8   : > { %10926 = vmatpush3.bf16.msra.mxu0 %v11872_v24  ;;  %v1802_v24 = vrot.slane %v1800_v33, 4  ;;  %16626 = vst [vmem:[#allocation24_spill] sm:$0xff] %v12980_v10  ;;  %v1808_v33 = vrot.slane %v1806_v13, 3  ;;  %v9432_v62 = vcombine.low %v12975_v28, %v12980_v10  ;;  %v13143_v10 = vld [vmem:[%s12497_s8 + $0x5c] sm:$0xff]  }
  0xc9   : > { %10927 = vmatprep.subr.bf16.mxu0 %v11876_v2  ;;  %16640 = vst [vmem:[#allocation38_spill] sm:$0xff] %v13143_v10 }
  0xca   : > { %10978 = vmatpush3.bf16.msra.mxu1 %v11887_v32  ;;  %v11895_v32 = vld [vmem:[#allocation6 + $0x158] sm:$0xff]   ;;  %v1803_v57 = vor.u32 %v1802_v24, %v1799_v27  ;;  %v1812_v21 = vor.u32 %v1811_v16, %v1808_v33  ;;  %v1842_v33 = vshrl.u32 %v9432_v62, 16  ;;  %v1845_v36 = vshll.u32 %v9432_v62, 16 }
  0xcb   : > { %10840 = vmatmul.mubr.bf16.gmra.mxu0 %v12757_v56  ;;  %10979 = vmatprep.subr.bf16.mxu1 %v11890_v4  ;;  %v9430_v56 = vcombine.low %v12956_v39, %v12962_v17  ;;  %v13212_v39 = vld [vmem:[%s12497_s8 + $0x8c] sm:$0xff]  }
  0xcc   : > { %10892 = vmatmul.mubr.bf16.gmra.mxu1 %v1777_v29  ;;  %10843 = vmatprep.mubr.bf16.mxu0 %v12773_v59  ;;  %v1818_v59 = vshll.u32 %v9429_v31, 16  ;;  %v12988_v29 = vld [vmem:[%s12497_s8 + $0x70] sm:$0xf]  ;;  %v1804_v24 = vsel %vm1223_vm2, %v1794_v6, %v1803_v57  ;;  %v13006_v6 = vld [vmem:[%s12497_s8 + $0x7c] sm:$0xf] }
  0xcd   : > { %10895 = vmatprep.mubr.bf16.mxu1 %v1786_v58  ;;  %10928 = vmatpush3.bf16.msra.mxu0 %v11876_v2  ;;  %v1824_v14 = vshrl.u32 %v9430_v56, 16  ;;  %16627 = vst [vmem:[#allocation25_spill] sm:$0xff] %v12988_v29  ;;  %v12991_v58 = vld [vmem:[%s12497_s8 + $0x74] sm:$0xf]  ;;  %v1827_v13 = vshll.u32 %v9430_v56, 16  ;;  %16630 = vst [vmem:[#allocation28_spill] sm:$0xff] %v13006_v6 }
  0xce   : > { %10929 = vmatprep.subr.bf16.mxu0 %v11879_v19  ;;  %10980 = vmatpush3.bf16.msra.mxu1 %v11890_v4  ;;  %v9431_v4 = vcombine.low %v12967_v12, %v12970_v30  ;;  %16628 = vst [vmem:[#allocation26_spill] sm:$0xff] %v12991_v58  ;;  %v1820_v31 = vrot.slane %v1818_v59, 4  ;;  %v13002_v2 = vld [vmem:[%s12497_s8 + $0x78] sm:$0xf]  ;;  %v13049_v12 = vld [vmem:[%s12497_s8 + $0x94] sm:$0xf] }
  0xcf   : > { %10981 = vmatprep.subr.bf16.mxu1 %v11892_v47  ;;  %16629 = vst [vmem:[#allocation27_spill] sm:$0xff] %v13002_v2  ;;  %v1826_v27 = vrot.slane %v1824_v14, 3  ;;  %v9434_v14 = vcombine.low %v13002_v2, %v13006_v6  ;;  %16636 = vst [vmem:[#allocation34_spill] sm:$0xff] %v13049_v12 }
  0xd0   : > { %v1836_v56 = vshll.u32 %v9431_v4, 16 }
  0xd1   : > { %10930 = vmatpush3.bf16.msra.mxu0 %v11879_v19  ;;  %v1821_v19 = vor.u32 %v1820_v31, %v1817_v52  ;;  %v11897_v52 = vld [vmem:[#allocation6 + $0x100] sm:$0xff]  }
  0xd2   : > { %10931 = vmatprep.subr.bf16.mxu0 %v11882_v51  ;;  %10982 = vmatpush3.bf16.msra.mxu1 %v11892_v47  ;;  %v11901_v47 = vld [vmem:[#allocation6 + $0x148] sm:$0xff]  }
  0xd3   : > { %10844 = vmatmul.mubr.bf16.gmra.mxu0 %v12787_v42  ;;  %10983 = vmatprep.subr.bf16.mxu1 %v11895_v32  ;;  %v1833_v42 = vshrl.u32 %v9431_v4, 16  ;;  %v13022_v4 = vld [vmem:[%s12497_s8 + $0x84] sm:$0xf]  ;;  %v1822_v16 = vsel %vm1223_vm2, %v1812_v21, %v1821_v19  ;;  %v11898_v31 = vld [vmem:[%s12497_s8 + $0x90] ss:$0 sps:$4 sm:$0xff]  }
  0xd4   : > { %10896 = vmatmul.mubr.bf16.gmra.mxu1 %v1795_v25  ;;  %10847 = vmatprep.mubr.bf16.mxu0 %v12803_v44  ;;  %v9433_v44 = vcombine.low %v12988_v29, %v12991_v58  ;;  %v11891_v25 = vld [vmem:[#allocation6 + $0x108] sm:$0xff]   ;;  %16632 = vst [vmem:[#allocation30_spill] sm:$0xff] %v13022_v4  ;;  %v1301_v2 = vshrl.u32 %v11898_v31, 16 }
  0xd5   : > { %10899 = vmatprep.mubr.bf16.mxu1 %v1804_v24  ;;  %10932 = vmatpush3.bf16.msra.mxu0 %v11882_v51  ;;  %v1829_v24 = vrot.slane %v1827_v13, 4  ;;  %v13015_v51 = vld [vmem:[%s12497_s8 + $0x80] sm:$0xf]  ;;  %v1835_v59 = vrot.slane %v1833_v42, 3  ;;  %v1838_v13 = vrot.slane %v1836_v56, 4  ;;  %v1863_v56 = vshll.u32 %v9434_v14, 16 }
  0xd6   : > { %10933 = vmatprep.subr.bf16.mxu0 %v11886_v5  ;;  %10984 = vmatpush3.bf16.msra.mxu1 %v11895_v32  ;;  %16631 = vst [vmem:[#allocation29_spill] sm:$0xff] %v13015_v51  ;;  %v1813_v32 = vsel %vm1223_vm2, %v1803_v57, %v1812_v21  ;;  %v1851_v0 = vshrl.u32 %v9433_v44, 16  ;;  %v1844_v57 = vrot.slane %v1842_v33, 3  ;;  %v1860_v21 = vshrl.u32 %v9434_v14, 16 }
  0xd7   : > { %10985 = vmatprep.subr.bf16.mxu1 %v11896_v20  ;;  %v1830_v62 = vor.u32 %v1829_v24, %v1826_v27  ;;  %v1839_v33 = vor.u32 %v1838_v13, %v1835_v59  ;;  %v1847_v27 = vrot.slane %v1845_v36, 4  ;;  %v9436_v14 = vcombine.low %v13028_v15, %v13031_v34  ;;  %v13058_v59 = vld [vmem:[%s12497_s8 + $0x98] sm:$0xf]  ;;  %v13090_v34 = vld [vmem:[%s12497_s8 + $0x24] sm:$0xff]  }
  0xd8   : > { %v1853_v24 = vrot.slane %v1851_v0, 3  ;;  %16637 = vst [vmem:[#allocation35_spill] sm:$0xff] %v13058_v59  ;;  %v1865_v29 = vrot.slane %v1863_v56, 4  ;;  %v13087_v0 = vld [vmem:[%s12497_s8 + $0x1c] sm:$0xff]  }
  0xd9   : > { %10934 = vmatpush3.bf16.msra.mxu0 %v11886_v5  ;;  %v1854_v5 = vshll.u32 %v9433_v44, 16  ;;  %v13046_v44 = vld [vmem:[%s12497_s8 + $0x90] sm:$0xf]  ;;  %v1831_v13 = vsel %vm1223_vm2, %v1821_v19, %v1830_v62 }
  0xda   : > { %10935 = vmatprep.subr.bf16.mxu0 %v11891_v25  ;;  %10986 = vmatpush3.bf16.msra.mxu1 %v11896_v20  ;;  %v9435_v20 = vcombine.low %v13015_v51, %v13022_v4  ;;  %16635 = vst [vmem:[#allocation33_spill] sm:$0xff] %v13046_v44  ;;  %v9437_v19 = vcombine.low %v13046_v44, %v13049_v12  ;;  %v13133_v12 = vld [vmem:[%s12497_s8 + $0x54] sm:$0xff]  }
  0xdb   : > { %10848 = vmatmul.mubr.bf16.gmra.mxu0 %v12829_v50  ;;  %10987 = vmatprep.subr.bf16.mxu1 %v11901_v47  ;;  %v13043_v50 = vld [vmem:[#allocation6 + $0x1b8] sm:$0xff]   ;;  %v1848_v44 = vor.u32 %v1847_v27, %v1844_v57 }
  0xdc   : > { %10900 = vmatmul.mubr.bf16.gmra.mxu1 %v1813_v32  ;;  %10851 = vmatprep.mubr.bf16.mxu0 %v12836_v46  ;;  %v1869_v42 = vshrl.u32 %v9435_v20, 16  ;;  %v1872_v36 = vshll.u32 %v9435_v20, 16  ;;  %v1840_v46 = vsel %vm1223_vm2, %v1830_v62, %v1839_v33  ;;  %v1878_v32 = vshrl.u32 %v9436_v14, 16  ;;  %v13077_v62 = vld [vmem:[%s12497_s8 + $0xc] sm:$0xff]  }
  0xdd   : > { %10903 = vmatprep.mubr.bf16.mxu1 %v1822_v16  ;;  %10936 = vmatpush3.bf16.msra.mxu0 %v11891_v25  ;;  %v1856_v16 = vrot.slane %v1854_v5, 4  ;;  %v13060_v25 = vld [vmem:[#allocation6 + $0x1f8] sm:$0xff]   ;;  %v1881_v20 = vshll.u32 %v9436_v14, 16  ;;  %v1304_v5 = vshll.u32 %v11898_v31, 16  ;;  %v13100_v31 = vrot.slane %v1301_v2, 3 }
  0xde   : > { %10937 = vmatprep.subr.bf16.mxu0 %v11897_v52  ;;  %10988 = vmatpush3.bf16.msra.mxu1 %v11901_v47  ;;  %v1862_v47 = vrot.slane %v1860_v21, 3  ;;  %v1874_v56 = vrot.slane %v1872_v36, 4  ;;  %v13092_v4 = vrot.slane %v1878_v32, 3  ;;  %v1887_v21 = vshrl.u32 %v9437_v19, 16 }
  0xdf   : > { %10989 = vmatprep.subr.bf16.mxu1 %v11902_v37  ;;  %v1857_v15 = vor.u32 %v1856_v16, %v1853_v24  ;;  %v1883_v14 = vrot.slane %v1881_v20, 4  ;;  %v13102_v36 = vrot.slane %v1304_v5, 4  ;;  %v1849_v57 = vsel %vm1223_vm2, %v1839_v33, %v1848_v44  ;;  %v13123_v24 = vld [vmem:[%s12497_s8 + $0x4c] sm:$0xff]  }
  0xe0   : > { %v1866_v27 = vor.u32 %v1865_v29, %v1862_v47  ;;  %v2646_v32 = vshll.u32 %v13077_v62, 16  ;;  %v2659_v2 = vshll.u32 %v13087_v0, 16  ;;  %v1889_v5 = vrot.slane %v1887_v21, 3  ;;  %v13115_v47 = vld [vmem:[%s12497_s8 + $0x3c] sm:$0xff]  }
  0xe1   : > { %10938 = vmatpush3.bf16.msra.mxu0 %v11897_v52  ;;  %v9438_v52 = vcombine.low %v13058_v59, %v13058_v59  ;;  %v1858_v16 = vsel %vm1223_vm2, %v1848_v44, %v1857_v15  ;;  %v2667_v29 = vshll.u32 %v13090_v34, 16  ;;  %v2691_v6 = vshll.u32 %v13115_v47, 16 }
  0xe2   : > { %10990 = vmatpush3.bf16.msra.mxu1 %v11902_v37  ;;  %11027 = vmatprep.subr.bf16.mxu0 %v13043_v50  ;;  %v1871_v37 = vrot.slane %v1869_v42, 3  ;;  %v13098_v42 = vld [vmem:[%s12497_s8 + $0x34] sm:$0xff]   ;;  %v13140_v58 = vrot.slane %v2659_v2, 1  ;;  %v13168_v2 = vld [vmem:[%s12497_s8 + $0x6c] sm:$0xff]   ;;  %v1884_v17 = vor.u32 %v1883_v14, %v13092_v4 }
  0xe3   : > { %10852 = vmatmul.mubr.bf16.gmra.mxu0 %v12853_v60  ;;  %11079 = vmatprep.subr.bf16.mxu1 %v13060_v25  ;;  %v13084_v60 = vld [vmem:[%s12497_s8 + $0x14] sm:$0xff]   ;;  %v1896_v59 = vshrl.u32 %v9438_v52, 16  ;;  %16642 = vst [vmem:[#allocation40_spill] sm:$0xff] %v13168_v2 }
  0xe4   : > { %10904 = vmatmul.mubr.bf16.gmra.mxu1 %v1831_v13  ;;  %10855 = vmatprep.mubr.bf16.mxu0 %v12859_v53  ;;  %v13095_v13 = vld [vmem:[%s12497_s8 + $0x2c] sm:$0xff]   ;;  %v1890_v53 = vshll.u32 %v9437_v19, 16  ;;  %v2651_v19 = vshll.u32 %v13084_v60, 16  ;;  %v1875_v21 = vor.u32 %v1874_v56, %v1871_v37  ;;  %v13150_v56 = vld [vmem:[%s12497_s8 + $0x64] sm:$0xff]   ;;  %v3071_v14 = vld [vmem:[%s12497_s8 + $0x18] sm:$0xf] }
  0xe5   : > { %10907 = vmatprep.mubr.bf16.mxu1 %v1840_v46  ;;  %v1899_v46 = vshll.u32 %v9438_v52, 16  ;;  %v13111_v33 = vrot.slane %v1896_v59, 3  ;;  %v2675_v44 = vshll.u32 %v13095_v13, 16  ;;  %v13120_v52 = vld [vmem:[%s12497_s8 + $0x44] sm:$0xff]   ;;  %v1867_v59 = vsel %vm1223_vm2, %v1857_v15, %v1866_v27  ;;  %16641 = vst [vmem:[#allocation39_spill] sm:$0xff] %v13150_v56 }
  0xe6   : > { %v1892_v20 = vrot.slane %v1890_v53, 4  ;;  %16638 = vst [vmem:[#allocation36_spill] sm:$0xff] %v13120_v52  ;;  %v13137_v51 = vrot.slane %v2651_v19, 1  ;;  %v13146_v15 = vrot.slane %v2667_v29, 1  ;;  %v1876_v30 = vsel %vm1223_vm2, %v1866_v27, %v1875_v21 }
  0xe7   : > { %v13129_v53 = vrot.slane %v1899_v46, 4  ;;  %v2707_v19 = vshll.u32 %v13123_v24, 16  ;;  %v2723_v27 = vshll.u32 %v13143_v10, 16  ;;  %v2771_v10 = vshll.u32 %v13212_v39, 16 }
  0xeb   : > { %10856 = vmatmul.mubr.bf16.gmra.mxu0 %v12881_v11  ;;  %v13126_v11 = vld [vmem:[%s12497_s8 + $0x24] sm:$0xff]  }
  0xec   : > { %10908 = vmatmul.mubr.bf16.gmra.mxu1 %v1849_v57  ;;  %10859 = vmatprep.mubr.bf16.mxu0 %v12893_v8  ;;  %16639 = vst [vmem:[#allocation37_spill] sm:$0xff] %v13126_v11  ;;  %v2683_v57 = vshll.u32 %v13098_v42, 16  ;;  %v13135_v8 = vrot.slane %v2646_v32, 1  ;;  %v16515_v46 = vshll.u32 %v13126_v11, 16  ;;  %v13153_v32 = vrot.slane %v2675_v44, 1 }
  0xed   : > { %10911 = vmatprep.mubr.bf16.mxu1 %v1858_v16  ;;  %v16520_v29 = vshrl.u32 %v13126_v11, 16  ;;  %v2699_v44 = vshll.u32 %v13120_v52, 16  ;;  %v13198_v52 = vrot.slane %v2723_v27, 1  ;;  %v2755_v27 = vshll.u32 %v13185_v43, 16 }
  0xee   : > { %v13158_v28 = vrot.slane %v2683_v57, 1  ;;  %v4014_v37 = vrot.slane %v16515_v46, 2  ;;  %v2715_v57 = vshll.u32 %v13133_v12, 16  ;;  %v13175_v46 = vrot.slane %v2691_v6, 1  ;;  %v13223_v6 = vld [vmem:[%s12497_s8 + $0x94] sm:$0xff]  }
  0xef   : > { %v4013_v16 = vrot.slane %v16520_v29, 1 }
  0xf0   : > { %v13194_v4 = vrot.slane %v2715_v57, 1 }
  0xf1   : > { %v13187_v29 = vor.u32 %v4014_v37, %v4013_v16  ;;  %v13203_v16 = vld [vmem:[%s12497_s8 + $0x84] sm:$0xff]   ;;  %v1885_v37 = vsel %vm1223_vm2, %v1875_v21, %v1884_v17  ;;  %v1307_v21 = vor.u32 %v13102_v36, %v13100_v31 }
  0xf3   : > { %10860 = vmatmul.mubr.bf16.gmra.mxu0 %v12906_v40  ;;  %v2731_v40 = vshll.u32 %v13150_v56, 16  ;;  %v2763_v56 = vshll.u32 %v13203_v16, 16 }
  0xf4   : > { %10912 = vmatmul.mubr.bf16.gmra.mxu1 %v1867_v59  ;;  %10863 = vmatprep.mubr.bf16.mxu0 %v12912_v3  ;;  %v1893_v59 = vor.u32 %v1892_v20, %v1889_v5  ;;  %v13189_v3 = vrot.slane %v2699_v44, 1  ;;  %v2739_v20 = vshll.u32 %v13168_v2, 16  ;;  %v2747_v44 = vshll.u32 %v13182_v48, 16  ;;  %v3070_v5 = vld [vmem:[%s12497_s8 + $0x14] sm:$0xf] }
  0xf5   : > { %10915 = vmatprep.mubr.bf16.mxu1 %v1876_v30  ;;  %v13192_v30 = vrot.slane %v2707_v19, 1  ;;  %v13206_v19 = vrot.slane %v2731_v40, 1  ;;  %v1902_v40 = vor.u32 %v13129_v53, %v13111_v33  ;;  %v13235_v31 = vcombine.low %v3070_v5, %v3071_v14 }
  0xf6   : > { %v1894_v57 = vsel %vm1223_vm2, %v1884_v17, %v1893_v59  ;;  %v11953_v17 = vld [vmem:[%s12497_s8 + $0x9c] ss:$0 sps:$4 sm:$0x11]   ;;  %v13237_v36 = vrot.slane %v2739_v20, 1  ;;  %v13239_v33 = vrot.slane %v2747_v44, 1  ;;  %v13247_v2 = vrot.slane %v2755_v27, 1 }
  0xf7   : > { %16643 = vst [vmem:[#allocation41_spill] sm:$0xff] %v13206_v19  ;;  %v13228_v19 = vld [vmem:[%s12497_s8 + $0x1c] sm:$0xff]   ;;  %v13249_v5 = vrot.slane %v2763_v56, 1  ;;  %v13311_v20 = vld [vmem:[%s12497_s8 + $0x54] sm:$0xff]  }
  0xf8   : > { %v16526_v44 = vshll.u32 %v13228_v19, 16  ;;  %v11935_v56 = vld [vmem:[#allocation6 + $0x1f0] sm:$0xff]  }
  0xfb   : > { %10864 = vmatmul.mubr.bf16.gmra.mxu0 %v12938_v1  ;;  %v16644_v1 = vshrl.u32 %v13077_v62, 16  ;;  %v1308_v62 = vsel %vm1223_vm2, %v12940_v61, %v1307_v21  ;;  %v3219_v61 = vshll.u32 %v13235_v31, 16  ;;  %v16645_v21 = vcombine.low %v12685_v22, %v12688_v49 }
  0xfc   : > { %10916 = vmatmul.mubr.bf16.gmra.mxu1 %v1885_v37  ;;  %10867 = vmatprep.mubr.bf16.mxu0 %v12948_v26  ;;  %v2787_v26 = vshll.u32 %v11953_v17, 16  ;;  %v16647_v17 = vshrl.u32 %v13087_v0, 16  ;;  %v13277_v22 = vrot.slane %v16526_v44, 1 }
  0xfd   : > { %10919 = vmatprep.mubr.bf16.mxu1 %v1894_v57  ;;  %v2649_v37 = vor.u32 %v13135_v8, %v16644_v1  ;;  %v1903_v8 = vsel %vm1223_vm2, %v1893_v59, %v1902_v40  ;;  %v2779_v1 = vshll.u32 %v13223_v6, 16  ;;  %v13255_v57 = vrot.slane %v2771_v10, 1  ;;  %v3643_v59 = vld [vmem:[%s12497_s8 + $0x14] sm:$0xe] }
  0xfe   : > { %v16646_v10 = vshrl.u32 %v13084_v60, 16  ;;  %v13272_v27 = vrot.slane %v2787_v26, 1  ;;  %v13283_v60 = vld [vmem:[%s12497_s8 + $0x2c] sm:$0xff]   ;;  %v13285_v0 = vrot.slane %v3219_v61, 1  ;;  %v16649_v26 = vshll.u32 %v13126_v11, 16 }
  0xff   : > { %v2654_v53 = vsel %vm2642_vm3, %v2649_v37, %v13137_v51  ;;  %v2665_v37 = vor.u32 %v16647_v17, %v13140_v58  ;;  %v13299_v17 = vld [vmem:[%s12497_s8 + $0x44] sm:$0xff]   ;;  %v3240_v44 = vshll.u32 %v13283_v60, 16  ;;  %v16535_v49 = vshrl.u32 %v13283_v60, 16 }
 0x100   : > { %v2657_v40 = vor.u32 %v16646_v10, %v13137_v51  ;;  %16648 = vst [vmem:[#allocation42_spill] sm:$0xff] %v13272_v27  ;;  %v13280_v51 = vcombine.low %v3643_v59, %v3071_v14  ;;  %v13296_v10 = vld [vmem:[%s12497_s8 + $0x3c] sm:$0xff]   ;;  %v13303_v59 = vld [vmem:[%s12497_s8 + $0x4c] sm:$0xff]   ;;  %v13326_v27 = vld [vmem:[%s12497_s8 + $0x64] sm:$0xff]   ;;  %v16534_v11 = vshrl.u32 %v13299_v17, 16 }
 0x101   : > { %v13341_v14 = vld [vmem:[%s12497_s8 + $0x6c] sm:$0xff]  }
 0x102   : > { %v2662_v61 = vsel %vm2642_vm3, %v2657_v40, %v13140_v58  ;;  %v11918_v58 = vld [vmem:[#allocation6 + $0x1a8] sm:$0xff]  }
 0x103   : > { %10868 = vmatmul.mubr.bf16.gmra.mxu0 %v1308_v62  ;;  %v13270_v62 = vrot.slane %v2779_v1, 1  ;;  %v13288_v1 = vld [vmem:[%s12497_s8 + $0x34] sm:$0xff]  }
 0x104   : > { %10920 = vmatmul.mubr.bf16.gmra.mxu1 %v1903_v8  ;;  %10939 = vmatprep.mubr.bf16.mxu0 %v16645_v21  ;;  %v11912_v8 = vld [vmem:[#allocation6 + $0x1b0] sm:$0xff]   ;;  %v11940_v40 = vld [vmem:[#allocation6 + $0x1e8] sm:$0xff]  }
 0x105   : > { %10991 = vmatprep.mubr.bf16.mxu1 %v2654_v53  ;;  %v13292_v53 = vrot.slane %v16649_v26, 1  ;;  %v2670_v26 = vsel %vm2642_vm3, %v2665_v37, %v13146_v15  ;;  %v13323_v21 = vld [vmem:[%s12497_s8 + $0x5c] sm:$0xff]   ;;  %v11923_v37 = vld [vmem:[#allocation6 + $0x1a0] sm:$0xff]  }
 0x107   : > { %16650 = vst [vmem:[#allocation43_spill] sm:$0xff] %v13292_v53  ;;  %v16651_v53 = vcombine.low %v12761_v41, %v12797_v55  ;;  %v16652_v41 = vcombine.low %v12800_v18, %v12810_v63  ;;  %v16653_v55 = vshrl.u32 %v13090_v34, 16  ;;  %v16654_v18 = vshrl.u32 %v13095_v13, 16 }
 0x108   : > { %v16656_v34 = vcombine.low %v12847_v9, %v12850_v23 }
 0x109   : > { %v2681_v63 = vor.u32 %v16654_v18, %v13153_v32  ;;  %v11934_v18 = vld [vmem:[#allocation6 + $0x190] sm:$0xff]  }
 0x10b   : > { %10940 = vmatmul.mubr.bf16.vlgmr.msra.gmra.mxu0 %v16651_v53  ;;  %v2673_v53 = vor.u32 %v16653_v55, %v13146_v15  ;;  %v2686_v15 = vsel %vm2642_vm3, %v2681_v63, %v13158_v28  ;;  %v11928_v63 = vld [vmem:[#allocation6 + $0x198] sm:$0xff]  }
 0x10c   : > { %11028 = vmatpush3.bf16.msra.mxu0 %v13043_v50  ;;  %10992 = vmatmul.mubr.bf16.vlgmr.msra.gmra.mxu1 %v2662_v61  ;;  %v16533_v50 = vshrl.u32 %v13303_v59, 16  ;;  %v13355_v61 = vld [vmem:[%s12497_s8 + $0x7c] sm:$0xff]  }
 0x10d   : > { %10943 = vmatprep.mubr.bf16.mxu0 %v16652_v41  ;;  %10995 = vmatprep.mubr.bf16.mxu1 %v2670_v26  ;;  %v13349_v26 = vld [vmem:[%s12497_s8 + $0x74] sm:$0xff]   ;;  %v2678_v13 = vsel %vm2642_vm3, %v2673_v53, %v13153_v32  ;;  %v4005_v41 = vshll.u32 %v13280_v51, 16  ;;  %v16660_v32 = vshll.u32 %v13228_v19, 16 }
 0x10e   : > { %11029 = vmatprep.subr.bf16.mxu0 %v11912_v8  ;;  %11080 = vmatpush3.bf16.msra.mxu1 %v13060_v25  ;;  %v11942_v25 = vld [vmem:[#allocation6 + $0x1e0] sm:$0xff]  }
 0x10f   : > { %11081 = vmatprep.subr.bf16.mxu1 %v11935_v56  ;;  %v4007_v23 = vrot.slane %v4005_v41, 2 }
 0x110   : > { %11030 = vmatpush3.bf16.msra.mxu0 %v11912_v8  ;;  %v16655_v8 = vcombine.low %v12822_v54, %v12840_v7  ;;  %v16657_v54 = vshrl.u32 %v13098_v42, 16 }
 0x111   : > { %11031 = vmatprep.subr.bf16.mxu0 %v11918_v58 }
 0x112   : > { %11082 = vmatpush3.bf16.msra.mxu1 %v11935_v56  ;;  %v4002_v56 = vshrl.u32 %v13280_v51, 16  ;;  %v2689_v7 = vor.u32 %v16657_v54, %v13158_v28 }
 0x113   : > { %10944 = vmatmul.mubr.bf16.gmra.mxu0 %v16655_v8  ;;  %11083 = vmatprep.subr.bf16.mxu1 %v11940_v40  ;;  %v16658_v8 = vshrl.u32 %v13115_v47, 16  ;;  %v11948_v47 = vld [vmem:[#allocation6 + $0x1d0] sm:$0xff]  }
 0x114   : > { %10996 = vmatmul.mubr.bf16.gmra.mxu1 %v2678_v13  ;;  %10947 = vmatprep.mubr.bf16.mxu0 %v16656_v34  ;;  %v11947_v13 = vld [vmem:[#allocation6 + $0x1d8] sm:$0xff]   ;;  %v4004_v9 = vrot.slane %v4002_v56, 1  ;;  %v16659_v34 = vshrl.u32 %v13228_v19, 16 }
 0x115   : > { %10999 = vmatprep.mubr.bf16.mxu1 %v2686_v15  ;;  %11032 = vmatpush3.bf16.msra.mxu0 %v11918_v58  ;;  %v2697_v53 = vor.u32 %v16658_v8, %v13175_v46  ;;  %v4010_v15 = vrot.slane %v16660_v32, 2  ;;  %v2694_v58 = vsel %vm2642_vm3, %v2689_v7, %v13175_v46  ;;  %v16661_v32 = vcombine.low %v12856_v38, %v12884_v35  ;;  %v16662_v46 = vld [vmem:[#allocation13_spill] sm:$0xff]  ;;  %v11954_v7 = vld [vmem:[#allocation6 + $0x1c8] sm:$0xff]  }
 0x116   : > { %11033 = vmatprep.subr.bf16.mxu0 %v11923_v37  ;;  %11084 = vmatpush3.bf16.msra.mxu1 %v11940_v40  ;;  %v4009_v55 = vrot.slane %v16659_v34, 1  ;;  %v4008_v42 = vor.u32 %v4007_v23, %v4004_v9  ;;  %v16666_v38 = vshrl.u32 %v13123_v24, 16  ;;  %v4017_v8 = vrot.slane %v16535_v49, 1  ;;  %v11950_v34 = vld [vmem:[#allocation6 + $0x180] sm:$0xff]  }
 0x117   : > { %11085 = vmatprep.subr.bf16.mxu1 %v11942_v25  ;;  %v2702_v40 = vsel %vm2642_vm3, %v2697_v53, %v13189_v3  ;;  %v11941_v53 = vld [vmem:[#allocation6 + $0x188] sm:$0xff]   ;;  %v16667_v9 = vshrl.u32 %v13288_v1, 16 }
 0x118   : > { %v4011_v28 = vor.u32 %v4010_v15, %v4009_v55  ;;  %v2713_v35 = vor.u32 %v16666_v38, %v13192_v30 }
 0x119   : > { %11034 = vmatpush3.bf16.msra.mxu0 %v11923_v37  ;;  %v16663_v37 = vcombine.low %v12887_v45, %v16662_v46  ;;  %v4018_v45 = vrot.slane %v3240_v44, 2  ;;  %v4021_v23 = vrot.slane %v16667_v9, 1  ;;  %v16680_v9 = vshll.u32 %v13296_v10, 16 }
 0x11a   : > { %11035 = vmatprep.subr.bf16.mxu0 %v11928_v63  ;;  %11086 = vmatpush3.bf16.msra.mxu1 %v11942_v25  ;;  %v13390_v41 = vsel %vm4000_vm4, %v4008_v42, %v4011_v28  ;;  %v13397_v55 = vsel %vm4000_vm4, %v4011_v28, %v13187_v29  ;;  %v16664_v25 = vld [vmem:[#allocation36_spill] sm:$0xff]  ;;  %v2718_v28 = vsel %vm2642_vm3, %v2713_v35, %v13194_v4 }
 0x11b   : > { %10948 = vmatmul.mubr.bf16.gmra.mxu0 %v16661_v32  ;;  %11087 = vmatprep.subr.bf16.mxu1 %v11947_v13  ;;  %v16665_v56 = vshrl.u32 %v16664_v25, 16  ;;  %v4019_v15 = vor.u32 %v4018_v45, %v4017_v8  ;;  %v16670_v32 = vld [vmem:[#allocation15_spill] sm:$0xff]  ;;  %v16679_v8 = vshrl.u32 %v13296_v10, 16 }
 0x11c   : > { %11000 = vmatmul.mubr.bf16.gmra.mxu1 %v2694_v58  ;;  %10951 = vmatprep.mubr.bf16.mxu0 %v16663_v37 }
 0x11d   : > { %11003 = vmatprep.mubr.bf16.mxu1 %v2702_v40  ;;  %v2705_v54 = vor.u32 %v16665_v56, %v13189_v3  ;;  %11036 = vmatpush3.bf16.msra.mxu0 %v11928_v63  ;;  %v16668_v3 = vshll.u32 %v13288_v1, 16  ;;  %v13422_v58 = vsel %vm4000_vm4, %v13187_v29, %v4019_v15  ;;  %v16669_v40 = vld [vmem:[#allocation14_spill] sm:$0xff]  ;;  %v13433_v56 = vld [vmem:[#allocation6 + $0x238] sm:$0xff]   ;;  %v16676_v29 = vshrl.u32 %v13133_v12, 16 }
 0x11e   : > { %11037 = vmatprep.subr.bf16.mxu0 %v11934_v18  ;;  %11088 = vmatpush3.bf16.msra.mxu1 %v11947_v13  ;;  %v11955_v13 = vld [vmem:[#allocation6 + $0x1c0] sm:$0xff]   ;;  %v16671_v46 = vcombine.low %v16669_v40, %v16670_v32  ;;  %v4025_v45 = vrot.slane %v16679_v8, 1  ;;  %v16681_v12 = vshll.u32 %v13299_v17, 16  ;;  %v16684_v40 = vld [vmem:[#allocation18_spill] sm:$0xff]  ;;  %v16685_v32 = vld [vmem:[#allocation19_spill] sm:$0xff] }
 0x11f   : > { %11089 = vmatprep.subr.bf16.mxu1 %v11948_v47  ;;  %v4022_v63 = vrot.slane %v16668_v3, 2  ;;  %v2710_v24 = vsel %vm2642_vm3, %v2705_v54, %v13192_v30  ;;  %v16673_v30 = vld [vmem:[#allocation16_spill] sm:$0xff]  ;;  %v16677_v54 = vld [vmem:[#allocation38_spill] sm:$0xff]  ;;  %v4029_v3 = vrot.slane %v16534_v11, 1 }
 0x120   : > { %v16678_v38 = vshrl.u32 %v16677_v54, 16  ;;  %v13645_v11 = vld [vmem:[%s12497_s8 + $0x94] sm:$0xff]  }
 0x121   : > { %11038 = vmatpush3.bf16.msra.mxu0 %v11934_v18  ;;  %v4023_v42 = vor.u32 %v4022_v63, %v4021_v23  ;;  %v16674_v18 = vld [vmem:[#allocation17_spill] sm:$0xff]  ;;  %v4026_v23 = vrot.slane %v16680_v9, 2 }
 0x122   : > { %11039 = vmatprep.subr.bf16.mxu0 %v11941_v53  ;;  %11090 = vmatpush3.bf16.msra.mxu1 %v11948_v47  ;;  %v16675_v25 = vcombine.low %v16673_v30, %v16674_v18  ;;  %v2721_v47 = vor.u32 %v16676_v29, %v13194_v4  ;;  %v2729_v35 = vor.u32 %v16678_v38, %v13198_v52  ;;  %v4030_v4 = vrot.slane %v16681_v12, 2 }
 0x123   : > { %10952 = vmatmul.mubr.bf16.gmra.mxu0 %v16671_v46  ;;  %11091 = vmatprep.subr.bf16.mxu1 %v11954_v7  ;;  %v13428_v37 = vsel %vm4000_vm4, %v4019_v15, %v4023_v42  ;;  %v16686_v46 = vcombine.low %v16684_v40, %v16685_v32  ;;  %v4033_v38 = vrot.slane %v16533_v50, 1  ;;  %v16700_v40 = vld [vmem:[#allocation23_spill] sm:$0xff] }
 0x124   : > { %16672 = vst [vmem:[#allocation13_spill] sm:$0xff] %v13428_v37  ;;  %11004 = vmatmul.mubr.bf16.gmra.mxu1 %v2710_v24  ;;  %10955 = vmatprep.mubr.bf16.mxu0 %v16675_v25  ;;  %v2726_v63 = vsel %vm2642_vm3, %v2721_v47, %v13198_v52  ;;  %v4031_v15 = vor.u32 %v4030_v4, %v4029_v3  ;;  %v16688_v52 = vld [vmem:[#allocation20_spill] sm:$0xff] }
 0x125   : > { %11007 = vmatprep.mubr.bf16.mxu1 %v2718_v28  ;;  %11040 = vmatpush3.bf16.msra.mxu0 %v11941_v53  ;;  %v4027_v53 = vor.u32 %v4026_v23, %v4025_v45  ;;  %v16696_v45 = vshrl.u32 %v13311_v20, 16  ;;  %v16697_v23 = vshll.u32 %v13311_v20, 16 }
 0x126   : > { %11041 = vmatprep.subr.bf16.mxu0 %v11950_v34  ;;  %11092 = vmatpush3.bf16.msra.mxu1 %v11954_v7  ;;  %v16682_v7 = vld [vmem:[#allocation41_spill] sm:$0xff] }
 0x127   : > { %11093 = vmatprep.subr.bf16.mxu1 %v11955_v13  ;;  %v2734_v24 = vsel %vm2642_vm3, %v2729_v35, %v16682_v7  ;;  %v13455_v28 = vsel %vm4000_vm4, %v4023_v42, %v4027_v53  ;;  %v13461_v30 = vsel %vm4000_vm4, %v4027_v53, %v4031_v15  ;;  %v16693_v42 = vld [vmem:[#allocation40_spill] sm:$0xff]  ;;  %v16695_v35 = vshll.u32 %v13303_v59, 16 }
 0x128   : > { %16683 = vst [vmem:[#allocation36_spill] sm:$0xff] %v13455_v28  ;;  %16687 = vst [vmem:[#allocation14_spill] sm:$0xff] %v13461_v30  ;;  %v16694_v47 = vshrl.u32 %v16693_v42, 16  ;;  %v4037_v9 = vrot.slane %v16696_v45, 1  ;;  %v4038_v3 = vrot.slane %v16697_v23, 2 }
 0x129   : > { %11042 = vmatpush3.bf16.msra.mxu0 %v11950_v34  ;;  %v16689_v34 = vld [vmem:[#allocation21_spill] sm:$0xff]  ;;  %v4034_v8 = vrot.slane %v16695_v35, 2 }
 0x12a   : > { %11094 = vmatpush3.bf16.msra.mxu1 %v11955_v13  ;;  %11131 = vmatprep.subr.bf16.mxu0 %v13433_v56  ;;  %v16690_v18 = vcombine.low %v16688_v52, %v16689_v34  ;;  %v16691_v13 = vld [vmem:[#allocation39_spill] sm:$0xff]  ;;  %v2745_v54 = vor.u32 %v16694_v47, %v13237_v36  ;;  %v4039_v53 = vor.u32 %v4038_v3, %v4037_v9  ;;  %v16703_v52 = vld [vmem:[#allocation24_spill] sm:$0xff]  ;;  %v16704_v34 = vld [vmem:[#allocation25_spill] sm:$0xff]  ;;  %v16709_v47 = vshll.u32 %v13323_v21, 16 }
 0x12b   : > { %10956 = vmatmul.mubr.bf16.gmra.mxu0 %v16686_v46  ;;  %v16692_v25 = vshrl.u32 %v16691_v13, 16  ;;  %v4035_v12 = vor.u32 %v4034_v8, %v4033_v38  ;;  %v16710_v38 = vshrl.u32 %v13326_v27, 16  ;;  %v16711_v8 = vshll.u32 %v13326_v27, 16 }
 0x12c   : > { %11008 = vmatmul.mubr.bf16.gmra.mxu1 %v2726_v63  ;;  %10959 = vmatprep.mubr.bf16.mxu0 %v16690_v18  ;;  %v2750_v63 = vsel %vm2642_vm3, %v2745_v54, %v13239_v33  ;;  %v16705_v18 = vcombine.low %v16703_v52, %v16704_v34  ;;  %v4042_v54 = vrot.slane %v16709_v47, 2  ;;  %v16723_v47 = vshll.u32 %v13341_v14, 16 }
 0x12d   : > { %11011 = vmatprep.mubr.bf16.mxu1 %v2734_v24  ;;  %v2737_v29 = vor.u32 %v16692_v25, %v16682_v7  ;;  %v13485_v7 = vsel %vm4000_vm4, %v4031_v15, %v4035_v12  ;;  %v16699_v24 = vld [vmem:[#allocation22_spill] sm:$0xff]  ;;  %v13491_v46 = vsel %vm4000_vm4, %v4035_v12, %v4039_v53  ;;  %v16707_v15 = vshrl.u32 %v13185_v43, 16 }
 0x12e   : > { %16698 = vst [vmem:[#allocation15_spill] sm:$0xff] %v13485_v7  ;;  %v16701_v32 = vcombine.low %v16699_v24, %v16700_v40  ;;  %16702 = vst [vmem:[#allocation16_spill] sm:$0xff] %v13491_v46  ;;  %v4045_v35 = vrot.slane %v16710_v38, 1  ;;  %v4046_v45 = vrot.slane %v16711_v8, 2  ;;  %v16713_v12 = vld [vmem:[#allocation26_spill] sm:$0xff] }
 0x12f   : > { %v2742_v4 = vsel %vm2642_vm3, %v2737_v29, %v13237_v36  ;;  %v16706_v36 = vshrl.u32 %v13182_v48, 16  ;;  %v2761_v25 = vor.u32 %v16707_v15, %v13247_v2  ;;  %v16708_v29 = vshrl.u32 %v13323_v21, 16 }
 0x130   : > { %v16721_v15 = vshrl.u32 %v13212_v39, 16 }
 0x131   : > { %v2753_v13 = vor.u32 %v16706_v36, %v13239_v33  ;;  %v4041_v42 = vrot.slane %v16708_v29, 1  ;;  %v4047_v33 = vor.u32 %v4046_v45, %v4045_v35  ;;  %v2766_v43 = vsel %vm2642_vm3, %v2761_v25, %v13249_v5 }
 0x132   : > { %v2777_v25 = vor.u32 %v16721_v15, %v13255_v57  ;;  %v16722_v29 = vshrl.u32 %v13341_v14, 16  ;;  %v16725_v45 = vshll.u32 %v13349_v26, 16 }
 0x133   : > { %10960 = vmatmul.mubr.bf16.gmra.mxu0 %v16701_v32  ;;  %v4043_v9 = vor.u32 %v4042_v54, %v4041_v42  ;;  %v2758_v48 = vsel %vm2642_vm3, %v2753_v13, %v13247_v2  ;;  %v16717_v2 = vld [vmem:[#allocation28_spill] sm:$0xff]  ;;  %v16718_v32 = vld [vmem:[#allocation29_spill] sm:$0xff]  ;;  %v4050_v54 = vrot.slane %v16723_v47, 2  ;;  %v16730_v47 = vld [vmem:[#allocation31_spill] sm:$0xff] }
 0x134   : > { %11012 = vmatmul.mubr.bf16.gmra.mxu1 %v2742_v4  ;;  %10963 = vmatprep.mubr.bf16.mxu0 %v16705_v18  ;;  %v16714_v4 = vld [vmem:[#allocation27_spill] sm:$0xff]  ;;  %v16719_v52 = vcombine.low %v16717_v2, %v16718_v32  ;;  %v4049_v42 = vrot.slane %v16722_v29, 1 }
 0x135   : > { %11015 = vmatprep.mubr.bf16.mxu1 %v2750_v63  ;;  %v13515_v23 = vsel %vm4000_vm4, %v4039_v53, %v4043_v9  ;;  %v16715_v63 = vcombine.low %v16713_v12, %v16714_v4  ;;  %v13521_v24 = vsel %vm4000_vm4, %v4043_v9, %v4047_v33  ;;  %v16720_v53 = vshrl.u32 %v13203_v16, 16  ;;  %v13541_v16 = vld [vmem:[%s12497_s8 + $0x84] sm:$0xff]  }
 0x136   : > { %16712 = vst [vmem:[#allocation17_spill] sm:$0xff] %v13515_v23  ;;  %16716 = vst [vmem:[#allocation38_spill] sm:$0xff] %v13521_v24  ;;  %v4054_v9 = vrot.slane %v16725_v45, 2  ;;  %v16531_v12 = vshrl.u32 %v13355_v61, 16  ;;  %v4051_v4 = vor.u32 %v4050_v54, %v4049_v42  ;;  %v16729_v42 = vld [vmem:[#allocation30_spill] sm:$0xff]  ;;  %v16753_v23 = vshrl.u32 %v13283_v60, 16 }
 0x137   : > { %v2769_v34 = vor.u32 %v16720_v53, %v13249_v5  ;;  %v16724_v5 = vshrl.u32 %v13349_v26, 16  ;;  %v16731_v54 = vcombine.low %v16729_v42, %v16730_v47  ;;  %v16742_v47 = vshll.u32 %v13355_v61, 16 }
 0x138   : > { %v4057_v42 = vrot.slane %v16531_v12, 1 }
 0x139   : > { %v4053_v8 = vrot.slane %v16724_v5, 1  ;;  %v2774_v39 = vsel %vm2642_vm3, %v2769_v34, %v13255_v57  ;;  %v2782_v57 = vsel %vm2642_vm3, %v2777_v25, %v13270_v62  ;;  %v16733_v25 = vld [vmem:[#allocation32_spill] sm:$0xff] }
 0x13b   : > { %v10733_v3 = vpop.f32.mrf.mxu0  ;;  %10964 = vmatmul.mubr.bf16.gmra.mxu0 %v16715_v63  ;;  %v9865_v63 = vld [vmem:[%s16483_s5] sm:$0xff]   ;;  %v13558_v32 = vor.u32 %v4054_v9, %v4053_v8  ;;  %v16734_v8 = vld [vmem:[#allocation33_spill] sm:$0xff] }
 0x13c   : > { %v10785_v40 = vpop.f32.mrf.mxu1  ;;  %11016 = vmatmul.mubr.bf16.gmra.mxu1 %v2758_v48  ;;  %10967 = vmatprep.mubr.bf16.mxu0 %v16719_v52  ;;  %v9866_v52 = vunpack.c.l.bf16 %v9865_v63  ;;  %v9867_v53 = vunpack.c.h.bf16 %v9865_v63  ;;  %v16735_v45 = vcombine.low %v16733_v25, %v16734_v8 }
 0x13d   : > { %v13529_v18 = vadd.f32 %v10785_v40, %v10733_v3  ;;  %v643_v36 = vpop.f32.mrf.mxu0  ;;  %11019 = vmatprep.mubr.bf16.mxu1 %v2766_v43  ;;  %v16726_v43 = vshrl.u32 %v13223_v6, 16  ;;  %v16727_v6 = vshrl.u32 %v13228_v19, 16 }
 0x13e   : > { %v1060_v13 = vpop.f32.mrf.mxu1  ;;  %v11729_v5 = vpack.i.bf16 %v9867_v53, %v9866_v52  ;;  %v16738_v52 = vld [vmem:[#allocation43_spill] sm:$0xff] }
 0x13f   : > { %v13538_v38 = vadd.f32 %v1060_v13, %v643_v36  ;;  %v10734_v35 = vpop.f32.mrf.mxu0  ;;  %v2785_v3 = vor.u32 %v16726_v43, %v13270_v62  ;;  %v3230_v34 = vor.u32 %v16727_v6, %v13277_v22  ;;  %v13566_v13 = vsel %vm4000_vm4, %v4047_v33, %v4051_v4 }
 0x140   : > { %v10786_v48 = vpop.f32.mrf.mxu1  ;;  %16728 = vst [vmem:[#allocation41_spill] sm:$0xff] %v13566_v13  ;;  %v16736_v33 = vshrl.u32 %v13235_v31, 16  ;;  %v16530_v31 = vshrl.u32 %v13541_v16, 16 }
 0x141   : > { %v13556_v40 = vadd.f32 %v10786_v48, %v10734_v35  ;;  %v646_v2 = vpop.f32.mrf.mxu0  ;;  %v13575_v35 = vsel %vm4000_vm4, %v4051_v4, %v13558_v32  ;;  %v12318_v48 = vmov 0   ;;  %v13591_v53 = vsel %vm2642_vm3, %v3230_v34, %v16738_v52 }
 0x142   : > { %v1063_v36 = vpop.f32.mrf.mxu1  ;;  %16732 = vst [vmem:[#allocation18_spill] sm:$0xff] %v13575_v35  ;;  %v3222_v9 = vor.u32 %v13285_v0, %v16736_v33  ;;  %300 = vst [vmem:[#allocation2] sm:$0xf] %v12318_v48  ;;  %11728 = vset.pattern.permute.xlu0 %v12318_v48  ;;  %v4058_v34 = vrot.slane %v16742_v47, 2  ;;  %11734 = vset.pattern.permute.xlu1 %v12318_v48  ;;  %v4061_v8 = vrot.slane %v16530_v31, 1  ;;  %v16752_v35 = vshrl.u32 %v13645_v11, 16 }
 0x143   : > { %v13568_v15 = vadd.f32 %v1063_v36, %v646_v2  ;;  %v10737_v29 = vpop.f32.mrf.mxu0  ;;  %10968 = vmatmul.mubr.bf16.gmra.mxu0 %v16731_v54  ;;  %301 = vst [vmem:[#allocation2 + $0x4] sm:$0xf] %v12318_v48  ;;  %302 = vst [vmem:[#allocation2 + $0x8] sm:$0xf] %v12318_v48  ;;  %v16532_v2 = vshll.u32 %v13541_v16, 16  ;;  %v16739_v36 = vld [vmem:[#allocation37_spill] sm:$0xff]  ;;  %11730 = vperm.xlu0 %11728, %v11729_v5  }
 0x144   : > { %v10789_v62 = vpop.f32.mrf.mxu1  ;;  %11020 = vmatmul.mubr.bf16.gmra.mxu1 %v2774_v39  ;;  %10971 = vmatprep.mubr.bf16.mxu0 %v16735_v45  ;;  %303 = vst [vmem:[#allocation2 + $0x9c] sm:$0xf] %v12318_v48  ;;  %304 = vst [vmem:[#allocation2 + $0xa0] sm:$0xf] %v12318_v48  ;;  %v16737_v39 = vld [vmem:[#allocation42_spill] sm:$0xff]  ;;  %v16740_v6 = vrot.slane %v16739_v36, 1  ;;  %v3227_v33 = vsel %vm2642_vm3, %v3222_v9, %v13277_v22 }
 0x145   : > { %305 = vst [vmem:[#allocation2 + $0xa4] sm:$0xf] %v12318_v48  ;;  %v13583_v43 = vadd.f32 %v10789_v62, %v10737_v29  ;;  %v659_v4 = vpop.f32.mrf.mxu0  ;;  %11023 = vmatprep.mubr.bf16.mxu1 %v2782_v57  ;;  %v2790_v63 = vsel %vm2642_vm3, %v2785_v3, %v16737_v39  ;;  %v16741_v29 = vrot.slane %v13228_v19, 1  ;;  %v10179_v3 = vld [vmem:[%s16483_s5 + $0x8] sm:$0xff]   ;;  %v4062_v5 = vrot.slane %v16532_v2, 2  ;;  %v13631_v22 = vld [vmem:[%s16483_s5 + $0x20] sm:$0xff]  }
 0x146   : > { %v1076_v0 = vpop.f32.mrf.mxu1  ;;  %v9870_v25 = vunpack.c.l.bf16 %v10179_v3  ;;  %v16743_v39 = vshrl.u32 %v16739_v36, 16  ;;  %v3242_v48 = vrot.slane %v3240_v44, 1  ;;  %v9882_v44 = vunpack.c.l.bf16 %v13631_v22 }
 0x147   : > { %v13598_v57 = vsel %vm3663_vm5, %v16741_v29, %v16740_v6  ;;  %v13607_v54 = vadd.f32 %v1076_v0, %v659_v4  ;;  %v10738_v62 = vpop.f32.mrf.mxu0  ;;  %v13621_v4 = vld [vmem:[%s12497_s8 + $0x8c] sm:$0xff]   ;;  %v4059_v0 = vor.u32 %v4058_v34, %v4057_v42  ;;  %v16744_v42 = vrot.slane %v13228_v19, 1 }
 0x148   : > { %v10790_v45 = vpop.f32.mrf.mxu1  ;;  %v3238_v6 = vor.u32 %v16743_v39, %v16738_v52  ;;  %v13626_v29 = vld [vmem:[%s16483_s5 + $0x18] sm:$0xff]   ;;  %v4063_v52 = vor.u32 %v4062_v5, %v4061_v8  ;;  %v16745_v34 = vrot.slane %v13280_v51, 1  ;;  %4492 = vperm.xlu0 %11728, %v9870_v25   ;;  %v10180_v8 = vld [vmem:[%s16483_s5 + $0x10] sm:$0xff]   ;;  %v16747_v5 = vld [vmem:[#allocation34_spill] sm:$0xff]  ;;  %v9871_v25 = vunpack.c.h.bf16 %v10179_v3 }
 0x149   : > { %v13633_v9 = vadd.f32 %v10790_v45, %v10738_v62  ;;  %v662_v47 = vpop.f32.mrf.mxu0  ;;  %v9879_v39 = vunpack.c.h.bf16 %v13626_v29  ;;  %v13649_v62 = vsel %vm4000_vm4, %v13558_v32, %v4059_v0  ;;  %v16748_v45 = vld [vmem:[#allocation35_spill] sm:$0xff]  ;;  %v4069_v13 = vrot.slane %v16752_v35, 1  ;;  %v13705_v35 = vld [vmem:[%s16483_s5 + $0x40] sm:$0xff]  }
 0x14a   : > { %v1079_v31 = vpop.f32.mrf.mxu1  ;;  %v3666_v12 = vsel %vm3663_vm5, %v16745_v34, %v16744_v42  ;;  %16746 = vst [vmem:[#allocation19_spill] sm:$0xff] %v13649_v62  ;;  %v16749_v42 = vcombine.low %v16747_v5, %v16748_v45  ;;  %v13660_v34 = vsel %vm4000_vm4, %v4059_v0, %v4063_v52  ;;  %v3243_v32 = vsel %vm2642_vm3, %v3238_v6, %v3242_v48  ;;  %v13668_v5 = vld [vmem:[%s16483_s5 + $0x28] sm:$0xff]   ;;  %v13673_v0 = vld [vmem:[%s16483_s5 + $0x30] sm:$0xff]  }
 0x14b   : > { %v13654_v19 = vadd.f32 %v1079_v31, %v662_v47  ;;  %v10741_v51 = vpop.f32.mrf.mxu0  ;;  %16750 = vst [vmem:[#allocation20_spill] sm:$0xff] %v13660_v34  ;;  %v11745_v50 = vpack.i.bf16 %v9882_v44, %v9879_v39  ;;  %v16536_v31 = vshrl.u32 %v13621_v4, 16  ;;  %v9874_v47 = vunpack.c.l.bf16 %v10180_v8 }
 0x14c   : > { %10972 = vmatmul.mubr.bf16.gmra.mxu0 %v16749_v42  ;;  %v10793_v2 = vpop.f32.mrf.mxu1  ;;  %11024 = vmatmul.mubr.bf16.gmra.mxu1 %v2790_v63  ;;  %v9887_v6 = vunpack.c.h.bf16 %v13668_v5  ;;  %v9890_v39 = vunpack.c.l.bf16 %v13673_v0  ;;  %v3246_v45 = vor.u32 %v16753_v23, %v3242_v48  ;;  %v9883_v28 = vunpack.c.h.bf16 %v13631_v22 }
 0x14d   : > { %11043 = vmatprep.mubr.bf16.mxu0 %v3227_v33  ;;  %v13675_v3 = vadd.f32 %v10793_v2, %v10741_v51  ;;  %v675_v63 = vpop.f32.mrf.mxu0  ;;  %11095 = vmatprep.mubr.bf16.mxu1 %v3666_v12  ;;  %v11735_v42 = vpack.i.bf16 %v9874_v47, %v9871_v25  ;;  %v4065_v49 = vrot.slane %v16536_v31, 1  ;;  %v16751_v2 = vshll.u32 %v13621_v4, 16 }
 0x14e   : > { %v1092_v44 = vpop.f32.mrf.mxu1  ;;  %11746 = vperm.xlu0 %11728, %v11745_v50   ;;  %v9875_v33 = vunpack.c.h.bf16 %v10180_v8  ;;  %v11755_v62 = vpack.i.bf16 %v9890_v39, %v9887_v6  ;;  %v13692_v50 = vld [vmem:[%s12497_s8 + $0x9c] sm:$0xff]   ;;  %v16754_v47 = vshll.u32 %v13645_v11, 16  ;;  %v13700_v8 = vld [vmem:[%s16483_s5 + $0x38] sm:$0xff]   ;;  %v9886_v37 = vunpack.c.l.bf16 %v13668_v5 }
 0x14f   : > { %v4066_v51 = vrot.slane %v16751_v2, 2  ;;  %v13685_v34 = vadd.f32 %v1092_v44, %v675_v63  ;;  %v10742_v12 = vpop.f32.mrf.mxu0  ;;  %11736 = vperm.xlu1 %11734, %v11735_v42   ;;  %v9878_v63 = vunpack.c.l.bf16 %v13626_v29  ;;  %v9895_v39 = vunpack.c.h.bf16 %v13700_v8 }
 0x150   : > { %v10794_v24 = vpop.f32.mrf.mxu1  ;;  %v4070_v31 = vrot.slane %v16754_v47, 2  ;;  %v9898_v29 = vunpack.c.l.bf16 %v13705_v35  ;;  %v16756_v42 = vrot.slane %v13283_v60, 1  ;;  %v16757_v2 = vrot.slane %v16739_v36, 1  ;;  %v11963_v47 = vld [vmem:[#allocation6 + $0x230] sm:$0xff]  }
 0x151   : > { %v4067_v25 = vor.u32 %v4066_v51, %v4065_v49  ;;  %v13707_v23 = vadd.f32 %v10794_v24, %v10742_v12  ;;  %v678_v48 = vpop.f32.mrf.mxu0  ;;  %v16755_v49 = vshll.u32 %v13288_v1, 16  ;;  %v11740_v46 = vpack.i.bf16 %v9878_v63, %v9875_v33 }
 0x152   : > { %v1095_v44 = vpop.f32.mrf.mxu1  ;;  %v3670_v51 = vsel %vm3663_vm5, %v16757_v2, %v16756_v42  ;;  %11756 = vperm.xlu0 %11728, %v11755_v62   ;;  %v4071_v12 = vor.u32 %v4070_v31, %v4069_v13  ;;  %v11765_v30 = vpack.i.bf16 %v9898_v29, %v9895_v39  ;;  %v16538_v13 = vshll.u32 %v13692_v50, 16 }
 0x153   : > { %v3250_v6 = vrot.slane %v16755_v49, 1  ;;  %v13719_v24 = vsel %vm4000_vm4, %v4063_v52, %v4067_v25  ;;  %v13721_v7 = vadd.f32 %v1095_v44, %v678_v48  ;;  %v10745_v49 = vpop.f32.mrf.mxu0  ;;  %v16759_v52 = vshrl.u32 %v13288_v1, 16  ;;  %11741 = vperm.xlu1 %11734, %v11740_v46  }
 0x154   : > { %16758 = vst [vmem:[#allocation21_spill] sm:$0xff] %v13719_v24  ;;  %11044 = vmatmul.mubr.bf16.vlgmr.msra.gmra.mxu0 %v13591_v53  ;;  %v10797_v36 = vpop.f32.mrf.mxu1  ;;  %11096 = vmatmul.mubr.bf16.vlgmr.msra.gmra.mxu1 %v13598_v57  ;;  %v16537_v31 = vshrl.u32 %v13692_v50, 16  ;;  %v13733_v33 = vsel %vm4000_vm4, %v4067_v25, %v4071_v12  ;;  %v13738_v53 = vld [vmem:[%s16483_s5 + $0x48] sm:$0xff]   ;;  %v16761_v5 = vshll.u32 %v13296_v10, 16  ;;  %v11966_v25 = vld [vmem:[#allocation6 + $0x228] sm:$0xff]   ;;  %v11750_v42 = vpack.i.bf16 %v9886_v37, %v9883_v28 }
 0x155   : > { %11132 = vmatpush3.bf16.msra.mxu0 %v13433_v56  ;;  %v3254_v62 = vor.u32 %v16759_v52, %v3250_v6  ;;  %16760 = vst [vmem:[#allocation39_spill] sm:$0xff] %v13733_v33  ;;  %v13743_v56 = vld [vmem:[%s16483_s5 + $0x50] sm:$0xff]   ;;  %v13745_v57 = vadd.f32 %v10797_v36, %v10745_v49  ;;  %v691_v22 = vpop.f32.mrf.mxu0  ;;  %11047 = vmatprep.mubr.bf16.mxu0 %v3243_v32  ;;  %v9903_v48 = vunpack.c.h.bf16 %v13738_v53  ;;  %v4074_v32 = vrot.slane %v16538_v13, 2 }
 0x156   : > { %11099 = vmatprep.mubr.bf16.mxu1 %v3670_v51  ;;  %v3258_v63 = vrot.slane %v16761_v5, 1  ;;  %v9906_v39 = vunpack.c.l.bf16 %v13743_v56  ;;  %v1108_v29 = vpop.f32.mrf.mxu1  ;;  %11133 = vmatprep.subr.bf16.mxu0 %v11963_v47  ;;  %v4073_v2 = vrot.slane %v16537_v31, 1  ;;  %v9891_v52 = vunpack.c.h.bf16 %v13673_v0  ;;  %v13776_v0 = vld [vmem:[%s16483_s5 + $0x60] sm:$0xff]  }
 0x157   : > { %v13756_v51 = vadd.f32 %v1108_v29, %v691_v22  ;;  %v10746_v49 = vpop.f32.mrf.mxu0  ;;  %11766 = vperm.xlu0 %11728, %v11765_v30   ;;  %v9894_v5 = vunpack.c.l.bf16 %v13700_v8  ;;  %v3251_v44 = vsel %vm2642_vm3, %v3246_v45, %v3250_v6  ;;  %v16762_v37 = vrot.slane %v13288_v1, 1  ;;  %v13771_v30 = vld [vmem:[%s16483_s5 + $0x58] sm:$0xff]   ;;  %11751 = vperm.xlu1 %11734, %v11750_v42  }
 0x158   : > { %v11775_v36 = vpack.i.bf16 %v9906_v39, %v9903_v48  ;;  %v10798_v33 = vpop.f32.mrf.mxu1  ;;  %v16763_v28 = vrot.slane %v13283_v60, 1  ;;  %v13766_v31 = vor.u32 %v4074_v32, %v4073_v2  ;;  %v3259_v60 = vsel %vm2642_vm3, %v3254_v62, %v3258_v63 }
 0x159   : > { %11134 = vmatpush3.bf16.msra.mxu0 %v11963_v47  ;;  %v13778_v45 = vadd.f32 %v10798_v33, %v10746_v49  ;;  %v694_v8 = vpop.f32.mrf.mxu0  ;;  %v9911_v6 = vunpack.c.h.bf16 %v13771_v30  ;;  %v9914_v47 = vunpack.c.l.bf16 %v13776_v0  ;;  %v16765_v48 = vshll.u32 %v13299_v17, 16  ;;  %v11969_v33 = vld [vmem:[#allocation6 + $0x220] sm:$0xff]  }
 0x15a   : > { %v3672_v46 = vsel %vm3663_vm5, %v16763_v28, %v16762_v37  ;;  %16764 = vst [vmem:[#allocation40_spill] sm:$0xff] %v13766_v31  ;;  %11135 = vmatprep.subr.bf16.mxu0 %v11966_v25  ;;  %v1111_v22 = vpop.f32.mrf.mxu1  ;;  %v16766_v29 = vrot.slane %v13296_v10, 1  ;;  %v16767_v2 = vmov %v16762_v37  ;;  %v13792_v62 = vsel %vm4000_vm4, %v4071_v12, %v13766_v31  ;;  %v12155_v12 = vld [vmem:[%s12497_s8 + $0x44] sm:$0xff]  }
 0x15b   : > { %v3266_v39 = vrot.slane %v16765_v48, 1  ;;  %16768 = vst [vmem:[#allocation22_spill] sm:$0xff] %v13792_v62  ;;  %v11760_v49 = vpack.i.bf16 %v9894_v5, %v9891_v52  ;;  %v13794_v37 = vadd.f32 %v1111_v22, %v694_v8  ;;  %v10749_v28 = vpop.f32.mrf.mxu0  ;;  %11776 = vperm.xlu0 %11728, %v11775_v36   ;;  %v11785_v48 = vpack.i.bf16 %v9914_v47, %v9911_v6  ;;  %v13820_v6 = vld [vmem:[%s12497_s8 + $0x4c] sm:$0xff]  }
 0x15c   : > { %v3674_v32 = vsel %vm3663_vm5, %v16767_v2, %v16766_v29  ;;  %11048 = vmatmul.mubr.bf16.gmra.mxu0 %v3251_v44  ;;  %v9899_v13 = vunpack.c.h.bf16 %v13705_v35  ;;  %v9902_v1 = vunpack.c.l.bf16 %v13738_v53  ;;  %v10801_v24 = vpop.f32.mrf.mxu1  ;;  %11100 = vmatmul.mubr.bf16.gmra.mxu1 %v3672_v46  ;;  %v16769_v42 = vshrl.u32 %v13296_v10, 16  ;;  %v13806_v44 = vld [vmem:[%s16483_s5 + $0x68] sm:$0xff]   ;;  %v13811_v35 = vld [vmem:[%s16483_s5 + $0x70] sm:$0xff]  }
 0x15d   : > { %11051 = vmatprep.mubr.bf16.mxu0 %v3259_v60  ;;  %v3675_v2 = vrot.slane %v12155_v12, 1  ;;  %v16770_v52 = vshrl.u32 %v13299_v17, 16  ;;  %v13813_v53 = vadd.f32 %v10801_v24, %v10749_v28  ;;  %v707_v36 = vpop.f32.mrf.mxu0  ;;  %11103 = vmatprep.mubr.bf16.mxu1 %v3674_v32  ;;  %v9919_v17 = vunpack.c.h.bf16 %v13806_v44  ;;  %v11972_v22 = vld [vmem:[#allocation6 + $0x218] sm:$0xff]  }
 0x15e   : > { %v3262_v29 = vor.u32 %v16769_v42, %v3258_v63  ;;  %11136 = vmatpush3.bf16.msra.mxu0 %v11966_v25  ;;  %v16771_v63 = vshll.u32 %v13303_v59, 16  ;;  %v9922_v8 = vunpack.c.l.bf16 %v13811_v35  ;;  %v1124_v60 = vpop.f32.mrf.mxu1  ;;  %11761 = vperm.xlu1 %11734, %v11760_v49   ;;  %v11770_v24 = vpack.i.bf16 %v9902_v1, %v9899_v13  ;;  %v10193_v13 = vld [vmem:[%s16483_s5 + $0x78] sm:$0xff]   ;;  %v13837_v49 = vld [vmem:[%s16483_s5 + $0x80] sm:$0xff]  }
 0x15f   : > { %v3270_v5 = vor.u32 %v16770_v52, %v3266_v39  ;;  %11137 = vmatprep.subr.bf16.mxu0 %v11969_v33  ;;  %v13823_v28 = vadd.f32 %v1124_v60, %v707_v36  ;;  %v10750_v32 = vpop.f32.mrf.mxu0  ;;  %11786 = vperm.xlu0 %11728, %v11785_v48   ;;  %v9907_v42 = vunpack.c.h.bf16 %v13743_v56  ;;  %v9910_v12 = vunpack.c.l.bf16 %v13771_v30 }
 0x160   : > { %v3274_v46 = vrot.slane %v16771_v63, 1  ;;  %v11795_v25 = vpack.i.bf16 %v9922_v8, %v9919_v17  ;;  %v10802_v52 = vpop.f32.mrf.mxu1  ;;  %v3267_v63 = vsel %vm2642_vm3, %v3262_v29, %v3266_v39  ;;  %v16772_v31 = vrot.slane %v13296_v10, 1  ;;  %v11975_v8 = vld [vmem:[#allocation6 + $0x210] sm:$0xff]  }
 0x161   : > { %v13839_v48 = vadd.f32 %v10802_v52, %v10750_v32  ;;  %v710_v56 = vpop.f32.mrf.mxu0  ;;  %v9927_v39 = vunpack.c.h.bf16 %v10193_v13  ;;  %v9930_v10 = vunpack.c.l.bf16 %v13837_v49  ;;  %v16774_v36 = vrot.slane %v13820_v6, 1 }
 0x162   : > { %v3676_v47 = vsel %vm3663_vm5, %v16772_v31, %v3675_v2  ;;  %v3275_v30 = vsel %vm2642_vm3, %v3270_v5, %v3274_v46  ;;  %11138 = vmatpush3.bf16.msra.mxu0 %v11969_v33  ;;  %v1127_v1 = vpop.f32.mrf.mxu1  ;;  %v16773_v31 = vshll.u32 %v13311_v20, 16  ;;  %11771 = vperm.xlu1 %11734, %v11770_v24   ;;  %v11780_v60 = vpack.i.bf16 %v9910_v12, %v9907_v42  ;;  %v12157_v12 = vld [vmem:[%s12497_s8 + $0x54] sm:$0xff]  }
 0x163   : > { %v3678_v17 = vsel %vm3663_vm5, %v3675_v2, %v16774_v36  ;;  %11139 = vmatprep.subr.bf16.mxu0 %v11972_v22  ;;  %v13848_v32 = vadd.f32 %v1127_v1, %v710_v56  ;;  %v10753_v5 = vpop.f32.mrf.mxu0  ;;  %11796 = vperm.xlu0 %11728, %v11795_v25   ;;  %v11805_v33 = vpack.i.bf16 %v9930_v10, %v9927_v39  ;;  %v9915_v52 = vunpack.c.h.bf16 %v13776_v0  ;;  %v12158_v10 = vld [vmem:[%s12497_s8 + $0x5c] sm:$0xff]  }
 0x164   : > { %v3282_v29 = vrot.slane %v16773_v31, 1  ;;  %11052 = vmatmul.mubr.bf16.gmra.mxu0 %v3267_v63  ;;  %v9918_v31 = vunpack.c.l.bf16 %v13806_v44  ;;  %v10805_v62 = vpop.f32.mrf.mxu1  ;;  %11104 = vmatmul.mubr.bf16.gmra.mxu1 %v3676_v47  ;;  %v16775_v2 = vshrl.u32 %v13303_v59, 16  ;;  %v3679_v56 = vrot.slane %v12157_v12, 1 }
 0x165   : > { %11055 = vmatprep.mubr.bf16.mxu0 %v3275_v30  ;;  %v13854_v24 = vadd.f32 %v10805_v62, %v10753_v5  ;;  %v723_v42 = vpop.f32.mrf.mxu0  ;;  %11107 = vmatprep.mubr.bf16.mxu1 %v3678_v17  ;;  %v16776_v25 = vshrl.u32 %v13311_v20, 16  ;;  %v16777_v39 = vshll.u32 %v13323_v21, 16  ;;  %v3681_v47 = vrot.slane %v12158_v10, 1  ;;  %v11978_v30 = vld [vmem:[#allocation6 + $0x208] sm:$0xff]   ;;  %v10195_v62 = vld [vmem:[%s16483_s5 + $0x88] sm:$0xff]  }
 0x166   : > { %v3278_v36 = vor.u32 %v16775_v2, %v3274_v46  ;;  %11140 = vmatpush3.bf16.msra.mxu0 %v11972_v22  ;;  %v1140_v44 = vpop.f32.mrf.mxu1  ;;  %11781 = vperm.xlu1 %11734, %v11780_v60   ;;  %v11790_v59 = vpack.i.bf16 %v9918_v31, %v9915_v52  ;;  %v9935_v20 = vunpack.c.h.bf16 %v10195_v62  ;;  %v9923_v17 = vunpack.c.h.bf16 %v13811_v35 }
 0x167   : > { %v3286_v63 = vor.u32 %v16776_v25, %v3282_v29  ;;  %v3290_v0 = vrot.slane %v16777_v39, 1  ;;  %11141 = vmatprep.subr.bf16.mxu0 %v11975_v8  ;;  %v13865_v46 = vadd.f32 %v1140_v44, %v723_v42  ;;  %v10754_v1 = vpop.f32.mrf.mxu0  ;;  %11806 = vperm.xlu0 %11728, %v11805_v33   ;;  %v9926_v5 = vunpack.c.l.bf16 %v10193_v13  ;;  %v11982_v39 = vld [vmem:[#allocation6 + $0x200] sm:$0xff]  }
 0x168   : > { %v10806_v22 = vpop.f32.mrf.mxu1  ;;  %v3283_v2 = vsel %vm2642_vm3, %v3278_v36, %v3282_v29  ;;  %v16778_v60 = vrot.slane %v13820_v6, 1  ;;  %v3682_v33 = vsel %vm3663_vm5, %v3679_v56, %v3681_v47  ;;  %v16779_v36 = vshll.u32 %v13326_v27, 16 }
 0x169   : > { %v13869_v12 = vadd.f32 %v10806_v22, %v10754_v1  ;;  %v726_v25 = vpop.f32.mrf.mxu0  ;;  %v3291_v31 = vsel %vm2642_vm3, %v3286_v63, %v3290_v0  ;;  %v11800_v35 = vpack.i.bf16 %v9926_v5, %v9923_v17  ;;  %v9931_v63 = vunpack.c.h.bf16 %v13837_v49  ;;  %v12159_v17 = vld [vmem:[%s12497_s8 + $0x64] sm:$0xff]  }
 0x16a   : > { %v3680_v52 = vsel %vm3663_vm5, %v16778_v60, %v3679_v56  ;;  %11142 = vmatpush3.bf16.msra.mxu0 %v11975_v8  ;;  %v1143_v42 = vpop.f32.mrf.mxu1  ;;  %11791 = vperm.xlu1 %11734, %v11790_v59   ;;  %v3298_v6 = vrot.slane %v16779_v36, 1  ;;  %v9934_v8 = vunpack.c.l.bf16 %v10195_v62  ;;  %v16780_v56 = vshrl.u32 %v13323_v21, 16  ;;  %v12160_v62 = vld [vmem:[%s12497_s8 + $0x6c] sm:$0xff]  }
 0x16b   : > { %11143 = vmatprep.subr.bf16.mxu0 %v11978_v30  ;;  %v13876_v13 = vadd.f32 %v1143_v42, %v726_v25  ;;  %v10757_v29 = vpop.f32.mrf.mxu0  ;;  %4657 = vperm.xlu0 %11728, %v9935_v20   ;;  %v3683_v5 = vrot.slane %v12159_v17, 1  ;;  %v16781_v22 = vshrl.u32 %v13326_v27, 16  ;;  %v16782_v20 = vshll.u32 %v13341_v14, 16  ;;  %v12161_v17 = vld [vmem:[%s12497_s8 + $0x74] sm:$0xff]  }
 0x16c   : > { %11056 = vmatmul.mubr.bf16.gmra.mxu0 %v3283_v2  ;;  %v10809_v44 = vpop.f32.mrf.mxu1  ;;  %11108 = vmatmul.mubr.bf16.gmra.mxu1 %v3680_v52  ;;  %v3294_v10 = vor.u32 %v16780_v56, %v3290_v0  ;;  %v3685_v60 = vrot.slane %v12160_v62, 1  ;;  %v11810_v21 = vpack.i.bf16 %v9934_v8, %v9931_v63 }
 0x16d   : > { %11059 = vmatprep.mubr.bf16.mxu0 %v3291_v31  ;;  %v13883_v59 = vadd.f32 %v10809_v44, %v10757_v29  ;;  %v739_v1 = vpop.f32.mrf.mxu0  ;;  %11111 = vmatprep.mubr.bf16.mxu1 %v3682_v33  ;;  %v3302_v2 = vor.u32 %v16781_v22, %v3298_v6  ;;  %v3306_v25 = vrot.slane %v16782_v20, 1  ;;  %v3684_v29 = vsel %vm3663_vm5, %v3681_v47, %v3683_v5 }
 0x16e   : > { %11144 = vmatpush3.bf16.msra.mxu0 %v11978_v30  ;;  %v1156_v49 = vpop.f32.mrf.mxu1  ;;  %11801 = vperm.xlu1 %11734, %v11800_v35   ;;  %v3299_v42 = vsel %vm2642_vm3, %v3294_v10, %v3298_v6  ;;  %v3686_v44 = vsel %vm3663_vm5, %v3683_v5, %v3685_v60  ;;  %v16783_v6 = vshll.u32 %v13349_v26, 16  ;;  %v16784_v47 = vshrl.u32 %v13341_v14, 16 }
 0x16f   : > { %11145 = vmatprep.subr.bf16.mxu0 %v11982_v39  ;;  %v13891_v0 = vadd.f32 %v1156_v49, %v739_v1  ;;  %v10758_v52 = vpop.f32.mrf.mxu0  ;;  %v3307_v36 = vsel %vm2642_vm3, %v3302_v2, %v3306_v25  ;;  %v3687_v5 = vrot.slane %v12161_v17, 1  ;;  %v16785_v22 = vshrl.u32 %v13349_v26, 16 }
 0x170   : > { %v10810_v31 = vpop.f32.mrf.mxu1  ;;  %v3314_v8 = vrot.slane %v16783_v6, 1  ;;  %v3310_v10 = vor.u32 %v16784_v47, %v3306_v25  ;;  %v16786_v20 = vshll.u32 %v13355_v61, 16 }
 0x171   : > { %v13894_v33 = vadd.f32 %v10810_v31, %v10758_v52  ;;  %v742_v27 = vpop.f32.mrf.mxu0 }
 0x172   : > { %11146 = vmatpush3.bf16.msra.mxu0 %v11982_v39  ;;  %v1159_v30 = vpop.f32.mrf.mxu1  ;;  %11811 = vperm.xlu1 %11734, %v11810_v21   ;;  %v3318_v2 = vor.u32 %v16785_v22, %v3314_v8  ;;  %v3322_v49 = vrot.slane %v16786_v20, 1  ;;  %v12162_v21 = vld [vmem:[%s12497_s8 + $0x7c] sm:$0xff]   ;;  %v3315_v25 = vsel %vm2642_vm3, %v3310_v10, %v3314_v8  ;;  %v16788_v8 = vshrl.u32 %v13355_v61, 16 }
 0x173   : > { %v13899_v35 = vadd.f32 %v1159_v30, %v742_v27  ;;  %v10761_v63 = vpop.f32.mrf.mxu0  ;;  %v3689_v52 = vrot.slane %v12162_v21, 1  ;;  %v3691_v22 = vrot.slane %v13541_v16, 1  ;;  %v16790_v20 = vshll.u32 %v13621_v4, 16 }
 0x174   : > { %11060 = vmatmul.mubr.bf16.gmra.mxu0 %v3299_v42  ;;  %v10813_v56 = vpop.f32.mrf.mxu1  ;;  %11112 = vmatmul.mubr.bf16.gmra.mxu1 %v3684_v29  ;;  %v3323_v26 = vsel %vm2642_vm3, %v3318_v2, %v3322_v49  ;;  %v3326_v10 = vor.u32 %v16788_v8, %v3322_v49 }
 0x175   : > { %11063 = vmatprep.mubr.bf16.mxu0 %v3307_v36  ;;  %v13905_v1 = vadd.f32 %v10813_v56, %v10761_v63  ;;  %v755_v39 = vpop.f32.mrf.mxu0  ;;  %11115 = vmatprep.mubr.bf16.mxu1 %v3686_v44  ;;  %v3688_v36 = vsel %vm3663_vm5, %v3685_v60, %v3687_v5  ;;  %v3690_v44 = vsel %vm3663_vm5, %v3687_v5, %v3689_v52  ;;  %v16787_v56 = vshll.u32 %v13541_v16, 16 }
 0x176   : > { %v1172_v62 = vpop.f32.mrf.mxu1  ;;  %v16789_v5 = vshrl.u32 %v13541_v16, 16  ;;  %v3692_v16 = vsel %vm3663_vm5, %v3689_v52, %v3691_v22  ;;  %v11983_v52 = vld [vmem:[%s12497_s8 + $0xa4] ss:$0 sps:$4 sm:$0x11]  }
 0x177   : > { %v13913_v31 = vadd.f32 %v1172_v62, %v755_v39  ;;  %v10762_v42 = vpop.f32.mrf.mxu0  ;;  %v3330_v47 = vrot.slane %v16787_v56, 1  ;;  %v3338_v62 = vrot.slane %v16790_v20, 1  ;;  %v16791_v56 = vshll.u32 %v13645_v11, 16 }
 0x178   : > { %v10814_v14 = vpop.f32.mrf.mxu1 }
 0x179   : > { %v13916_v27 = vadd.f32 %v10814_v14, %v10762_v42  ;;  %v758_v29 = vpop.f32.mrf.mxu0  ;;  %v3334_v2 = vor.u32 %v16789_v5, %v3330_v47  ;;  %v3693_v42 = vrot.slane %v13621_v4, 1  ;;  %v3331_v49 = vsel %vm2642_vm3, %v3326_v10, %v3330_v47 }
 0x17a   : > { %v1175_v30 = vpop.f32.mrf.mxu1  ;;  %v16792_v10 = vshrl.u32 %v13621_v4, 16 }
 0x17b   : > { %v13921_v63 = vadd.f32 %v1175_v30, %v758_v29  ;;  %v10765_v6 = vpop.f32.mrf.mxu0 }
 0x17c   : > { %11064 = vmatmul.mubr.bf16.gmra.mxu0 %v3315_v25  ;;  %v10817_v39 = vpop.f32.mrf.mxu1  ;;  %11116 = vmatmul.mubr.bf16.gmra.mxu1 %v3688_v36 }
 0x17d   : > { %11067 = vmatprep.mubr.bf16.mxu0 %v3323_v26  ;;  %v13927_v17 = vadd.f32 %v10817_v39, %v10765_v6  ;;  %v771_v60 = vpop.f32.mrf.mxu0  ;;  %11119 = vmatprep.mubr.bf16.mxu1 %v3690_v44  ;;  %v3339_v26 = vsel %vm2642_vm3, %v3334_v2, %v3338_v62  ;;  %v3694_v44 = vsel %vm3663_vm5, %v3691_v22, %v3693_v42  ;;  %v3346_v39 = vrot.slane %v16791_v56, 1 }
 0x17e   : > { %v1188_v21 = vpop.f32.mrf.mxu1  ;;  %v3695_v2 = vrot.slane %v13645_v11, 1  ;;  %v16793_v22 = vshrl.u32 %v13645_v11, 16  ;;  %v3360_v11 = vshll.u32 %v11983_v52, 16 }
 0x17f   : > { %v13935_v14 = vadd.f32 %v1188_v21, %v771_v60  ;;  %v10766_v25 = vpop.f32.mrf.mxu0  ;;  %v3342_v60 = vor.u32 %v16792_v10, %v3338_v62  ;;  %v16794_v21 = vshll.u32 %v13692_v50, 16 }
 0x180   : > { %v10818_v61 = vpop.f32.mrf.mxu1  ;;  %v3350_v20 = vor.u32 %v16793_v22, %v3346_v39  ;;  %v3696_v10 = vsel %vm3663_vm5, %v3693_v42, %v3695_v2  ;;  %v16795_v42 = vshrl.u32 %v13692_v50, 16 }
 0x181   : > { %v13938_v29 = vadd.f32 %v10818_v61, %v10766_v25  ;;  %v13940_v36 = vpop.f32.mrf.mxu0  ;;  %v3354_v25 = vrot.slane %v16794_v21, 1 }
 0x182   : > { %v13944_v30 = vpop.f32.mrf.mxu1 }
 0x183   : > { %v10837_v6 = vpop.f32.mrf.mxu0  ;;  %v3355_v22 = vsel %vm2642_vm3, %v3350_v20, %v3354_v25  ;;  %v3362_v20 = vrot.slane %v3360_v11, 1 }
 0x184   : > { %11068 = vmatmul.mubr.bf16.gmra.mxu0 %v3331_v49  ;;  %v1554_v8 = vadd.f32 %v10837_v6, %v13529_v18  ;;  %v10889_v47 = vpop.f32.mrf.mxu1  ;;  %11120 = vmatmul.mubr.bf16.gmra.mxu1 %v3692_v16  ;;  %v3697_v16 = vrot.slane %v13692_v50, 1  ;;  %v3347_v6 = vsel %vm2642_vm3, %v3342_v60, %v3346_v39  ;;  %v3358_v60 = vor.u32 %v16795_v42, %v3354_v25 }
 0x185   : > { %11071 = vmatprep.mubr.bf16.mxu0 %v3339_v26  ;;  %v1409_v5 = vpop.f32.mrf.mxu0  ;;  %11123 = vmatprep.mubr.bf16.mxu1 %v3694_v44 }
 0x186   : > { %v1552_v61 = vadd.f32 %v1409_v5, %v13538_v38  ;;  %v13959_v18 = vadd.f32 %v10889_v47, %v1554_v8  ;;  %v2004_v49 = vpop.f32.mrf.mxu1 }
 0x187   : > { %v10838_v4 = vpop.f32.mrf.mxu0 }
 0x188   : > { %v1555_v62 = vadd.f32 %v10838_v4, %v13556_v40  ;;  %v13963_v26 = vadd.f32 %v2004_v49, %v1552_v61  ;;  %v10890_v44 = vpop.f32.mrf.mxu1  ;;  %v3698_v40 = vsel %vm3663_vm5, %v3695_v2, %v3697_v16 }
 0x189   : > { %v1412_v56 = vpop.f32.mrf.mxu0 }
 0x18a   : > { %v13969_v38 = vadd.f32 %v1412_v56, %v13568_v15  ;;  %v13971_v8 = vadd.f32 %v10890_v44, %v1555_v62  ;;  %v13973_v47 = vpop.f32.mrf.mxu1  ;;  %v3699_v15 = vrot.slane %v11983_v52, 1  ;;  %v3363_v56 = vsel %vm2642_vm3, %v3358_v60, %v3362_v20 }
 0x18b   : > { %v10841_v5 = vpop.f32.mrf.mxu0 }
 0x18c   : > { %11072 = vmatmul.mubr.bf16.gmra.mxu0 %v3347_v6  ;;  %v1558_v21 = vadd.f32 %v10841_v5, %v13583_v43  ;;  %v10893_v39 = vpop.f32.mrf.mxu1  ;;  %11124 = vmatmul.mubr.bf16.gmra.mxu1 %v3696_v10  ;;  %v3700_v50 = vsel %vm3663_vm5, %v3697_v16, %v3699_v15 }
 0x18d   : > { %11075 = vmatprep.mubr.bf16.mxu0 %v3355_v22  ;;  %v1425_v61 = vpop.f32.mrf.mxu0  ;;  %11127 = vmatprep.mubr.bf16.mxu1 %v3698_v40 }
 0x18e   : > { %v1556_v49 = vadd.f32 %v1425_v61, %v13607_v54  ;;  %v13980_v4 = vadd.f32 %v10893_v39, %v1558_v21  ;;  %v2020_v62 = vpop.f32.mrf.mxu1 }
 0x18f   : > { %v10842_v2 = vpop.f32.mrf.mxu0 }
 0x190   : > { %v1559_v44 = vadd.f32 %v10842_v2, %v13633_v9  ;;  %v13983_v6 = vadd.f32 %v2020_v62, %v1556_v49  ;;  %v10894_v43 = vpop.f32.mrf.mxu1 }
 0x191   : > { %v1428_v10 = vpop.f32.mrf.mxu0 }
 0x192   : > { %v13988_v25 = vadd.f32 %v1428_v10, %v13654_v19  ;;  %v13990_v52 = vadd.f32 %v10894_v43, %v1559_v44  ;;  %v13992_v54 = vpop.f32.mrf.mxu1 }
 0x193   : > { %v10845_v11 = vpop.f32.mrf.mxu0 }
 0x194   : > { %11076 = vmatmul.mubr.bf16.gmra.mxu0 %v3363_v56  ;;  %v1562_v22 = vadd.f32 %v10845_v11, %v13675_v3  ;;  %v10897_v9 = vpop.f32.mrf.mxu1  ;;  %11128 = vmatmul.mubr.bf16.gmra.mxu1 %v3700_v50 }
 0x195   : > { %11147 = vmatprep.mubr.bf16.mxu0 %v13390_v41  ;;  %v1441_v40 = vpop.f32.mrf.mxu0 }
 0x196   : > { %v1560_v5 = vadd.f32 %v1441_v40, %v13685_v34  ;;  %v13997_v21 = vadd.f32 %v10897_v9, %v1562_v22  ;;  %v2036_v16 = vpop.f32.mrf.mxu1  ;;  %v16796_v22 = vld [vmem:[#allocation13_spill] sm:$0xff]  ;;  %v16797_v40 = vld [vmem:[#allocation36_spill] sm:$0xff] }
 0x197   : > { %v10846_v19 = vpop.f32.mrf.mxu0 }
 0x198   : > { %v1563_v39 = vadd.f32 %v10846_v19, %v13707_v23  ;;  %v14000_v42 = vadd.f32 %v2036_v16, %v1560_v5  ;;  %v10898_v60 = vpop.f32.mrf.mxu1 }
 0x199   : > { %v1444_v20 = vpop.f32.mrf.mxu0 }
 0x19a   : > { %v14003_v61 = vadd.f32 %v1444_v20, %v13721_v7  ;;  %v14005_v3 = vadd.f32 %v10898_v60, %v1563_v39  ;;  %v14007_v15 = vpop.f32.mrf.mxu1 }
 0x19b   : > { %v10849_v41 = vpop.f32.mrf.mxu0 }
 0x19c   : > { %11148 = vmatmul.mubr.bf16.vlgmr.msra.gmra.mxu0 %v13397_v55  ;;  %v1566_v34 = vadd.f32 %v10849_v41, %v13745_v57  ;;  %v10901_v49 = vpop.f32.mrf.mxu1 }
 0x19d   : > { %11151 = vmatprep.mubr.bf16.mxu0 %v13422_v58  ;;  %v1457_v23 = vpop.f32.mrf.mxu0 }
 0x19e   : > { %v1564_v62 = vadd.f32 %v1457_v23, %v13756_v51  ;;  %v14013_v2 = vadd.f32 %v10901_v49, %v1566_v34  ;;  %v2052_v44 = vpop.f32.mrf.mxu1 }
 0x19f   : > { %v10850_v7 = vpop.f32.mrf.mxu0 }
 0x1a0   : > { %v1567_v43 = vadd.f32 %v10850_v7, %v13778_v45  ;;  %v14016_v56 = vadd.f32 %v2052_v44, %v1564_v62  ;;  %v10902_v10 = vpop.f32.mrf.mxu1  ;;  %v16798_v62 = vld [vmem:[#allocation14_spill] sm:$0xff]  ;;  %v16799_v7 = vld [vmem:[#allocation15_spill] sm:$0xff] }
 0x1a1   : > { %v1460_v50 = vpop.f32.mrf.mxu0 }
 0x1a2   : > { %v14019_v55 = vadd.f32 %v1460_v50, %v13794_v37  ;;  %v14021_v57 = vadd.f32 %v10902_v10, %v1567_v43  ;;  %v14023_v11 = vpop.f32.mrf.mxu1 }
 0x1a3   : > { %v10853_v58 = vpop.f32.mrf.mxu0 }
 0x1a4   : > { %11152 = vmatmul.mubr.bf16.gmra.mxu0 %v16796_v22  ;;  %v1570_v51 = vadd.f32 %v10853_v58, %v13813_v53  ;;  %v10905_v9 = vpop.f32.mrf.mxu1 }
 0x1a5   : > { %11155 = vmatprep.mubr.bf16.mxu0 %v16797_v40  ;;  %v1473_v45 = vpop.f32.mrf.mxu0 }
 0x1a6   : > { %v1568_v5 = vadd.f32 %v1473_v45, %v13823_v28  ;;  %v14029_v16 = vadd.f32 %v10905_v9, %v1570_v51  ;;  %v2068_v19 = vpop.f32.mrf.mxu1 }
 0x1a7   : > { %v10854_v37 = vpop.f32.mrf.mxu0 }
 0x1a8   : > { %v1571_v39 = vadd.f32 %v10854_v37, %v13839_v48  ;;  %v14032_v60 = vadd.f32 %v2068_v19, %v1568_v5  ;;  %v10906_v20 = vpop.f32.mrf.mxu1  ;;  %v11985_v5 = vld [vmem:[#allocation8 + $0x78] sm:$0xff]  }
 0x1a9   : > { %v1476_v41 = vpop.f32.mrf.mxu0  ;;  %11183 = vmatprep.subr.bf16.mxu1 %v11985_v5 }
 0x1aa   : > { %v14035_v34 = vadd.f32 %v1476_v41, %v13848_v32  ;;  %v14037_v53 = vadd.f32 %v10906_v20, %v1571_v39  ;;  %v14039_v49 = vpop.f32.mrf.mxu1  ;;  %v16801_v20 = vld [vmem:[#allocation17_spill] sm:$0xff]  ;;  %11184 = vmatpush3.bf16.msra.mxu1 %v11985_v5 }
 0x1ab   : > { %v10857_v23 = vpop.f32.mrf.mxu0  ;;  %v16803_v5 = vld [vmem:[#allocation41_spill] sm:$0xff] }
 0x1ac   : > { %11156 = vmatmul.mubr.bf16.gmra.mxu0 %v16798_v62  ;;  %v1574_v28 = vadd.f32 %v10857_v23, %v13854_v24  ;;  %v10909_v44 = vpop.f32.mrf.mxu1 }
 0x1ad   : > { %11159 = vmatprep.mubr.bf16.mxu0 %v16799_v7  ;;  %v1489_v48 = vpop.f32.mrf.mxu0 }
 0x1ae   : > { %v1572_v43 = vadd.f32 %v1489_v48, %v13865_v46  ;;  %v14045_v10 = vadd.f32 %v10909_v44, %v1574_v28  ;;  %v2084_v50 = vpop.f32.mrf.mxu1  ;;  %v16800_v46 = vld [vmem:[#allocation16_spill] sm:$0xff] }
 0x1af   : > { %v10858_v32 = vpop.f32.mrf.mxu0 }
 0x1b0   : > { %v1575_v58 = vadd.f32 %v10858_v32, %v13869_v12  ;;  %v14048_v22 = vadd.f32 %v2084_v50, %v1572_v43  ;;  %v10910_v51 = vpop.f32.mrf.mxu1  ;;  %v11986_v32 = vld [vmem:[#allocation8 + $0x70] sm:$0xff]  }
 0x1b1   : > { %v1492_v9 = vpop.f32.mrf.mxu0  ;;  %11185 = vmatprep.subr.bf16.mxu1 %v11986_v32 }
 0x1b2   : > { %v14051_v40 = vadd.f32 %v1492_v9, %v13876_v13  ;;  %v14053_v24 = vadd.f32 %v10910_v51, %v1575_v58  ;;  %v14055_v45 = vpop.f32.mrf.mxu1  ;;  %11186 = vmatpush3.bf16.msra.mxu1 %v11986_v32  ;;  %v16805_v32 = vld [vmem:[#allocation19_spill] sm:$0xff] }
 0x1b3   : > { %v10861_v19 = vpop.f32.mrf.mxu0 }
 0x1b4   : > { %11160 = vmatmul.mubr.bf16.gmra.mxu0 %v16800_v46  ;;  %v1578_v37 = vadd.f32 %v10861_v19, %v13883_v59  ;;  %v10913_v39 = vpop.f32.mrf.mxu1 }
 0x1b5   : > { %11163 = vmatprep.mubr.bf16.mxu0 %v16801_v20  ;;  %v1505_v12 = vpop.f32.mrf.mxu0 }
 0x1b6   : > { %v1576_v41 = vadd.f32 %v1505_v12, %v13891_v0  ;;  %v14061_v13 = vadd.f32 %v10913_v39, %v1578_v37  ;;  %v2100_v23 = vpop.f32.mrf.mxu1  ;;  %v16802_v0 = vld [vmem:[#allocation38_spill] sm:$0xff] }
 0x1b7   : > { %v10862_v62 = vpop.f32.mrf.mxu0 }
 0x1b8   : > { %v1579_v28 = vadd.f32 %v10862_v62, %v13894_v33  ;;  %v14064_v44 = vadd.f32 %v2100_v23, %v1576_v41  ;;  %v10914_v7 = vpop.f32.mrf.mxu1 }
 0x1b9   : > { %v1508_v48 = vpop.f32.mrf.mxu0 }
 0x1ba   : > { %v14067_v59 = vadd.f32 %v1508_v48, %v13899_v35  ;;  %v14069_v43 = vadd.f32 %v10914_v7, %v1579_v28  ;;  %v14071_v50 = vpop.f32.mrf.mxu1  ;;  %v16804_v7 = vld [vmem:[#allocation18_spill] sm:$0xff] }
 0x1bb   : > { %v10865_v58 = vpop.f32.mrf.mxu0 }
 0x1bc   : > { %11164 = vmatmul.mubr.bf16.gmra.mxu0 %v16802_v0  ;;  %v1582_v51 = vadd.f32 %v10865_v58, %v13905_v1  ;;  %v10917_v9 = vpop.f32.mrf.mxu1 }
 0x1bd   : > { %11167 = vmatprep.mubr.bf16.mxu0 %v16803_v5  ;;  %v1521_v33 = vpop.f32.mrf.mxu0 }
 0x1be   : > { %v1580_v19 = vadd.f32 %v1521_v33, %v13913_v31  ;;  %v14077_v35 = vadd.f32 %v10917_v9, %v1582_v51  ;;  %v2116_v46 = vpop.f32.mrf.mxu1 }
 0x1bf   : > { %v10866_v37 = vpop.f32.mrf.mxu0 }
 0x1c0   : > { %v1583_v39 = vadd.f32 %v10866_v37, %v13916_v27  ;;  %v14080_v20 = vadd.f32 %v2116_v46, %v1580_v19  ;;  %v10918_v12 = vpop.f32.mrf.mxu1  ;;  %v11987_v27 = vld [vmem:[#allocation8 + $0x68] sm:$0xff]   ;;  %v11984_v46 = vld [vmem:[%s12497_s8 + $0xa4] ss:$0 sps:$4 sm:$0x33]  }
 0x1c1   : > { %v1524_v41 = vpop.f32.mrf.mxu0  ;;  %11187 = vmatprep.subr.bf16.mxu1 %v11987_v27 }
 0x1c2   : > { %v14083_v1 = vadd.f32 %v1524_v41, %v13921_v63  ;;  %v14085_v23 = vadd.f32 %v10918_v12, %v1583_v39  ;;  %v14087_v62 = vpop.f32.mrf.mxu1  ;;  %11188 = vmatpush3.bf16.msra.mxu1 %v11987_v27 }
 0x1c3   : > { %v10869_v28 = vpop.f32.mrf.mxu0 }
 0x1c4   : > { %11168 = vmatmul.mubr.bf16.gmra.mxu0 %v16804_v7  ;;  %v1586_v31 = vadd.f32 %v10869_v28, %v13927_v17  ;;  %v10921_v48 = vpop.f32.mrf.mxu1  ;;  %v16808_v7 = vld [vmem:[#allocation21_spill] sm:$0xff] }
 0x1c5   : > { %11171 = vmatprep.mubr.bf16.mxu0 %v16805_v32  ;;  %v1537_v58 = vpop.f32.mrf.mxu0 }
 0x1c6   : > { %v1584_v0 = vadd.f32 %v1537_v58, %v13935_v14  ;;  %v14093_v51 = vadd.f32 %v10921_v48, %v1586_v31  ;;  %v2132_v63 = vpop.f32.mrf.mxu1  ;;  %v16807_v14 = vld [vmem:[#allocation20_spill] sm:$0xff]  ;;  %v4078_v31 = vshrl.u32 %v11984_v46, 16  ;;  %v11988_v48 = vld [vmem:[#allocation8 + $0x60] sm:$0xff]  }
 0x1c7   : > { %v10870_v9 = vpop.f32.mrf.mxu0  ;;  %11189 = vmatprep.subr.bf16.mxu1 %v11988_v48 }
 0x1c8   : > { %v1587_v5 = vadd.f32 %v10870_v9, %v13938_v29  ;;  %v14096_v33 = vadd.f32 %v2132_v63, %v1584_v0  ;;  %v10922_v19 = vpop.f32.mrf.mxu1  ;;  %v4081_v29 = vshll.u32 %v11984_v46, 16  ;;  %11190 = vmatpush3.bf16.msra.mxu1 %v11988_v48  ;;  %v16811_v48 = vld [vmem:[#allocation22_spill] sm:$0xff] }
 0x1c9   : > { %v14099_v17 = vpop.f32.mrf.mxu0 }
 0x1ca   : > { %v14101_v37 = vadd.f32 %v10922_v19, %v1587_v5  ;;  %v14103_v39 = vpop.f32.mrf.mxu1  ;;  %v4080_v19 = vrot.slane %v4078_v31, 1 }
 0x1cb   : > { %16806 = vst [vmem:[#allocation23_spill] sm:$0xff] %v14103_v39  ;;  %v10941_v12 = vpop.f32.mrf.mxu0 }
 0x1cc   : > { %11172 = vmatmul.mubr.bf16.gmra.mxu0 %v16807_v14  ;;  %v2462_v41 = vadd.f32 %v10941_v12, %v13959_v18  ;;  %v10993_v28 = vpop.f32.mrf.mxu1  ;;  %v4083_v12 = vrot.slane %v4081_v29, 2 }
 0x1cd   : > { %11175 = vmatprep.mubr.bf16.mxu0 %v16808_v7  ;;  %v2317_v32 = vpop.f32.mrf.mxu0 }
 0x1ce   : > { %v2460_v27 = vadd.f32 %v2317_v32, %v13963_v26  ;;  %v14109_v58 = vadd.f32 %v10993_v28, %v2462_v41  ;;  %v2891_v0 = vpop.f32.mrf.mxu1  ;;  %v16810_v41 = vld [vmem:[#allocation39_spill] sm:$0xff] }
 0x1cf   : > { %v10942_v63 = vpop.f32.mrf.mxu0 }
 0x1d0   : > { %v2463_v9 = vadd.f32 %v10942_v63, %v13971_v8  ;;  %v14112_v5 = vadd.f32 %v2891_v0, %v2460_v27  ;;  %v10994_v18 = vpop.f32.mrf.mxu1  ;;  %v4084_v8 = vor.u32 %v4083_v12, %v4080_v19  ;;  %v11989_v63 = vld [vmem:[#allocation8 + $0x58] sm:$0xff]  }
 0x1d1   : > { %v14114_v14 = vpop.f32.mrf.mxu0  ;;  %11191 = vmatprep.subr.bf16.mxu1 %v11989_v63 }
 0x1d2   : > { %v14116_v46 = vadd.f32 %v10994_v18, %v2463_v9  ;;  %v14118_v7 = vpop.f32.mrf.mxu1  ;;  %11192 = vmatpush3.bf16.msra.mxu1 %v11989_v63  ;;  %v11992_v63 = vld [vmem:[#allocation8 + $0x30] sm:$0xff]  }
 0x1d3   : > { %16809 = vst [vmem:[#allocation24_spill] sm:$0xff] %v14118_v7  ;;  %v10945_v26 = vpop.f32.mrf.mxu0 }
 0x1d4   : > { %11176 = vmatmul.mubr.bf16.gmra.mxu0 %v16810_v41  ;;  %v2466_v28 = vadd.f32 %v10945_v26, %v13980_v4  ;;  %v10997_v32 = vpop.f32.mrf.mxu1  ;;  %v16812_v41 = vld [vmem:[#allocation40_spill] sm:$0xff] }
 0x1d5   : > { %11179 = vmatprep.mubr.bf16.mxu0 %v16811_v48  ;;  %v2333_v27 = vpop.f32.mrf.mxu0  ;;  %v4085_v4 = vsel %vm4000_vm4, %v16812_v41, %v4084_v8 }
 0x1d6   : > { %v2464_v0 = vadd.f32 %v2333_v27, %v13983_v6  ;;  %v14124_v31 = vadd.f32 %v10997_v32, %v2466_v28  ;;  %v2907_v29 = vpop.f32.mrf.mxu1  ;;  %v11990_v28 = vld [vmem:[#allocation8 + $0x38] sm:$0xff]  }
 0x1d7   : > { %v10946_v9 = vpop.f32.mrf.mxu0  ;;  %11235 = vmatprep.subr.bf16.mxu0 %v11990_v28 }
 0x1d8   : > { %v2467_v18 = vadd.f32 %v10946_v9, %v13990_v52  ;;  %v14127_v7 = vadd.f32 %v2907_v29, %v2464_v0  ;;  %v10998_v39 = vpop.f32.mrf.mxu1  ;;  %11236 = vmatpush3.bf16.msra.mxu0 %v11990_v28 }
 0x1d9   : > { %v14131_v26 = vpop.f32.mrf.mxu0  ;;  %11237 = vmatprep.subr.bf16.mxu0 %v11992_v63 }
 0x1da   : > { %v14133_v19 = vadd.f32 %v10998_v39, %v2467_v18  ;;  %v14135_v6 = vpop.f32.mrf.mxu1 }
 0x1db   : > { %16813 = vst [vmem:[#allocation25_spill] sm:$0xff] %v14135_v6  ;;  %v10949_v12 = vpop.f32.mrf.mxu0 }
 0x1dc   : > { %11180 = vmatmul.mubr.bf16.gmra.mxu0 %v4085_v4  ;;  %v2470_v32 = vadd.f32 %v10949_v12, %v13997_v21  ;;  %v11001_v52 = vpop.f32.mrf.mxu1  ;;  %v11993_v12 = vld [vmem:[#allocation8 + $0x28] sm:$0xff]  }
 0x1dd   : > { %v2349_v48 = vpop.f32.mrf.mxu0  ;;  %11238 = vmatpush3.bf16.msra.mxu0 %v11992_v63 }
 0x1de   : > { %v2468_v27 = vadd.f32 %v2349_v48, %v14000_v42  ;;  %v14139_v0 = vadd.f32 %v11001_v52, %v2470_v32  ;;  %v2923_v8 = vpop.f32.mrf.mxu1  ;;  %11239 = vmatprep.subr.bf16.mxu0 %v11993_v12 }
 0x1df   : > { %v10950_v29 = vpop.f32.mrf.mxu0 }
 0x1e0   : > { %v2471_v39 = vadd.f32 %v10950_v29, %v14005_v3  ;;  %v14142_v9 = vadd.f32 %v2923_v8, %v2468_v27  ;;  %v11002_v18 = vpop.f32.mrf.mxu1  ;;  %v11995_v29 = vld [vmem:[#allocation8 + $0x20] sm:$0xff]  }
 0x1e1   : > { %v14144_v41 = vpop.f32.mrf.mxu0  ;;  %11240 = vmatpush3.bf16.msra.mxu0 %v11993_v12  ;;  %v11996_v12 = vld [vmem:[#allocation8 + $0x18] sm:$0xff]  }
 0x1e2   : > { %v14146_v21 = vadd.f32 %v11002_v18, %v2471_v39  ;;  %v14148_v4 = vpop.f32.mrf.mxu1  ;;  %11241 = vmatprep.subr.bf16.mxu0 %v11995_v29 }
 0x1e3   : > { %16814 = vst [vmem:[#allocation26_spill] sm:$0xff] %v14148_v4  ;;  %v10953_v42 = vpop.f32.mrf.mxu0  ;;  %v11991_v4 = vld [vmem:[#allocation8 + $0x50] sm:$0xff]  }
 0x1e4   : > { %v2474_v32 = vadd.f32 %v10953_v42, %v14013_v2  ;;  %v11005_v28 = vpop.f32.mrf.mxu1  ;;  %11193 = vmatprep.subr.bf16.mxu1 %v11991_v4 }
 0x1e5   : > { %v2365_v52 = vpop.f32.mrf.mxu0  ;;  %11242 = vmatpush3.bf16.msra.mxu0 %v11995_v29  ;;  %11194 = vmatpush3.bf16.msra.mxu1 %v11991_v4 }
 0x1e6   : > { %v2472_v3 = vadd.f32 %v2365_v52, %v14016_v56  ;;  %v14152_v48 = vadd.f32 %v11005_v28, %v2474_v32  ;;  %v2939_v27 = vpop.f32.mrf.mxu1  ;;  %11243 = vmatprep.subr.bf16.mxu0 %v11996_v12 }
 0x1e7   : > { %v10954_v8 = vpop.f32.mrf.mxu0 }
 0x1e8   : > { %v2475_v39 = vadd.f32 %v10954_v8, %v14021_v57  ;;  %v14155_v18 = vadd.f32 %v2939_v27, %v2472_v3  ;;  %v11006_v63 = vpop.f32.mrf.mxu1 }
 0x1e9   : > { %v14157_v6 = vpop.f32.mrf.mxu0  ;;  %11244 = vmatpush3.bf16.msra.mxu0 %v11996_v12  ;;  %v11997_v12 = vld [vmem:[#allocation8 + $0x40] sm:$0xff]  }
 0x1ea   : > { %16815 = vst [vmem:[#allocation27_spill] sm:$0xff] %v14157_v6  ;;  %v14159_v2 = vadd.f32 %v11006_v63, %v2475_v39  ;;  %v14161_v42 = vpop.f32.mrf.mxu1  ;;  %v11994_v39 = vld [vmem:[#allocation8 + $0x48] sm:$0xff]   ;;  %v11998_v63 = vld [vmem:[#allocation8 + $0x10] sm:$0xff]  }
 0x1eb   : > { %16816 = vst [vmem:[#allocation28_spill] sm:$0xff] %v14161_v42  ;;  %v10957_v56 = vpop.f32.mrf.mxu0  ;;  %11195 = vmatprep.subr.bf16.mxu1 %v11994_v39  ;;  %11245 = vmatprep.subr.bf16.mxu0 %v11998_v63 }
 0x1ec   : > { %v2478_v32 = vadd.f32 %v10957_v56, %v14029_v16  ;;  %v11009_v28 = vpop.f32.mrf.mxu1  ;;  %11196 = vmatpush3.bf16.msra.mxu1 %v11994_v39 }
 0x1ed   : > { %v2381_v57 = vpop.f32.mrf.mxu0  ;;  %11246 = vmatpush3.bf16.msra.mxu0 %v11998_v63  ;;  %11197 = vmatprep.subr.bf16.mxu1 %v11997_v12 }
 0x1ee   : > { %v2476_v52 = vadd.f32 %v2381_v57, %v14032_v60  ;;  %v14165_v3 = vadd.f32 %v11009_v28, %v2478_v32  ;;  %v2955_v27 = vpop.f32.mrf.mxu1  ;;  %v12001_v32 = vld [vmem:[#allocation8 + $0x8] sm:$0xff]  }
 0x1ef   : > { %v10958_v8 = vpop.f32.mrf.mxu0  ;;  %11247 = vmatprep.subr.bf16.mxu0 %v12001_v32 }
 0x1f0   : > { %v2479_v42 = vadd.f32 %v10958_v8, %v14037_v53  ;;  %v14168_v29 = vadd.f32 %v2955_v27, %v2476_v52  ;;  %v11010_v4 = vpop.f32.mrf.mxu1  ;;  %11198 = vmatpush3.bf16.msra.mxu1 %v11997_v12 }
 0x1f1   : > { %v14170_v6 = vpop.f32.mrf.mxu0  ;;  %11248 = vmatpush3.bf16.msra.mxu0 %v12001_v32 }
 0x1f2   : > { %16817 = vst [vmem:[#allocation29_spill] sm:$0xff] %v14170_v6  ;;  %v14172_v16 = vadd.f32 %v11010_v4, %v2479_v42  ;;  %v14174_v56 = vpop.f32.mrf.mxu1  ;;  %v12003_v4 = vld [vmem:[#allocation8] sm:$0xff]  }
 0x1f3   : > { %16818 = vst [vmem:[#allocation30_spill] sm:$0xff] %v14174_v56  ;;  %v10961_v60 = vpop.f32.mrf.mxu0  ;;  %11249 = vmatprep.subr.bf16.mxu0 %v12003_v4 }
 0x1f4   : > { %v2482_v28 = vadd.f32 %v10961_v60, %v14045_v10  ;;  %v11013_v57 = vpop.f32.mrf.mxu1 }
 0x1f5   : > { %v2397_v53 = vpop.f32.mrf.mxu0  ;;  %11250 = vmatpush3.bf16.msra.mxu0 %v12003_v4 }
 0x1f6   : > { %v2480_v52 = vadd.f32 %v2397_v53, %v14048_v22  ;;  %v14178_v27 = vadd.f32 %v11013_v57, %v2482_v28  ;;  %v2971_v8 = vpop.f32.mrf.mxu1 }
 0x1f7   : > { %v10962_v42 = vpop.f32.mrf.mxu0 }
 0x1f8   : > { %v2483_v39 = vadd.f32 %v10962_v42, %v14053_v24  ;;  %v14181_v63 = vadd.f32 %v2971_v8, %v2480_v52  ;;  %v11014_v56 = vpop.f32.mrf.mxu1 }
 0x1f9   : > { %v14183_v6 = vpop.f32.mrf.mxu0 }
 0x1fa   : > { %16819 = vst [vmem:[#allocation31_spill] sm:$0xff] %v14183_v6  ;;  %v14185_v10 = vadd.f32 %v11014_v56, %v2483_v39  ;;  %v14187_v60 = vpop.f32.mrf.mxu1 }
 0x1fb   : > { %16820 = vst [vmem:[#allocation32_spill] sm:$0xff] %v14187_v60  ;;  %v10965_v22 = vpop.f32.mrf.mxu0 }
 0x1fc   : > { %v2486_v28 = vadd.f32 %v10965_v22, %v14061_v13  ;;  %v11017_v12 = vpop.f32.mrf.mxu1 }
 0x1fd   : > { %v2413_v32 = vpop.f32.mrf.mxu0 }
 0x1fe   : > { %v2484_v57 = vadd.f32 %v2413_v32, %v14064_v44  ;;  %v14191_v53 = vadd.f32 %v11017_v12, %v2486_v28  ;;  %v2987_v24 = vpop.f32.mrf.mxu1  ;;  %v14203_v44 = vld [vmem:[#allocation8 + $0xb8] sm:$0xff]  }
 0x1ff   : > { %v10966_v52 = vpop.f32.mrf.mxu0  ;;  %16823 = vst [vmem:[#allocation43_spill] sm:$0xff] %v14203_v44  ;;  %11287 = vmatprep.subr.bf16.mxu1 %v14203_v44 }
 0x200   : > { %v2487_v8 = vadd.f32 %v10966_v52, %v14069_v43  ;;  %v14194_v42 = vadd.f32 %v2987_v24, %v2484_v57  ;;  %v11018_v56 = vpop.f32.mrf.mxu1 }
 0x201   : > { %v14196_v39 = vpop.f32.mrf.mxu0 }
 0x202   : > { %16821 = vst [vmem:[#allocation33_spill] sm:$0xff] %v14196_v39  ;;  %v14198_v60 = vadd.f32 %v11018_v56, %v2487_v8  ;;  %v14200_v4 = vpop.f32.mrf.mxu1 }
 0x203   : > { %16822 = vst [vmem:[#allocation42_spill] sm:$0xff] %v14200_v4  ;;  %v10969_v13 = vpop.f32.mrf.mxu0 }
 0x204   : > { %v2490_v22 = vadd.f32 %v10969_v13, %v14077_v35  ;;  %v11021_v6 = vpop.f32.mrf.mxu1 }
 0x205   : > { %v2429_v28 = vpop.f32.mrf.mxu0 }
 0x206   : > { %v2488_v12 = vadd.f32 %v2429_v28, %v14080_v20  ;;  %v14206_v32 = vadd.f32 %v11021_v6, %v2490_v22  ;;  %v3003_v43 = vpop.f32.mrf.mxu1 }
 0x207   : > { %v10970_v57 = vpop.f32.mrf.mxu0 }
 0x208   : > { %v2491_v24 = vadd.f32 %v10970_v57, %v14085_v23  ;;  %v14210_v52 = vadd.f32 %v3003_v43, %v2488_v12  ;;  %v11022_v8 = vpop.f32.mrf.mxu1 }
 0x209   : > { %v14212_v56 = vpop.f32.mrf.mxu0 }
 0x20a   : > { %v14214_v35 = vadd.f32 %v11022_v8, %v2491_v24  ;;  %v14216_v13 = vpop.f32.mrf.mxu1 }
 0x20b   : > { %16824 = vst [vmem:[#allocation37_spill] sm:$0xff] %v14216_v13 }
 0x20c   : > { %v10973_v4 = vpop.f32.mrf.mxu0  ;;  %v11025_v6 = vpop.f32.mrf.mxu1 }
 0x20d   : > { %v2494_v20 = vadd.f32 %v10973_v4, %v14093_v51 }
 0x20e   : > { %v2445_v22 = vpop.f32.mrf.mxu0  ;;  %v3019_v39 = vpop.f32.mrf.mxu1 }
 0x20f   : > { %v2492_v28 = vadd.f32 %v2445_v22, %v14096_v33  ;;  %v14220_v44 = vadd.f32 %v11025_v6, %v2494_v20 }
 0x210   : > { %v10974_v23 = vpop.f32.mrf.mxu0  ;;  %v11026_v57 = vpop.f32.mrf.mxu1 }
 0x211   : > { %v2495_v12 = vadd.f32 %v10974_v23, %v14101_v37  ;;  %v14223_v43 = vadd.f32 %v3019_v39, %v2492_v28 }
 0x212   : > { %v14225_v24 = vpop.f32.mrf.mxu0  ;;  %v14229_v13 = vpop.f32.mrf.mxu1 }
 0x213   : > { %v14227_v8 = vadd.f32 %v11026_v57, %v2495_v12  ;;  %16825 = vst [vmem:[#allocation34_spill] sm:$0xff] %v14229_v13 }
 0x214   : > { %v11045_v51 = vpop.f32.mrf.mxu0  ;;  %v14234_v33 = vpop.f32.mrf.mxu1 }
 0x215   : > { %v14232_v4 = vadd.f32 %v11045_v51, %v14109_v58 }
 0x216   : > { %v3464_v20 = vpop.f32.mrf.mxu0  ;;  %v14239_v37 = vpop.f32.mrf.mxu1 }
 0x217   : > { %v14237_v6 = vadd.f32 %v3464_v20, %v14112_v5 }
 0x218   : > { %v11046_v39 = vpop.f32.mrf.mxu0  ;;  %v14244_v28 = vpop.f32.mrf.mxu1 }
 0x219   : > { %v14242_v22 = vadd.f32 %v11046_v39, %v14116_v46  ;;  %16827 = vst [vmem:[#allocation13_spill] sm:$0xff] %v14244_v28 }
 0x21a   : > { %v14246_v23 = vpop.f32.mrf.mxu0  ;;  %v14248_v12 = vpop.f32.mrf.mxu1 }
 0x21b   : > { %16826 = vst [vmem:[#allocation35_spill] sm:$0xff] %v14242_v22  ;;  %16828 = vst [vmem:[#allocation36_spill] sm:$0xff] %v14248_v12 }
 0x21c   : > { %v11049_v58 = vpop.f32.mrf.mxu0  ;;  %v14253_v51 = vpop.f32.mrf.mxu1 }
 0x21d   : > { %v14251_v57 = vadd.f32 %v11049_v58, %v14124_v31  ;;  %16829 = vst [vmem:[#allocation14_spill] sm:$0xff] %v14253_v51  ;;  %v14269_v58 = vpop.permute.xlu0 %11730 }
 0x21e   : > { %v3480_v5 = vpop.f32.mrf.mxu0  ;;  %v14258_v13 = vpop.f32.mrf.mxu1 }
 0x21f   : > { %v14256_v20 = vadd.f32 %v3480_v5, %v14127_v7  ;;  %16831 = vst [vmem:[#allocation16_spill] sm:$0xff] %v14258_v13 }
 0x220   : > { %v11050_v46 = vpop.f32.mrf.mxu0  ;;  %v14263_v28 = vpop.f32.mrf.mxu1 }
 0x221   : > { %16830 = vst [vmem:[#allocation15_spill] sm:$0xff] %v14256_v20  ;;  %v14261_v39 = vadd.f32 %v11050_v46, %v14133_v19  ;;  %16833 = vst [vmem:[#allocation38_spill] sm:$0xff] %v14263_v28  ;;  %v14281_v28 = vpop.permute.xlu1 %11736 }
 0x222   : > { %v14265_v22 = vpop.f32.mrf.mxu0  ;;  %v14267_v12 = vpop.f32.mrf.mxu1 }
 0x223   : > { %16832 = vst [vmem:[#allocation17_spill] sm:$0xff] %v14261_v39  ;;  %16834 = vst [vmem:[#allocation41_spill] sm:$0xff] %v14267_v12 }
 0x224   : > { %v11053_v31 = vpop.f32.mrf.mxu0  ;;  %v14274_v7 = vpop.f32.mrf.mxu1 }
 0x225   : > { %v14272_v51 = vadd.f32 %v11053_v31, %v14139_v0  ;;  %16836 = vst [vmem:[#allocation19_spill] sm:$0xff] %v14274_v7  ;;  %v14290_v0 = vpop.permute.xlu0 %4492 }
 0x226   : > { %v3496_v5 = vpop.f32.mrf.mxu0  ;;  %v14279_v19 = vpop.f32.mrf.mxu1  ;;  %16841 = vst [vmem:[#allocation40_spill] sm:$0xff] %v14290_v0 }
 0x227   : > { %16835 = vst [vmem:[#allocation18_spill] sm:$0xff] %v14272_v51  ;;  %v14277_v13 = vadd.f32 %v3496_v5, %v14142_v9  ;;  %16838 = vst [vmem:[#allocation21_spill] sm:$0xff] %v14279_v19  ;;  %v14301_v51 = vld [vmem:[#allocation8 + $0xf8] sm:$0xff]  }
 0x228   : > { %v11054_v46 = vpop.f32.mrf.mxu0  ;;  %v14286_v12 = vpop.f32.mrf.mxu1  ;;  %16845 = vst [vmem:[#allocation47_spill] sm:$0xff] %v14301_v51  ;;  %11339 = vmatprep.subr.bf16.mxu0 %v14301_v51 }
 0x229   : > { %16837 = vst [vmem:[#allocation20_spill] sm:$0xff] %v14277_v13  ;;  %v14284_v39 = vadd.f32 %v11054_v46, %v14146_v21  ;;  %16840 = vst [vmem:[#allocation22_spill] sm:$0xff] %v14286_v12  ;;  %v14299_v13 = vpop.permute.xlu1 %11741  ;;  %v14308_v0 = vpop.permute.xlu0 %11746 }
 0x22a   : > { %v14288_v20 = vpop.f32.mrf.mxu0  ;;  %v14292_v31 = vpop.f32.mrf.mxu1  ;;  %16848 = vst [vmem:[#allocation50_spill] sm:$0xff] %v14308_v0 }
 0x22b   : > { %16839 = vst [vmem:[#allocation39_spill] sm:$0xff] %v14284_v39  ;;  %16842 = vst [vmem:[#allocation44_spill] sm:$0xff] %v14292_v31 }
 0x22c   : > { %v11057_v7 = vpop.f32.mrf.mxu0  ;;  %v14297_v5 = vpop.f32.mrf.mxu1 }
 0x22d   : > { %v14295_v9 = vadd.f32 %v11057_v7, %v14152_v48  ;;  %16844 = vst [vmem:[#allocation46_spill] sm:$0xff] %v14297_v5  ;;  %v14320_v39 = vpop.permute.xlu1 %11751 }
 0x22e   : > { %v3512_v19 = vpop.f32.mrf.mxu0  ;;  %v14306_v46 = vpop.f32.mrf.mxu1 }
 0x22f   : > { %16843 = vst [vmem:[#allocation45_spill] sm:$0xff] %v14295_v9  ;;  %v14304_v21 = vadd.f32 %v3512_v19, %v14155_v18  ;;  %16847 = vst [vmem:[#allocation49_spill] sm:$0xff] %v14306_v46 }
 0x230   : > { %v11058_v12 = vpop.f32.mrf.mxu0  ;;  %v14314_v7 = vpop.f32.mrf.mxu1 }
 0x231   : > { %16846 = vst [vmem:[#allocation48_spill] sm:$0xff] %v14304_v21  ;;  %v14312_v48 = vadd.f32 %v11058_v12, %v14159_v2  ;;  %16850 = vst [vmem:[#allocation52_spill] sm:$0xff] %v14314_v7  ;;  %v14327_v21 = vpop.permute.xlu0 %11756 }
 0x232   : > { %v14316_v5 = vpop.f32.mrf.mxu0  ;;  %v14318_v9 = vpop.f32.mrf.mxu1  ;;  %16854 = vst [vmem:[#allocation56_spill] sm:$0xff] %v14327_v21 }
 0x233   : > { %16849 = vst [vmem:[#allocation51_spill] sm:$0xff] %v14312_v48  ;;  %16851 = vst [vmem:[#allocation53_spill] sm:$0xff] %v14318_v9 }
 0x234   : > { %v11061_v31 = vpop.f32.mrf.mxu0  ;;  %v14325_v19 = vpop.f32.mrf.mxu1 }
 0x235   : > { %v14323_v18 = vadd.f32 %v11061_v31, %v14165_v3  ;;  %16853 = vst [vmem:[#allocation55_spill] sm:$0xff] %v14325_v19  ;;  %v14341_v3 = vpop.permute.xlu1 %11761 }
 0x236   : > { %v3528_v46 = vpop.f32.mrf.mxu0  ;;  %v14332_v12 = vpop.f32.mrf.mxu1  ;;  %16860 = vst [vmem:[#allocation62_spill] sm:$0xff] %v14341_v3 }
 0x237   : > { %16852 = vst [vmem:[#allocation54_spill] sm:$0xff] %v14323_v18  ;;  %v14330_v2 = vadd.f32 %v3528_v46, %v14168_v29  ;;  %16856 = vst [vmem:[#allocation58_spill] sm:$0xff] %v14332_v12  ;;  %v14345_v18 = vpop.permute.xlu0 %11766 }
 0x238   : > { %v11062_v51 = vpop.f32.mrf.mxu0  ;;  %v14337_v9 = vpop.f32.mrf.mxu1  ;;  %16862 = vst [vmem:[#allocation64_spill] sm:$0xff] %v14345_v18 }
 0x239   : > { %16855 = vst [vmem:[#allocation57_spill] sm:$0xff] %v14330_v2  ;;  %v14335_v7 = vadd.f32 %v11062_v51, %v14172_v16  ;;  %16858 = vst [vmem:[#allocation60_spill] sm:$0xff] %v14337_v9 }
 0x23a   : > { %v14339_v48 = vpop.f32.mrf.mxu0  ;;  %v14343_v31 = vpop.f32.mrf.mxu1 }
 0x23b   : > { %16857 = vst [vmem:[#allocation59_spill] sm:$0xff] %v14335_v7  ;;  %16859 = vst [vmem:[#allocation61_spill] sm:$0xff] %v14339_v48  ;;  %v14357_v7 = vpop.permute.xlu1 %11771 }
 0x23c   : > { %16861 = vst [vmem:[#allocation63_spill] sm:$0xff] %v14343_v31  ;;  %v11065_v19 = vpop.f32.mrf.mxu0  ;;  %v14350_v46 = vpop.f32.mrf.mxu1  ;;  %16867 = vst [vmem:[#allocation69_spill] sm:$0xff] %v14357_v7 }
 0x23d   : > { %v14348_v29 = vadd.f32 %v11065_v19, %v14178_v27  ;;  %16864 = vst [vmem:[#allocation66_spill] sm:$0xff] %v14350_v46  ;;  %v14366_v27 = vpop.permute.xlu0 %11776 }
 0x23e   : > { %v3544_v12 = vpop.f32.mrf.mxu0  ;;  %v14355_v51 = vpop.f32.mrf.mxu1  ;;  %16870 = vst [vmem:[#allocation72_spill] sm:$0xff] %v14366_v27 }
 0x23f   : > { %16863 = vst [vmem:[#allocation65_spill] sm:$0xff] %v14348_v29  ;;  %v14353_v16 = vadd.f32 %v3544_v12, %v14181_v63  ;;  %16866 = vst [vmem:[#allocation68_spill] sm:$0xff] %v14355_v51  ;;  %v1192_v12 = vadd.f32 %v13944_v30, %v13940_v36  ;;  %v2156_v30 = vadd.f32 %v14007_v15, %v14003_v61 }
 0x240   : > { %v11066_v9 = vpop.f32.mrf.mxu0  ;;  %v14362_v31 = vpop.f32.mrf.mxu1 }
 0x241   : > { %16865 = vst [vmem:[#allocation67_spill] sm:$0xff] %v14353_v16  ;;  %v14360_v2 = vadd.f32 %v11066_v9, %v14185_v10  ;;  %16869 = vst [vmem:[#allocation71_spill] sm:$0xff] %v14362_v31  ;;  %v14375_v16 = vpop.permute.xlu1 %11781  ;;  %v1585_v31 = vadd.f32 %v14099_v17, %v1192_v12  ;;  %v14383_v29 = vpop.permute.xlu0 %11786  ;;  %v14400_v17 = vadd.f32 %v14039_v49, %v14035_v34  ;;  %v16873_v34 = vld [vmem:[#allocation23_spill] sm:$0xff] }
 0x242   : > { %v14364_v48 = vpop.f32.mrf.mxu0  ;;  %v14368_v19 = vpop.f32.mrf.mxu1  ;;  %16871 = vst [vmem:[#allocation73_spill] sm:$0xff] %v14375_v16  ;;  %16872 = vst [vmem:[#allocation74_spill] sm:$0xff] %v14383_v29  ;;  %v16908_v16 = vld [vmem:[#allocation21_spill] sm:$0xff] }
 0x243   : > { %16868 = vst [vmem:[#allocation70_spill] sm:$0xff] %v14360_v2  ;;  %v14422_v49 = vadd.f32 %v16873_v34, %v1585_v31 }
 0x244   : > { %v11069_v46 = vpop.f32.mrf.mxu0  ;;  %v14380_v9 = vpop.f32.mrf.mxu1 }
 0x245   : > { %v14371_v63 = vadd.f32 %v11069_v46, %v14191_v53  ;;  %v2148_v53 = vadd.f32 %v13973_v47, %v13969_v38  ;;  %v2152_v46 = vadd.f32 %v13992_v54, %v13988_v25  ;;  %v14404_v38 = vadd.f32 %v14055_v45, %v14051_v40  ;;  %v14438_v45 = vpop.permute.xlu0 %11796 }
 0x246   : > { %v3560_v51 = vpop.f32.mrf.mxu0  ;;  %v14410_v25 = vadd.f32 %v14071_v50, %v14067_v59  ;;  %v14426_v50 = vpop.permute.xlu1 %11791  ;;  %16875 = vst [vmem:[#allocation75_spill] sm:$0xff] %v14438_v45 }
 0x247   : > { %v14378_v10 = vadd.f32 %v3560_v51, %v14194_v42  ;;  %v14396_v42 = vadd.f32 %v14023_v11, %v14019_v55  ;;  %v2461_v54 = vadd.f32 %v14114_v14, %v2148_v53  ;;  %v14415_v55 = vpop.f32.mrf.mxu1  ;;  %v14419_v11 = vadd.f32 %v14087_v62, %v14083_v1  ;;  %16874 = vst [vmem:[#allocation23_spill] sm:$0xff] %v14426_v50  ;;  %v4877_v62 = vld [vmem:[#allocation2 + $0x4] sm:$0xf]  ;;  %v4876_v51 = vld [vmem:[#allocation2] sm:$0xc] }
 0x248   : > { %v11070_v2 = vpop.f32.mrf.mxu0  ;;  %v4929_v14 = vld [vmem:[#allocation2] sm:$0x8]  ;;  %v2469_v53 = vadd.f32 %v14144_v41, %v2156_v30  ;;  %v9609_v21 = vcombine.low %v4876_v51, %v4877_v62 }
 0x249   : > { %v14390_v36 = vadd.f32 %v11070_v2, %v14198_v60  ;;  %v16876_v60 = vld [vmem:[#allocation24_spill] sm:$0xff]  ;;  %v14474_v30 = vpop.permute.xlu0 %11806 }
 0x24a   : > { %v14406_v47 = vpop.f32.mrf.mxu0  ;;  %v3035_v61 = vadd.f32 %v16876_v60, %v2461_v54  ;;  %v14456_v54 = vcombine.low %v4929_v14, %v4877_v62  ;;  %v14464_v51 = vpop.permute.xlu1 %11801  ;;  %v5326_v34 = vshll.u32 %v9609_v21, 16  ;;  %v16881_v62 = vld [vmem:[#allocation27_spill] sm:$0xff] }
 0x24b   : > { %16877 = vst [vmem:[#allocation24_spill] sm:$0xff] %v14464_v51 }
 0x24c   : > { %v11073_v59 = vpop.f32.mrf.mxu0  ;;  %v5759_v14 = vshll.u32 %v14456_v54, 16 }
 0x24d   : > { %v14431_v2 = vadd.f32 %v11073_v59, %v14206_v32  ;;  %v2465_v32 = vadd.f32 %v14131_v26, %v2152_v46  ;;  %v14442_v59 = vpop.f32.mrf.mxu1  ;;  %v16879_v46 = vld [vmem:[#allocation26_spill] sm:$0xff]  ;;  %v2473_v26 = vadd.f32 %v16881_v62, %v14396_v42  ;;  %v16882_v42 = vld [vmem:[#allocation29_spill] sm:$0xff] }
 0x24e   : > { %v3576_v12 = vpop.f32.mrf.mxu0  ;;  %v3043_v60 = vadd.f32 %v16879_v46, %v2469_v53  ;;  %v2477_v62 = vadd.f32 %v16882_v42, %v14400_v17  ;;  %v14498_v41 = vpop.permute.xlu1 %11811  ;;  %v14511_v27 = vrot.slane %v5759_v14, 4  ;;  %v16889_v17 = vld [vmem:[#allocation28_spill] sm:$0xff]  ;;  %v16890_v46 = vld [vmem:[#allocation33_spill] sm:$0xff] }
 0x24f   : > { %v14445_v1 = vadd.f32 %v3576_v12, %v14210_v52  ;;  %v14467_v31 = vpop.f32.mrf.mxu1  ;;  %v5323_v12 = vshrl.u32 %v9609_v21, 16  ;;  %16883 = vst [vmem:[#allocation26_spill] sm:$0xff] %v14498_v41  ;;  %v3047_v42 = vadd.f32 %v16889_v17, %v2473_v26  ;;  %v2485_v51 = vadd.f32 %v16890_v46, %v14410_v25  ;;  %v16891_v25 = vld [vmem:[#allocation30_spill] sm:$0xff]  ;;  %v16892_v46 = vld [vmem:[#allocation32_spill] sm:$0xff] }
 0x250   : > { %v11074_v15 = vpop.f32.mrf.mxu0  ;;  %16888 = vst [vmem:[#allocation76_spill] sm:$0xff] %v14511_v27  ;;  %v3616_v14 = vadd.f32 %v14288_v20, %v3043_v60  ;;  %v16902_v60 = vld [vmem:[#allocation17_spill] sm:$0xff]  ;;  %v16903_v26 = vld [vmem:[#allocation38_spill] sm:$0xff] }
 0x251   : > { %v14452_v0 = vadd.f32 %v11074_v15, %v14214_v35  ;;  %v16878_v35 = vld [vmem:[#allocation25_spill] sm:$0xff]  ;;  %v14487_v21 = vpop.f32.mrf.mxu1  ;;  %v14500_v45 = vrot.slane %v5323_v12, 2  ;;  %v2489_v12 = vadd.f32 %v14212_v56, %v14419_v11  ;;  %v3620_v27 = vadd.f32 %v14316_v5, %v3047_v42 }
 0x252   : > { %v14458_v52 = vpop.f32.mrf.mxu0  ;;  %v3039_v15 = vadd.f32 %v16878_v35, %v2465_v32  ;;  %16880 = vst [vmem:[#allocation25_spill] sm:$0xff] %v14474_v30  ;;  %v5756_v35 = vshrl.u32 %v14456_v54, 16  ;;  %v14502_v30 = vrot.slane %v5326_v34, 3  ;;  %v2493_v34 = vadd.f32 %v14225_v24, %v14422_v49  ;;  %v16904_v24 = vld [vmem:[#allocation41_spill] sm:$0xff] }
 0x253   : > { %16884 = vst [vmem:[#allocation27_spill] sm:$0xff] %v14500_v45  ;;  %v3951_v49 = vadd.f32 %v16903_v26, %v16902_v60  ;;  %v16911_v26 = vld [vmem:[#allocation44_spill] sm:$0xff]  ;;  %v16912_v5 = vld [vmem:[#allocation61_spill] sm:$0xff] }
 0x254   : > { %v11077_v40 = vpop.f32.mrf.mxu0  ;;  %16885 = vst [vmem:[#allocation29_spill] sm:$0xff] %v14502_v30  ;;  %v14509_v32 = vrot.slane %v5756_v35, 3  ;;  %v3051_v35 = vadd.f32 %v16891_v25, %v2477_v62  ;;  %v3612_v56 = vadd.f32 %v14265_v22, %v3039_v15  ;;  %v16894_v62 = vld [vmem:[#allocation37_spill] sm:$0xff]  ;;  %v16895_v22 = vld [vmem:[#allocation34_spill] sm:$0xff] }
 0x255   : > { %v14477_v29 = vadd.f32 %v11077_v40, %v14220_v44  ;;  %v3063_v25 = vadd.f32 %v16894_v62, %v2489_v12  ;;  %v14542_v15 = vadd.f32 %v16895_v22, %v2493_v34  ;;  %v16900_v62 = vld [vmem:[#allocation15_spill] sm:$0xff]  ;;  %v16901_v22 = vld [vmem:[#allocation16_spill] sm:$0xff] }
 0x256   : > { %v3592_v53 = vpop.f32.mrf.mxu0  ;;  %v3948_v20 = vadd.f32 %v16901_v22, %v16900_v62  ;;  %v16910_v62 = vld [vmem:[#allocation22_spill] sm:$0xff]  ;;  %v3624_v42 = vadd.f32 %v16912_v5, %v3051_v35  ;;  %v16922_v35 = vld [vmem:[#allocation55_spill] sm:$0xff] }
 0x257   : > { %v14490_v44 = vadd.f32 %v3592_v53, %v14223_v43  ;;  %v16886_v43 = vld [vmem:[#allocation31_spill] sm:$0xff] }
 0x258   : > { %v11078_v7 = vpop.f32.mrf.mxu0  ;;  %v2481_v53 = vadd.f32 %v16886_v43, %v14404_v38  ;;  %16887 = vst [vmem:[#allocation31_spill] sm:$0xff] %v14509_v32  ;;  %v14525_v38 = vpop.f32.mrf.mxu1  ;;  %v16893_v43 = vld [vmem:[#allocation42_spill] sm:$0xff]  ;;  %v3949_v32 = vadd.f32 %v16904_v24, %v3612_v56  ;;  %v14576_v56 = vadd.f32 %v16911_v26, %v3616_v14  ;;  %v16919_v14 = vld [vmem:[#allocation53_spill] sm:$0xff] }
 0x259   : > { %v14507_v40 = vadd.f32 %v11078_v7, %v14227_v8  ;;  %v3946_v8 = vadd.f32 %v14234_v33, %v14232_v4  ;;  %v3608_v7 = vadd.f32 %v14246_v23, %v3035_v61  ;;  %v3944_v33 = vadd.f32 %v14239_v37, %v14237_v6  ;;  %v16896_v6 = vld [vmem:[#allocation35_spill] sm:$0xff]  ;;  %v16897_v37 = vld [vmem:[#allocation13_spill] sm:$0xff] }
 0x25a   : > { %v14520_v50 = vpop.f32.mrf.mxu0  ;;  %v3055_v4 = vadd.f32 %v16892_v46, %v2481_v53  ;;  %v3059_v17 = vadd.f32 %v16893_v43, %v2485_v51  ;;  %v14548_v53 = vld [vmem:[%s16480_s2] ss:$0 sm:$0xff]  ;;  %v14555_v12 = vpop.f32.mrf.mxu1  ;;  %v14592_v26 = vadd.f32 %v16919_v14, %v3620_v27  ;;  %v16928_v27 = vld [vmem:[#allocation59_spill] sm:$0xff]  ;;  %v16929_v14 = vld [vmem:[#allocation60_spill] sm:$0xff] }
 0x25b   : > { %v16899_v51 = vld [vmem:[#allocation14_spill] sm:$0xff] }
 0x25c   : > { %v11149_v11 = vpop.f32.mrf.mxu0  ;;  %v3950_v43 = vadd.f32 %v16899_v51, %v14251_v57  ;;  %v16909_v51 = vld [vmem:[#allocation39_spill] sm:$0xff]  ;;  %16920 = vst [vmem:[#allocation28_spill] sm:$0xff] %v14592_v26  ;;  %v3628_v5 = vadd.f32 %v14364_v48, %v3055_v4  ;;  %v14608_v26 = vadd.f32 %v16929_v14, %v16928_v27 }
 0x25d   : > { %v4331_v23 = vadd.f32 %v11149_v11, %v3946_v8  ;;  %v3947_v8 = vadd.f32 %v16897_v37, %v16896_v6  ;;  %v16898_v11 = vld [vmem:[#allocation36_spill] sm:$0xff]  ;;  %v16905_v6 = vld [vmem:[#allocation18_spill] sm:$0xff]  ;;  %v16906_v37 = vld [vmem:[#allocation19_spill] sm:$0xff]  ;;  %v14573_v22 = vadd.f32 %v16910_v62, %v16909_v51 }
 0x25e   : > { %v4186_v46 = vpop.f32.mrf.mxu0  ;;  %v3945_v61 = vadd.f32 %v16898_v11, %v3608_v7  ;;  %v3954_v7 = vadd.f32 %v16906_v37, %v16905_v6  ;;  %v16907_v11 = vld [vmem:[#allocation20_spill] sm:$0xff]  ;;  %v16913_v6 = vld [vmem:[#allocation45_spill] sm:$0xff]  ;;  %v16914_v37 = vld [vmem:[#allocation46_spill] sm:$0xff] }
 0x25f   : > { %v4329_v34 = vadd.f32 %v4186_v46, %v3944_v33  ;;  %v14567_v57 = vadd.f32 %v16908_v16, %v16907_v11  ;;  %v4374_v33 = vadd.f32 %v14548_v53, %v4331_v23  ;;  %v14581_v18 = vadd.f32 %v16914_v37, %v16913_v6  ;;  %v16915_v16 = vld [vmem:[#allocation48_spill] sm:$0xff]  ;;  %v16916_v11 = vld [vmem:[#allocation49_spill] sm:$0xff]  ;;  %v16917_v51 = vld [vmem:[#allocation51_spill] sm:$0xff] }
 0x260   : > { %v11150_v41 = vpop.f32.mrf.mxu0  ;;  %v14585_v23 = vadd.f32 %v16916_v11, %v16915_v16  ;;  %v16918_v62 = vld [vmem:[#allocation52_spill] sm:$0xff]  ;;  %v16924_v16 = vunpack.i.l.bf16 %v14269_v58  ;;  %v16937_v27 = vld [vmem:[#allocation71_spill] sm:$0xff] }
 0x261   : > { %v4372_v46 = vadd.f32 %v14548_v53, %v4329_v34  ;;  %v4332_v24 = vadd.f32 %v11150_v41, %v3947_v8  ;;  %v3916_v34 = vpop.f32.mrf.mxu1  ;;  %v14589_v30 = vadd.f32 %v16918_v62, %v16917_v51  ;;  %v16921_v41 = vld [vmem:[#allocation54_spill] sm:$0xff]  ;;  %v4410_v37 = vmax.f32 %v4374_v33, 0.0  ;;  %v16932_v33 = vld [vmem:[#allocation65_spill] sm:$0xff] }
 0x262   : > { %v4189_v60 = vpop.f32.mrf.mxu0  ;;  %v14596_v8 = vadd.f32 %v16922_v35, %v16921_v41  ;;  %v16926_v51 = vld [vmem:[#allocation58_spill] sm:$0xff]  ;;  %v16930_v41 = vld [vmem:[#allocation63_spill] sm:$0xff] }
 0x263   : > { %v4408_v3 = vmax.f32 %v4372_v46, 0.0  ;;  %v4330_v45 = vadd.f32 %v4189_v60, %v3945_v61  ;;  %v16925_v60 = vld [vmem:[#allocation57_spill] sm:$0xff]  ;;  %v14611_v35 = vadd.f32 %v16930_v41, %v3624_v42  ;;  %v4375_v48 = vadd.f32 %v14548_v53, %v4332_v24 }
 0x264   : > { %16923 = vst [vmem:[#allocation33_spill] sm:$0xff] %v14596_v8  ;;  %v11153_v6 = vpop.f32.mrf.mxu0  ;;  %v14604_v62 = vadd.f32 %v16926_v51, %v16925_v60  ;;  %v16933_v8 = vld [vmem:[#allocation66_spill] sm:$0xff]  ;;  %v14627_v42 = vadd.f32 %v14368_v19, %v3628_v5  ;;  %v3632_v24 = vadd.f32 %v14406_v47, %v3059_v17  ;;  %v3636_v19 = vadd.f32 %v14458_v52, %v3063_v25 }
 0x265   : > { %v4660_v11 = vmul.f32 %v16924_v16, %v4408_v3  ;;  %v4373_v61 = vadd.f32 %v14548_v53, %v4330_v45  ;;  %v4335_v46 = vadd.f32 %v11153_v6, %v3950_v43  ;;  %16931 = vst [vmem:[#allocation32_spill] sm:$0xff] %v14611_v35  ;;  %v14616_v3 = vadd.f32 %v16933_v8, %v16932_v33  ;;  %v16934_v45 = vld [vmem:[#allocation67_spill] sm:$0xff]  ;;  %v16935_v43 = vld [vmem:[#allocation68_spill] sm:$0xff]  ;;  %v11129_v16 = vpop.f32.mrf.mxu1 }
 0x266   : > { %16927 = vst [vmem:[#allocation30_spill] sm:$0xff] %v14604_v62  ;;  %v4202_v4 = vpop.f32.mrf.mxu0  ;;  %v14620_v6 = vadd.f32 %v16935_v43, %v16934_v45  ;;  %v16936_v62 = vld [vmem:[#allocation70_spill] sm:$0xff]  ;;  %v16938_v8 = vld [vmem:[#allocation40_spill] sm:$0xff]  ;;  %v16939_v45 = vunpack.i.h.bf16 %v14269_v58  ;;  %v4411_v5 = vmax.f32 %v4375_v48, 0.0  ;;  %v14646_v58 = vadd.f32 %v14442_v59, %v14390_v36 }
 0x267   : > { %v9792_v60 = vpack.c.bf16 %v4660_v11, %v4660_v11  ;;  %v4409_v51 = vmax.f32 %v4373_v61, 0.0  ;;  %v14624_v14 = vadd.f32 %v16937_v27, %v16936_v62  ;;  %v4333_v41 = vadd.f32 %v4202_v4, %v3948_v20 }
 0x268   : > { %v11154_v35 = vpop.f32.mrf.mxu0  ;;  %v4662_v33 = vmul.f32 %v16938_v8, %v4410_v37  ;;  %v4378_v11 = vadd.f32 %v14548_v53, %v4335_v46  ;;  %v14636_v62 = vadd.f32 %v14380_v9, %v14371_v63  ;;  %v14642_v20 = vadd.f32 %v14415_v55, %v14378_v10  ;;  %v3929_v37 = vpop.f32.mrf.mxu1 }
 0x269   : > { %4840 = vst [vmem:[#allocation2 + $0xc] sm:$0xf] %v9792_v60  ;;  %v4661_v43 = vmul.f32 %v16939_v45, %v4409_v51  ;;  %v4336_v61 = vadd.f32 %v11154_v35, %v3951_v49  ;;  %v4376_v47 = vadd.f32 %v14548_v53, %v4333_v41  ;;  %v14649_v63 = vadd.f32 %v14467_v31, %v3632_v24 }
 0x26a   : > { %v4205_v17 = vpop.f32.mrf.mxu0  ;;  %v14653_v9 = vadd.f32 %v14487_v21, %v14431_v2  ;;  %v14658_v10 = vadd.f32 %v14525_v38, %v14445_v1  ;;  %v4414_v36 = vmax.f32 %v4378_v11, 0.0  ;;  %v14663_v31 = vadd.f32 %v14555_v12, %v14452_v0  ;;  %v11130_v38 = vpop.f32.mrf.mxu1 }
 0x26b   : > { %v9939_v49 = vpack.c.bf16 %v4662_v33, %v4661_v43  ;;  %v4334_v46 = vadd.f32 %v4205_v17, %v3949_v32  ;;  %v4412_v52 = vmax.f32 %v4376_v47, 0.0  ;;  %v4379_v25 = vadd.f32 %v14548_v53, %v4336_v61  ;;  %v16944_v17 = vld [vmem:[#allocation50_spill] sm:$0xff] }
 0x26c   : > { %v11157_v35 = vpop.f32.mrf.mxu0  ;;  %v14665_v32 = vadd.f32 %v3916_v34, %v3636_v19  ;;  %v16940_v2 = vunpack.i.l.bf16 %v14281_v28  ;;  %v16941_v48 = vunpack.i.h.bf16 %v14281_v28  ;;  %v14672_v1 = vadd.f32 %v11129_v16, %v14477_v29  ;;  %v3932_v47 = vpop.f32.mrf.mxu1 }
 0x26d   : > { %10196 = vst [vmem:[#allocation2 + $0x10] sm:$0xff] %v9939_v49   ;;  %v4377_v55 = vadd.f32 %v14548_v53, %v4334_v46  ;;  %v4339_v59 = vadd.f32 %v11157_v35, %v3954_v7  ;;  %v14677_v0 = vadd.f32 %v3929_v37, %v14490_v44  ;;  %v3640_v12 = vadd.f32 %v14520_v50, %v14542_v15 }
 0x26e   : > { %v4663_v21 = vmul.f32 %v16940_v2, %v4411_v5  ;;  %v4664_v4 = vmul.f32 %v16941_v48, %v4412_v52  ;;  %v4218_v60 = vpop.f32.mrf.mxu0  ;;  %v4415_v24 = vmax.f32 %v4379_v25, 0.0  ;;  %v16942_v29 = vunpack.i.h.bf16 %v14299_v13 }
 0x26f   : > { %v4413_v51 = vmax.f32 %v4377_v55, 0.0  ;;  %v4382_v7 = vadd.f32 %v14548_v53, %v4339_v59  ;;  %v4337_v27 = vadd.f32 %v4218_v60, %v14567_v57  ;;  %v16943_v8 = vunpack.i.l.bf16 %v14299_v13 }
 0x270   : > { %v9944_v34 = vpack.c.bf16 %v4664_v4, %v4663_v21  ;;  %v11158_v28 = vpop.f32.mrf.mxu0  ;;  %v14681_v41 = vld [vmem:[#allocation2 + $0x8] sm:$0xff]   ;;  %v4666_v16 = vmul.f32 %v16942_v29, %v4414_v36  ;;  %v14690_v44 = vadd.f32 %v11130_v38, %v14507_v40  ;;  %v16945_v37 = vunpack.i.l.bf16 %v16944_v17 }
 0x271   : > { %v4665_v33 = vmul.f32 %v16943_v8, %v4413_v51  ;;  %v4380_v45 = vadd.f32 %v14548_v53, %v4337_v27  ;;  %v4340_v57 = vadd.f32 %v11158_v28, %v14573_v22  ;;  %v5040_v15 = vrot.slane %v14681_v41, 3  ;;  %v12008_v27 = vld [vmem:[#allocation8 + $0xb0] sm:$0xff]  }
 0x272   : > { %10197 = vst [vmem:[#allocation2 + $0x18] sm:$0xff] %v9944_v34   ;;  %v4221_v50 = vpop.f32.mrf.mxu0  ;;  %v5331_v43 = vshrl.u32 %v14681_v41, 16  ;;  %v5334_v11 = vshll.u32 %v14681_v41, 16  ;;  %v4418_v19 = vmax.f32 %v4382_v7, 0.0  ;;  %v4667_v22 = vmul.f32 %v16945_v37, %v4415_v24  ;;  %v16953_v37 = vld [vmem:[#allocation27_spill] sm:$0xff] }
 0x273   : > { %v9949_v61 = vpack.c.bf16 %v4666_v16, %v4665_v33  ;;  %v4416_v5 = vmax.f32 %v4380_v45, 0.0  ;;  %v4383_v13 = vadd.f32 %v14548_v53, %v4340_v57  ;;  %v4338_v40 = vadd.f32 %v4221_v50, %v14576_v56  ;;  %v16949_v50 = vld [vmem:[#allocation56_spill] sm:$0xff] }
 0x274   : > { %v11161_v49 = vpop.f32.mrf.mxu0  ;;  %v16946_v46 = vrot.slane %v14456_v54, 3  ;;  %v14702_v25 = vld [vmem:[#allocation2 + $0x10] sm:$0xff]   ;;  %v5333_v35 = vrot.slane %v5331_v43, 2  ;;  %v16947_v36 = vunpack.i.h.bf16 %v16944_v17  ;;  %v5336_v21 = vrot.slane %v5334_v11, 3  ;;  %v16952_v17 = vld [vmem:[#allocation29_spill] sm:$0xff] }
 0x275   : > { %10198 = vst [vmem:[#allocation2 + $0x20] sm:$0xff] %v9949_v61   ;;  %v4419_v59 = vmax.f32 %v4383_v13, 0.0  ;;  %v4343_v2 = vadd.f32 %v11161_v49, %v14581_v18  ;;  %v4381_v56 = vadd.f32 %v14548_v53, %v4338_v40  ;;  %v5042_v54 = vrot.slane %v14702_v25, 3  ;;  %v16955_v40 = vld [vmem:[#allocation43_spill] sm:$0xff]  ;;  %v12011_v49 = vld [vmem:[#allocation8 + $0xa8] sm:$0xff]  }
 0x276   : > { %v5041_v52 = vsel %vm505_vm1, %v16946_v46, %v5040_v15  ;;  %v4668_v55 = vmul.f32 %v16947_v36, %v4416_v5  ;;  %v4234_v48 = vpop.f32.mrf.mxu0  ;;  %v5340_v4 = vshrl.u32 %v14702_v25, 16  ;;  %v5343_v60 = vshll.u32 %v14702_v25, 16 }
 0x277   : > { %11199 = vmatprep.mubr.bf16.mxu1 %v5041_v52  ;;  %v14713_v38 = vadd.f32 %v3932_v47, %v3640_v12  ;;  %v4386_v7 = vadd.f32 %v14548_v53, %v4343_v2  ;;  %v4341_v18 = vadd.f32 %v4234_v48, %v14585_v23  ;;  %v4417_v34 = vmax.f32 %v4381_v56, 0.0 }
 0x278   : > { %v9954_v51 = vpack.c.bf16 %v4668_v55, %v4667_v22  ;;  %v11162_v24 = vpop.f32.mrf.mxu0  ;;  %v5043_v28 = vsel %vm505_vm1, %v5040_v15, %v5042_v54  ;;  %v5337_v29 = vor.u32 %v5336_v21, %v5333_v35  ;;  %v5342_v16 = vrot.slane %v5340_v4, 2  ;;  %v16956_v35 = vld [vmem:[#allocation28_spill] sm:$0xff] }
 0x279   : > { %v16948_v8 = vunpack.i.h.bf16 %v14320_v39  ;;  %v4422_v12 = vmax.f32 %v4386_v7, 0.0  ;;  %v4384_v45 = vadd.f32 %v14548_v53, %v4341_v18  ;;  %v4344_v57 = vadd.f32 %v11162_v24, %v14589_v30  ;;  %11200 = vmatmul.mubr.bf16.vlgmr.msra.gmra.mxu1 %v5043_v28  ;;  %v14724_v23 = vld [vmem:[#allocation2 + $0x18] sm:$0xff]  }
 0x27a   : > { %10199 = vst [vmem:[#allocation2 + $0x28] sm:$0xff] %v9954_v51   ;;  %v16950_v61 = vunpack.i.l.bf16 %v16949_v50  ;;  %v16951_v15 = vunpack.i.l.bf16 %v14320_v39  ;;  %v4237_v47 = vpop.f32.mrf.mxu0  ;;  %v16954_v22 = vor.u32 %v16952_v17, %v16953_v37  ;;  %11288 = vmatpush3.bf16.msra.mxu1 %v16955_v40  ;;  %v5345_v30 = vrot.slane %v5343_v60, 3 }
 0x27b   : > { %v4670_v33 = vmul.f32 %v16948_v8, %v4418_v19  ;;  %v4420_v46 = vmax.f32 %v4384_v45, 0.0  ;;  %v4387_v52 = vadd.f32 %v14548_v53, %v4344_v57  ;;  %v4342_v36 = vadd.f32 %v4237_v47, %v16956_v35  ;;  %11289 = vmatprep.subr.bf16.mxu1 %v12008_v27  ;;  %v16960_v8 = vld [vmem:[#allocation33_spill] sm:$0xff]  ;;  %v12024_v45 = vld [vmem:[#allocation8 + $0xf0] sm:$0xff]  }
 0x27c   : > { %v4671_v5 = vmul.f32 %v16950_v61, %v4419_v59  ;;  %v4669_v13 = vmul.f32 %v16951_v15, %v4417_v34  ;;  %v5338_v19 = vsel %vm789_vm0, %v16954_v22, %v5337_v29  ;;  %v14739_v39 = vrot.slane %v5331_v43, 3  ;;  %v16957_v59 = vld [vmem:[#allocation62_spill] sm:$0xff]  ;;  %v11165_v56 = vpop.f32.mrf.mxu0  ;;  %v16961_v15 = vld [vmem:[#allocation64_spill] sm:$0xff]  ;;  %v12014_v22 = vld [vmem:[#allocation8 + $0xa0] sm:$0xff]  }
 0x27d   : > { %11251 = vmatprep.mubr.bf16.mxu0 %v5338_v19  ;;  %v16958_v2 = vunpack.i.h.bf16 %v16957_v59  ;;  %v5044_v48 = vrot.slane %v14724_v23, 3  ;;  %v14744_v51 = vor.u32 %v5345_v30, %v5342_v16  ;;  %v14746_v7 = vld [vmem:[#allocation2 + $0x20] sm:$0xff]   ;;  %v16959_v18 = vunpack.i.h.bf16 %v16949_v50 }
 0x27e   : > { %v9959_v55 = vpack.c.bf16 %v4670_v33, %v4669_v13  ;;  %v4423_v24 = vmax.f32 %v4387_v52, 0.0  ;;  %v4385_v28 = vadd.f32 %v14548_v53, %v4342_v36  ;;  %v4347_v43 = vadd.f32 %v11165_v56, %v16960_v8  ;;  %v4250_v33 = vpop.f32.mrf.mxu0  ;;  %11290 = vmatpush3.bf16.msra.mxu1 %v12008_v27  ;;  %v12026_v56 = vld [vmem:[#allocation8 + $0xe8] sm:$0xff]  }
 0x27f   : > { %v4674_v21 = vmul.f32 %v16958_v2, %v4422_v12  ;;  %v4672_v34 = vmul.f32 %v16959_v18, %v4420_v46  ;;  %v5045_v12 = vsel %vm505_vm1, %v5042_v54, %v5044_v48  ;;  %v5347_v57 = vsel %vm789_vm0, %v5337_v29, %v14744_v51  ;;  %v16963_v54 = vld [vmem:[#allocation30_spill] sm:$0xff]  ;;  %11291 = vmatprep.subr.bf16.mxu1 %v12011_v49 }
 0x280   : > { %10200 = vst [vmem:[#allocation2 + $0x30] sm:$0xff] %v9959_v55   ;;  %v5046_v16 = vrot.slane %v14746_v7, 3  ;;  %v5349_v61 = vshrl.u32 %v14724_v23, 16  ;;  %v16962_v13 = vunpack.i.l.bf16 %v16961_v15  ;;  %v4421_v17 = vmax.f32 %v4385_v28, 0.0  ;;  %11203 = vmatprep.mubr.bf16.mxu1 %v5045_v12  ;;  %11252 = vmatmul.mubr.bf16.vlgmr.msra.gmra.mxu0 %v5347_v57  ;;  %v11166_v40 = vpop.f32.mrf.mxu0  ;;  %v16966_v28 = vld [vmem:[#allocation69_spill] sm:$0xff]  ;;  %v16968_v12 = vld [vmem:[#allocation32_spill] sm:$0xff] }
 0x281   : > { %v9964_v50 = vpack.c.bf16 %v4672_v34, %v4671_v5  ;;  %v4390_v37 = vadd.f32 %v14548_v53, %v4347_v43  ;;  %v4345_v19 = vadd.f32 %v4250_v33, %v16963_v54  ;;  %v5352_v27 = vshll.u32 %v14724_v23, 16  ;;  %v16964_v5 = vld [vmem:[#allocation47_spill] sm:$0xff] }
 0x282   : > { %v14759_v47 = vmul.f32 %v16962_v13, %v4423_v24  ;;  %v5047_v29 = vsel %vm505_vm1, %v5044_v48, %v5046_v16  ;;  %v5351_v30 = vrot.slane %v5349_v61, 2  ;;  %11340 = vmatpush3.bf16.msra.mxu0 %v16964_v5  ;;  %v16965_v46 = vunpack.i.l.bf16 %v16957_v59  ;;  %v14771_v55 = vld [vmem:[#allocation2 + $0x28] sm:$0xff]   ;;  %v4253_v18 = vpop.f32.mrf.mxu0  ;;  %11292 = vmatpush3.bf16.msra.mxu1 %v12011_v49 }
 0x283   : > { %10201 = vst [vmem:[#allocation2 + $0x38] sm:$0xff] %v9964_v50   ;;  %v4426_v35 = vmax.f32 %v4390_v37, 0.0  ;;  %v4348_v36 = vadd.f32 %v11166_v40, %v14608_v26  ;;  %11204 = vmatmul.mubr.bf16.gmra.mxu1 %v5047_v29  ;;  %v5358_v2 = vshrl.u32 %v14746_v7, 16  ;;  %11341 = vmatprep.subr.bf16.mxu0 %v12024_v45  ;;  %v4388_v48 = vadd.f32 %v14548_v53, %v4345_v19  ;;  %v12018_v50 = vld [vmem:[#allocation8 + $0x98] sm:$0xff]  }
 0x284   : > { %v4673_v52 = vmul.f32 %v16965_v46, %v4421_v17  ;;  %v5354_v34 = vrot.slane %v5352_v27, 3  ;;  %v5361_v24 = vshll.u32 %v14746_v7, 16  ;;  %v14780_v59 = vrot.slane %v5334_v11, 4  ;;  %11293 = vmatprep.subr.bf16.mxu1 %v12014_v22  ;;  %v11169_v37 = vpop.f32.mrf.mxu0  ;;  %v12029_v11 = vld [vmem:[#allocation8 + $0xe0] sm:$0xff]  }
 0x285   : > { %v16967_v8 = vunpack.i.h.bf16 %v16966_v28  ;;  %v4391_v33 = vadd.f32 %v14548_v53, %v4348_v36  ;;  %v4346_v57 = vadd.f32 %v4253_v18, %v16968_v12  ;;  %v4424_v13 = vmax.f32 %v4388_v48, 0.0  ;;  %v16970_v36 = vld [vmem:[#allocation72_spill] sm:$0xff] }
 0x286   : > { %v9969_v26 = vpack.c.bf16 %v4674_v21, %v4673_v52  ;;  %v5355_v17 = vor.u32 %v5354_v34, %v5351_v30  ;;  %v5048_v49 = vrot.slane %v14771_v55, 3  ;;  %v5360_v41 = vrot.slane %v5358_v2, 2  ;;  %11342 = vmatpush3.bf16.msra.mxu0 %v12024_v45  ;;  %v4266_v46 = vpop.f32.mrf.mxu0  ;;  %11294 = vmatpush3.bf16.msra.mxu1 %v12014_v22 }
 0x287   : > { %v14784_v43 = vmul.f32 %v16967_v8, %v4426_v35  ;;  %v4427_v21 = vmax.f32 %v4391_v33, 0.0  ;;  %v4389_v54 = vadd.f32 %v14548_v53, %v4346_v57  ;;  %v4351_v19 = vadd.f32 %v11169_v37, %v14616_v3  ;;  %11343 = vmatprep.subr.bf16.mxu0 %v12026_v56  ;;  %v14800_v52 = vld [vmem:[#allocation2 + $0x30] sm:$0xff]   ;;  %11295 = vmatprep.subr.bf16.mxu1 %v12018_v50 }
 0x288   : > { %10202 = vst [vmem:[#allocation2 + $0x40] sm:$0xff] %v9969_v26   ;;  %v5363_v40 = vrot.slane %v5361_v24, 3  ;;  %v16969_v29 = vunpack.i.h.bf16 %v16961_v15  ;;  %v5356_v5 = vsel %vm789_vm0, %v14744_v51, %v5355_v17  ;;  %v5049_v45 = vsel %vm505_vm1, %v5046_v16, %v5048_v49  ;;  %v12022_v51 = vld [vmem:[#allocation8 + $0x90] sm:$0xff]   ;;  %v11170_v8 = vpop.f32.mrf.mxu0 }
 0x289   : > { %v5367_v35 = vshrl.u32 %v14771_v55, 16  ;;  %v16971_v3 = vunpack.i.l.bf16 %v16970_v36  ;;  %v4425_v18 = vmax.f32 %v4389_v54, 0.0  ;;  %11255 = vmatprep.mubr.bf16.mxu0 %v5356_v5  ;;  %v4394_v15 = vadd.f32 %v14548_v53, %v4351_v19  ;;  %11207 = vmatprep.mubr.bf16.mxu1 %v5049_v45 }
 0x28a   : > { %v4676_v30 = vmul.f32 %v16969_v29, %v4424_v13  ;;  %v4349_v34 = vadd.f32 %v4266_v46, %v14620_v6  ;;  %v5364_v16 = vor.u32 %v5363_v40, %v5360_v41  ;;  %v5050_v33 = vrot.slane %v14800_v52, 3  ;;  %11344 = vmatpush3.bf16.msra.mxu0 %v12026_v56  ;;  %v4269_v54 = vpop.f32.mrf.mxu0  ;;  %11296 = vmatpush3.bf16.msra.mxu1 %v12018_v50  ;;  %v16973_v29 = vld [vmem:[#allocation73_spill] sm:$0xff] }
 0x28b   : > { %v14805_v48 = vmul.f32 %v16971_v3, %v4427_v21  ;;  %v5369_v22 = vrot.slane %v5367_v35, 2  ;;  %v16972_v12 = vunpack.i.l.bf16 %v16966_v28  ;;  %v4430_v13 = vmax.f32 %v4394_v15, 0.0  ;;  %v14817_v21 = vld [vmem:[#allocation2 + $0x38] sm:$0xff]   ;;  %11345 = vmatprep.subr.bf16.mxu0 %v12029_v11  ;;  %11297 = vmatprep.subr.bf16.mxu1 %v12022_v51 }
 0x28c   : > { %v9974_v26 = vpack.c.bf16 %v4676_v30, %v14759_v47  ;;  %v4392_v37 = vadd.f32 %v14548_v53, %v4349_v34  ;;  %v4352_v6 = vadd.f32 %v11170_v8, %v14624_v14  ;;  %v12031_v47 = vld [vmem:[#allocation8 + $0xd8] sm:$0xff]   ;;  %v5365_v41 = vsel %vm789_vm0, %v5355_v17, %v5364_v16  ;;  %v12027_v17 = vld [vmem:[#allocation8 + $0x88] sm:$0xff]   ;;  %v11173_v3 = vpop.f32.mrf.mxu0 }
 0x28d   : > { %v4677_v57 = vmul.f32 %v16972_v12, %v4425_v18  ;;  %v5051_v19 = vsel %vm505_vm1, %v5048_v49, %v5050_v33  ;;  %v5370_v56 = vshll.u32 %v14771_v55, 16  ;;  %v5376_v28 = vshrl.u32 %v14800_v52, 16  ;;  %11256 = vmatmul.mubr.bf16.gmra.mxu0 %v5365_v41  ;;  %v12034_v12 = vld [vmem:[#allocation8 + $0xd0] sm:$0xff]  }
 0x28e   : > { %10203 = vst [vmem:[#allocation2 + $0x48] sm:$0xff] %v9974_v26   ;;  %v16974_v30 = vunpack.i.h.bf16 %v16973_v29  ;;  %v4428_v5 = vmax.f32 %v4392_v37, 0.0  ;;  %v4395_v46 = vadd.f32 %v14548_v53, %v4352_v6  ;;  %11208 = vmatmul.mubr.bf16.gmra.mxu1 %v5051_v19  ;;  %v4350_v45 = vadd.f32 %v4269_v54, %v14627_v42  ;;  %11346 = vmatpush3.bf16.msra.mxu0 %v12029_v11  ;;  %v4282_v37 = vpop.f32.mrf.mxu0 }
 0x28f   : > { %v9979_v40 = vpack.c.bf16 %v14784_v43, %v4677_v57  ;;  %v5372_v49 = vrot.slane %v5370_v56, 3  ;;  %v5052_v50 = vrot.slane %v14817_v21, 3  ;;  %v5378_v43 = vrot.slane %v5376_v28, 2  ;;  %v14835_v18 = vld [vmem:[#allocation2 + $0x40] sm:$0xff]   ;;  %11347 = vmatprep.subr.bf16.mxu0 %v12031_v47  ;;  %11298 = vmatpush3.bf16.msra.mxu1 %v12022_v51 }
 0x290   : > { %v14826_v14 = vmul.f32 %v16974_v30, %v4430_v13  ;;  %v16975_v15 = vunpack.i.h.bf16 %v16970_v36  ;;  %v4431_v26 = vmax.f32 %v4395_v46, 0.0  ;;  %v4355_v42 = vadd.f32 %v11173_v3, %v14636_v62  ;;  %v16976_v36 = vld [vmem:[#allocation74_spill] sm:$0xff]  ;;  %v12032_v30 = vld [vmem:[#allocation8 + $0x80] sm:$0xff]   ;;  %v11174_v46 = vpop.f32.mrf.mxu0  ;;  %11299 = vmatprep.subr.bf16.mxu1 %v12027_v17 }
 0x291   : > { %10204 = vst [vmem:[#allocation2 + $0x50] sm:$0xff] %v9979_v40   ;;  %v5379_v8 = vshll.u32 %v14800_v52, 16  ;;  %v4393_v57 = vadd.f32 %v14548_v53, %v4350_v45  ;;  %v5373_v13 = vor.u32 %v5372_v49, %v5369_v22  ;;  %v5053_v6 = vsel %vm505_vm1, %v5050_v33, %v5052_v50  ;;  %v12035_v51 = vld [vmem:[#allocation8 + $0xc8] sm:$0xff]  }
 0x292   : > { %v4680_v34 = vmul.f32 %v16975_v15, %v4428_v5  ;;  %v5054_v41 = vrot.slane %v14835_v18, 3  ;;  %v16977_v54 = vunpack.i.l.bf16 %v16976_v36  ;;  %v4398_v62 = vadd.f32 %v14548_v53, %v4355_v42  ;;  %11211 = vmatprep.mubr.bf16.mxu1 %v5053_v6  ;;  %11348 = vmatpush3.bf16.msra.mxu0 %v12031_v47 }
 0x293   : > { %v4353_v40 = vadd.f32 %v4282_v37, %v14642_v20  ;;  %v4429_v5 = vmax.f32 %v4393_v57, 0.0  ;;  %v5374_v22 = vsel %vm789_vm0, %v5364_v16, %v5373_v13  ;;  %v5381_v33 = vrot.slane %v5379_v8, 3  ;;  %11349 = vmatprep.subr.bf16.mxu0 %v12034_v12  ;;  %11300 = vmatpush3.bf16.msra.mxu1 %v12027_v17  ;;  %v16979_v57 = vld [vmem:[#allocation23_spill] sm:$0xff] }
 0x294   : > { %v9984_v11 = vpack.c.bf16 %v4680_v34, %v14805_v48  ;;  %v14847_v19 = vmul.f32 %v16977_v54, %v4431_v26  ;;  %v5055_v48 = vsel %vm505_vm1, %v5052_v50, %v5054_v41  ;;  %11259 = vmatprep.mubr.bf16.mxu0 %v5374_v22  ;;  %v4434_v45 = vmax.f32 %v4398_v62, 0.0  ;;  %v4285_v26 = vpop.f32.mrf.mxu0  ;;  %11301 = vmatprep.subr.bf16.mxu1 %v12032_v30 }
 0x295   : > { %v4396_v20 = vadd.f32 %v14548_v53, %v4353_v40  ;;  %v4356_v49 = vadd.f32 %v11174_v46, %v14646_v58  ;;  %v5385_v16 = vshrl.u32 %v14817_v21, 16  ;;  %v16978_v3 = vunpack.i.l.bf16 %v16973_v29  ;;  %v14863_v42 = vld [vmem:[#allocation2 + $0x48] sm:$0xff]   ;;  %v14872_v29 = vld [vmem:[#allocation8 + $0x138] sm:$0xff]  }
 0x296   : > { %10205 = vst [vmem:[#allocation2 + $0x58] sm:$0xff] %v9984_v11   ;;  %v5382_v34 = vor.u32 %v5381_v33, %v5378_v43  ;;  %v5388_v50 = vshll.u32 %v14817_v21, 16  ;;  %v5394_v47 = vshrl.u32 %v14835_v18, 16  ;;  %v16980_v37 = vunpack.i.h.bf16 %v16979_v57  ;;  %11212 = vmatmul.mubr.bf16.gmra.mxu1 %v5055_v48  ;;  %11350 = vmatpush3.bf16.msra.mxu0 %v12034_v12 }
 0x297   : > { %v4681_v15 = vmul.f32 %v16978_v3, %v4429_v5  ;;  %v4432_v58 = vmax.f32 %v4396_v20, 0.0  ;;  %v4399_v11 = vadd.f32 %v14548_v53, %v4356_v49  ;;  %v4354_v54 = vadd.f32 %v4285_v26, %v14649_v63  ;;  %v11177_v5 = vpop.f32.mrf.mxu0  ;;  %11351 = vmatprep.subr.bf16.mxu0 %v12035_v51  ;;  %11302 = vmatpush3.bf16.msra.mxu1 %v12032_v30  ;;  %v12040_v49 = vld [vmem:[#allocation8 + $0xc0] sm:$0xff]  }
 0x298   : > { %v14868_v6 = vmul.f32 %v16980_v37, %v4434_v45  ;;  %v5383_v62 = vsel %vm789_vm0, %v5373_v13, %v5382_v34  ;;  %v5387_v17 = vrot.slane %v5385_v16, 2  ;;  %v5390_v40 = vrot.slane %v5388_v50, 3  ;;  %11391 = vmatprep.subr.bf16.mxu1 %v14872_v29 }
 0x299   : > { %v9989_v43 = vpack.c.bf16 %v14826_v14, %v4681_v15  ;;  %v16981_v22 = vunpack.i.h.bf16 %v16976_v36  ;;  %11260 = vmatmul.mubr.bf16.gmra.mxu0 %v5383_v62  ;;  %v4435_v63 = vmax.f32 %v4399_v11, 0.0  ;;  %v4397_v46 = vadd.f32 %v14548_v53, %v4354_v54  ;;  %v14884_v14 = vld [vmem:[#allocation2 + $0x50] sm:$0xff]   ;;  %v4298_v45 = vpop.f32.mrf.mxu0  ;;  %v16982_v15 = vld [vmem:[#allocation75_spill] sm:$0xff] }
 0x29a   : > { %v4359_v48 = vadd.f32 %v11177_v5, %v14653_v9  ;;  %v5391_v13 = vor.u32 %v5390_v40, %v5387_v17  ;;  %v5056_v20 = vrot.slane %v14863_v42, 3  ;;  %v5396_v12 = vrot.slane %v5394_v47, 2  ;;  %11352 = vmatpush3.bf16.msra.mxu0 %v12035_v51 }
 0x29b   : > { %v4684_v33 = vmul.f32 %v16981_v22, %v4432_v58  ;;  %10206 = vst [vmem:[#allocation2 + $0x60] sm:$0xff] %v9989_v43   ;;  %v5397_v36 = vshll.u32 %v14835_v18, 16  ;;  %v16983_v26 = vunpack.i.l.bf16 %v16982_v15  ;;  %v4433_v37 = vmax.f32 %v4397_v46, 0.0  ;;  %v11178_v43 = vpop.f32.mrf.mxu0  ;;  %11353 = vmatprep.subr.bf16.mxu0 %v12040_v49 }
 0x29c   : > { %v4402_v58 = vadd.f32 %v14548_v53, %v4359_v48  ;;  %v5392_v11 = vsel %vm789_vm0, %v5382_v34, %v5391_v13  ;;  %v4357_v54 = vadd.f32 %v4298_v45, %v14658_v10  ;;  %v5057_v30 = vsel %vm505_vm1, %v5054_v41, %v5056_v20  ;;  %v16985_v48 = vld [vmem:[#allocation24_spill] sm:$0xff] }
 0x29d   : > { %v9994_v3 = vpack.c.bf16 %v4684_v33, %v14847_v19  ;;  %v14893_v9 = vmul.f32 %v16983_v26, %v4435_v63  ;;  %v5399_v19 = vrot.slane %v5397_v36, 3  ;;  %v16984_v62 = vunpack.i.l.bf16 %v16979_v57  ;;  %11263 = vmatprep.mubr.bf16.mxu0 %v5392_v11  ;;  %11215 = vmatprep.mubr.bf16.mxu1 %v5057_v30  ;;  %v4301_v41 = vpop.f32.mrf.mxu0  ;;  %v14911_v51 = vld [vmem:[#allocation2 + $0x58] sm:$0xff]   ;;  %v14913_v57 = vld [vmem:[#allocation8 + $0x178] sm:$0xff]  }
 0x29e   : > { %v4438_v40 = vmax.f32 %v4402_v58, 0.0  ;;  %v4360_v34 = vadd.f32 %v11178_v43, %v14663_v31  ;;  %v5058_v10 = vrot.slane %v14884_v14, 3  ;;  %v4400_v5 = vadd.f32 %v14548_v53, %v4357_v54  ;;  %11354 = vmatpush3.bf16.msra.mxu0 %v12040_v49 }
 0x29f   : > { %10207 = vst [vmem:[#allocation2 + $0x68] sm:$0xff] %v9994_v3   ;;  %v4685_v17 = vmul.f32 %v16984_v62, %v4433_v37  ;;  %v5400_v22 = vor.u32 %v5399_v19, %v5396_v12  ;;  %v16584_v33 = vshrl.u32 %v14863_v42, 16  ;;  %v16582_v63 = vshll.u32 %v14863_v42, 16  ;;  %v11181_v54 = vpop.f32.mrf.mxu0  ;;  %11443 = vmatprep.subr.bf16.mxu0 %v14913_v57 }
 0x2a0   : > { %v16986_v45 = vunpack.i.h.bf16 %v16985_v48  ;;  %v4403_v3 = vadd.f32 %v14548_v53, %v4360_v34  ;;  %v4358_v26 = vadd.f32 %v4301_v41, %v14665_v32  ;;  %v4436_v12 = vmax.f32 %v4400_v5, 0.0  ;;  %v16988_v34 = vld [vmem:[#allocation25_spill] sm:$0xff] }
 0x2a1   : > { %v9999_v46 = vpack.c.bf16 %v14868_v6, %v4685_v17  ;;  %v5401_v37 = vsel %vm789_vm0, %v5391_v13, %v5400_v22  ;;  %v5059_v58 = vsel %vm505_vm1, %v5056_v20, %v5058_v10  ;;  %v5405_v11 = vrot.slane %v16584_v33, 2  ;;  %v4314_v20 = vpop.f32.mrf.mxu0 }
 0x2a2   : > { %v4690_v31 = vmul.f32 %v16986_v45, %v4438_v40  ;;  %11264 = vmatmul.mubr.bf16.gmra.mxu0 %v5401_v37  ;;  %v4439_v6 = vmax.f32 %v4403_v3, 0.0  ;;  %v4401_v30 = vadd.f32 %v14548_v53, %v4358_v26  ;;  %11216 = vmatmul.mubr.bf16.gmra.mxu1 %v5059_v58  ;;  %v5408_v19 = vrot.slane %v16582_v63, 3  ;;  %v14933_v40 = vld [vmem:[#allocation2 + $0x60] sm:$0xff]  }
 0x2a3   : > { %10208 = vst [vmem:[#allocation2 + $0x70] sm:$0xff] %v9999_v46   ;;  %v4363_v32 = vadd.f32 %v11181_v54, %v14672_v1  ;;  %v16987_v13 = vunpack.i.h.bf16 %v16982_v15  ;;  %v5060_v62 = vrot.slane %v14911_v51, 3  ;;  %v5412_v17 = vshrl.u32 %v14884_v14, 16  ;;  %v11182_v37 = vpop.f32.mrf.mxu0 }
 0x2a4   : > { %v16588_v49 = vshll.u32 %v14884_v14, 16  ;;  %v16989_v5 = vunpack.i.l.bf16 %v16988_v34  ;;  %v4437_v46 = vmax.f32 %v4401_v30, 0.0  ;;  %v5409_v45 = vor.u32 %v5408_v19, %v5405_v11 }
 0x2a5   : > { %v4688_v43 = vmul.f32 %v16987_v13, %v4436_v12  ;;  %v4406_v1 = vadd.f32 %v14548_v53, %v4363_v32  ;;  %v4361_v3 = vadd.f32 %v4314_v20, %v14677_v0  ;;  %v5061_v26 = vsel %vm505_vm1, %v5058_v10, %v5060_v62  ;;  %v4317_v10 = vpop.f32.mrf.mxu0 }
 0x2a6   : > { %v4691_v41 = vmul.f32 %v16989_v5, %v4439_v6  ;;  %v5414_v12 = vrot.slane %v5412_v17, 2  ;;  %v16990_v58 = vunpack.i.l.bf16 %v16985_v48  ;;  %v5410_v13 = vsel %vm789_vm0, %v5400_v22, %v5409_v45  ;;  %11219 = vmatprep.mubr.bf16.mxu1 %v5061_v26  ;;  %v14949_v30 = vld [vmem:[#allocation2 + $0x68] sm:$0xff]   ;;  %v16991_v22 = vld [vmem:[#allocation26_spill] sm:$0xff] }
 0x2a7   : > { %v10004_v15 = vpack.c.bf16 %v4688_v43, %v14893_v9  ;;  %v4442_v6 = vmax.f32 %v4406_v1, 0.0  ;;  %v5417_v11 = vrot.slane %v16588_v49, 3  ;;  %11267 = vmatprep.mubr.bf16.mxu0 %v5410_v13  ;;  %v4404_v0 = vadd.f32 %v14548_v53, %v4361_v3 }
 0x2a8   : > { %v4689_v54 = vmul.f32 %v16990_v58, %v4437_v46  ;;  %v4364_v9 = vadd.f32 %v11182_v37, %v14690_v44  ;;  %v5062_v19 = vrot.slane %v14933_v40, 3  ;;  %v16575_v48 = vshrl.u32 %v14911_v51, 16 }
 0x2a9   : > { %10209 = vst [vmem:[#allocation2 + $0x78] sm:$0xff] %v10004_v15   ;;  %v16992_v43 = vunpack.i.h.bf16 %v16991_v22  ;;  %v5418_v5 = vor.u32 %v5417_v11, %v5414_v12  ;;  %v4362_v46 = vadd.f32 %v4317_v10, %v14713_v38  ;;  %v4440_v1 = vmax.f32 %v4404_v0, 0.0  ;;  %v4658_v11 = vpop.permute.xlu0 %4657 }
 0x2aa   : > { %v10009_v32 = vpack.c.bf16 %v4690_v31, %v4689_v54  ;;  %v4407_v15 = vadd.f32 %v14548_v53, %v4364_v9  ;;  %v5063_v26 = vsel %vm505_vm1, %v5060_v62, %v5062_v19  ;;  %v5423_v44 = vrot.slane %v16575_v48, 2  ;;  %v14966_v58 = vld [vmem:[#allocation2 + $0x70] sm:$0xff]  }
 0x2ab   : > { %v4694_v20 = vmul.f32 %v16992_v43, %v4442_v6  ;;  %v5419_v3 = vsel %vm789_vm0, %v5409_v45, %v5418_v5  ;;  %v4405_v37 = vadd.f32 %v14548_v53, %v4362_v46  ;;  %11220 = vmatmul.mubr.bf16.gmra.mxu1 %v5063_v26  ;;  %v16574_v31 = vshll.u32 %v14911_v51, 16 }
 0x2ac   : > { %10210 = vst [vmem:[#allocation2 + $0x80] sm:$0xff] %v10009_v32   ;;  %v5064_v12 = vrot.slane %v14949_v30, 3  ;;  %v16993_v38 = vunpack.i.h.bf16 %v16988_v34  ;;  %11268 = vmatmul.mubr.bf16.gmra.mxu0 %v5419_v3  ;;  %v4443_v62 = vmax.f32 %v4407_v15, 0.0  ;;  %v16587_v13 = vshrl.u32 %v14933_v40, 16 }
 0x2ad   : > { %v16585_v6 = vshll.u32 %v14933_v40, 16  ;;  %v4441_v45 = vmax.f32 %v4405_v37, 0.0  ;;  %v5426_v53 = vrot.slane %v16574_v31, 3  ;;  %v5066_v9 = vrot.slane %v14966_v58, 3 }
 0x2ae   : > { %v4692_v54 = vmul.f32 %v16993_v38, %v4440_v1  ;;  %v5065_v0 = vsel %vm505_vm1, %v5062_v19, %v5064_v12  ;;  %v4695_v32 = vmul.f32 %v4658_v11, %v4443_v62  ;;  %v5432_v34 = vrot.slane %v16587_v13, 2  ;;  %v15071_v13 = vld [vmem:[#allocation2 + $0x28] sm:$0xf] }
 0x2af   : > { %11223 = vmatprep.mubr.bf16.mxu1 %v5065_v0  ;;  %v5435_v43 = vrot.slane %v16585_v6, 3  ;;  %v16994_v46 = vunpack.i.l.bf16 %v16991_v22  ;;  %v5427_v15 = vor.u32 %v5426_v53, %v5423_v44  ;;  %v5067_v26 = vsel %vm505_vm1, %v5064_v12, %v5066_v9 }
 0x2b0   : > { %v10014_v10 = vpack.c.bf16 %v4692_v54, %v4691_v41  ;;  %v16573_v3 = vshrl.u32 %v14949_v30, 16  ;;  %v14984_v19 = vld [vmem:[#allocation2 + $0x78] sm:$0xff]   ;;  %v9827_v41 = vpack.c.bf16 %v4695_v32, %v4695_v32  ;;  %v16572_v38 = vshll.u32 %v14949_v30, 16 }
 0x2b1   : > { %v4693_v1 = vmul.f32 %v16994_v46, %v4441_v45  ;;  %v5436_v37 = vor.u32 %v5435_v43, %v5432_v34  ;;  %v16581_v54 = vshrl.u32 %v14966_v58, 16  ;;  %v5428_v11 = vsel %vm789_vm0, %v5418_v5, %v5427_v15 }
 0x2b2   : > { %10211 = vst [vmem:[#allocation2 + $0x88] sm:$0xff] %v10014_v10   ;;  %v5441_v22 = vrot.slane %v16573_v3, 2  ;;  %v5068_v44 = vrot.slane %v14984_v19, 3  ;;  %4875 = vst [vmem:[#allocation2 + $0x98] sm:$0xf] %v9827_v41  ;;  %11271 = vmatprep.mubr.bf16.mxu0 %v5428_v11  ;;  %v5444_v45 = vrot.slane %v16572_v38, 3  ;;  %v15005_v34 = vor.u32 %v14780_v59, %v14739_v39 }
 0x2b3   : > { %v10019_v62 = vpack.c.bf16 %v4694_v20, %v4693_v1  ;;  %v5437_v12 = vsel %vm789_vm0, %v5427_v15, %v5436_v37  ;;  %v5450_v53 = vrot.slane %v16581_v54, 2  ;;  %v16580_v0 = vshll.u32 %v14966_v58, 16  ;;  %v14998_v20 = vld [vmem:[#allocation2 + $0x80] sm:$0xff]   ;;  %11224 = vmatmul.mubr.bf16.gmra.mxu1 %v5067_v26  ;;  %v15011_v26 = vld [vmem:[#allocation2 + $0x18] sm:$0xf]  ;;  %v16995_v59 = vld [vmem:[#allocation76_spill] sm:$0xff] }
 0x2b4   : > { %v5069_v5 = vsel %vm505_vm1, %v5066_v9, %v5068_v44  ;;  %v16577_v10 = vshrl.u32 %v14984_v19, 16  ;;  %v16576_v32 = vshll.u32 %v14984_v19, 16  ;;  %11272 = vmatmul.mubr.bf16.gmra.mxu0 %v5437_v12  ;;  %v5445_v43 = vor.u32 %v5444_v45, %v5441_v22  ;;  %v6119_v12 = vld [vmem:[#allocation2 + $0x8] sm:$0x8]  ;;  %v15023_v45 = vld [vmem:[#allocation2 + $0xc] sm:$0xf] }
 0x2b5   : > { %10212 = vst [vmem:[#allocation2 + $0x90] sm:$0xff] %v10019_v62   ;;  %11227 = vmatprep.mubr.bf16.mxu1 %v5069_v5  ;;  %v5453_v46 = vrot.slane %v16580_v0, 3  ;;  %v5070_v1 = vrot.slane %v14998_v20, 3  ;;  %v16578_v15 = vshrl.u32 %v14998_v20, 16  ;;  %v16579_v39 = vshll.u32 %v14998_v20, 16  ;;  %v16996_v62 = vld [vmem:[#allocation31_spill] sm:$0xff] }
 0x2b6   : > { %v5459_v9 = vrot.slane %v16577_v10, 2  ;;  %v5462_v41 = vrot.slane %v16576_v32, 3  ;;  %v16997_v11 = vor.u32 %v16995_v59, %v16996_v62  ;;  %v5446_v5 = vsel %vm789_vm0, %v5436_v37, %v5445_v43  ;;  %v15026_v3 = vld [vmem:[#allocation2 + $0x14] sm:$0xf]  ;;  %v15035_v62 = vld [vmem:[#allocation2 + $0x10] sm:$0xf] }
 0x2b7   : > { %v5454_v38 = vor.u32 %v5453_v46, %v5450_v53  ;;  %11275 = vmatprep.mubr.bf16.mxu0 %v5446_v5  ;;  %v5071_v10 = vsel %vm505_vm1, %v5068_v44, %v5070_v1  ;;  %v5468_v59 = vrot.slane %v16578_v15, 2  ;;  %v5471_v53 = vrot.slane %v16579_v39, 3 }
 0x2b8   : > { %v5766_v22 = vsel %vm1223_vm2, %v16997_v11, %v15005_v34  ;;  %v5463_v31 = vor.u32 %v5462_v41, %v5459_v9  ;;  %v9627_v44 = vcombine.low %v6119_v12, %v15023_v45  ;;  %v9628_v15 = vcombine.low %v15035_v62, %v15026_v3  ;;  %v15054_v12 = vld [vmem:[#allocation2 + $0x1c] sm:$0xf] }
 0x2b9   : > { %v15028_v48 = vld [vmem:[#allocation2 + $0x88] sm:$0xff]   ;;  %v5455_v11 = vsel %vm789_vm0, %v5445_v43, %v5454_v38  ;;  %v5472_v0 = vor.u32 %v5471_v53, %v5468_v59  ;;  %v15062_v59 = vld [vmem:[#allocation2 + $0x24] sm:$0xf]  ;;  %v5780_v52 = vrot.slane %v5370_v56, 4  ;;  %v15114_v56 = vld [vmem:[#allocation2 + $0x40] sm:$0xf] }
 0x2ba   : > { %v5072_v37 = vrot.slane %v15028_v48, 3  ;;  %v16583_v46 = vshrl.u32 %v15028_v48, 16  ;;  %v5464_v9 = vsel %vm789_vm0, %v5454_v38, %v5463_v31  ;;  %v16586_v5 = vshll.u32 %v15028_v48, 16 }
 0x2bb   : > { %11228 = vmatmul.mubr.bf16.gmra.mxu1 %v5071_v10  ;;  %v5767_v10 = vrot.slane %v5340_v4, 3  ;;  %v6274_v33 = vshrl.u32 %v9628_v15, 16  ;;  %v6277_v6 = vshll.u32 %v9628_v15, 16  ;;  %v5772_v4 = vrot.slane %v5352_v27, 4 }
 0x2bc   : > { %v12033_v41 = vld [vmem:[#allocation2 + $0x90] ss:$0 sps:$4 sm:$0x77]   ;;  %v5073_v32 = vsel %vm505_vm1, %v5070_v1, %v5072_v37  ;;  %v5477_v43 = vrot.slane %v16583_v46, 2  ;;  %11276 = vmatmul.mubr.bf16.gmra.mxu0 %v5455_v11  ;;  %v5480_v38 = vrot.slane %v16586_v5, 3  ;;  %v6266_v46 = vshrl.u32 %v9627_v44, 16 }
 0x2bd   : > { %11231 = vmatprep.mubr.bf16.mxu1 %v5073_v32  ;;  %v5074_v39 = vrot.slane %v12033_v41, 3  ;;  %11279 = vmatprep.mubr.bf16.mxu0 %v5464_v9  ;;  %v5484_v54 = vshrl.u32 %v12033_v41, 16  ;;  %v5487_v63 = vshll.u32 %v12033_v41, 16  ;;  %v5768_v32 = vrot.slane %v5343_v60, 4  ;;  %v15060_v5 = vld [vmem:[#allocation2 + $0x20] sm:$0xf] }
 0x2be   : > { %v5481_v1 = vor.u32 %v5480_v38, %v5477_v43  ;;  %v5771_v11 = vrot.slane %v5349_v61, 3  ;;  %v6269_v9 = vshll.u32 %v9627_v44, 16  ;;  %v5473_v41 = vsel %vm789_vm0, %v5463_v31, %v5472_v0 }
 0x2bf   : > { %v5075_v53 = vsel %vm505_vm1, %v5072_v37, %v5074_v39  ;;  %v5486_v43 = vrot.slane %v5484_v54, 2  ;;  %v5489_v15 = vrot.slane %v5487_v63, 3  ;;  %v5769_v38 = vor.u32 %v5768_v32, %v5767_v10  ;;  %v15084_v10 = vld [vmem:[#allocation2 + $0x30] sm:$0xf] }
 0x2c0   : > { %v5482_v25 = vsel %vm789_vm0, %v5472_v0, %v5481_v1  ;;  %v9629_v60 = vcombine.low %v15011_v26, %v15054_v12  ;;  %v5773_v61 = vor.u32 %v5772_v4, %v5771_v11  ;;  %v6276_v49 = vrot.slane %v6274_v33, 3  ;;  %v15082_v0 = vld [vmem:[#allocation2 + $0x2c] sm:$0xf] }
 0x2c1   : > { %v6279_v39 = vrot.slane %v6277_v6, 4  ;;  %v5770_v23 = vsel %vm1223_vm2, %v15005_v34, %v5769_v38  ;;  %v9630_v63 = vcombine.low %v15060_v5, %v15062_v59  ;;  %v5775_v31 = vrot.slane %v5358_v2, 3 }
 0x2c2   : > { %v5774_v27 = vsel %vm1223_vm2, %v5769_v38, %v5773_v61  ;;  %v5776_v54 = vrot.slane %v5361_v24, 4  ;;  %v5490_v33 = vor.u32 %v5489_v15, %v5486_v43  ;;  %v6268_v6 = vrot.slane %v6266_v46, 3  ;;  %v15096_v43 = vld [vmem:[#allocation2 + $0x38] sm:$0xf] }
 0x2c3   : > { %11232 = vmatmul.mubr.bf16.gmra.mxu1 %v5075_v53  ;;  %v6271_v37 = vrot.slane %v6269_v9, 4  ;;  %v6283_v34 = vshrl.u32 %v9629_v60, 16  ;;  %v6286_v44 = vshll.u32 %v9629_v60, 16  ;;  %v6280_v32 = vor.u32 %v6279_v39, %v6276_v49  ;;  %v15088_v53 = vld [vmem:[#allocation2 + $0x34] sm:$0xf]  ;;  %v12043_v60 = vld [vmem:[#allocation8 + $0x130] sm:$0xff]  }
 0x2c4   : > { %11280 = vmatmul.mubr.bf16.gmra.mxu0 %v5473_v41  ;;  %11303 = vmatprep.mubr.bf16.mxu1 %v5766_v22  ;;  %v5777_v22 = vor.u32 %v5776_v54, %v5775_v31  ;;  %v9631_v11 = vcombine.low %v15071_v13, %v15082_v0  ;;  %v6292_v2 = vshrl.u32 %v9630_v63, 16  ;;  %v6295_v7 = vshll.u32 %v9630_v63, 16  ;;  %v15098_v49 = vld [vmem:[#allocation2 + $0x3c] sm:$0xf]  ;;  %v12046_v54 = vld [vmem:[#allocation8 + $0x128] sm:$0xff]  }
 0x2c5   : > { %11283 = vmatprep.mubr.bf16.mxu0 %v5482_v25  ;;  %v5491_v4 = vsel %vm789_vm0, %v5481_v1, %v5490_v33  ;;  %v6272_v41 = vor.u32 %v6271_v37, %v6268_v6  ;;  %v5783_v46 = vrot.slane %v5376_v28, 3  ;;  %v5784_v9 = vrot.slane %v5379_v8, 4  ;;  %v15116_v33 = vld [vmem:[#allocation2 + $0x44] sm:$0xf] }
 0x2c6   : > { %v5778_v24 = vsel %vm1223_vm2, %v5773_v61, %v5777_v22  ;;  %v6285_v15 = vrot.slane %v6283_v34, 3  ;;  %v6288_v38 = vrot.slane %v6286_v44, 4  ;;  %v5779_v25 = vrot.slane %v5367_v35, 3 }
 0x2c7   : > { %v9632_v1 = vcombine.low %v15084_v10, %v15088_v53  ;;  %v6281_v61 = vsel %vm1223_vm2, %v6272_v41, %v6280_v32  ;;  %v6301_v28 = vshrl.u32 %v9631_v11, 16  ;;  %v15107_v8 = vor.u32 %v5784_v9, %v5783_v46 }
 0x2c8   : > { %v6294_v39 = vrot.slane %v6292_v2, 3  ;;  %v6297_v63 = vrot.slane %v6295_v7, 4  ;;  %v6304_v31 = vshll.u32 %v9631_v11, 16  ;;  %v5791_v35 = vrot.slane %v5394_v47, 3  ;;  %v12049_v7 = vld [vmem:[#allocation8 + $0x120] sm:$0xff]  }
 0x2c9   : > { %v9633_v55 = vcombine.low %v15096_v43, %v15098_v49  ;;  %v6289_v6 = vor.u32 %v6288_v38, %v6285_v15  ;;  %v5781_v37 = vor.u32 %v5780_v52, %v5779_v25  ;;  %v6303_v34 = vrot.slane %v6301_v28, 3  ;;  %v12059_v25 = vld [vmem:[#allocation8 + $0x170] sm:$0xff]  }
 0x2ca   : > { %v6313_v47 = vshll.u32 %v9632_v1, 16  ;;  %v6298_v44 = vor.u32 %v6297_v63, %v6294_v39  ;;  %v6306_v11 = vrot.slane %v6304_v31, 4  ;;  %v5799_v18 = vrot.slane %v5412_v17, 3  ;;  %v15141_v52 = vld [vmem:[#allocation2 + $0x4c] sm:$0xf] }
 0x2cb   : > { %11304 = vmatmul.mubr.bf16.vlgmr.msra.gmra.mxu1 %v5770_v23  ;;  %v6310_v23 = vshrl.u32 %v9632_v1, 16  ;;  %v6322_v41 = vshll.u32 %v9633_v55, 16  ;;  %v6290_v46 = vsel %vm1223_vm2, %v6280_v32, %v6289_v6  ;;  %v5782_v9 = vsel %vm1223_vm2, %v5777_v22, %v5781_v37  ;;  %v15137_v32 = vld [vmem:[#allocation2 + $0x48] sm:$0xf] }
 0x2cc   : > { %11284 = vmatmul.mubr.bf16.gmra.mxu0 %v5491_v4  ;;  %11307 = vmatprep.mubr.bf16.mxu1 %v5774_v27  ;;  %v5792_v27 = vrot.slane %v5397_v36, 4  ;;  %v5788_v4 = vrot.slane %v5388_v50, 4  ;;  %v6319_v36 = vshrl.u32 %v9633_v55, 16  ;;  %v16998_v15 = vshll.u32 %v14884_v14, 16 }
 0x2cd   : > { %11355 = vmatprep.mubr.bf16.mxu0 %v6281_v61  ;;  %11392 = vmatpush3.bf16.msra.mxu1 %v14872_v29  ;;  %v5787_v29 = vrot.slane %v5385_v16, 3  ;;  %v9634_v16 = vcombine.low %v15114_v56, %v15116_v33  ;;  %v6299_v21 = vsel %vm1223_vm2, %v6289_v6, %v6298_v44  ;;  %v6312_v50 = vrot.slane %v6310_v23, 3  ;;  %v12061_v23 = vld [vmem:[#allocation8 + $0x168] sm:$0xff]  }
 0x2ce   : > { %11393 = vmatprep.subr.bf16.mxu1 %v12043_v60  ;;  %v15122_v2 = vor.u32 %v5792_v27, %v5791_v35  ;;  %v5800_v38 = vrot.slane %v16998_v15, 4  ;;  %v6315_v17 = vrot.slane %v6313_v47, 4  ;;  %v6321_v61 = vrot.slane %v6319_v36, 3  ;;  %v15153_v47 = vld [vmem:[#allocation2 + $0x54] sm:$0xf] }
 0x2cf   : > { %v15135_v1 = vor.u32 %v5788_v4, %v5787_v29  ;;  %v6324_v14 = vrot.slane %v6322_v41, 4  ;;  %v16999_v28 = vshrl.u32 %v14933_v40, 16  ;;  %v17000_v63 = vshll.u32 %v14933_v40, 16 }
 0x2d0   : > { %v15139_v22 = vor.u32 %v5800_v38, %v5799_v18  ;;  %v6328_v35 = vshrl.u32 %v9634_v16, 16  ;;  %v6316_v55 = vor.u32 %v6315_v17, %v6312_v50  ;;  %v9635_v6 = vcombine.low %v15137_v32, %v15141_v52  ;;  %v12058_v18 = vld [vmem:[#allocation8 + $0x110] sm:$0xff]   ;;  %v15175_v17 = vld [vmem:[#allocation2 + $0x5c] sm:$0xf] }
 0x2d1   : > { %11394 = vmatpush3.bf16.msra.mxu1 %v12043_v60  ;;  %v6307_v60 = vor.u32 %v6306_v11, %v6303_v34  ;;  %v5807_v39 = vrot.slane %v16999_v28, 3  ;;  %v5808_v31 = vrot.slane %v17000_v63, 4  ;;  %v15151_v34 = vld [vmem:[#allocation2 + $0x50] sm:$0xf]  ;;  %v5790_v40 = vsel %vm1223_vm2, %v15107_v8, %v15135_v1  ;;  %v15180_v63 = vld [vmem:[#allocation2 + $0x60] sm:$0xf] }
 0x2d2   : > { %11395 = vmatprep.subr.bf16.mxu1 %v12046_v54  ;;  %v6325_v29 = vor.u32 %v6324_v14, %v6321_v61  ;;  %v17002_v41 = vshll.u32 %v14863_v42, 16  ;;  %v17004_v15 = vshll.u32 %v14966_v58, 16  ;;  %v6340_v50 = vshll.u32 %v9635_v6, 16 }
 0x2d3   : > { %11308 = vmatmul.mubr.bf16.gmra.mxu1 %v5778_v24  ;;  %v12053_v24 = vld [vmem:[#allocation8 + $0x118] sm:$0xff]   ;;  %v6308_v27 = vsel %vm1223_vm2, %v6298_v44, %v6307_v60  ;;  %v15155_v11 = vor.u32 %v5808_v31, %v5807_v39  ;;  %v17001_v44 = vshrl.u32 %v14863_v42, 16  ;;  %v15173_v42 = vld [vmem:[#allocation2 + $0x58] sm:$0xf] }
 0x2d4   : > { %11356 = vmatmul.mubr.bf16.vlgmr.msra.gmra.mxu0 %v6290_v46  ;;  %11311 = vmatprep.mubr.bf16.mxu1 %v5782_v9  ;;  %v5796_v46 = vrot.slane %v17002_v41, 4  ;;  %v17003_v9 = vshrl.u32 %v14966_v58, 16  ;;  %v5816_v38 = vrot.slane %v17004_v15, 4  ;;  %v6326_v14 = vsel %vm1223_vm2, %v6316_v55, %v6325_v29  ;;  %v15182_v58 = vld [vmem:[#allocation2 + $0x64] sm:$0xf]  ;;  %v12068_v15 = vld [vmem:[#allocation8 + $0x100] sm:$0xff]  }
 0x2d5   : > { %11359 = vmatprep.mubr.bf16.mxu0 %v6299_v21  ;;  %11396 = vmatpush3.bf16.msra.mxu1 %v12046_v54  ;;  %v6331_v54 = vshll.u32 %v9634_v16, 16  ;;  %v5795_v4 = vrot.slane %v17001_v44, 3  ;;  %v9636_v16 = vcombine.low %v15151_v34, %v15153_v47  ;;  %v6337_v21 = vshrl.u32 %v9635_v6, 16 }
 0x2d6   : > { %11397 = vmatprep.subr.bf16.mxu1 %v12049_v7  ;;  %11444 = vmatpush3.bf16.msra.mxu0 %v14913_v57  ;;  %v5786_v57 = vsel %vm1223_vm2, %v5781_v37, %v15107_v8  ;;  %v5815_v37 = vrot.slane %v17003_v9, 3  ;;  %v6317_v8 = vsel %vm1223_vm2, %v6307_v60, %v6316_v55  ;;  %v12063_v60 = vld [vmem:[#allocation8 + $0x108] sm:$0xff]   ;;  %v9637_v55 = vcombine.low %v15173_v42, %v15175_v17 }
 0x2d7   : > { %11445 = vmatprep.subr.bf16.mxu0 %v12059_v25  ;;  %v6333_v36 = vrot.slane %v6331_v54, 4  ;;  %v5797_v39 = vor.u32 %v5796_v46, %v5795_v4  ;;  %v6346_v31 = vshrl.u32 %v9636_v16, 16  ;;  %v17007_v44 = vshrl.u32 %v14998_v20, 16  ;;  %v12066_v46 = vld [vmem:[#allocation8 + $0x158] sm:$0xff]  }
 0x2d8   : > { %v15177_v61 = vor.u32 %v5816_v38, %v5815_v37  ;;  %v17009_v37 = vshrl.u32 %v14911_v51, 16 }
 0x2d9   : > { %11398 = vmatpush3.bf16.msra.mxu1 %v12049_v7  ;;  %v6330_v7 = vrot.slane %v6328_v35, 3  ;;  %v6349_v35 = vshll.u32 %v9636_v16, 16  ;;  %v5823_v4 = vrot.slane %v17007_v44, 3  ;;  %v6348_v38 = vrot.slane %v6346_v31, 3  ;;  %v15217_v44 = vld [vmem:[#allocation8 + $0x1b8] sm:$0xff]  }
 0x2da   : > { %11399 = vmatprep.subr.bf16.mxu1 %v12053_v24  ;;  %11446 = vmatpush3.bf16.msra.mxu0 %v12059_v25  ;;  %v12064_v25 = vld [vmem:[#allocation8 + $0x160] sm:$0xff]  }
 0x2db   : > { %11312 = vmatmul.mubr.bf16.gmra.mxu1 %v5786_v57  ;;  %11447 = vmatprep.subr.bf16.mxu0 %v12061_v23  ;;  %v6334_v28 = vor.u32 %v6333_v36, %v6330_v7  ;;  %v6339_v57 = vrot.slane %v6337_v21, 3  ;;  %v9638_v7 = vcombine.low %v15180_v63, %v15182_v58 }
 0x2dc   : > { %11360 = vmatmul.mubr.bf16.gmra.mxu0 %v6308_v27  ;;  %11315 = vmatprep.mubr.bf16.mxu1 %v5790_v40  ;;  %v17006_v27 = vshll.u32 %v14984_v19, 16  ;;  %v6342_v40 = vrot.slane %v6340_v50, 4  ;;  %v12070_v50 = vld [vmem:[#allocation8 + $0x150] sm:$0xff]  }
 0x2dd   : > { %11363 = vmatprep.mubr.bf16.mxu0 %v6317_v8  ;;  %11400 = vmatpush3.bf16.msra.mxu1 %v12053_v24  ;;  %v17005_v24 = vshrl.u32 %v14984_v19, 16  ;;  %v17008_v19 = vshll.u32 %v14998_v20, 16  ;;  %v6335_v9 = vsel %vm1223_vm2, %v6325_v29, %v6334_v28  ;;  %v5803_v8 = vrot.slane %v17009_v37, 3 }
 0x2de   : > { %11401 = vmatprep.subr.bf16.mxu1 %v12058_v18  ;;  %11448 = vmatpush3.bf16.msra.mxu0 %v12061_v23  ;;  %v5820_v6 = vrot.slane %v17006_v27, 4  ;;  %v5794_v23 = vsel %vm1223_vm2, %v15135_v1, %v15122_v2  ;;  %v17010_v1 = vshll.u32 %v14911_v51, 16  ;;  %v6351_v20 = vrot.slane %v6349_v35, 4 }
 0x2df   : > { %v5819_v54 = vrot.slane %v17005_v24, 3  ;;  %11449 = vmatprep.subr.bf16.mxu0 %v12064_v25  ;;  %v5824_v41 = vrot.slane %v17008_v19, 4  ;;  %v6355_v24 = vshrl.u32 %v9637_v55, 16  ;;  %v6367_v31 = vshll.u32 %v9638_v7, 16 }
 0x2e0   : > { %v5804_v16 = vrot.slane %v17010_v1, 4  ;;  %v17014_v1 = vshll.u32 %v14949_v30, 16 }
 0x2e1   : > { %11402 = vmatpush3.bf16.msra.mxu1 %v12058_v18  ;;  %v5821_v36 = vor.u32 %v5820_v6, %v5819_v54  ;;  %v5798_v18 = vsel %vm1223_vm2, %v15122_v2, %v5797_v39  ;;  %v5825_v29 = vor.u32 %v5824_v41, %v5823_v4  ;;  %v6343_v2 = vor.u32 %v6342_v40, %v6339_v57  ;;  %v15221_v57 = vld [vmem:[#allocation2 + $0x68] sm:$0xf]  ;;  %v15223_v40 = vld [vmem:[#allocation2 + $0x6c] sm:$0xf]  ;;  %v12073_v41 = vld [vmem:[#allocation8 + $0x148] sm:$0xff]  }
 0x2e2   : > { %11403 = vmatprep.subr.bf16.mxu1 %v12063_v60  ;;  %11450 = vmatpush3.bf16.msra.mxu0 %v12064_v25  ;;  %v17011_v54 = vshrl.u32 %v15028_v48, 16  ;;  %v17012_v25 = vshll.u32 %v15028_v48, 16  ;;  %v6364_v6 = vshrl.u32 %v9638_v7, 16  ;;  %v5805_v4 = vor.u32 %v5804_v16, %v5803_v8  ;;  %v15228_v7 = vld [vmem:[#allocation2 + $0x70] sm:$0xf] }
 0x2e3   : > { %11316 = vmatmul.mubr.bf16.gmra.mxu1 %v5794_v23  ;;  %v15208_v21 = vsel %vm1223_vm2, %v15177_v61, %v5821_v36  ;;  %v15215_v35 = vsel %vm1223_vm2, %v5821_v36, %v5825_v29  ;;  %11451 = vmatprep.subr.bf16.mxu0 %v12066_v46  ;;  %v6344_v48 = vsel %vm1223_vm2, %v6334_v28, %v6343_v2  ;;  %v15230_v36 = vld [vmem:[#allocation2 + $0x74] sm:$0xf]  ;;  %v6369_v37 = vrot.slane %v6367_v31, 4 }
 0x2e4   : > { %11364 = vmatmul.mubr.bf16.gmra.mxu0 %v6326_v14  ;;  %11319 = vmatprep.mubr.bf16.mxu1 %v5798_v18  ;;  %v5827_v51 = vrot.slane %v17011_v54, 3  ;;  %v5828_v27 = vrot.slane %v17012_v25, 4  ;;  %v6358_v14 = vshll.u32 %v9637_v55, 16  ;;  %v5802_v55 = vsel %vm1223_vm2, %v5797_v39, %v15139_v22 }
 0x2e5   : > { %11367 = vmatprep.mubr.bf16.mxu0 %v6335_v9  ;;  %11404 = vmatpush3.bf16.msra.mxu1 %v12063_v60  ;;  %v6352_v60 = vor.u32 %v6351_v20, %v6348_v38  ;;  %v6366_v18 = vrot.slane %v6364_v6, 3  ;;  %v5806_v28 = vsel %vm1223_vm2, %v15139_v22, %v5805_v4  ;;  %v17013_v39 = vshrl.u32 %v14949_v30, 16  ;;  %v15254_v6 = vld [vmem:[#allocation2 + $0x84] sm:$0xf] }
 0x2e6   : > { %v15219_v23 = vor.u32 %v5828_v27, %v5827_v51  ;;  %11452 = vmatpush3.bf16.msra.mxu0 %v12066_v46  ;;  %11405 = vmatprep.subr.bf16.mxu1 %v12068_v15  ;;  %v6357_v46 = vrot.slane %v6355_v24, 3  ;;  %v6360_v9 = vrot.slane %v6358_v14, 4  ;;  %v5812_v16 = vrot.slane %v17014_v1, 4  ;;  %v15248_v14 = vld [vmem:[#allocation2 + $0x78] sm:$0xf] }
 0x2e7   : > { %11453 = vmatprep.subr.bf16.mxu0 %v12070_v50  ;;  %v5811_v8 = vrot.slane %v17013_v39, 3  ;;  %v6353_v38 = vsel %vm1223_vm2, %v6343_v2, %v6352_v60  ;;  %v9640_v20 = vcombine.low %v15228_v7, %v15230_v36  ;;  %v6370_v24 = vor.u32 %v6369_v37, %v6366_v18  ;;  %v15252_v2 = vld [vmem:[#allocation2 + $0x80] sm:$0xf] }
 0x2e8   : > { %v15234_v19 = vsel %vm1223_vm2, %v5825_v29, %v15219_v23  ;;  %v12076_v29 = vld [vmem:[#allocation8 + $0x140] sm:$0xff]   ;;  %v6361_v22 = vor.u32 %v6360_v9, %v6357_v46  ;;  %v9657_v31 = vcombine.low %v15062_v59, %v15071_v13  ;;  %v5810_v9 = vsel %vm1223_vm2, %v5805_v4, %v15155_v11 }
 0x2e9   : > { %11406 = vmatpush3.bf16.msra.mxu1 %v12068_v15  ;;  %v9639_v15 = vcombine.low %v15221_v57, %v15223_v40  ;;  %v5813_v54 = vor.u32 %v5812_v16, %v5811_v8  ;;  %v6382_v25 = vshrl.u32 %v9640_v20, 16  ;;  %v6385_v27 = vshll.u32 %v9640_v20, 16 }
 0x2ea   : > { %11495 = vmatprep.subr.bf16.mxu1 %v15217_v44  ;;  %11454 = vmatpush3.bf16.msra.mxu0 %v12070_v50  ;;  %v15250_v50 = vld [vmem:[#allocation2 + $0x7c] sm:$0xf]  ;;  %v6371_v46 = vsel %vm1223_vm2, %v6361_v22, %v6370_v24 }
 0x2eb   : > { %11320 = vmatmul.mubr.bf16.gmra.mxu1 %v5802_v55  ;;  %11455 = vmatprep.subr.bf16.mxu0 %v12073_v41  ;;  %v6373_v51 = vshrl.u32 %v9639_v15, 16  ;;  %v6376_v30 = vshll.u32 %v9639_v15, 16  ;;  %v15260_v55 = vld [vmem:[#allocation8 + $0x1f8] sm:$0xff]   ;;  %v5814_v18 = vsel %vm1223_vm2, %v15155_v11, %v5813_v54  ;;  %v9641_v39 = vcombine.low %v15248_v14, %v15250_v50 }
 0x2ec   : > { %11368 = vmatmul.mubr.bf16.gmra.mxu0 %v6344_v48  ;;  %11323 = vmatprep.mubr.bf16.mxu1 %v5806_v28  ;;  %v9658_v48 = vcombine.low %v15082_v0, %v15084_v10  ;;  %v6384_v8 = vrot.slane %v6382_v25, 3  ;;  %v6387_v1 = vrot.slane %v6385_v27, 4  ;;  %v15281_v25 = vld [vmem:[#allocation2 + $0x8c] sm:$0xf] }
 0x2ed   : > { %11371 = vmatprep.mubr.bf16.mxu0 %v6353_v38  ;;  %v6375_v37 = vrot.slane %v6373_v51, 3  ;;  %v6378_v28 = vrot.slane %v6376_v30, 4  ;;  %v6391_v15 = vshrl.u32 %v9641_v39, 16  ;;  %v6394_v38 = vshll.u32 %v9641_v39, 16  ;;  %v15279_v30 = vld [vmem:[#allocation2 + $0x88] sm:$0xf] }
 0x2ee   : > { %11456 = vmatpush3.bf16.msra.mxu0 %v12073_v41  ;;  %v6362_v41 = vsel %vm1223_vm2, %v6352_v60, %v6361_v22  ;;  %v9642_v60 = vcombine.low %v15252_v2, %v15254_v6 }
 0x2ef   : > { %11457 = vmatprep.subr.bf16.mxu0 %v12076_v29  ;;  %v6379_v16 = vor.u32 %v6378_v28, %v6375_v37 }
 0x2f0   : > { %v6400_v22 = vshrl.u32 %v9642_v60, 16  ;;  %v6403_v51 = vshll.u32 %v9642_v60, 16  ;;  %v9643_v60 = vcombine.low %v15279_v30, %v15281_v25 }
 0x2f1   : > { %v6380_v39 = vsel %vm1223_vm2, %v6370_v24, %v6379_v16  ;;  %v15310_v24 = vld [vmem:[#allocation2 + $0x98] sm:$0xf] }
 0x2f2   : > { %11458 = vmatpush3.bf16.msra.mxu0 %v12076_v29  ;;  %v6388_v29 = vor.u32 %v6387_v1, %v6384_v8  ;;  %v6393_v8 = vrot.slane %v6391_v15, 3  ;;  %v6396_v1 = vrot.slane %v6394_v38, 4  ;;  %v6412_v20 = vshll.u32 %v9643_v60, 16 }
 0x2f3   : > { %11324 = vmatmul.mubr.bf16.gmra.mxu1 %v5810_v9  ;;  %11547 = vmatprep.subr.bf16.mxu0 %v15260_v55  ;;  %v5818_v9 = vsel %vm1223_vm2, %v5813_v54, %v15177_v61  ;;  %v6402_v61 = vrot.slane %v6400_v22, 3  ;;  %v6405_v54 = vrot.slane %v6403_v51, 4  ;;  %v12108_v22 = vld [vmem:[#allocation8 + $0x1f0] sm:$0xff]  }
 0x2f4   : > { %11372 = vmatmul.mubr.bf16.gmra.mxu0 %v6362_v41  ;;  %11327 = vmatprep.mubr.bf16.mxu1 %v5814_v18  ;;  %v15285_v41 = vld [vmem:[#allocation2 + $0x90] sm:$0xf]  ;;  %v6389_v27 = vsel %vm1223_vm2, %v6379_v16, %v6388_v29  ;;  %v6397_v28 = vor.u32 %v6396_v1, %v6393_v8  ;;  %v6414_v1 = vrot.slane %v6412_v20, 4 }
 0x2f5   : > { %11375 = vmatprep.mubr.bf16.mxu0 %v6371_v46  ;;  %v15287_v46 = vld [vmem:[#allocation2 + $0x94] sm:$0xf]  ;;  %v12069_v18 = vld [vmem:[#allocation2 + $0x90] ss:$0 sps:$4 sm:$0xff]   ;;  %v6406_v16 = vor.u32 %v6405_v54, %v6402_v61 }
 0x2f6   : > { %v9644_v37 = vcombine.low %v15285_v41, %v15287_v46  ;;  %v5835_v15 = vshll.u32 %v12069_v18, 16 }
 0x2f8   : > { %v6418_v11 = vshrl.u32 %v9644_v37, 16  ;;  %v5837_v4 = vrot.slane %v5835_v15, 4  ;;  %v12074_v15 = vld [vmem:[#allocation2 + $0xc] sm:$0xff]  }
 0x2fa   : > { %v6420_v61 = vrot.slane %v6418_v11, 3 }
 0x2fb   : > { %11328 = vmatmul.mubr.bf16.gmra.mxu1 %v5818_v9  ;;  %v5832_v9 = vshrl.u32 %v12069_v18, 16  ;;  %v6398_v18 = vsel %vm1223_vm2, %v6388_v29, %v6397_v28  ;;  %v9645_v29 = vcombine.low %v15310_v24, %v15310_v24 }
 0x2fc   : > { %11376 = vmatmul.mubr.bf16.gmra.mxu0 %v6380_v39  ;;  %11331 = vmatprep.mubr.bf16.mxu1 %v15208_v21  ;;  %v6409_v39 = vshrl.u32 %v9643_v60, 16  ;;  %v6421_v21 = vshll.u32 %v9644_v37, 16  ;;  %v6407_v37 = vsel %vm1223_vm2, %v6397_v28, %v6406_v16  ;;  %v12075_v60 = vld [vmem:[#allocation2 + $0x14] sm:$0xff]  }
 0x2fd   : > { %11379 = vmatprep.mubr.bf16.mxu0 %v6389_v27  ;;  %v5834_v27 = vrot.slane %v5832_v9, 3  ;;  %v6430_v11 = vshll.u32 %v9645_v29, 16  ;;  %v7176_v9 = vshll.u32 %v12074_v15, 16 }
 0x2fe   : > { %v6411_v8 = vrot.slane %v6409_v39, 3  ;;  %v6423_v54 = vrot.slane %v6421_v21, 4 }
 0x300   : > { %v6415_v39 = vor.u32 %v6414_v1, %v6411_v8  ;;  %v6424_v28 = vor.u32 %v6423_v54, %v6420_v61  ;;  %v7181_v1 = vshll.u32 %v12075_v60, 16 }
 0x302   : > { %v6425_v8 = vsel %vm1223_vm2, %v6415_v39, %v6424_v28 }
 0x303   : > { %11332 = vmatmul.mubr.bf16.gmra.mxu1 %v15215_v35  ;;  %v5838_v35 = vor.u32 %v5837_v4, %v5834_v27  ;;  %v6416_v4 = vsel %vm1223_vm2, %v6406_v16, %v6415_v39 }
 0x304   : > { %11380 = vmatmul.mubr.bf16.gmra.mxu0 %v6398_v18  ;;  %11335 = vmatprep.mubr.bf16.mxu1 %v15234_v19  ;;  %v15324_v18 = vld [vmem:[#allocation2 + $0x24] sm:$0xff]   ;;  %v6427_v19 = vshrl.u32 %v9645_v29, 16  ;;  %v6432_v29 = vrot.slane %v6430_v11, 4 }
 0x305   : > { %11383 = vmatprep.mubr.bf16.mxu0 %v6407_v37  ;;  %v5839_v21 = vsel %vm1223_vm2, %v15219_v23, %v5838_v35  ;;  %v9654_v37 = vcombine.low %v15023_v45, %v15035_v62  ;;  %v16590_v27 = vshll.u32 %v15324_v18, 16  ;;  %v16589_v61 = vshrl.u32 %v15324_v18, 16  ;;  %v12079_v62 = vld [vmem:[#allocation2 + $0x1c] sm:$0xff]   ;;  %v12083_v11 = vld [vmem:[#allocation8 + $0x1b0] sm:$0xff]  }
 0x306   : > { %v6429_v54 = vrot.slane %v6427_v19, 3  ;;  %v7178_v45 = vrot.slane %v7176_v9, 1  ;;  %v7174_v35 = vshrl.u32 %v12074_v15, 16  ;;  %v7189_v19 = vshll.u32 %v12079_v62, 16 }
 0x307   : > { %v8542_v23 = vrot.slane %v16590_v27, 2  ;;  %v8541_v16 = vrot.slane %v16589_v61, 1  ;;  %v17015_v9 = vcombine.low %v15026_v3, %v15011_v26  ;;  %v7193_v3 = vshrl.u32 %v12079_v62, 16  ;;  %v12093_v61 = vld [vmem:[#allocation8 + $0x1a0] sm:$0xff]  }
 0x308   : > { %v6433_v39 = vor.u32 %v6432_v29, %v6429_v54  ;;  %v12089_v54 = vld [vmem:[#allocation2 + $0x3c] sm:$0xff]  }
 0x309   : > { %v15338_v20 = vor.u32 %v8542_v23, %v8541_v16  ;;  %v12084_v23 = vld [vmem:[#allocation2 + $0x2c] sm:$0xff]   ;;  %v12085_v16 = vld [vmem:[#allocation2 + $0x34] sm:$0xff]   ;;  %v12088_v29 = vld [vmem:[#allocation8 + $0x1a8] sm:$0xff]  }
 0x30a   : > { %v6434_v51 = vsel %vm1223_vm2, %v6424_v28, %v6433_v39  ;;  %v12094_v28 = vld [vmem:[#allocation2 + $0x4c] sm:$0xff]   ;;  %v7213_v39 = vshll.u32 %v12085_v16, 16 }
 0x30b   : > { %11336 = vmatmul.mubr.bf16.gmra.mxu1 %v5839_v21  ;;  %v7183_v21 = vrot.slane %v7181_v1, 1 }
 0x30c   : > { %11384 = vmatmul.mubr.bf16.gmra.mxu0 %v6416_v4  ;;  %11407 = vmatprep.mubr.bf16.mxu1 %v9654_v37  ;;  %v12080_v4 = vld [vmem:[#allocation2 + $0x24] sm:$0xff]   ;;  %v7179_v37 = vor.u32 %v7178_v45, %v7174_v35  ;;  %v7185_v45 = vshrl.u32 %v12075_v60, 16  ;;  %v15348_v35 = vld [vmem:[#allocation2 + $0x54] sm:$0xff]  }
 0x30d   : > { %11387 = vmatprep.mubr.bf16.mxu0 %v6425_v8  ;;  %v9656_v8 = vcombine.low %v15054_v12, %v15060_v5  ;;  %v7197_v1 = vshll.u32 %v12080_v4, 16  ;;  %v12090_v5 = vld [vmem:[#allocation2 + $0x44] sm:$0xff]   ;;  %v7191_v12 = vrot.slane %v7189_v19, 1  ;;  %v7237_v19 = vshll.u32 %v12094_v28, 16 }
 0x30e   : > { %v7184_v15 = vsel %vm2642_vm3, %v7179_v37, %v7183_v21  ;;  %v15350_v37 = vld [vmem:[#allocation2 + $0x5c] sm:$0xff]   ;;  %v7201_v60 = vshrl.u32 %v12080_v4, 16  ;;  %v7245_v62 = vshll.u32 %v15348_v35, 16  ;;  %v7209_v4 = vshrl.u32 %v12084_v23, 16 }
 0x30f   : > { %v7199_v26 = vrot.slane %v7197_v1, 1  ;;  %v15357_v1 = vld [vmem:[#allocation2 + $0x64] sm:$0xff]   ;;  %v7233_v38 = vshrl.u32 %v12090_v5, 16 }
 0x310   : > { %v7247_v0 = vrot.slane %v7245_v62, 1  ;;  %v7261_v10 = vshll.u32 %v15357_v1, 16 }
 0x313   : > { %11408 = vmatmul.mubr.bf16.vlgmr.msra.gmra.mxu1 %v17015_v9  ;;  %v7221_v9 = vshll.u32 %v12089_v54, 16 }
 0x314   : > { %11388 = vmatmul.mubr.bf16.gmra.mxu0 %v6434_v51  ;;  %11411 = vmatprep.mubr.bf16.mxu1 %v9656_v8  ;;  %v7205_v51 = vshll.u32 %v12084_v23, 16  ;;  %v7187_v8 = vor.u32 %v7185_v45, %v7183_v21  ;;  %v7215_v45 = vrot.slane %v7213_v39, 1  ;;  %v15370_v23 = vld [vmem:[#allocation2 + $0x1c] sm:$0xff]  }
 0x315   : > { %11459 = vmatprep.mubr.bf16.mxu0 %v7184_v15  ;;  %11496 = vmatpush3.bf16.msra.mxu1 %v15217_v44  ;;  %v7229_v15 = vshll.u32 %v12090_v5, 16  ;;  %v7195_v44 = vor.u32 %v7193_v3, %v7191_v12  ;;  %v7223_v13 = vrot.slane %v7221_v9, 1  ;;  %v7217_v3 = vshrl.u32 %v12085_v16, 16  ;;  %v15374_v5 = vld [vmem:[#allocation2 + $0x2c] sm:$0xff]  }
 0x316   : > { %11497 = vmatprep.subr.bf16.mxu1 %v12083_v11  ;;  %v7192_v27 = vsel %vm2642_vm3, %v7187_v8, %v7191_v12  ;;  %v7253_v12 = vshll.u32 %v15350_v37, 16  ;;  %v7239_v8 = vrot.slane %v7237_v19, 1  ;;  %v15376_v19 = vld [vmem:[#allocation2 + $0x34] sm:$0xff]  }
 0x317   : > { %v7200_v21 = vsel %vm2642_vm3, %v7195_v44, %v7199_v26  ;;  %v7231_v59 = vrot.slane %v7229_v15, 1  ;;  %v7225_v44 = vshrl.u32 %v12089_v54, 16  ;;  %v7219_v39 = vor.u32 %v7217_v3, %v7215_v45  ;;  %v12122_v3 = vld [vmem:[#allocation8 + $0x1d0] sm:$0xff]  }
 0x318   : > { %v15366_v9 = vrot.slane %v7253_v12, 1  ;;  %v7249_v54 = vshrl.u32 %v15348_v35, 16  ;;  %v12106_v12 = vld [vmem:[#allocation8 + $0x190] sm:$0xff]  }
 0x319   : > { %11498 = vmatpush3.bf16.msra.mxu1 %v12083_v11  ;;  %v7207_v11 = vrot.slane %v7205_v51, 1  ;;  %v7227_v15 = vor.u32 %v7225_v44, %v7223_v13  ;;  %v15415_v44 = vld [vmem:[#allocation2 + $0x5c] sm:$0xff]  }
 0x31a   : > { %11499 = vmatprep.subr.bf16.mxu1 %v12088_v29 }
 0x31b   : > { %11412 = vmatmul.mubr.bf16.gmra.mxu1 %v9657_v31  ;;  %v7203_v31 = vor.u32 %v7201_v60, %v7199_v26  ;;  %v7211_v51 = vor.u32 %v7209_v4, %v7207_v11  ;;  %v15368_v26 = vld [vmem:[#allocation2 + $0x6c] sm:$0xff]   ;;  %v15391_v35 = vsel %vm2642_vm3, %v7227_v15, %v7231_v59  ;;  %v15402_v4 = vld [vmem:[#allocation2 + $0x54] sm:$0xff]   ;;  %v12113_v15 = vld [vmem:[#allocation8 + $0x188] sm:$0xff]  }
 0x31c   : > { %11460 = vmatmul.mubr.bf16.vlgmr.msra.gmra.mxu0 %v7192_v27  ;;  %11415 = vmatprep.mubr.bf16.mxu1 %v9658_v48  ;;  %v12099_v27 = vld [vmem:[#allocation8 + $0x198] sm:$0xff]   ;;  %v12111_v48 = vld [vmem:[#allocation8 + $0x1e8] sm:$0xff]  }
 0x31d   : > { %11463 = vmatprep.mubr.bf16.mxu0 %v7200_v21  ;;  %11500 = vmatpush3.bf16.msra.mxu1 %v12088_v29  ;;  %v7241_v29 = vshrl.u32 %v12094_v28, 16  ;;  %v7208_v16 = vsel %vm2642_vm3, %v7203_v31, %v7207_v11  ;;  %v7216_v60 = vsel %vm2642_vm3, %v7211_v51, %v7215_v45  ;;  %v15380_v28 = vsel %vm2642_vm3, %v7219_v39, %v7223_v13  ;;  %v15383_v11 = vld [vmem:[#allocation2 + $0x3c] sm:$0xff]   ;;  %v15419_v51 = vld [vmem:[#allocation2 + $0x6c] sm:$0xff]  }
 0x31e   : > { %11501 = vmatprep.subr.bf16.mxu1 %v12093_v61  ;;  %11548 = vmatpush3.bf16.msra.mxu0 %v15260_v55  ;;  %v7235_v55 = vor.u32 %v7233_v38, %v7231_v59  ;;  %v7257_v21 = vshrl.u32 %v15350_v37, 16  ;;  %17016 = vst [vmem:[#allocation42_spill] sm:$0xff] %v15383_v11  ;;  %v15385_v38 = vld [vmem:[#allocation2 + $0x44] sm:$0xff]   ;;  %v15396_v13 = vor.u32 %v7249_v54, %v7247_v0  ;;  %v15398_v31 = vrot.slane %v7261_v10, 1  ;;  %v15400_v37 = vld [vmem:[#allocation2 + $0x4c] sm:$0xff]   ;;  %v12120_v54 = vld [vmem:[#allocation8 + $0x180] sm:$0xff]  }
 0x31f   : > { %11549 = vmatprep.subr.bf16.mxu0 %v12108_v22  ;;  %v7243_v62 = vor.u32 %v7241_v29, %v7239_v8  ;;  %v15417_v10 = vld [vmem:[#allocation2 + $0x64] sm:$0xff]   ;;  %v15425_v29 = vld [vmem:[#allocation2 + $0x74] sm:$0xff]   ;;  %v15439_v39 = vld [vmem:[#allocation2 + $0x8c] sm:$0xff]  }
 0x320   : > { %v15394_v45 = vsel %vm2642_vm3, %v7235_v55, %v7239_v8  ;;  %v15411_v59 = vor.u32 %v7257_v21, %v15366_v9  ;;  %v16592_v8 = vshll.u32 %v15370_v23, 16  ;;  %v12118_v21 = vld [vmem:[#allocation8 + $0x1d8] sm:$0xff]  }
 0x321   : > { %11502 = vmatpush3.bf16.msra.mxu1 %v12093_v61  ;;  %v17017_v61 = vcombine.low %v15088_v53, %v15096_v43  ;;  %v17018_v53 = vcombine.low %v15098_v49, %v15114_v56  ;;  %v15408_v43 = vsel %vm2642_vm3, %v7243_v62, %v7247_v0  ;;  %v16591_v49 = vshrl.u32 %v15370_v23, 16  ;;  %v15433_v62 = vld [vmem:[#allocation2 + $0x84] sm:$0xff]   ;;  %v15445_v56 = vld [vmem:[#allocation2 + $0x94] sm:$0xff]  }
 0x322   : > { %11503 = vmatprep.subr.bf16.mxu1 %v12099_v27  ;;  %11550 = vmatpush3.bf16.msra.mxu0 %v12108_v22  ;;  %v12115_v22 = vld [vmem:[#allocation8 + $0x1e0] sm:$0xff]   ;;  %v17020_v0 = vcombine.low %v15141_v52, %v15151_v34  ;;  %v17024_v52 = vshrl.u32 %v15376_v19, 16 }
 0x323   : > { %11416 = vmatmul.mubr.bf16.gmra.mxu1 %v17017_v61  ;;  %11551 = vmatprep.subr.bf16.mxu0 %v12111_v48  ;;  %v17031_v61 = vshrl.u32 %v15400_v37, 16 }
 0x324   : > { %11464 = vmatmul.mubr.bf16.gmra.mxu0 %v7208_v16  ;;  %11419 = vmatprep.mubr.bf16.mxu1 %v17018_v53  ;;  %v15427_v16 = vld [vmem:[#allocation2 + $0x7c] sm:$0xff]   ;;  %v17019_v53 = vcombine.low %v15116_v33, %v15137_v32  ;;  %v8549_v34 = vrot.slane %v17024_v52, 1  ;;  %v15484_v32 = vld [vmem:[#allocation8 + $0x238] sm:$0xff]  }
 0x325   : > { %11467 = vmatprep.mubr.bf16.mxu0 %v7216_v60  ;;  %11504 = vmatpush3.bf16.msra.mxu1 %v12099_v27  ;;  %v8537_v27 = vrot.slane %v16591_v49, 1  ;;  %v8538_v60 = vrot.slane %v16592_v8, 2  ;;  %v17027_v49 = vshll.u32 %v15383_v11, 16 }
 0x326   : > { %11505 = vmatprep.subr.bf16.mxu1 %v12106_v12  ;;  %11552 = vmatpush3.bf16.msra.mxu0 %v12111_v48 }
 0x327   : > { %11553 = vmatprep.subr.bf16.mxu0 %v12115_v22 }
 0x329   : > { %11506 = vmatpush3.bf16.msra.mxu1 %v12106_v12  ;;  %v15455_v12 = vld [vmem:[#allocation2 + $0x9c] sm:$0xff]  }
 0x32a   : > { %11507 = vmatprep.subr.bf16.mxu1 %v12113_v15  ;;  %11554 = vmatpush3.bf16.msra.mxu0 %v12115_v22  ;;  %v17022_v22 = vshll.u32 %v15374_v5, 16 }
 0x32b   : > { %11420 = vmatmul.mubr.bf16.gmra.mxu1 %v17019_v53  ;;  %11555 = vmatprep.subr.bf16.mxu0 %v12118_v21  ;;  %v17021_v53 = vshrl.u32 %v15374_v5, 16 }
 0x32c   : > { %11468 = vmatmul.mubr.bf16.gmra.mxu0 %v15380_v28  ;;  %11423 = vmatprep.mubr.bf16.mxu1 %v17020_v0  ;;  %v8546_v55 = vrot.slane %v17022_v22, 2  ;;  %v15478_v28 = vor.u32 %v8538_v60, %v8537_v27  ;;  %v17025_v0 = vshll.u32 %v15376_v19, 16  ;;  %v8554_v27 = vrot.slane %v17027_v49, 2  ;;  %v12126_v60 = vld [vmem:[#allocation8 + $0x1c8] sm:$0xff]  }
 0x32d   : > { %v8545_v48 = vrot.slane %v17021_v53, 1  ;;  %11471 = vmatprep.mubr.bf16.mxu0 %v15391_v35  ;;  %11508 = vmatpush3.bf16.msra.mxu1 %v12113_v15  ;;  %v17026_v35 = vshrl.u32 %v15383_v11, 16  ;;  %v17030_v53 = vshll.u32 %v15385_v38, 16  ;;  %v8561_v11 = vrot.slane %v17031_v61, 1 }
 0x32e   : > { %17023 = vst [vmem:[#allocation37_spill] sm:$0xff] %v15478_v28  ;;  %v8550_v8 = vrot.slane %v17025_v0, 2  ;;  %11556 = vmatpush3.bf16.msra.mxu0 %v12118_v21  ;;  %11509 = vmatprep.subr.bf16.mxu1 %v12120_v54  ;;  %v15494_v52 = vsel %vm4000_vm4, %v15478_v28, %v15338_v20  ;;  %v17029_v0 = vshrl.u32 %v15385_v38, 16 }
 0x32f   : > { %v8547_v22 = vor.u32 %v8546_v55, %v8545_v48  ;;  %v8553_v15 = vrot.slane %v17026_v35, 1  ;;  %11557 = vmatprep.subr.bf16.mxu0 %v12122_v3  ;;  %17028 = vst [vmem:[#allocation34_spill] sm:$0xff] %v15494_v52  ;;  %v8558_v55 = vrot.slane %v17030_v53, 2  ;;  %v17033_v53 = vshrl.u32 %v15402_v4, 16 }
 0x330   : > { %v8551_v21 = vor.u32 %v8550_v8, %v8549_v34  ;;  %v8557_v33 = vrot.slane %v17029_v0, 1  ;;  %v17032_v34 = vshll.u32 %v15400_v37, 16 }
 0x331   : > { %v15503_v35 = vsel %vm4000_vm4, %v15338_v20, %v8547_v22  ;;  %v8555_v49 = vor.u32 %v8554_v27, %v8553_v15  ;;  %11510 = vmatpush3.bf16.msra.mxu1 %v12120_v54  ;;  %v8565_v28 = vrot.slane %v17033_v53, 1  ;;  %v17035_v15 = vshll.u32 %v15402_v4, 16 }
 0x332   : > { %v15508_v52 = vsel %vm4000_vm4, %v8547_v22, %v8551_v21  ;;  %v8559_v8 = vor.u32 %v8558_v55, %v8557_v33  ;;  %v8562_v0 = vrot.slane %v17032_v34, 2  ;;  %11558 = vmatpush3.bf16.msra.mxu0 %v12122_v3  ;;  %11599 = vmatprep.subr.bf16.mxu1 %v15484_v32  ;;  %v17036_v54 = vshrl.u32 %v15415_v44, 16  ;;  %v12129_v3 = vld [vmem:[#allocation8 + $0x1c0] sm:$0xff]  }
 0x333   : > { %v15516_v20 = vsel %vm4000_vm4, %v8551_v21, %v8555_v49  ;;  %v8566_v61 = vrot.slane %v17035_v15, 2  ;;  %v17037_v33 = vshll.u32 %v15415_v44, 16  ;;  %v17038_v55 = vcombine.low %v15153_v47, %v15173_v42  ;;  %11559 = vmatprep.subr.bf16.mxu0 %v12126_v60 }
 0x334   : > { %17034 = vst [vmem:[#allocation35_spill] sm:$0xff] %v15516_v20  ;;  %v8569_v22 = vrot.slane %v17036_v54, 1  ;;  %v15528_v34 = vsel %vm4000_vm4, %v8555_v49, %v8559_v8  ;;  %v8563_v21 = vor.u32 %v8562_v0, %v8561_v11  ;;  %v17039_v53 = vshrl.u32 %v15417_v10, 16  ;;  %11472 = vmatmul.mubr.bf16.gmra.mxu0 %v15394_v45 }
 0x335   : > { %v8570_v27 = vrot.slane %v17037_v33, 2  ;;  %11424 = vmatmul.mubr.bf16.gmra.mxu1 %v17038_v55  ;;  %v17040_v15 = vshll.u32 %v15417_v10, 16  ;;  %v17041_v54 = vcombine.low %v15175_v17, %v15180_v63  ;;  %v8567_v47 = vor.u32 %v8566_v61, %v8565_v28  ;;  %11475 = vmatprep.mubr.bf16.mxu0 %v15408_v43 }
 0x336   : > { %v8573_v48 = vrot.slane %v17039_v53, 1  ;;  %v17042_v33 = vshrl.u32 %v15419_v51, 16  ;;  %v17043_v49 = vshll.u32 %v15419_v51, 16  ;;  %v15544_v0 = vsel %vm4000_vm4, %v8559_v8, %v8563_v21  ;;  %11560 = vmatpush3.bf16.msra.mxu0 %v12126_v60 }
 0x337   : > { %v8574_v20 = vrot.slane %v17040_v15, 2  ;;  %11427 = vmatprep.mubr.bf16.mxu1 %v17041_v54  ;;  %v8571_v42 = vor.u32 %v8570_v27, %v8569_v22  ;;  %v17044_v45 = vshrl.u32 %v15425_v29, 16  ;;  %v17045_v17 = vshll.u32 %v15425_v29, 16  ;;  %11561 = vmatprep.subr.bf16.mxu0 %v12129_v3 }
 0x338   : > { %v8577_v55 = vrot.slane %v17042_v33, 1  ;;  %v8578_v11 = vrot.slane %v17043_v49, 2  ;;  %v15551_v28 = vsel %vm4000_vm4, %v8563_v21, %v8567_v47  ;;  %v17048_v43 = vshrl.u32 %v15427_v16, 16  ;;  %v15565_v21 = vld [vmem:[#allocation2 + $0x74] sm:$0xff]  }
 0x339   : > { %v8575_v53 = vor.u32 %v8574_v20, %v8573_v48  ;;  %v8581_v15 = vrot.slane %v17044_v45, 1  ;;  %v8582_v63 = vrot.slane %v17045_v17, 2  ;;  %17046 = vst [vmem:[#allocation13_spill] sm:$0xff] %v15551_v28  ;;  %v15554_v61 = vsel %vm4000_vm4, %v8567_v47, %v8571_v42 }
 0x33a   : > { %17047 = vst [vmem:[#allocation36_spill] sm:$0xff] %v15554_v61  ;;  %v8579_v22 = vor.u32 %v8578_v11, %v8577_v55  ;;  %v8585_v27 = vrot.slane %v17048_v43, 1  ;;  %v17050_v20 = vshll.u32 %v15427_v16, 16  ;;  %v17051_v60 = vshrl.u32 %v15433_v62, 16  ;;  %11562 = vmatpush3.bf16.msra.mxu0 %v12129_v3 }
 0x33b   : > { %v15559_v48 = vsel %vm4000_vm4, %v8571_v42, %v8575_v53  ;;  %v8583_v8 = vor.u32 %v8582_v63, %v8581_v15  ;;  %v17053_v55 = vshll.u32 %v15433_v62, 16  ;;  %v17054_v11 = vshrl.u32 %v15439_v39, 16 }
 0x33c   : > { %17049 = vst [vmem:[#allocation14_spill] sm:$0xff] %v15559_v48  ;;  %v8586_v54 = vrot.slane %v17050_v20, 2  ;;  %v8589_v33 = vrot.slane %v17051_v60, 1  ;;  %v15568_v47 = vsel %vm4000_vm4, %v8575_v53, %v8579_v22  ;;  %v17055_v42 = vshll.u32 %v15439_v39, 16 }
 0x33d   : > { %17052 = vst [vmem:[#allocation15_spill] sm:$0xff] %v15568_v47  ;;  %v8590_v49 = vrot.slane %v17053_v55, 2  ;;  %v8593_v45 = vrot.slane %v17054_v11, 1  ;;  %v15577_v17 = vsel %vm4000_vm4, %v8579_v22, %v8583_v8  ;;  %v17057_v43 = vshrl.u32 %v15445_v56, 16 }
 0x33e   : > { %v8594_v15 = vrot.slane %v17055_v42, 2  ;;  %17056 = vst [vmem:[#allocation16_spill] sm:$0xff] %v15577_v17  ;;  %v8587_v63 = vor.u32 %v8586_v54, %v8585_v27  ;;  %v17058_v60 = vshll.u32 %v15445_v56, 16  ;;  %v17059_v55 = vshrl.u32 %v15455_v12, 16  ;;  %v12110_v42 = vld [vmem:[#allocation2 + $0x7c] sm:$0xff]  }
 0x33f   : > { %v8597_v20 = vrot.slane %v17057_v43, 1  ;;  %v8591_v47 = vor.u32 %v8590_v49, %v8589_v33  ;;  %v17060_v11 = vshll.u32 %v15455_v12, 16  ;;  %v7256_v22 = vsel %vm2642_vm3, %v15396_v13, %v15366_v9 }
 0x340   : > { %v8598_v53 = vrot.slane %v17058_v60, 2  ;;  %v8595_v48 = vor.u32 %v8594_v15, %v8593_v45  ;;  %v8601_v61 = vrot.slane %v17059_v55, 1  ;;  %v7264_v27 = vsel %vm2642_vm3, %v15411_v59, %v15398_v31  ;;  %11476 = vmatmul.mubr.bf16.gmra.mxu0 %v7256_v22  ;;  %v11201_v15 = vpop.f32.mrf.mxu1 }
 0x341   : > { %v8602_v28 = vrot.slane %v17060_v11, 2  ;;  %v17061_v54 = vcombine.low %v15182_v58, %v15221_v57  ;;  %v15597_v3 = vsel %vm4000_vm4, %v8583_v8, %v8587_v63  ;;  %v17063_v49 = vcombine.low %v15223_v40, %v15228_v7  ;;  %11479 = vmatprep.mubr.bf16.mxu0 %v7264_v27 }
 0x342   : > { %17062 = vst [vmem:[#allocation17_spill] sm:$0xff] %v15597_v3  ;;  %v8599_v33 = vor.u32 %v8598_v53, %v8597_v20  ;;  %v7277_v45 = vshll.u32 %v15565_v21, 16  ;;  %v15604_v9 = vsel %vm4000_vm4, %v8587_v63, %v8591_v47  ;;  %v15607_v13 = vsel %vm4000_vm4, %v8591_v47, %v8595_v48  ;;  %v5176_v43 = vpop.f32.mrf.mxu1  ;;  %v7600_v53 = vld [vmem:[#allocation2 + $0x14] sm:$0xf] }
 0x343   : > { %11428 = vmatmul.mubr.bf16.gmra.mxu1 %v17061_v54  ;;  %17064 = vst [vmem:[#allocation38_spill] sm:$0xff] %v15604_v9  ;;  %17065 = vst [vmem:[#allocation41_spill] sm:$0xff] %v15607_v13  ;;  %v15609_v59 = vor.u32 %v8602_v28, %v8601_v61  ;;  %v17068_v57 = vshll.u32 %v15368_v26, 16  ;;  %v7265_v7 = vshrl.u32 %v15357_v1, 16  ;;  %v7273_v47 = vshrl.u32 %v15368_v26, 16  ;;  %v12112_v28 = vld [vmem:[#allocation2 + $0x84] sm:$0xff]  }
 0x344   : > { %11431 = vmatprep.mubr.bf16.mxu1 %v17063_v49  ;;  %v15612_v58 = vsel %vm4000_vm4, %v8595_v48, %v8599_v33  ;;  %v7279_v63 = vrot.slane %v7277_v45, 1  ;;  %v15622_v61 = vld [vmem:[#allocation2 + $0x18] sm:$0xf]  ;;  %v7285_v60 = vshll.u32 %v12110_v42, 16  ;;  %v17070_v11 = vcombine.low %v15230_v36, %v15248_v14  ;;  %v11202_v1 = vpop.f32.mrf.mxu1  ;;  %v12117_v54 = vld [vmem:[#allocation2 + $0x8c] sm:$0xff]  }
 0x345   : > { %17066 = vst [vmem:[#allocation18_spill] sm:$0xff] %v15609_v59  ;;  %17067 = vst [vmem:[#allocation19_spill] sm:$0xff] %v15612_v58  ;;  %v7271_v8 = vrot.slane %v17068_v57, 1  ;;  %v15618_v40 = vsel %vm4000_vm4, %v8599_v33, %v15609_v59  ;;  %v7267_v48 = vor.u32 %v7265_v7, %v15398_v31  ;;  %v9707_v22 = vcombine.low %v7600_v53, %v15622_v61  ;;  %v11253_v33 = vpop.f32.mrf.mxu0 }
 0x346   : > { %17069 = vst [vmem:[#allocation20_spill] sm:$0xff] %v15618_v40  ;;  %v17071_v27 = vcombine.low %v15250_v50, %v15252_v2  ;;  %v7293_v31 = vshll.u32 %v12112_v28, 16  ;;  %v5179_v49 = vpop.f32.mrf.mxu1  ;;  %v15634_v45 = vadd.f32 %v11253_v33, %v11201_v15  ;;  %v7287_v57 = vrot.slane %v7285_v60, 1 }
 0x347   : > { %v7275_v20 = vor.u32 %v7273_v47, %v7271_v8  ;;  %v7272_v55 = vsel %vm2642_vm3, %v7267_v48, %v7271_v8  ;;  %v7281_v36 = vshrl.u32 %v15565_v21, 16  ;;  %v5592_v14 = vpop.f32.mrf.mxu0  ;;  %v7749_v7 = vshll.u32 %v9707_v22, 16 }
 0x348   : > { %11480 = vmatmul.mubr.bf16.gmra.mxu0 %v7272_v55  ;;  %v11205_v8 = vpop.f32.mrf.mxu1  ;;  %v7289_v47 = vshrl.u32 %v12110_v42, 16  ;;  %v7295_v48 = vrot.slane %v7293_v31, 1  ;;  %v7301_v53 = vshll.u32 %v12117_v54, 16  ;;  %v17072_v21 = vcombine.low %v15254_v6, %v15279_v30 }
 0x349   : > { %v7280_v26 = vsel %vm2642_vm3, %v7275_v20, %v7279_v63  ;;  %v15637_v20 = vadd.f32 %v5592_v14, %v5176_v43  ;;  %v7283_v50 = vor.u32 %v7281_v36, %v7279_v63  ;;  %v11254_v2 = vpop.f32.mrf.mxu0  ;;  %v7751_v42 = vrot.slane %v7749_v7, 1 }
 0x34a   : > { %11483 = vmatprep.mubr.bf16.mxu0 %v7280_v26  ;;  %v5192_v55 = vpop.f32.mrf.mxu1  ;;  %v15639_v26 = vadd.f32 %v11254_v2, %v11202_v1  ;;  %v17073_v63 = vcombine.low %v15281_v25, %v15285_v41  ;;  %v7303_v1 = vrot.slane %v7301_v53, 1  ;;  %v7305_v14 = vshrl.u32 %v12117_v54, 16  ;;  %v12125_v2 = vld [vmem:[#allocation2 + $0x9c] ss:$0 sps:$4 sm:$0x11]  }
 0x34b   : > { %11432 = vmatmul.mubr.bf16.gmra.mxu1 %v17070_v11  ;;  %v7291_v11 = vor.u32 %v7289_v47, %v7287_v57  ;;  %v7288_v15 = vsel %vm2642_vm3, %v7283_v50, %v7287_v57  ;;  %v5595_v60 = vpop.f32.mrf.mxu0  ;;  %v7747_v57 = vshrl.u32 %v9707_v22, 16  ;;  %v7297_v6 = vshrl.u32 %v12112_v28, 16 }
 0x34c   : > { %11435 = vmatprep.mubr.bf16.mxu1 %v17071_v27  ;;  %v12119_v27 = vld [vmem:[#allocation2 + $0x94] sm:$0xff]   ;;  %v11206_v33 = vpop.f32.mrf.mxu1  ;;  %v15649_v31 = vadd.f32 %v5595_v60, %v5179_v49  ;;  %v17074_v50 = vshll.u32 %v15370_v23, 16  ;;  %v17075_v22 = vcombine.low %v15287_v46, %v15310_v24  ;;  %v7317_v60 = vshll.u32 %v12125_v2, 16 }
 0x34d   : > { %v7296_v43 = vsel %vm2642_vm3, %v7291_v11, %v7295_v48  ;;  %v7309_v47 = vshll.u32 %v12119_v27, 16  ;;  %v7752_v30 = vor.u32 %v7751_v42, %v7747_v57  ;;  %v11257_v11 = vpop.f32.mrf.mxu0  ;;  %v17076_v57 = vshll.u32 %v15324_v18, 16 }
 0x34e   : > { %v5195_v36 = vpop.f32.mrf.mxu1  ;;  %v7756_v7 = vrot.slane %v17074_v50, 1  ;;  %v15653_v25 = vadd.f32 %v11257_v11, %v11205_v8 }
 0x34f   : > { %v7311_v41 = vrot.slane %v7309_v47, 1  ;;  %v5608_v53 = vpop.f32.mrf.mxu0 }
 0x350   : > { %11484 = vmatmul.mubr.bf16.gmra.mxu0 %v7288_v15  ;;  %v7307_v15 = vor.u32 %v7305_v14, %v7303_v1  ;;  %v11209_v59 = vpop.f32.mrf.mxu1  ;;  %v7757_v28 = vsel %vm2642_vm3, %v7752_v30, %v7756_v7  ;;  %v7764_v14 = vrot.slane %v17076_v57, 1  ;;  %v7319_v30 = vrot.slane %v7317_v60, 1 }
 0x351   : > { %11487 = vmatprep.mubr.bf16.mxu0 %v7296_v43  ;;  %v15661_v43 = vadd.f32 %v5608_v53, %v5192_v55  ;;  %v11258_v8 = vpop.f32.mrf.mxu0  ;;  %v17077_v55 = vshll.u32 %v15374_v5, 16 }
 0x352   : > { %v5208_v54 = vpop.f32.mrf.mxu1  ;;  %v7312_v42 = vsel %vm2642_vm3, %v7307_v15, %v7311_v41  ;;  %v15665_v46 = vadd.f32 %v11258_v8, %v11206_v33  ;;  %v17078_v15 = vshrl.u32 %v15370_v23, 16  ;;  %v17079_v33 = vshrl.u32 %v15324_v18, 16 }
 0x353   : > { %11436 = vmatmul.mubr.bf16.gmra.mxu1 %v17072_v21  ;;  %v7299_v21 = vor.u32 %v7297_v6, %v7295_v48  ;;  %v5611_v47 = vpop.f32.mrf.mxu0  ;;  %v7772_v2 = vrot.slane %v17077_v55, 1  ;;  %v17081_v55 = vld [vmem:[#allocation42_spill] sm:$0xff] }
 0x354   : > { %11439 = vmatprep.mubr.bf16.mxu1 %v17073_v63  ;;  %v11210_v48 = vpop.f32.mrf.mxu1  ;;  %v7313_v63 = vshrl.u32 %v12119_v27, 16  ;;  %v7760_v11 = vor.u32 %v17078_v15, %v7756_v7  ;;  %v15674_v27 = vadd.f32 %v5611_v47, %v5195_v36  ;;  %v7768_v53 = vor.u32 %v17079_v33, %v7764_v14  ;;  %v12137_v47 = vld [vmem:[#allocation8 + $0x228] sm:$0xff]  }
 0x355   : > { %v7304_v49 = vsel %vm2642_vm3, %v7299_v21, %v7303_v1  ;;  %v8173_v1 = vld [vmem:[#allocation2 + $0x14] sm:$0xe]  ;;  %v8194_v21 = vrot.slane %v15370_v23, 1  ;;  %v17082_v15 = vshll.u32 %v17081_v55, 16 }
 0x356   : > { %v15668_v24 = vcombine.low %v8173_v1, %v15622_v61  ;;  %v7315_v6 = vor.u32 %v7313_v63, %v7311_v41  ;;  %v5211_v50 = vpop.f32.mrf.mxu1  ;;  %v7765_v41 = vsel %vm2642_vm3, %v7760_v11, %v7764_v14  ;;  %v17080_v1 = vshll.u32 %v15376_v19, 16 }
 0x357   : > { %v7788_v11 = vrot.slane %v17082_v15, 1 }
 0x358   : > { %11488 = vmatmul.mubr.bf16.gmra.mxu0 %v7304_v49  ;;  %v11213_v49 = vpop.f32.mrf.mxu1  ;;  %v8193_v61 = vrot.slane %v15668_v24, 1  ;;  %v7320_v60 = vsel %vm2642_vm3, %v7315_v6, %v7319_v30  ;;  %v7780_v57 = vrot.slane %v17080_v1, 1 }
 0x359   : > { %11491 = vmatprep.mubr.bf16.mxu0 %v7312_v42  ;;  %v7773_v42 = vsel %vm2642_vm3, %v7768_v53, %v7772_v2  ;;  %v8198_v53 = vrot.slane %v15374_v5, 1 }
 0x35a   : > { %v5224_v7 = vpop.f32.mrf.mxu1  ;;  %v8195_v23 = vsel %vm3663_vm5, %v8193_v61, %v8194_v21 }
 0x35b   : > { %11440 = vmatmul.mubr.bf16.gmra.mxu1 %v17075_v22  ;;  %v12134_v22 = vld [vmem:[#allocation8 + $0x230] sm:$0xff]  }
 0x35c   : > { %11511 = vmatprep.mubr.bf16.mxu1 %v7757_v28  ;;  %v11261_v28 = vpop.f32.mrf.mxu0  ;;  %v11214_v63 = vpop.f32.mrf.mxu1 }
 0x35d   : > { %v15683_v36 = vadd.f32 %v11261_v28, %v11209_v59  ;;  %v8196_v59 = vrot.slane %v15324_v18, 1 }
 0x35e   : > { %v5624_v8 = vpop.f32.mrf.mxu0  ;;  %v5227_v30 = vpop.f32.mrf.mxu1 }
 0x35f   : > { %v15689_v14 = vadd.f32 %v5624_v8, %v5208_v54  ;;  %v17084_v54 = vshrl.u32 %v15376_v19, 16 }
 0x360   : > { %11492 = vmatmul.mubr.bf16.gmra.mxu0 %v7320_v60  ;;  %v11262_v6 = vpop.f32.mrf.mxu0 }
 0x361   : > { %11563 = vmatprep.mubr.bf16.mxu0 %v8195_v23  ;;  %v15694_v33 = vadd.f32 %v11262_v6, %v11210_v48  ;;  %v7784_v28 = vor.u32 %v17084_v54, %v7780_v57  ;;  %v8197_v48 = vsel %vm3663_vm5, %v8194_v21, %v8196_v59  ;;  %v12143_v21 = vld [vmem:[#allocation8 + $0x218] sm:$0xff]  }
 0x362   : > { %v11217_v8 = vpop.f32.mrf.mxu1 }
 0x363   : > { %11512 = vmatmul.mubr.bf16.vlgmr.msra.gmra.mxu1 %v7765_v41  ;;  %v5627_v41 = vpop.f32.mrf.mxu0  ;;  %v7789_v1 = vsel %vm2642_vm3, %v7784_v28, %v7788_v11  ;;  %v8202_v28 = vrot.slane %v17081_v55, 1 }
 0x364   : > { %11515 = vmatprep.mubr.bf16.mxu1 %v7773_v42  ;;  %11600 = vmatpush3.bf16.msra.mxu1 %v15484_v32  ;;  %v17083_v32 = vshrl.u32 %v15374_v5, 16  ;;  %v15701_v60 = vadd.f32 %v5627_v41, %v5211_v50  ;;  %v12140_v42 = vld [vmem:[#allocation8 + $0x220] sm:$0xff]   ;;  %v17086_v41 = vshll.u32 %v15400_v37, 16 }
 0x365   : > { %11601 = vmatprep.subr.bf16.mxu1 %v12134_v22  ;;  %v11265_v23 = vpop.f32.mrf.mxu0 }
 0x366   : > { %v7776_v61 = vor.u32 %v17083_v32, %v7772_v2  ;;  %v15706_v5 = vadd.f32 %v11265_v23, %v11213_v49  ;;  %v8199_v2 = vsel %vm3663_vm5, %v8196_v59, %v8198_v53  ;;  %v8200_v49 = vrot.slane %v15376_v19, 1 }
 0x367   : > { %v5640_v50 = vpop.f32.mrf.mxu0  ;;  %v7804_v54 = vrot.slane %v17086_v41, 1 }
 0x368   : > { %11602 = vmatpush3.bf16.msra.mxu1 %v12134_v22  ;;  %v7781_v18 = vsel %vm2642_vm3, %v7776_v61, %v7780_v57  ;;  %11564 = vmatmul.mubr.bf16.vlgmr.msra.gmra.mxu0 %v8197_v48  ;;  %v5240_v22 = vpop.f32.mrf.mxu1  ;;  %v17085_v57 = vshll.u32 %v15385_v38, 16  ;;  %v15711_v15 = vadd.f32 %v5640_v50, %v5224_v7  ;;  %v17088_v7 = vshrl.u32 %v15385_v38, 16  ;;  %v12146_v50 = vld [vmem:[#allocation8 + $0x210] sm:$0xff]  }
 0x369   : > { %11603 = vmatprep.subr.bf16.mxu1 %v12137_v47  ;;  %11567 = vmatprep.mubr.bf16.mxu0 %v8199_v2  ;;  %v11266_v32 = vpop.f32.mrf.mxu0 }
 0x36a   : > { %v7796_v6 = vrot.slane %v17085_v57, 1  ;;  %v11218_v61 = vpop.f32.mrf.mxu1  ;;  %v15716_v59 = vadd.f32 %v11266_v32, %v11214_v63  ;;  %v8201_v63 = vsel %vm3663_vm5, %v8198_v53, %v8200_v49  ;;  %v12149_v53 = vld [vmem:[#allocation8 + $0x208] sm:$0xff]  }
 0x36b   : > { %11516 = vmatmul.mubr.bf16.gmra.mxu1 %v7781_v18  ;;  %v17087_v18 = vshrl.u32 %v17081_v55, 16  ;;  %v5643_v48 = vpop.f32.mrf.mxu0 }
 0x36c   : > { %11519 = vmatprep.mubr.bf16.mxu1 %v7789_v1  ;;  %11604 = vmatpush3.bf16.msra.mxu1 %v12137_v47  ;;  %v5243_v47 = vpop.f32.mrf.mxu1  ;;  %v7800_v1 = vor.u32 %v17088_v7, %v7796_v6  ;;  %v15723_v2 = vadd.f32 %v5643_v48, %v5227_v30  ;;  %v8204_v7 = vrot.slane %v15385_v38, 1  ;;  %v12152_v38 = vld [vmem:[#allocation8 + $0x200] sm:$0xff]  }
 0x36d   : > { %11605 = vmatprep.subr.bf16.mxu1 %v12140_v42  ;;  %v7792_v23 = vor.u32 %v17087_v18, %v7788_v11  ;;  %v11269_v55 = vpop.f32.mrf.mxu0  ;;  %v8203_v11 = vsel %vm3663_vm5, %v8200_v49, %v8202_v28 }
 0x36e   : > { %v11221_v57 = vpop.f32.mrf.mxu1  ;;  %v7805_v32 = vsel %vm2642_vm3, %v7800_v1, %v7804_v54  ;;  %v15729_v41 = vadd.f32 %v11269_v55, %v11217_v8  ;;  %v17090_v1 = vshll.u32 %v15415_v44, 16  ;;  %v8206_v8 = vrot.slane %v15400_v37, 1 }
 0x36f   : > { %v7797_v19 = vsel %vm2642_vm3, %v7792_v23, %v7796_v6  ;;  %v5656_v18 = vpop.f32.mrf.mxu0 }
 0x370   : > { %11606 = vmatpush3.bf16.msra.mxu1 %v12140_v42  ;;  %11568 = vmatmul.mubr.bf16.gmra.mxu0 %v8201_v63  ;;  %v5256_v30 = vpop.f32.mrf.mxu1  ;;  %v17089_v42 = vshll.u32 %v15402_v4, 16  ;;  %v15733_v23 = vadd.f32 %v5656_v18, %v5240_v22  ;;  %v7820_v49 = vrot.slane %v17090_v1, 1  ;;  %v17091_v63 = vshrl.u32 %v15400_v37, 16 }
 0x371   : > { %11607 = vmatprep.subr.bf16.mxu1 %v12143_v21  ;;  %11571 = vmatprep.mubr.bf16.mxu0 %v8203_v11  ;;  %v17092_v11 = vshrl.u32 %v15402_v4, 16  ;;  %v8205_v1 = vsel %vm3663_vm5, %v8202_v28, %v8204_v7 }
 0x372   : > { %v7812_v6 = vrot.slane %v17089_v42, 1  ;;  %v11222_v48 = vpop.f32.mrf.mxu1 }
 0x373   : > { %11520 = vmatmul.mubr.bf16.gmra.mxu1 %v7797_v19  ;;  %v11270_v19 = vpop.f32.mrf.mxu0 }
 0x374   : > { %11523 = vmatprep.mubr.bf16.mxu1 %v7805_v32  ;;  %11608 = vmatpush3.bf16.msra.mxu1 %v12143_v21  ;;  %v7808_v32 = vor.u32 %v17091_v63, %v7804_v54  ;;  %v15741_v55 = vadd.f32 %v11270_v19, %v11218_v61  ;;  %v5259_v21 = vpop.f32.mrf.mxu1  ;;  %v7816_v42 = vor.u32 %v17092_v11, %v7812_v6  ;;  %v8208_v11 = vrot.slane %v15402_v4, 1 }
 0x375   : > { %11609 = vmatprep.subr.bf16.mxu1 %v12146_v50  ;;  %v5659_v22 = vpop.f32.mrf.mxu0  ;;  %v8207_v54 = vsel %vm3663_vm5, %v8204_v7, %v8206_v8 }
 0x376   : > { %v7813_v18 = vsel %vm2642_vm3, %v7808_v32, %v7812_v6  ;;  %v15746_v40 = vadd.f32 %v5659_v22, %v5243_v47  ;;  %v11225_v58 = vpop.f32.mrf.mxu1  ;;  %v7821_v37 = vsel %vm2642_vm3, %v7816_v42, %v7820_v49  ;;  %v17093_v6 = vshll.u32 %v15417_v10, 16 }
 0x377   : > { %v11273_v61 = vpop.f32.mrf.mxu0  ;;  %v17094_v42 = vshll.u32 %v15419_v51, 16 }
 0x378   : > { %11610 = vmatpush3.bf16.msra.mxu1 %v12146_v50  ;;  %11572 = vmatmul.mubr.bf16.gmra.mxu0 %v8205_v1  ;;  %v15751_v19 = vadd.f32 %v11273_v61, %v11221_v57  ;;  %v5272_v50 = vpop.f32.mrf.mxu1  ;;  %v7828_v63 = vrot.slane %v17093_v6, 1  ;;  %v8210_v57 = vrot.slane %v15415_v44, 1 }
 0x379   : > { %11611 = vmatprep.subr.bf16.mxu1 %v12149_v53  ;;  %11575 = vmatprep.mubr.bf16.mxu0 %v8207_v54  ;;  %v5672_v47 = vpop.f32.mrf.mxu0  ;;  %v7836_v22 = vrot.slane %v17094_v42, 1 }
 0x37a   : > { %v15755_v28 = vadd.f32 %v5672_v47, %v5256_v30  ;;  %v11226_v32 = vpop.f32.mrf.mxu1  ;;  %v8209_v47 = vsel %vm3663_vm5, %v8206_v8, %v8208_v11 }
 0x37b   : > { %11524 = vmatmul.mubr.bf16.gmra.mxu1 %v7813_v18  ;;  %v11274_v7 = vpop.f32.mrf.mxu0  ;;  %v17095_v18 = vshrl.u32 %v15415_v44, 16 }
 0x37c   : > { %11527 = vmatprep.mubr.bf16.mxu1 %v7821_v37  ;;  %11612 = vmatpush3.bf16.msra.mxu1 %v12149_v53  ;;  %v15763_v37 = vadd.f32 %v11274_v7, %v11222_v48  ;;  %v5275_v61 = vpop.f32.mrf.mxu1  ;;  %v17096_v53 = vshrl.u32 %v15417_v10, 16  ;;  %v8211_v48 = vsel %vm3663_vm5, %v8208_v11, %v8210_v57  ;;  %v17097_v7 = vshll.u32 %v15425_v29, 16 }
 0x37d   : > { %11613 = vmatprep.subr.bf16.mxu1 %v12152_v38  ;;  %v7824_v1 = vor.u32 %v17095_v18, %v7820_v49  ;;  %v5675_v30 = vpop.f32.mrf.mxu0  ;;  %v8214_v11 = vrot.slane %v15419_v51, 1 }
 0x37e   : > { %v7832_v54 = vor.u32 %v17096_v53, %v7828_v63  ;;  %v15768_v4 = vadd.f32 %v5675_v30, %v5259_v21  ;;  %v11229_v42 = vpop.f32.mrf.mxu1  ;;  %v17098_v53 = vshll.u32 %v15427_v16, 16 }
 0x37f   : > { %v7829_v6 = vsel %vm2642_vm3, %v7824_v1, %v7828_v63  ;;  %v11277_v44 = vpop.f32.mrf.mxu0  ;;  %v7844_v63 = vrot.slane %v17097_v7, 1  ;;  %v8212_v1 = vrot.slane %v15417_v10, 1 }
 0x380   : > { %11614 = vmatpush3.bf16.msra.mxu1 %v12152_v38  ;;  %v7837_v13 = vsel %vm2642_vm3, %v7832_v54, %v7836_v22  ;;  %11576 = vmatmul.mubr.bf16.gmra.mxu0 %v8209_v47  ;;  %v15773_v49 = vadd.f32 %v11277_v44, %v11225_v58  ;;  %v5288_v38 = vpop.f32.mrf.mxu1  ;;  %v7852_v54 = vrot.slane %v17098_v53, 1  ;;  %v17100_v44 = vshrl.u32 %v15425_v29, 16 }
 0x381   : > { %11579 = vmatprep.mubr.bf16.mxu0 %v8211_v48  ;;  %v5688_v21 = vpop.f32.mrf.mxu0  ;;  %v8213_v10 = vsel %vm3663_vm5, %v8210_v57, %v8212_v1 }
 0x382   : > { %v15777_v18 = vadd.f32 %v5688_v21, %v5272_v50  ;;  %v11230_v8 = vpop.f32.mrf.mxu1  ;;  %v7848_v48 = vor.u32 %v17100_v44, %v7844_v63  ;;  %v17102_v44 = vshll.u32 %v15439_v39, 16 }
 0x383   : > { %11528 = vmatmul.mubr.bf16.gmra.mxu1 %v7829_v6  ;;  %v11278_v30 = vpop.f32.mrf.mxu0 }
 0x384   : > { %11531 = vmatprep.mubr.bf16.mxu1 %v7837_v13  ;;  %v17099_v13 = vshrl.u32 %v15419_v51, 16  ;;  %v15785_v6 = vadd.f32 %v11278_v30, %v11226_v32  ;;  %v5291_v47 = vpop.f32.mrf.mxu1  ;;  %v7853_v9 = vsel %vm2642_vm3, %v7848_v48, %v7852_v54  ;;  %v8215_v51 = vsel %vm3663_vm5, %v8212_v1, %v8214_v11 }
 0x385   : > { %v5691_v50 = vpop.f32.mrf.mxu0  ;;  %v17101_v30 = vshll.u32 %v15433_v62, 16  ;;  %v7868_v48 = vrot.slane %v17102_v44, 1  ;;  %v8218_v1 = vrot.slane %v15427_v16, 1 }
 0x386   : > { %v7840_v58 = vor.u32 %v17099_v13, %v7836_v22  ;;  %v15790_v21 = vadd.f32 %v5691_v50, %v5275_v61  ;;  %v11233_v53 = vpop.f32.mrf.mxu1 }
 0x387   : > { %v11281_v3 = vpop.f32.mrf.mxu0 }
 0x388   : > { %v7845_v7 = vsel %vm2642_vm3, %v7840_v58, %v7844_v63  ;;  %11580 = vmatmul.mubr.bf16.gmra.mxu0 %v8213_v10  ;;  %v15795_v32 = vadd.f32 %v11281_v3, %v11229_v42  ;;  %v5304_v22 = vpop.f32.mrf.mxu1  ;;  %v7860_v63 = vrot.slane %v17101_v30, 1  ;;  %v8216_v58 = vrot.slane %v15425_v29, 1 }
 0x389   : > { %11583 = vmatprep.mubr.bf16.mxu0 %v8215_v51  ;;  %v5704_v61 = vpop.f32.mrf.mxu0  ;;  %v17103_v3 = vshrl.u32 %v15427_v16, 16  ;;  %v17104_v10 = vshrl.u32 %v15433_v62, 16  ;;  %v17105_v16 = vshll.u32 %v15445_v56, 16 }
 0x38a   : > { %v15799_v13 = vadd.f32 %v5704_v61, %v5288_v38  ;;  %v11234_v57 = vpop.f32.mrf.mxu1  ;;  %v8217_v29 = vsel %vm3663_vm5, %v8214_v11, %v8216_v58 }
 0x38b   : > { %11532 = vmatmul.mubr.bf16.gmra.mxu1 %v7845_v7  ;;  %v11282_v50 = vpop.f32.mrf.mxu0  ;;  %v7864_v51 = vor.u32 %v17104_v10, %v7860_v63  ;;  %v15820_v10 = vld [vmem:[#allocation2 + $0xa4] ss:$0 sps:$4 sm:$0x11]  }
 0x38c   : > { %11535 = vmatprep.mubr.bf16.mxu1 %v7853_v9  ;;  %v7856_v9 = vor.u32 %v17103_v3, %v7852_v54  ;;  %v15807_v42 = vadd.f32 %v11282_v50, %v11230_v8  ;;  %v5307_v7 = vpop.f32.mrf.mxu1  ;;  %v7876_v54 = vrot.slane %v17105_v16, 1  ;;  %v8219_v50 = vsel %vm3663_vm5, %v8216_v58, %v8218_v1 }
 0x38d   : > { %v5707_v38 = vpop.f32.mrf.mxu0  ;;  %v7869_v17 = vsel %vm2642_vm3, %v7864_v51, %v7868_v48  ;;  %v17106_v51 = vshrl.u32 %v15439_v39, 16  ;;  %v8220_v58 = vrot.slane %v15433_v62, 1  ;;  %v8533_v62 = vshll.u32 %v15668_v24, 16 }
 0x38e   : > { %v7861_v30 = vsel %vm2642_vm3, %v7856_v9, %v7860_v63  ;;  %v15812_v61 = vadd.f32 %v5707_v38, %v5291_v47  ;;  %v11305_v44 = vpop.f32.mrf.mxu1 }
 0x38f   : > { %v11285_v8 = vpop.f32.mrf.mxu0  ;;  %v6085_v3 = vadd.f32 %v11305_v44, %v15634_v45  ;;  %v7872_v38 = vor.u32 %v17106_v51, %v7868_v48  ;;  %v17107_v45 = vshrl.u32 %v15445_v56, 16  ;;  %v17108_v44 = vshll.u32 %v15455_v12, 16 }
 0x390   : > { %11584 = vmatmul.mubr.bf16.gmra.mxu0 %v8217_v29  ;;  %v15822_v47 = vadd.f32 %v11285_v8, %v11233_v53  ;;  %v5940_v11 = vpop.f32.mrf.mxu1  ;;  %v8530_v48 = vshrl.u32 %v15668_v24, 16  ;;  %v17110_v24 = vshrl.u32 %v15455_v12, 16 }
 0x391   : > { %11587 = vmatprep.mubr.bf16.mxu0 %v8219_v50  ;;  %v5720_v63 = vpop.f32.mrf.mxu0  ;;  %v6083_v9 = vadd.f32 %v5940_v11, %v15637_v20  ;;  %v7884_v53 = vrot.slane %v17108_v44, 1  ;;  %v8222_v50 = vrot.slane %v15439_v39, 1  ;;  %v7890_v20 = vshll.u32 %v15820_v10, 16 }
 0x392   : > { %v11306_v29 = vpop.f32.mrf.mxu1 }
 0x393   : > { %11536 = vmatmul.mubr.bf16.gmra.mxu1 %v7861_v30  ;;  %v15827_v30 = vadd.f32 %v5720_v63, %v5304_v22  ;;  %v11286_v16 = vpop.f32.mrf.mxu0  ;;  %v6086_v8 = vadd.f32 %v11306_v29, %v15639_v26  ;;  %v8221_v26 = vsel %vm3663_vm5, %v8218_v1, %v8220_v58  ;;  %v8532_v1 = vrot.slane %v8530_v48, 1 }
 0x394   : > { %11539 = vmatprep.mubr.bf16.mxu1 %v7869_v17  ;;  %v7880_v17 = vor.u32 %v17107_v45, %v7876_v54  ;;  %v15837_v11 = vadd.f32 %v11286_v16, %v11234_v57  ;;  %v5943_v22 = vpop.f32.mrf.mxu1  ;;  %v7877_v45 = vsel %vm2642_vm3, %v7872_v38, %v7876_v54  ;;  %v8223_v16 = vsel %vm3663_vm5, %v8220_v58, %v8222_v50 }
 0x395   : > { %v5723_v63 = vpop.f32.mrf.mxu0  ;;  %v6084_v51 = vadd.f32 %v5943_v22, %v15649_v31  ;;  %v7888_v31 = vor.u32 %v17110_v24, %v7884_v53  ;;  %v7892_v22 = vrot.slane %v7890_v20, 1  ;;  %v8535_v38 = vrot.slane %v8533_v62, 2 }
 0x396   : > { %17109 = vst [vmem:[#allocation21_spill] sm:$0xff] %v15837_v11  ;;  %v15843_v44 = vadd.f32 %v5723_v63, %v5307_v7  ;;  %v11309_v29 = vpop.f32.mrf.mxu1  ;;  %v7885_v39 = vsel %vm2642_vm3, %v7880_v17, %v7884_v53  ;;  %v8224_v58 = vrot.slane %v15445_v56, 1  ;;  %v8226_v53 = vrot.slane %v15455_v12, 1  ;;  %v17111_v56 = vld [vmem:[#allocation37_spill] sm:$0xff] }
 0x397   : > { %v11357_v57 = vpop.f32.mrf.mxu0  ;;  %v6089_v11 = vadd.f32 %v11309_v29, %v15653_v25  ;;  %v8536_v48 = vor.u32 %v8535_v38, %v8532_v1 }
 0x398   : > { %11588 = vmatmul.mubr.bf16.gmra.mxu0 %v8221_v26  ;;  %v15851_v54 = vadd.f32 %v11357_v57, %v6085_v3  ;;  %v5956_v7 = vpop.f32.mrf.mxu1  ;;  %v7893_v3 = vsel %vm2642_vm3, %v7888_v31, %v7892_v22  ;;  %v8227_v12 = vsel %vm3663_vm5, %v8224_v58, %v8226_v53 }
 0x399   : > { %11591 = vmatprep.mubr.bf16.mxu0 %v8223_v16  ;;  %v6535_v63 = vpop.f32.mrf.mxu0  ;;  %v6087_v17 = vadd.f32 %v5956_v7, %v15661_v43 }
 0x39a   : > { %v11310_v26 = vpop.f32.mrf.mxu1 }
 0x39b   : > { %11540 = vmatmul.mubr.bf16.gmra.mxu1 %v7877_v45  ;;  %v15854_v45 = vadd.f32 %v6535_v63, %v6083_v9  ;;  %v11358_v25 = vpop.f32.mrf.mxu0  ;;  %v6090_v29 = vadd.f32 %v11310_v26, %v15665_v46  ;;  %v8225_v9 = vsel %vm3663_vm5, %v8222_v50, %v8224_v58  ;;  %v8540_v46 = vsel %vm4000_vm4, %v8536_v48, %v17111_v56 }
 0x39c   : > { %11543 = vmatprep.mubr.bf16.mxu1 %v7885_v39  ;;  %v15860_v20 = vadd.f32 %v11358_v25, %v6086_v8  ;;  %v5959_v39 = vpop.f32.mrf.mxu1 }
 0x39d   : > { %v6538_v62 = vpop.f32.mrf.mxu0  ;;  %v6088_v57 = vadd.f32 %v5959_v39, %v15674_v27  ;;  %v17112_v39 = vld [vmem:[#allocation34_spill] sm:$0xff] }
 0x39e   : > { %v15863_v43 = vadd.f32 %v6538_v62, %v6084_v51  ;;  %v11313_v16 = vpop.f32.mrf.mxu1  ;;  %v8228_v51 = vrot.slane %v15820_v10, 1 }
 0x39f   : > { %v11361_v24 = vpop.f32.mrf.mxu0  ;;  %v6093_v8 = vadd.f32 %v11313_v16, %v15683_v36 }
 0x3a0   : > { %11592 = vmatmul.mubr.bf16.gmra.mxu0 %v8225_v9  ;;  %v15870_v31 = vadd.f32 %v11361_v24, %v6089_v11  ;;  %v5972_v27 = vpop.f32.mrf.mxu1  ;;  %v8229_v36 = vsel %vm3663_vm5, %v8226_v53, %v8228_v51 }
 0x3a1   : > { %11595 = vmatprep.mubr.bf16.mxu0 %v8227_v12  ;;  %v6551_v22 = vpop.f32.mrf.mxu0  ;;  %v6091_v50 = vadd.f32 %v5972_v27, %v15689_v14 }
 0x3a2   : > { %v15874_v7 = vadd.f32 %v6551_v22, %v6087_v17  ;;  %v11314_v1 = vpop.f32.mrf.mxu1 }
 0x3a3   : > { %11544 = vmatmul.mubr.bf16.gmra.mxu1 %v7893_v3  ;;  %v11362_v38 = vpop.f32.mrf.mxu0  ;;  %v6094_v63 = vadd.f32 %v11314_v1, %v15694_v33 }
 0x3a4   : > { %11615 = vmatprep.mubr.bf16.mxu1 %v8540_v46  ;;  %v15877_v26 = vadd.f32 %v11362_v38, %v6090_v29  ;;  %v5975_v58 = vpop.f32.mrf.mxu1 }
 0x3a5   : > { %v6554_v11 = vpop.f32.mrf.mxu0  ;;  %v6092_v25 = vadd.f32 %v5975_v58, %v15701_v60 }
 0x3a6   : > { %v15881_v3 = vadd.f32 %v6554_v11, %v6088_v57  ;;  %v11317_v10 = vpop.f32.mrf.mxu1 }
 0x3a7   : > { %v11365_v14 = vpop.f32.mrf.mxu0  ;;  %v6097_v17 = vadd.f32 %v11317_v10, %v15706_v5 }
 0x3a8   : > { %11596 = vmatmul.mubr.bf16.gmra.mxu0 %v8229_v36  ;;  %v15886_v33 = vadd.f32 %v11365_v14, %v6093_v8  ;;  %v5988_v29 = vpop.f32.mrf.mxu1  ;;  %v17113_v8 = vld [vmem:[#allocation35_spill] sm:$0xff] }
 0x3a9   : > { %v6567_v48 = vpop.f32.mrf.mxu0  ;;  %v6095_v53 = vadd.f32 %v5988_v29, %v15711_v15 }
 0x3aa   : > { %v15889_v62 = vadd.f32 %v6567_v48, %v6091_v50  ;;  %v11318_v60 = vpop.f32.mrf.mxu1 }
 0x3ab   : > { %11616 = vmatmul.mubr.bf16.vlgmr.msra.gmra.mxu1 %v17112_v39  ;;  %v11366_v57 = vpop.f32.mrf.mxu0  ;;  %v6098_v9 = vadd.f32 %v11318_v60, %v15716_v59 }
 0x3ac   : > { %11619 = vmatprep.mubr.bf16.mxu1 %v15503_v35  ;;  %v15892_v16 = vadd.f32 %v11366_v57, %v6094_v63  ;;  %v5991_v56 = vpop.f32.mrf.mxu1 }
 0x3ad   : > { %v6570_v46 = vpop.f32.mrf.mxu0  ;;  %v6096_v5 = vadd.f32 %v5991_v56, %v15723_v2 }
 0x3ae   : > { %v15895_v24 = vadd.f32 %v6570_v46, %v6092_v25  ;;  %v11321_v35 = vpop.f32.mrf.mxu1  ;;  %v17115_v46 = vld [vmem:[#allocation36_spill] sm:$0xff] }
 0x3af   : > { %v11369_v12 = vpop.f32.mrf.mxu0  ;;  %v6101_v15 = vadd.f32 %v11321_v35, %v15729_v41 }
 0x3b0   : > { %v15900_v27 = vadd.f32 %v11369_v12, %v6097_v17  ;;  %v6004_v51 = vpop.f32.mrf.mxu1 }
 0x3b1   : > { %v6583_v59 = vpop.f32.mrf.mxu0  ;;  %v6099_v22 = vadd.f32 %v6004_v51, %v15733_v23 }
 0x3b2   : > { %v15903_v50 = vadd.f32 %v6583_v59, %v6095_v53  ;;  %v11322_v1 = vpop.f32.mrf.mxu1 }
 0x3b3   : > { %11620 = vmatmul.mubr.bf16.gmra.mxu1 %v15508_v52  ;;  %v11370_v2 = vpop.f32.mrf.mxu0  ;;  %v6102_v38 = vadd.f32 %v11322_v1, %v15741_v55 }
 0x3b4   : > { %11623 = vmatprep.mubr.bf16.mxu1 %v17113_v8  ;;  %v15906_v63 = vadd.f32 %v11370_v2, %v6098_v9  ;;  %v6007_v52 = vpop.f32.mrf.mxu1  ;;  %v17114_v9 = vld [vmem:[#allocation13_spill] sm:$0xff] }
 0x3b5   : > { %v6586_v36 = vpop.f32.mrf.mxu0  ;;  %v6100_v41 = vadd.f32 %v6007_v52, %v15746_v40  ;;  %v17116_v52 = vld [vmem:[#allocation14_spill] sm:$0xff] }
 0x3b6   : > { %v15909_v58 = vadd.f32 %v6586_v36, %v6096_v5  ;;  %v11325_v11 = vpop.f32.mrf.mxu1 }
 0x3b7   : > { %v11373_v25 = vpop.f32.mrf.mxu0  ;;  %v6105_v23 = vadd.f32 %v11325_v11, %v15751_v19 }
 0x3b8   : > { %v15914_v10 = vadd.f32 %v11373_v25, %v6101_v15  ;;  %v6020_v39 = vpop.f32.mrf.mxu1 }
 0x3b9   : > { %v6599_v55 = vpop.f32.mrf.mxu0  ;;  %v6103_v14 = vadd.f32 %v6020_v39, %v15755_v28 }
 0x3ba   : > { %v15917_v17 = vadd.f32 %v6599_v55, %v6099_v22  ;;  %v11326_v29 = vpop.f32.mrf.mxu1 }
 0x3bb   : > { %11624 = vmatmul.mubr.bf16.gmra.mxu1 %v15528_v34  ;;  %v11374_v40 = vpop.f32.mrf.mxu0  ;;  %v6106_v48 = vadd.f32 %v11326_v29, %v15763_v37 }
 0x3bc   : > { %11627 = vmatprep.mubr.bf16.mxu1 %v15544_v0  ;;  %v15920_v53 = vadd.f32 %v11374_v40, %v6102_v38  ;;  %v6023_v34 = vpop.f32.mrf.mxu1 }
 0x3bd   : > { %v6602_v60 = vpop.f32.mrf.mxu0  ;;  %v6104_v19 = vadd.f32 %v6023_v34, %v15768_v4 }
 0x3be   : > { %v15923_v57 = vadd.f32 %v6602_v60, %v6100_v41  ;;  %v11329_v0 = vpop.f32.mrf.mxu1  ;;  %v17117_v41 = vld [vmem:[#allocation15_spill] sm:$0xff] }
 0x3bf   : > { %v11377_v56 = vpop.f32.mrf.mxu0  ;;  %v6109_v28 = vadd.f32 %v11329_v0, %v15773_v49 }
 0x3c0   : > { %v15928_v5 = vadd.f32 %v11377_v56, %v6105_v23  ;;  %v6036_v35 = vpop.f32.mrf.mxu1 }
 0x3c1   : > { %v6615_v37 = vpop.f32.mrf.mxu0  ;;  %v6107_v12 = vadd.f32 %v6036_v35, %v15777_v18 }
 0x3c2   : > { %v15931_v15 = vadd.f32 %v6615_v37, %v6103_v14  ;;  %v11330_v8 = vpop.f32.mrf.mxu1 }
 0x3c3   : > { %11628 = vmatmul.mubr.bf16.gmra.mxu1 %v17114_v9  ;;  %v11378_v4 = vpop.f32.mrf.mxu0  ;;  %v6110_v51 = vadd.f32 %v11330_v8, %v15785_v6  ;;  %v17119_v9 = vld [vmem:[#allocation17_spill] sm:$0xff] }
 0x3c4   : > { %11631 = vmatprep.mubr.bf16.mxu1 %v17115_v46  ;;  %v15934_v59 = vadd.f32 %v11378_v4, %v6106_v48  ;;  %v6039_v22 = vpop.f32.mrf.mxu1  ;;  %v12154_v4 = vld [vmem:[#allocation2 + $0xa4] ss:$0 sps:$4 sm:$0x33]  }
 0x3c5   : > { %v6618_v1 = vpop.f32.mrf.mxu0  ;;  %v6108_v49 = vadd.f32 %v6039_v22, %v15790_v21 }
 0x3c6   : > { %v15937_v2 = vadd.f32 %v6618_v1, %v6104_v19  ;;  %v11333_v38 = vpop.f32.mrf.mxu1  ;;  %v17118_v19 = vld [vmem:[#allocation16_spill] sm:$0xff] }
 0x3c7   : > { %v11381_v36 = vpop.f32.mrf.mxu0  ;;  %v6113_v18 = vadd.f32 %v11333_v38, %v15795_v32 }
 0x3c8   : > { %v15942_v11 = vadd.f32 %v11381_v36, %v6109_v28  ;;  %v6052_v25 = vpop.f32.mrf.mxu1 }
 0x3c9   : > { %v6631_v6 = vpop.f32.mrf.mxu0  ;;  %v6111_v23 = vadd.f32 %v6052_v25, %v15799_v13  ;;  %v8609_v25 = vshll.u32 %v12154_v4, 16 }
 0x3ca   : > { %v15945_v39 = vadd.f32 %v6631_v6, %v6107_v12  ;;  %v11334_v55 = vpop.f32.mrf.mxu1  ;;  %v17120_v12 = vld [vmem:[#allocation21_spill] sm:$0xff] }
 0x3cb   : > { %11632 = vmatmul.mubr.bf16.gmra.mxu1 %v17116_v52  ;;  %v11382_v21 = vpop.f32.mrf.mxu0  ;;  %v6114_v14 = vadd.f32 %v11334_v55, %v15807_v42  ;;  %v17121_v52 = vld [vmem:[#allocation38_spill] sm:$0xff] }
 0x3cc   : > { %11635 = vmatprep.mubr.bf16.mxu1 %v17117_v41  ;;  %v15948_v29 = vadd.f32 %v11382_v21, %v6110_v51  ;;  %v6055_v40 = vpop.f32.mrf.mxu1  ;;  %v8606_v41 = vshrl.u32 %v12154_v4, 16 }
 0x3cd   : > { %v6634_v48 = vpop.f32.mrf.mxu0  ;;  %v6112_v32 = vadd.f32 %v6055_v40, %v15812_v61 }
 0x3ce   : > { %v15951_v34 = vadd.f32 %v6634_v48, %v6108_v49  ;;  %v11337_v60 = vpop.f32.mrf.mxu1 }
 0x3cf   : > { %v11385_v0 = vpop.f32.mrf.mxu0  ;;  %v6117_v13 = vadd.f32 %v11337_v60, %v15822_v47  ;;  %v8611_v60 = vrot.slane %v8609_v25, 2 }
 0x3d0   : > { %v15956_v56 = vadd.f32 %v11385_v0, %v6113_v18  ;;  %v6068_v28 = vpop.f32.mrf.mxu1  ;;  %v17122_v18 = vld [vmem:[#allocation41_spill] sm:$0xff] }
 0x3d1   : > { %v6647_v42 = vpop.f32.mrf.mxu0  ;;  %v6115_v46 = vadd.f32 %v6068_v28, %v15827_v30 }
 0x3d2   : > { %v15959_v35 = vadd.f32 %v6647_v42, %v6111_v23  ;;  %v11338_v37 = vpop.f32.mrf.mxu1  ;;  %v17123_v42 = vld [vmem:[#allocation19_spill] sm:$0xff] }
 0x3d3   : > { %11636 = vmatmul.mubr.bf16.gmra.mxu1 %v17118_v19  ;;  %v11386_v61 = vpop.f32.mrf.mxu0  ;;  %v6118_v8 = vadd.f32 %v11338_v37, %v17120_v12  ;;  %v17124_v37 = vld [vmem:[#allocation20_spill] sm:$0xff] }
 0x3d4   : > { %11639 = vmatprep.mubr.bf16.mxu1 %v17119_v9  ;;  %v15962_v51 = vadd.f32 %v11386_v61, %v6114_v14  ;;  %v6071_v22 = vpop.f32.mrf.mxu1 }
 0x3d5   : > { %v6650_v1 = vpop.f32.mrf.mxu0  ;;  %v6116_v47 = vadd.f32 %v6071_v22, %v15843_v44 }
 0x3d6   : > { %v15965_v49 = vadd.f32 %v6650_v1, %v6112_v32  ;;  %v11409_v38 = vpop.f32.mrf.mxu1  ;;  %v8608_v32 = vrot.slane %v8606_v41, 1 }
 0x3d7   : > { %v11389_v36 = vpop.f32.mrf.mxu0  ;;  %v6993_v30 = vadd.f32 %v11409_v38, %v15851_v54  ;;  %v17125_v38 = vld [vmem:[#allocation18_spill] sm:$0xff] }
 0x3d8   : > { %v15970_v6 = vadd.f32 %v11389_v36, %v6117_v13  ;;  %v6848_v23 = vpop.f32.mrf.mxu1  ;;  %v8612_v61 = vor.u32 %v8611_v60, %v8608_v32 }
 0x3d9   : > { %v6663_v55 = vpop.f32.mrf.mxu0  ;;  %v6991_v21 = vadd.f32 %v6848_v23, %v15854_v45 }
 0x3da   : > { %v15973_v14 = vadd.f32 %v6663_v55, %v6115_v46  ;;  %v11410_v44 = vpop.f32.mrf.mxu1 }
 0x3db   : > { %11640 = vmatmul.mubr.bf16.gmra.mxu1 %v17121_v52  ;;  %v11390_v40 = vpop.f32.mrf.mxu0  ;;  %v6994_v48 = vadd.f32 %v11410_v44, %v15860_v20  ;;  %v8613_v52 = vsel %vm4000_vm4, %v17125_v38, %v8612_v61 }
 0x3dc   : > { %11643 = vmatprep.mubr.bf16.mxu1 %v17122_v18  ;;  %v15976_v19 = vadd.f32 %v11390_v40, %v6118_v8  ;;  %v6851_v54 = vpop.f32.mrf.mxu1 }
 0x3dd   : > { %v6666_v0 = vpop.f32.mrf.mxu0  ;;  %v6992_v9 = vadd.f32 %v6851_v54, %v15863_v43 }
 0x3de   : > { %v15979_v13 = vadd.f32 %v6666_v0, %v6116_v47  ;;  %v11413_v28 = vpop.f32.mrf.mxu1 }
 0x3df   : > { %v11461_v45 = vpop.f32.mrf.mxu0  ;;  %v6997_v46 = vadd.f32 %v11413_v28, %v15870_v31 }
 0x3e0   : > { %v15984_v20 = vadd.f32 %v11461_v45, %v6993_v30  ;;  %v6864_v12 = vpop.f32.mrf.mxu1 }
 0x3e1   : > { %v7421_v8 = vpop.f32.mrf.mxu0  ;;  %v6995_v4 = vadd.f32 %v6864_v12, %v15874_v7 }
 0x3e2   : > { %v15987_v22 = vadd.f32 %v7421_v8, %v6991_v21  ;;  %v11414_v43 = vpop.f32.mrf.mxu1 }
 0x3e3   : > { %11644 = vmatmul.mubr.bf16.gmra.mxu1 %v17123_v42  ;;  %v11462_v1 = vpop.f32.mrf.mxu0  ;;  %v6998_v47 = vadd.f32 %v11414_v43, %v15877_v26 }
 0x3e4   : > { %11647 = vmatprep.mubr.bf16.mxu1 %v17124_v37  ;;  %v15992_v36 = vadd.f32 %v11462_v1, %v6994_v48  ;;  %v6867_v31 = vpop.f32.mrf.mxu1 }
 0x3e5   : > { %v7424_v18 = vpop.f32.mrf.mxu0  ;;  %v6996_v30 = vadd.f32 %v6867_v31, %v15881_v3 }
 0x3e6   : > { %v15995_v41 = vadd.f32 %v7424_v18, %v6992_v9  ;;  %v11417_v25 = vpop.f32.mrf.mxu1 }
 0x3e7   : > { %v11465_v7 = vpop.f32.mrf.mxu0  ;;  %v7001_v23 = vadd.f32 %v11417_v25, %v15886_v33 }
 0x3e8   : > { %v15998_v55 = vadd.f32 %v11465_v7, %v6997_v46  ;;  %v6880_v21 = vpop.f32.mrf.mxu1 }
 0x3e9   : > { %v7437_v26 = vpop.f32.mrf.mxu0  ;;  %v6999_v44 = vadd.f32 %v6880_v21, %v15889_v62 }
 0x3ea   : > { %v16001_v40 = vadd.f32 %v7437_v26, %v6995_v4  ;;  %v11418_v48 = vpop.f32.mrf.mxu1 }
 0x3eb   : > { %11648 = vmatmul.mubr.bf16.gmra.mxu1 %v8613_v52  ;;  %v11466_v32 = vpop.f32.mrf.mxu0  ;;  %v7002_v60 = vadd.f32 %v11418_v48, %v15892_v16 }
 0x3ec   : > { %v16004_v3 = vadd.f32 %v11466_v32, %v6998_v47  ;;  %v6883_v54 = vpop.f32.mrf.mxu1 }
 0x3ed   : > { %v7440_v0 = vpop.f32.mrf.mxu0  ;;  %v7000_v9 = vadd.f32 %v6883_v54, %v15895_v24 }
 0x3ee   : > { %v16007_v28 = vadd.f32 %v7440_v0, %v6996_v30  ;;  %v11421_v33 = vpop.f32.mrf.mxu1 }
 0x3ef   : > { %v11469_v42 = vpop.f32.mrf.mxu0  ;;  %v7005_v45 = vadd.f32 %v11421_v33, %v15900_v27 }
 0x3f0   : > { %v16010_v46 = vadd.f32 %v11469_v42, %v7001_v23  ;;  %v6896_v62 = vpop.f32.mrf.mxu1 }
 0x3f1   : > { %v7453_v37 = vpop.f32.mrf.mxu0  ;;  %v7003_v61 = vadd.f32 %v6896_v62, %v15903_v50 }
 0x3f2   : > { %v16013_v12 = vadd.f32 %v7453_v37, %v6999_v44  ;;  %v11422_v16 = vpop.f32.mrf.mxu1 }
 0x3f3   : > { %v11470_v8 = vpop.f32.mrf.mxu0  ;;  %v7006_v4 = vadd.f32 %v11422_v16, %v15906_v63 }
 0x3f4   : > { %v16016_v43 = vadd.f32 %v11470_v8, %v7002_v60  ;;  %v6899_v24 = vpop.f32.mrf.mxu1 }
 0x3f5   : > { %v7456_v1 = vpop.f32.mrf.mxu0  ;;  %v7004_v47 = vadd.f32 %v6899_v24, %v15909_v58 }
 0x3f6   : > { %v16019_v38 = vadd.f32 %v7456_v1, %v7000_v9  ;;  %v11425_v27 = vpop.f32.mrf.mxu1 }
 0x3f7   : > { %v11473_v52 = vpop.f32.mrf.mxu0  ;;  %v7009_v31 = vadd.f32 %v11425_v27, %v15914_v10 }
 0x3f8   : > { %v16022_v18 = vadd.f32 %v11473_v52, %v7005_v45  ;;  %v6912_v50 = vpop.f32.mrf.mxu1 }
 0x3f9   : > { %v7469_v30 = vpop.f32.mrf.mxu0  ;;  %v7007_v25 = vadd.f32 %v6912_v50, %v15917_v17 }
 0x3fa   : > { %v16025_v7 = vadd.f32 %v7469_v30, %v7003_v61  ;;  %v11426_v63 = vpop.f32.mrf.mxu1 }
 0x3fb   : > { %v11474_v23 = vpop.f32.mrf.mxu0  ;;  %v7010_v21 = vadd.f32 %v11426_v63, %v15920_v53 }
 0x3fc   : > { %v16028_v26 = vadd.f32 %v11474_v23, %v7006_v4  ;;  %v6915_v58 = vpop.f32.mrf.mxu1 }
 0x3fd   : > { %v7472_v44 = vpop.f32.mrf.mxu0  ;;  %v7008_v48 = vadd.f32 %v6915_v58, %v15923_v57 }
 0x3fe   : > { %v16031_v32 = vadd.f32 %v7472_v44, %v7004_v47 }
 0x400   : > { %v11477_v60 = vpop.f32.mrf.mxu0 }
 0x401   : > { %v16034_v0 = vadd.f32 %v11477_v60, %v7009_v31 }
 0x402   : > { %v7485_v9 = vpop.f32.mrf.mxu0 }
 0x403   : > { %v11429_v10 = vpop.f32.mrf.mxu1  ;;  %v16037_v42 = vadd.f32 %v7485_v9, %v7007_v25 }
 0x404   : > { %v7013_v54 = vadd.f32 %v11429_v10, %v15928_v5  ;;  %v11478_v45 = vpop.f32.mrf.mxu0 }
 0x405   : > { %v6928_v17 = vpop.f32.mrf.mxu1  ;;  %v16040_v37 = vadd.f32 %v11478_v45, %v7010_v21 }
 0x406   : > { %v7011_v33 = vadd.f32 %v6928_v17, %v15931_v15  ;;  %v7488_v61 = vpop.f32.mrf.mxu0 }
 0x407   : > { %v11430_v53 = vpop.f32.mrf.mxu1  ;;  %v16043_v8 = vadd.f32 %v7488_v61, %v7008_v48 }
 0x408   : > { %v7014_v62 = vadd.f32 %v11430_v53, %v15934_v59  ;;  %v11481_v4 = vpop.f32.mrf.mxu0 }
 0x409   : > { %v6931_v57 = vpop.f32.mrf.mxu1  ;;  %v16046_v1 = vadd.f32 %v11481_v4, %v7013_v54 }
 0x40a   : > { %v7012_v16 = vadd.f32 %v6931_v57, %v15937_v2  ;;  %v7501_v47 = vpop.f32.mrf.mxu0 }
 0x40b   : > { %v11433_v5 = vpop.f32.mrf.mxu1  ;;  %v16049_v52 = vadd.f32 %v7501_v47, %v7011_v33 }
 0x40c   : > { %v7017_v24 = vadd.f32 %v11433_v5, %v15942_v11  ;;  %v11482_v31 = vpop.f32.mrf.mxu0 }
 0x40d   : > { %v6944_v15 = vpop.f32.mrf.mxu1  ;;  %v16052_v30 = vadd.f32 %v11482_v31, %v7014_v62 }
 0x40e   : > { %v7015_v27 = vadd.f32 %v6944_v15, %v15945_v39  ;;  %v7504_v25 = vpop.f32.mrf.mxu0 }
 0x40f   : > { %v11434_v59 = vpop.f32.mrf.mxu1  ;;  %v16055_v23 = vadd.f32 %v7504_v25, %v7012_v16 }
 0x410   : > { %v7018_v50 = vadd.f32 %v11434_v59, %v15948_v29  ;;  %v11485_v21 = vpop.f32.mrf.mxu0 }
 0x411   : > { %v6947_v2 = vpop.f32.mrf.mxu1  ;;  %v16058_v44 = vadd.f32 %v11485_v21, %v7017_v24 }
 0x412   : > { %v7016_v63 = vadd.f32 %v6947_v2, %v15951_v34  ;;  %v7517_v48 = vpop.f32.mrf.mxu0 }
 0x413   : > { %v11437_v11 = vpop.f32.mrf.mxu1  ;;  %v16061_v60 = vadd.f32 %v7517_v48, %v7015_v27 }
 0x414   : > { %v7021_v58 = vadd.f32 %v11437_v11, %v15956_v56  ;;  %v11486_v54 = vpop.f32.mrf.mxu0 }
 0x415   : > { %v6960_v39 = vpop.f32.mrf.mxu1  ;;  %v16064_v9 = vadd.f32 %v11486_v54, %v7018_v50 }
 0x416   : > { %v7019_v10 = vadd.f32 %v6960_v39, %v15959_v35  ;;  %v7520_v33 = vpop.f32.mrf.mxu0 }
 0x417   : > { %v11438_v29 = vpop.f32.mrf.mxu1  ;;  %v16067_v45 = vadd.f32 %v7520_v33, %v7016_v63 }
 0x418   : > { %v7022_v17 = vadd.f32 %v11438_v29, %v15962_v51  ;;  %v11489_v62 = vpop.f32.mrf.mxu0 }
 0x419   : > { %v6963_v34 = vpop.f32.mrf.mxu1  ;;  %v16070_v61 = vadd.f32 %v11489_v62, %v7021_v58 }
 0x41a   : > { %v7020_v53 = vadd.f32 %v6963_v34, %v15965_v49  ;;  %v7533_v16 = vpop.f32.mrf.mxu0 }
 0x41b   : > { %v11441_v56 = vpop.f32.mrf.mxu1  ;;  %v16073_v4 = vadd.f32 %v7533_v16, %v7019_v10 }
 0x41c   : > { %v7025_v57 = vadd.f32 %v11441_v56, %v15970_v6  ;;  %v11490_v24 = vpop.f32.mrf.mxu0 }
 0x41d   : > { %v6976_v35 = vpop.f32.mrf.mxu1  ;;  %v16076_v47 = vadd.f32 %v11490_v24, %v7022_v17 }
 0x41e   : > { %v7023_v5 = vadd.f32 %v6976_v35, %v15973_v14  ;;  %v7536_v27 = vpop.f32.mrf.mxu0 }
 0x41f   : > { %v11442_v51 = vpop.f32.mrf.mxu1  ;;  %v16079_v31 = vadd.f32 %v7536_v27, %v7020_v53 }
 0x420   : > { %v7026_v15 = vadd.f32 %v11442_v51, %v15976_v19  ;;  %v11493_v50 = vpop.f32.mrf.mxu0 }
 0x421   : > { %v6979_v49 = vpop.f32.mrf.mxu1  ;;  %v16084_v14 = vadd.f32 %v11493_v50, %v7025_v57 }
 0x422   : > { %v7024_v59 = vadd.f32 %v6979_v49, %v15979_v13  ;;  %v7549_v63 = vpop.f32.mrf.mxu0 }
 0x423   : > { %v11513_v6 = vpop.f32.mrf.mxu1  ;;  %v16089_v19 = vadd.f32 %v7549_v63, %v7023_v5 }
 0x424   : > { %v16082_v2 = vadd.f32 %v11513_v6, %v15984_v20  ;;  %v11494_v58 = vpop.f32.mrf.mxu0 }
 0x425   : > { %v7994_v25 = vpop.f32.mrf.mxu1  ;;  %v16094_v39 = vadd.f32 %v11494_v58, %v7026_v15 }
 0x426   : > { %v16087_v11 = vadd.f32 %v7994_v25, %v15987_v22  ;;  %v7552_v10 = vpop.f32.mrf.mxu0 }
 0x427   : > { %v11514_v21 = vpop.f32.mrf.mxu1  ;;  %v16099_v29 = vadd.f32 %v7552_v10, %v7024_v59 }
 0x428   : > { %v16092_v13 = vadd.f32 %v11514_v21, %v15992_v36  ;;  %v16101_v17 = vpop.f32.mrf.mxu0 }
 0x429   : > { %v7997_v48 = vpop.f32.mrf.mxu1 }
 0x42a   : > { %v16097_v20 = vadd.f32 %v7997_v48, %v15995_v41  ;;  %v16106_v33 = vpop.f32.mrf.mxu0 }
 0x42b   : > { %v11517_v54 = vpop.f32.mrf.mxu1 }
 0x42c   : > { %v16104_v22 = vadd.f32 %v11517_v54, %v15998_v55  ;;  %v16111_v56 = vpop.f32.mrf.mxu0 }
 0x42d   : > { %v8010_v34 = vpop.f32.mrf.mxu1 }
 0x42e   : > { %v16109_v36 = vadd.f32 %v8010_v34, %v16001_v40  ;;  %v16116_v57 = vpop.f32.mrf.mxu0 }
 0x42f   : > { %v11518_v53 = vpop.f32.mrf.mxu1 }
 0x430   : > { %v16114_v41 = vadd.f32 %v11518_v53, %v16004_v3  ;;  %v16121_v16 = vpop.f32.mrf.mxu0 }
 0x431   : > { %v8013_v62 = vpop.f32.mrf.mxu1 }
 0x432   : > { %v16119_v35 = vadd.f32 %v8013_v62, %v16007_v28  ;;  %v16126_v51 = vpop.f32.mrf.mxu0 }
 0x433   : > { %v11521_v55 = vpop.f32.mrf.mxu1 }
 0x434   : > { %v16124_v5 = vadd.f32 %v11521_v55, %v16010_v46  ;;  %v16134_v27 = vpop.f32.mrf.mxu0 }
 0x435   : > { %v8026_v40 = vpop.f32.mrf.mxu1 }
 0x436   : > { %v16129_v24 = vadd.f32 %v8026_v40, %v16013_v12  ;;  %v16142_v50 = vpop.f32.mrf.mxu0 }
 0x437   : > { %v11522_v3 = vpop.f32.mrf.mxu1 }
 0x438   : > { %v16132_v15 = vadd.f32 %v11522_v3, %v16016_v43  ;;  %v16150_v21 = vpop.f32.mrf.mxu0 }
 0x439   : > { %v8029_v49 = vpop.f32.mrf.mxu1 }
 0x43a   : > { %v16137_v28 = vadd.f32 %v8029_v49, %v16019_v38  ;;  %v16158_v10 = vpop.f32.mrf.mxu0 }
 0x43b   : > { %v11525_v59 = vpop.f32.mrf.mxu1 }
 0x43c   : > { %v16140_v46 = vadd.f32 %v11525_v59, %v16022_v18  ;;  %v16166_v53 = vpop.f32.mrf.mxu0 }
 0x43d   : > { %v8042_v6 = vpop.f32.mrf.mxu1 }
 0x43e   : > { %v16145_v12 = vadd.f32 %v8042_v6, %v16025_v7  ;;  %v16174_v40 = vpop.f32.mrf.mxu0 }
 0x43f   : > { %v11526_v25 = vpop.f32.mrf.mxu1 }
 0x440   : > { %v16148_v43 = vadd.f32 %v11526_v25, %v16028_v26  ;;  %v16182_v59 = vpop.f32.mrf.mxu0 }
 0x441   : > { %v8045_v63 = vpop.f32.mrf.mxu1 }
 0x442   : > { %v16153_v38 = vadd.f32 %v8045_v63, %v16031_v32  ;;  %v16190_v63 = vpop.f32.mrf.mxu0 }
 0x443   : > { %v11529_v58 = vpop.f32.mrf.mxu1 }
 0x444   : > { %v16156_v18 = vadd.f32 %v11529_v58, %v16034_v0 }
 0x445   : > { %v8058_v48 = vpop.f32.mrf.mxu1 }
 0x446   : > { %v16161_v7 = vadd.f32 %v8058_v48, %v16037_v42 }
 0x447   : > { %v11530_v54 = vpop.f32.mrf.mxu1 }
 0x448   : > { %v16164_v26 = vadd.f32 %v11530_v54, %v16040_v37  ;;  %v16198_v54 = vpop.f32.mrf.mxu0 }
 0x449   : > { %v8061_v34 = vpop.f32.mrf.mxu1 }
 0x44a   : > { %v16169_v32 = vadd.f32 %v8061_v34, %v16043_v8 }
 0x44b   : > { %v11533_v62 = vpop.f32.mrf.mxu1 }
 0x44c   : > { %v16172_v0 = vadd.f32 %v11533_v62, %v16046_v1 }
 0x44d   : > { %v8074_v55 = vpop.f32.mrf.mxu1 }
 0x44e   : > { %v16177_v42 = vadd.f32 %v8074_v55, %v16049_v52  ;;  %v16206_v55 = vpop.f32.mrf.mxu0 }
 0x44f   : > { %v11534_v3 = vpop.f32.mrf.mxu1 }
 0x450   : > { %v16180_v37 = vadd.f32 %v11534_v3, %v16052_v30 }
 0x451   : > { %v8077_v49 = vpop.f32.mrf.mxu1 }
 0x452   : > { %v16185_v8 = vadd.f32 %v8077_v49, %v16055_v23 }
 0x453   : > { %v11537_v6 = vpop.f32.mrf.mxu1 }
 0x454   : > { %v16188_v1 = vadd.f32 %v11537_v6, %v16058_v44  ;;  %v16214_v6 = vpop.f32.mrf.mxu0 }
 0x455   : > { %v8090_v25 = vpop.f32.mrf.mxu1 }
 0x456   : > { %v16193_v52 = vadd.f32 %v8090_v25, %v16061_v60 }
 0x457   : > { %v11538_v58 = vpop.f32.mrf.mxu1 }
 0x458   : > { %v16196_v30 = vadd.f32 %v11538_v58, %v16064_v9 }
 0x459   : > { %v8093_v48 = vpop.f32.mrf.mxu1 }
 0x45a   : > { %v16201_v23 = vadd.f32 %v8093_v48, %v16067_v45 }
 0x45b   : > { %v11541_v34 = vpop.f32.mrf.mxu1 }
 0x45c   : > { %v16204_v44 = vadd.f32 %v11541_v34, %v16070_v61 }
 0x45d   : > { %v8106_v62 = vpop.f32.mrf.mxu1 }
 0x45e   : > { %17126 = vst [vmem:[#allocation39_spill] sm:$0xff] %v16204_v44  ;;  %v16209_v60 = vadd.f32 %v8106_v62, %v16073_v4  ;;  %v16222_v4 = vpop.f32.mrf.mxu0 }
 0x45f   : > { %v11542_v3 = vpop.f32.mrf.mxu1 }
 0x460   : > { %17127 = vst [vmem:[#allocation22_spill] sm:$0xff] %v16209_v60  ;;  %v16212_v9 = vadd.f32 %v11542_v3, %v16076_v47  ;;  %v16232_v3 = vpop.f32.mrf.mxu0 }
 0x461   : > { %v8109_v49 = vpop.f32.mrf.mxu1 }
 0x462   : > { %17128 = vst [vmem:[#allocation44_spill] sm:$0xff] %v16212_v9  ;;  %v16217_v45 = vadd.f32 %v8109_v49, %v16079_v31  ;;  %v8475_v31 = vadd.f32 %v16101_v17, %v16082_v2  ;;  %v10214_v2 = vld [vmem:[%s12497_s8 + $0x18] sm:$0xff]   ;;  %v8476_v17 = vadd.f32 %v16111_v56, %v16092_v13  ;;  %v8479_v56 = vadd.f32 %v16121_v16, %v16104_v22 }
 0x463   : > { %v11545_v25 = vpop.f32.mrf.mxu1  ;;  %v10028_v22 = vunpack.c.h.bf16 %v10214_v2 }
 0x464   : > { %17129 = vst [vmem:[#allocation61_spill] sm:$0xff] %v16217_v45  ;;  %v16220_v61 = vadd.f32 %v11545_v25, %v16084_v14  ;;  %v16240_v25 = vld [vmem:[%s16482_s4] ss:$0 sm:$0xff] }
 0x465   : > { %v8122_v58 = vpop.f32.mrf.mxu1 }
 0x466   : > { %17130 = vst [vmem:[#allocation45_spill] sm:$0xff] %v16220_v61  ;;  %v16225_v48 = vadd.f32 %v8122_v58, %v16089_v19  ;;  %v10213_v19 = vld [vmem:[%s12497_s8 + $0x10] sm:$0xff]  }
 0x467   : > { %v11546_v47 = vpop.f32.mrf.mxu1  ;;  %v10023_v13 = vunpack.c.l.bf16 %v10213_v19 }
 0x468   : > { %17131 = vst [vmem:[#allocation46_spill] sm:$0xff] %v16225_v48  ;;  %v16228_v34 = vadd.f32 %v11546_v47, %v16094_v39  ;;  %v8473_v39 = vadd.f32 %v16106_v33, %v16087_v11  ;;  %v16246_v47 = vld [vmem:[%s12497_s8 + $0xc] ss:$140 sps:$4 sm:$0xff]   ;;  %v8474_v11 = vadd.f32 %v16116_v57, %v16097_v20  ;;  %v8477_v20 = vadd.f32 %v16126_v51, %v16109_v36 }
 0x469   : > { %v8125_v62 = vpop.f32.mrf.mxu1  ;;  %17134 = vst [vmem:[#allocation51_spill] sm:$0xff] %v16246_v47  ;;  %v8972_v61 = vunpack.c.l.bf16 %v16246_v47  ;;  %v10215_v47 = vld [vmem:[%s12497_s8 + $0x20] sm:$0xff]   ;;  %v8480_v36 = vadd.f32 %v16134_v27, %v16114_v41  ;;  %v8478_v51 = vadd.f32 %v16142_v50, %v16119_v35  ;;  %v8483_v41 = vadd.f32 %v16150_v21, %v16124_v5 }
 0x46a   : > { %17132 = vst [vmem:[#allocation48_spill] sm:$0xff] %v16228_v34  ;;  %v16235_v14 = vadd.f32 %v8125_v62, %v16099_v29  ;;  %v16251_v29 = vpop.f32.mrf.mxu0 }
 0x46b   : > { %v11617_v49 = vpop.f32.mrf.mxu1 }
 0x46c   : > { %17133 = vst [vmem:[#allocation49_spill] sm:$0xff] %v16235_v14  ;;  %v8859_v58 = vadd.f32 %v11617_v49, %v8475_v31  ;;  %v10024_v14 = vunpack.c.h.bf16 %v10213_v19  ;;  %v10027_v49 = vunpack.c.l.bf16 %v10214_v2 }
 0x46d   : > { %v8714_v34 = vpop.f32.mrf.mxu1 }
 0x46e   : > { %v8902_v62 = vadd.f32 %v16240_v25, %v8859_v58  ;;  %v8857_v48 = vadd.f32 %v8714_v34, %v8473_v39  ;;  %v16260_v58 = vpop.f32.mrf.mxu0 }
 0x46f   : > { %v11618_v45 = vpop.f32.mrf.mxu1 }
 0x470   : > { %v8900_v33 = vadd.f32 %v16240_v25, %v8857_v48  ;;  %v8860_v31 = vadd.f32 %v11618_v45, %v8476_v17  ;;  %v9010_v60 = vadd.f32 %v10024_v14, %v8902_v62  ;;  %v16268_v16 = vpop.f32.mrf.mxu0 }
 0x471   : > { %v8717_v9 = vpop.f32.mrf.mxu1 }
 0x472   : > { %v8903_v34 = vadd.f32 %v16240_v25, %v8860_v31  ;;  %v8858_v39 = vadd.f32 %v8717_v9, %v8474_v11  ;;  %v9008_v45 = vadd.f32 %v8972_v61, %v8900_v33  ;;  %v9046_v14 = vmax.f32 %v9010_v60, 0.0  ;;  %v16271_v11 = vld [vmem:[%s12497_s8 + $0x28] sm:$0xff]   ;;  %v16282_v27 = vpop.f32.mrf.mxu0 }
 0x473   : > { %v11621_v57 = vpop.f32.mrf.mxu1  ;;  %v10032_v33 = vunpack.c.h.bf16 %v10215_v47 }
 0x474   : > { %v9011_v48 = vadd.f32 %v10027_v49, %v8903_v34  ;;  %v8901_v17 = vadd.f32 %v16240_v25, %v8858_v39  ;;  %v8863_v19 = vadd.f32 %v11621_v57, %v8479_v56  ;;  %v9044_v2 = vmax.f32 %v9008_v45, 0.0  ;;  %v10217_v57 = vld [vmem:[%s12497_s8 + $0x30] sm:$0xff]  }
 0x475   : > { %v8730_v44 = vpop.f32.mrf.mxu1 }
 0x476   : > { %v9047_v62 = vmax.f32 %v9011_v48, 0.0  ;;  %v9009_v31 = vadd.f32 %v10023_v13, %v8901_v17  ;;  %v8861_v9 = vadd.f32 %v8730_v44, %v8477_v20  ;;  %v8906_v61 = vadd.f32 %v16240_v25, %v8863_v19 }
 0x477   : > { %v11622_v49 = vpop.f32.mrf.mxu1  ;;  %v10035_v44 = vunpack.c.l.bf16 %v16271_v11  ;;  %v10031_v20 = vunpack.c.l.bf16 %v10215_v47  ;;  %v8481_v19 = vadd.f32 %v16158_v10, %v16129_v24  ;;  %v8484_v47 = vadd.f32 %v16166_v53, %v16132_v15 }
 0x478   : > { %v10097_v56 = vpack.c.bf16 %v9047_v62, %v9046_v14  ;;  %v9045_v34 = vmax.f32 %v9009_v31, 0.0  ;;  %v8904_v60 = vadd.f32 %v16240_v25, %v8861_v9  ;;  %v8864_v13 = vadd.f32 %v11622_v49, %v8480_v36  ;;  %v16294_v36 = vld [vmem:[%s12497_s8 + $0x38] sm:$0xff]  }
 0x479   : > { %v8733_v39 = vpop.f32.mrf.mxu1  ;;  %v9014_v45 = vadd.f32 %v10032_v33, %v8906_v61  ;;  %v10040_v31 = vunpack.c.h.bf16 %v10217_v57 }
 0x47a   : > { %10230 = vst [vmem:[%s16284_s11 + $0x8] sm:$0xff] %v10097_v56   ;;  %v10092_v35 = vpack.c.bf16 %v9045_v34, %v9044_v2  ;;  %v8862_v50 = vadd.f32 %v8733_v39, %v8478_v51  ;;  %v8907_v48 = vadd.f32 %v16240_v25, %v8864_v13  ;;  %v9012_v5 = vadd.f32 %v10028_v22, %v8904_v60  ;;  %v16298_v51 = vpop.f32.mrf.mxu0 }
 0x47b   : > { %v11625_v17 = vpop.f32.mrf.mxu1  ;;  %v9050_v24 = vmax.f32 %v9014_v45, 0.0  ;;  %v10043_v60 = vunpack.c.l.bf16 %v16294_v36  ;;  %v8482_v13 = vadd.f32 %v16174_v40, %v16137_v28  ;;  %v10039_v40 = vunpack.c.l.bf16 %v10217_v57 }
 0x47c   : > { %10093 = vst [vmem:[%s16284_s11] sm:$0xff] %v10092_v35   ;;  %v8905_v21 = vadd.f32 %v16240_v25, %v8862_v50  ;;  %v8867_v14 = vadd.f32 %v11625_v17, %v8483_v41  ;;  %v9015_v62 = vadd.f32 %v10035_v44, %v8907_v48  ;;  %v9048_v2 = vmax.f32 %v9012_v5, 0.0  ;;  %v16308_v35 = vpop.f32.mrf.mxu0  ;;  %v10219_v48 = vld [vmem:[%s12497_s8 + $0x40] sm:$0xff]  }
 0x47d   : > { %v8746_v9 = vpop.f32.mrf.mxu1  ;;  %v10036_v44 = vunpack.c.h.bf16 %v16271_v11  ;;  %v8487_v41 = vadd.f32 %v16182_v59, %v16140_v46  ;;  %v8488_v46 = vadd.f32 %v16198_v54, %v16148_v43  ;;  %v8486_v43 = vadd.f32 %v16206_v55, %v16153_v38 }
 0x47e   : > { %v9013_v61 = vadd.f32 %v10031_v20, %v8905_v21  ;;  %v8910_v33 = vadd.f32 %v16240_v25, %v8867_v14  ;;  %v8865_v49 = vadd.f32 %v8746_v9, %v8481_v19  ;;  %v9051_v10 = vmax.f32 %v9015_v62, 0.0  ;;  %v16317_v21 = vld [vmem:[%s12497_s8 + $0x48] sm:$0xff]   ;;  %v16322_v9 = vpop.f32.mrf.mxu0 }
 0x47f   : > { %v11626_v22 = vpop.f32.mrf.mxu1  ;;  %v8485_v19 = vadd.f32 %v16190_v63, %v16145_v12  ;;  %v10048_v62 = vunpack.c.h.bf16 %v10219_v48  ;;  %v8489_v55 = vadd.f32 %v16222_v4, %v16161_v7  ;;  %v16345_v7 = vld [vmem:[%s12497_s8 + $0x58] sm:$0xff]   ;;  %v8492_v4 = vadd.f32 %v16232_v3, %v16164_v26 }
 0x480   : > { %v9049_v56 = vmax.f32 %v9013_v61, 0.0  ;;  %v8868_v34 = vadd.f32 %v11626_v22, %v8484_v47  ;;  %v10107_v15 = vpack.c.bf16 %v9051_v10, %v9050_v24  ;;  %v8908_v53 = vadd.f32 %v16240_v25, %v8865_v49 }
 0x481   : > { %v8749_v39 = vpop.f32.mrf.mxu1  ;;  %v9018_v20 = vadd.f32 %v10040_v31, %v8910_v33  ;;  %v10044_v33 = vunpack.c.h.bf16 %v16294_v36  ;;  %v10051_v24 = vunpack.c.l.bf16 %v16317_v21  ;;  %v16332_v36 = vpop.f32.mrf.mxu0  ;;  %v8495_v26 = vadd.f32 %v16260_v58, %v16172_v0 }
 0x482   : > { %v10102_v50 = vpack.c.bf16 %v9049_v56, %v9048_v2  ;;  %v8911_v45 = vadd.f32 %v16240_v25, %v8868_v34  ;;  %10232 = vst [vmem:[%s16284_s11 + $0x18] sm:$0xff] %v10107_v15   ;;  %v8866_v28 = vadd.f32 %v8749_v39, %v8482_v13  ;;  %v9016_v59 = vadd.f32 %v10036_v44, %v8908_v53 }
 0x483   : > { %v11629_v17 = vpop.f32.mrf.mxu1  ;;  %v9054_v57 = vmax.f32 %v9018_v20, 0.0  ;;  %v8491_v13 = vadd.f32 %v16214_v6, %v16156_v18  ;;  %v10052_v6 = vunpack.c.h.bf16 %v16317_v21 }
 0x484   : > { %10231 = vst [vmem:[%s16284_s11 + $0x10] sm:$0xff] %v10102_v50   ;;  %v9019_v11 = vadd.f32 %v10043_v60, %v8911_v45  ;;  %v8871_v5 = vadd.f32 %v11629_v17, %v8487_v41  ;;  %v8909_v14 = vadd.f32 %v16240_v25, %v8866_v28  ;;  %v9052_v2 = vmax.f32 %v9016_v59, 0.0  ;;  %v16342_v28 = vpop.f32.mrf.mxu0 }
 0x485   : > { %v8762_v31 = vpop.f32.mrf.mxu1  ;;  %v10047_v60 = vunpack.c.l.bf16 %v10219_v48  ;;  %v10221_v48 = vld [vmem:[%s12497_s8 + $0x50] sm:$0xff]  }
 0x486   : > { %v9055_v47 = vmax.f32 %v9019_v11, 0.0  ;;  %v8914_v61 = vadd.f32 %v16240_v25, %v8871_v5  ;;  %v8869_v12 = vadd.f32 %v8762_v31, %v8485_v19  ;;  %v9017_v63 = vadd.f32 %v10039_v40, %v8909_v14  ;;  %v16356_v3 = vpop.f32.mrf.mxu0 }
 0x487   : > { %v11630_v49 = vpop.f32.mrf.mxu1  ;;  %v8490_v5 = vadd.f32 %v16251_v29, %v16169_v32  ;;  %v10056_v59 = vunpack.c.h.bf16 %v10221_v48 }
 0x488   : > { %v10117_v54 = vpack.c.bf16 %v9055_v47, %v9054_v57  ;;  %v8912_v10 = vadd.f32 %v16240_v25, %v8869_v12  ;;  %v8872_v22 = vadd.f32 %v11630_v49, %v8488_v46  ;;  %v9053_v56 = vmax.f32 %v9017_v63, 0.0 }
 0x489   : > { %v8765_v34 = vpop.f32.mrf.mxu1  ;;  %v9022_v15 = vadd.f32 %v10048_v62, %v8914_v61  ;;  %v10059_v61 = vunpack.c.l.bf16 %v16345_v7  ;;  %v10055_v63 = vunpack.c.l.bf16 %v10221_v48 }
 0x48a   : > { %10234 = vst [vmem:[%s16284_s11 + $0x28] sm:$0xff] %v10117_v54   ;;  %v8915_v53 = vadd.f32 %v16240_v25, %v8872_v22  ;;  %v8870_v38 = vadd.f32 %v8765_v34, %v8486_v43  ;;  %v10112_v44 = vpack.c.bf16 %v9053_v56, %v9052_v2  ;;  %v9020_v41 = vadd.f32 %v10044_v33, %v8912_v10  ;;  %v10223_v33 = vld [vmem:[%s12497_s8 + $0x60] sm:$0xff]   ;;  %v16366_v34 = vld [vmem:[%s12497_s8 + $0x68] sm:$0xff]  }
 0x48b   : > { %v11633_v39 = vpop.f32.mrf.mxu1  ;;  %v9058_v40 = vmax.f32 %v9022_v15, 0.0  ;;  %v8493_v54 = vadd.f32 %v16268_v16, %v16177_v42  ;;  %v10064_v2 = vunpack.c.h.bf16 %v10223_v33 }
 0x48c   : > { %v9023_v50 = vadd.f32 %v10051_v24, %v8915_v53  ;;  %v8913_v20 = vadd.f32 %v16240_v25, %v8870_v38  ;;  %v8875_v45 = vadd.f32 %v11633_v39, %v8491_v13  ;;  %10233 = vst [vmem:[%s16284_s11 + $0x20] sm:$0xff] %v10112_v44   ;;  %v9056_v14 = vmax.f32 %v9020_v41, 0.0  ;;  %v8442_v13 = vpop.f32.mrf.mxu0 }
 0x48d   : > { %v8778_v18 = vpop.f32.mrf.mxu1 }
 0x48e   : > { %v9059_v17 = vmax.f32 %v9023_v50, 0.0  ;;  %v9021_v19 = vadd.f32 %v10047_v60, %v8913_v20  ;;  %v8873_v11 = vadd.f32 %v8778_v18, %v8489_v55  ;;  %v8918_v46 = vadd.f32 %v16240_v25, %v8875_v45 }
 0x48f   : > { %v11634_v21 = vpop.f32.mrf.mxu1  ;;  %v8496_v60 = vadd.f32 %v16282_v27, %v16180_v37  ;;  %v10067_v50 = vunpack.c.l.bf16 %v16366_v34  ;;  %v8494_v20 = vadd.f32 %v16298_v51, %v16185_v8  ;;  %v10060_v45 = vunpack.c.h.bf16 %v16345_v7 }
 0x490   : > { %v10127_v62 = vpack.c.bf16 %v9059_v17, %v9058_v40  ;;  %v9057_v31 = vmax.f32 %v9021_v19, 0.0  ;;  %v8916_v57 = vadd.f32 %v16240_v25, %v8873_v11  ;;  %v8876_v47 = vadd.f32 %v11634_v21, %v8492_v4  ;;  %v10225_v11 = vld [vmem:[%s12497_s8 + $0x70] sm:$0xff]  }
 0x491   : > { %v8781_v12 = vpop.f32.mrf.mxu1  ;;  %v9026_v49 = vadd.f32 %v10056_v59, %v8918_v46  ;;  %v8499_v18 = vadd.f32 %v16308_v35, %v16188_v1  ;;  %v10063_v8 = vunpack.c.l.bf16 %v10223_v33  ;;  %v16385_v59 = vld [vmem:[%s12497_s8 + $0x78] sm:$0xff]   ;;  %v8500_v1 = vadd.f32 %v16332_v36, %v16196_v30 }
 0x492   : > { %10236 = vst [vmem:[%s16284_s11 + $0x38] sm:$0xff] %v10127_v62   ;;  %v10122_v32 = vpack.c.bf16 %v9057_v31, %v9056_v14  ;;  %v8874_v29 = vadd.f32 %v8781_v12, %v8490_v5  ;;  %v8919_v24 = vadd.f32 %v16240_v25, %v8876_v47  ;;  %v9024_v10 = vadd.f32 %v10052_v6, %v8916_v57  ;;  %v11594_v6 = vpop.f32.mrf.mxu0 }
 0x493   : > { %v11637_v43 = vpop.f32.mrf.mxu1  ;;  %v9062_v55 = vmax.f32 %v9026_v49, 0.0  ;;  %v8497_v5 = vadd.f32 %v16322_v9, %v16193_v52  ;;  %v10072_v14 = vunpack.c.h.bf16 %v10225_v11  ;;  %v10068_v12 = vunpack.c.h.bf16 %v16366_v34 }
 0x494   : > { %10235 = vst [vmem:[%s16284_s11 + $0x30] sm:$0xff] %v10122_v32   ;;  %v8917_v22 = vadd.f32 %v16240_v25, %v8874_v29  ;;  %v8879_v0 = vadd.f32 %v11637_v43, %v8495_v26  ;;  %v9027_v58 = vadd.f32 %v10059_v61, %v8919_v24  ;;  %v9060_v44 = vmax.f32 %v9024_v10, 0.0  ;;  %v8445_v31 = vpop.f32.mrf.mxu0 }
 0x495   : > { %v8794_v56 = vpop.f32.mrf.mxu1  ;;  %v10075_v32 = vunpack.c.l.bf16 %v16385_v59  ;;  %v8498_v30 = vadd.f32 %v16342_v28, %v16201_v23  ;;  %v10071_v43 = vunpack.c.l.bf16 %v10225_v11  ;;  %v17136_v23 = vld [vmem:[#allocation22_spill] sm:$0xff] }
 0x496   : > { %v9025_v15 = vadd.f32 %v10055_v63, %v8917_v22  ;;  %v8922_v53 = vadd.f32 %v16240_v25, %v8879_v0  ;;  %v8877_v38 = vadd.f32 %v8794_v56, %v8493_v54  ;;  %v9063_v42 = vmax.f32 %v9027_v58, 0.0  ;;  %v17135_v54 = vld [vmem:[#allocation39_spill] sm:$0xff]  ;;  %v11597_v22 = vpop.f32.mrf.mxu0 }
 0x497   : > { %v11638_v16 = vpop.f32.mrf.mxu1  ;;  %v8503_v10 = vadd.f32 %v16356_v3, %v17135_v54  ;;  %v8501_v28 = vadd.f32 %v8442_v13, %v17136_v23  ;;  %v10076_v3 = vunpack.c.h.bf16 %v16385_v59  ;;  %v10228_v13 = vld [vmem:[%s12497_s8 + $0x88] sm:$0xff]  }
 0x498   : > { %v9061_v39 = vmax.f32 %v9025_v15, 0.0  ;;  %v8880_v41 = vadd.f32 %v11638_v16, %v8496_v60  ;;  %v10137_v37 = vpack.c.bf16 %v9063_v42, %v9062_v55  ;;  %v8920_v27 = vadd.f32 %v16240_v25, %v8877_v38  ;;  %v10227_v55 = vld [vmem:[%s12497_s8 + $0x80] sm:$0xff]   ;;  %v8458_v16 = vpop.f32.mrf.mxu0  ;;  %v17143_v23 = vld [vmem:[#allocation49_spill] sm:$0xff] }
 0x499   : > { %v8797_v48 = vpop.f32.mrf.mxu1  ;;  %v9030_v17 = vadd.f32 %v10064_v2, %v8922_v53 }
 0x49a   : > { %v10132_v40 = vpack.c.bf16 %v9061_v39, %v9060_v44  ;;  %v8923_v19 = vadd.f32 %v16240_v25, %v8880_v41  ;;  %10238 = vst [vmem:[%s16284_s11 + $0x48] sm:$0xff] %v10137_v37   ;;  %v8878_v4 = vadd.f32 %v8797_v48, %v8494_v20  ;;  %v9028_v35 = vadd.f32 %v10060_v45, %v8920_v27  ;;  %v17137_v20 = vld [vmem:[#allocation44_spill] sm:$0xff]  ;;  %v17138_v27 = vld [vmem:[#allocation61_spill] sm:$0xff]  ;;  %v11598_v59 = vpop.f32.mrf.mxu0 }
 0x49b   : > { %v11641_v51 = vpop.f32.mrf.mxu1  ;;  %v9066_v57 = vmax.f32 %v9030_v17, 0.0  ;;  %v8504_v37 = vadd.f32 %v11594_v6, %v17137_v20  ;;  %v8502_v45 = vadd.f32 %v8445_v31, %v17138_v27 }
 0x49c   : > { %10237 = vst [vmem:[%s16284_s11 + $0x40] sm:$0xff] %v10132_v40   ;;  %v9031_v7 = vadd.f32 %v10067_v50, %v8923_v19  ;;  %v8883_v46 = vadd.f32 %v11641_v51, %v8499_v18  ;;  %v8921_v21 = vadd.f32 %v16240_v25, %v8878_v4  ;;  %v9064_v33 = vmax.f32 %v9028_v35, 0.0 }
 0x49d   : > { %v8810_v62 = vpop.f32.mrf.mxu1  ;;  %v10080_v18 = vunpack.c.h.bf16 %v10227_v55  ;;  %v10083_v51 = vunpack.c.l.bf16 %v10228_v13  ;;  %v10079_v35 = vunpack.c.l.bf16 %v10227_v55 }
 0x49e   : > { %v9067_v47 = vmax.f32 %v9031_v7, 0.0  ;;  %v8926_v61 = vadd.f32 %v16240_v25, %v8883_v46  ;;  %v8881_v52 = vadd.f32 %v8810_v62, %v8497_v5  ;;  %v9029_v9 = vadd.f32 %v10063_v8, %v8921_v21  ;;  %v17139_v7 = vld [vmem:[#allocation45_spill] sm:$0xff] }
 0x49f   : > { %v11642_v26 = vpop.f32.mrf.mxu1  ;;  %v8507_v46 = vadd.f32 %v11597_v22, %v17139_v7  ;;  %v10229_v21 = vld [vmem:[%s12497_s8 + $0x90] sm:$0xff]   ;;  %s11655_s8 = smul.u32 2304, %s12378_s25  ;;  %s12243_s25 = scalar_lea.vmem %s16434_s16, 2304 }
 0x4a0   : > { %v10147_v36 = vpack.c.bf16 %v9067_v47, %v9066_v57  ;;  %v8924_v29 = vadd.f32 %v16240_v25, %v8881_v52  ;;  %v8884_v63 = vadd.f32 %v11642_v26, %v8500_v1  ;;  %v9065_v49 = vmax.f32 %v9029_v9, 0.0  ;;  %v17140_v57 = vld [vmem:[#allocation46_spill] sm:$0xff]  ;;  %p12244_p5 = scmp.ne.s32.totalorder %s16434_s16, %s12243_s25  ;;  %p12251_p0 = scmp.lt.s32.totalorder %s12249_s26, %s12243_s25 }
 0x4a1   : > { %v8813_v24 = vpop.f32.mrf.mxu1  ;;  %v9034_v0 = vadd.f32 %v10072_v14, %v8926_v61  ;;  %v8505_v47 = vadd.f32 %v8458_v16, %v17140_v57  ;;  %v10088_v26 = vunpack.c.h.bf16 %v10229_v21  ;;  %s16432_s9 = scalar_lea.hbm %s16484_s6, %s11655_s8 }
 0x4a2   : > { %10240 = vst [vmem:[%s16284_s11 + $0x58] sm:$0xff] %v10147_v36   ;;  %v8927_v58 = vadd.f32 %v16240_v25, %v8884_v63  ;;  %v8882_v2 = vadd.f32 %v8813_v24, %v8498_v30  ;;  %v10142_v56 = vpack.c.bf16 %v9065_v49, %v9064_v33  ;;  %v9032_v60 = vadd.f32 %v10068_v12, %v8924_v29  ;;  %v17141_v30 = vld [vmem:[#allocation48_spill] sm:$0xff]  ;;  %v8461_v29 = vpop.f32.mrf.mxu0  ;;  %p12245_p7 = pnand %p12244_p5, %p17144_p11  ;;  %p12252_p10 = por %p12251_p0, %p12250_p13 }
 0x4a3   : > { %v11645_v34 = vpop.f32.mrf.mxu1  ;;  %v9070_v44 = vmax.f32 %v9034_v0, 0.0  ;;  %v8508_v36 = vadd.f32 %v11598_v59, %v17141_v30 }
 0x4a4   : > { %v9035_v15 = vadd.f32 %v10075_v32, %v8927_v58  ;;  %v8925_v53 = vadd.f32 %v16240_v25, %v8882_v2  ;;  %v8887_v38 = vadd.f32 %v11645_v34, %v8503_v10  ;;  %10239 = vst [vmem:[%s16284_s11 + $0x50] sm:$0xff] %v10142_v56   ;;  %v9068_v17 = vmax.f32 %v9032_v60, 0.0  ;;  %v17142_v58 = vld [vmem:[#allocation51_spill] sm:$0xff]  ;;  %p12246_p12 = pneg %p12245_p7 }
 0x4a5   : > { %v8826_v42 = vpop.f32.mrf.mxu1  ;;  %v9007_v2 = vunpack.c.h.bf16 %v17142_v58  ;;  %v10084_v60 = vunpack.c.h.bf16 %v10228_v13 }
 0x4a6   : > { %v9071_v39 = vmax.f32 %v9035_v15, 0.0  ;;  %v9033_v41 = vadd.f32 %v10071_v43, %v8925_v53  ;;  %v8885_v50 = vadd.f32 %v8826_v42, %v8501_v28  ;;  %v8930_v48 = vadd.f32 %v16240_v25, %v8887_v38  ;;  %p12253_p3 = pnand %p12252_p10, %p12246_p12 }
 0x4a7   : > { %v11646_v40 = vpop.f32.mrf.mxu1  ;;  %v8506_v28 = vadd.f32 %v8461_v29, %v17143_v23 }
 0x4a8   : > { %v10157_v19 = vpack.c.bf16 %v9071_v39, %v9070_v44  ;;  %v9069_v11 = vmax.f32 %v9033_v41, 0.0  ;;  %v8928_v4 = vadd.f32 %v16240_v25, %v8885_v50  ;;  %v8888_v8 = vadd.f32 %v11646_v40, %v8504_v37 }
 0x4a9   : > { %v8829_v5 = vpop.f32.mrf.mxu1  ;;  %v9038_v14 = vadd.f32 %v10080_v18, %v8930_v48 }
 0x4aa   : > { %10242 = vst [vmem:[%s16284_s11 + $0x68] sm:$0xff] %v10157_v19   ;;  %v10152_v6 = vpack.c.bf16 %v9069_v11, %v9068_v17  ;;  %v8886_v1 = vadd.f32 %v8829_v5, %v8502_v45  ;;  %v8931_v62 = vadd.f32 %v16240_v25, %v8888_v8  ;;  %v9036_v61 = vadd.f32 %v10076_v3, %v8928_v4 }
 0x4ab   : > { %v11649_v31 = vpop.f32.mrf.mxu1  ;;  %v9074_v24 = vmax.f32 %v9038_v14, 0.0  ;;  %v10087_v3 = vunpack.c.l.bf16 %v10229_v21 }
 0x4ac   : > { %10241 = vst [vmem:[%s16284_s11 + $0x60] sm:$0xff] %v10152_v6   ;;  %v8929_v52 = vadd.f32 %v16240_v25, %v8886_v1  ;;  %v8891_v9 = vadd.f32 %v11649_v31, %v8507_v46  ;;  %v9039_v12 = vadd.f32 %v10083_v51, %v8931_v62  ;;  %v9072_v10 = vmax.f32 %v9036_v61, 0.0 }
 0x4ad   : > { %v8842_v32 = vpop.f32.mrf.mxu1 }
 0x4ae   : > { %v9037_v63 = vadd.f32 %v10079_v35, %v8929_v52  ;;  %v8934_v33 = vadd.f32 %v16240_v25, %v8891_v9  ;;  %v8889_v49 = vadd.f32 %v8842_v32, %v8505_v47  ;;  %v9075_v43 = vmax.f32 %v9039_v12, 0.0 }
 0x4af   : > { %v11650_v54 = vpop.f32.mrf.mxu1 }
 0x4b0   : > { %v9073_v22 = vmax.f32 %v9037_v63, 0.0  ;;  %v8892_v0 = vadd.f32 %v11650_v54, %v8508_v36  ;;  %v10167_v56 = vpack.c.bf16 %v9075_v43, %v9074_v24  ;;  %v8932_v34 = vadd.f32 %v16240_v25, %v8889_v49 }
 0x4b1   : > { %v8845_v15 = vpop.f32.mrf.mxu1  ;;  %v9042_v38 = vadd.f32 %v10088_v26, %v8934_v33 }
 0x4b2   : > { %v10162_v53 = vpack.c.bf16 %v9073_v22, %v9072_v10  ;;  %v8935_v55 = vadd.f32 %v16240_v25, %v8892_v0  ;;  %10244 = vst [vmem:[%s16284_s11 + $0x78] sm:$0xff] %v10167_v56   ;;  %v8890_v42 = vadd.f32 %v8845_v15, %v8506_v28  ;;  %v9040_v44 = vadd.f32 %v10084_v60, %v8932_v34 }
 0x4b3   : > { %v9078_v41 = vmax.f32 %v9042_v38, 0.0 }
 0x4b4   : > { %10243 = vst [vmem:[%s16284_s11 + $0x70] sm:$0xff] %v10162_v53   ;;  %v9043_v16 = vadd.f32 %v9007_v2, %v8935_v55  ;;  %v8933_v39 = vadd.f32 %v16240_v25, %v8890_v42  ;;  %v9076_v37 = vmax.f32 %v9040_v44, 0.0 }
 0x4b6   : > { %v9079_v50 = vmax.f32 %v9043_v16, 0.0  ;;  %v9041_v13 = vadd.f32 %v10087_v3, %v8933_v39 }
 0x4b8   : > { %v10177_v20 = vpack.c.bf16 %v9079_v50, %v9078_v41  ;;  %v9077_v27 = vmax.f32 %v9041_v13, 0.0 }
 0x4ba   : > { %10246 = vst [vmem:[%s16284_s11 + $0x88] sm:$0xff] %v10177_v20   ;;  %v10172_v45 = vpack.c.bf16 %v9077_v27, %v9076_v37 }
 0x4bc   : > { %10245 = vst [vmem:[%s16284_s11 + $0x80] sm:$0xff] %v10172_v45  }
 0x4bd   : > { %12256 = shalt.err (!%p12253_p3)
}
 0x4be   : > { %s12257_s10 = scalar_lea.hbm %s16432_s9, 2304  ;;  %s12261_s29 = scalar_lea.hbm %s16484_s6, 4608 }
 0x4bf   : > { %p12258_p2 = scmp.ne.s32.totalorder %s16432_s9, %s12257_s10  ;;  %p12262_p4 = scmp.lt.s32.totalorder %s16432_s9, %s16484_s6 }
 0x4c0   : > { %p12263_p6 = scmp.lt.s32.totalorder %s12261_s29, %s12257_s10 }
 0x4c1   : > { %p12259_p9 = pnand %p12258_p2, %p17144_p11 }
 0x4c2   : > { %p12264_p8 = por %p12263_p6, %p12262_p4 }
 0x4c3   : > { %p12260_p1 = pneg %p12259_p9 }
 0x4c5   : > { %p12265_p5 = pnand %p12264_p8, %p12260_p1 }
 0x4c7   : > { %12268 = shalt.err (!%p12265_p5)
}
 0x4c8   : > { %s12320_s18 = smov 64   ;;  %s12321_s20 = smov 4  }
 0x4c9   : > { %11666 = dma.vmem_to_hbm [thread:$0]  (%p17144_p11), %s16434_s16, 2304, %s16432_s9, %s9261_s17, %s12320_s18, %s12320_s18, %s12321_s20  }
 0x4ca PF: > { %s9289_s25 = sand.u32 1, %s12299_s21   ;;  %p17145_p7 = scmp.ne.s32.totalorder %s16599_s28, 0 }
 0x4cb   : > { %p17146_p12 = scmp.ge.s32.totalorder %s12311_s24, 2  ;;  %s9290_s12 = scalar_lea.sflag [#allocation5], %s9289_s25 }
 0x4cd   : > { %p11680_p13 = pnand %p17146_p12, %p17145_p7 }
 0x4cf   : > { %p11681_p0 = pneg %p11680_p13 }
 0x4d1   : > { %12294 = dma.done.wait (%p11681_p0), %s9290_s12, 2304  }
 0x4d2   : > { %12296 = vsyncadd (%p11681_p0), %s9290_s12, 4294964992  ;;  %p20_p10 = scmp.ge.s32.totalorder %s12435_s19, 4   ;;  %s17147_s21 = smov %s12303_s22 }
 0x4d3   : > { %s17148_s22 = smov %s12307_s23  ;;  %s17149_s23 = smov %s12451_s7 }
 0x4d4   : > { %s17150_s24 = smov %s12435_s19  ;;  %22 = sbr.rel (!%p20_p10) target bundleno = 6 (0x6), region = 97 }
 0x4d9   :  { %9295 = vsyncpa [#allocation4], 1 }
 0x4da   :  { %9297 = vsyncpa [#allocation4 + $0x1], 1 }
 0x4db   :  { %9298 = vsyncpa [#allocation7], 1 }
 0x4dc   :  { %9299 = vsyncpa [#allocation5], 1 }
 0x4dd   :  { %9301 = vsyncpa [#allocation5 + $0x1], 1 }

</bundles_post_ra>
